<compile_context>
chip_gen: v5e
topology: v5e:2x2
jax: 0.10.0
libtpu: 0.0.40
codegen_flags: <defaults>
</compile_context>

<pallas_src>
import functools
import math

import jax
import jax.numpy as jnp
from jax.experimental import pallas as pl
from jax.experimental.pallas import tpu as pltpu

BN_EPS = 1e-5
# TODO(synk): PyTorch BN would use batch statistics in train mode; here BN is
# folded in inference form with init params (gamma=1, beta=0, mean=0, var=1)
# and the scale is pre-folded into the conv weights at parameter-build time.
BN_SCALE = 1.0 / math.sqrt(1.0 + BN_EPS)


def _round_up(x, m):
    return ((x + m - 1) // m) * m


def _tile(dim, cap, align):
    """Tile size + padded size: full dim if small, else an aligned divisor,
    else pad up to a multiple of `cap` (never triggered in this network)."""
    if dim <= cap:
        return dim, dim
    for t in range(cap, align - 1, -align):
        if dim % t == 0:
            return t, dim
    return cap, _round_up(dim, cap)


# ------------------------------ Pallas kernels ------------------------------ #
def _mm_kernel(relu, has_res, a_ref, b_ref, bias_ref, *rest):
    """out = maybe_relu(a @ b + bias [+ residual]); bf16 in, f32 accumulate."""
    if has_res:
        res_ref, o_ref, acc_ref = rest
    else:
        res_ref = None
        o_ref, acc_ref = rest
    k = pl.program_id(2)

    @pl.when(k == 0)
    def _():
        acc_ref[...] = jnp.zeros_like(acc_ref)

    acc_ref[...] += jnp.dot(a_ref[...], b_ref[...],
                            preferred_element_type=jnp.float32)

    @pl.when(k == pl.num_programs(2) - 1)
    def _():
        y = acc_ref[...] + bias_ref[...]           # folded-BN bias, f32
        if has_res:
            y = y + res_ref[...].astype(jnp.float32)
        if relu:
            y = jnp.maximum(y, 0.0)
        o_ref[...] = y.astype(o_ref.dtype)


def _conv_s1_kernel(ho, wo, kh_sz, kw_sz, relu, x_ref, w_ref, b_ref, o_ref):
    """Stride-1 KxK conv: im2col happens in VMEM; kh/kw are static unrolled
    loops so the whole reduction (and the fused epilogue) runs in a single
    grid step per (image, cout-tile) with a register/VMEM-held f32 accumulator
    -- no scratch round-trips, no `pl.when`, fully parallel grid."""
    cin = x_ref.shape[-1]
    tn = o_ref.shape[-1]
    acc = jnp.zeros((ho * wo, tn), jnp.float32)
    for kh in range(kh_sz):
        for kw in range(kw_sz):
            patch = x_ref[0, kh:kh + ho, kw:kw + wo, :]          # (ho, wo, cin)
            acc = acc + jnp.dot(patch.reshape(ho * wo, cin), w_ref[kh, kw],
                                preferred_element_type=jnp.float32)
    y = acc + b_ref[...]
    if relu:
        y = jnp.maximum(y, 0.0)
    o_ref[...] = y.reshape(o_ref.shape).astype(o_ref.dtype)


# ------------------------------ Pallas wrappers ----------------------------- #
def _matmul_bias_act(a, b, bias, relu, residual=None):
    """maybe_relu(a @ b + bias [+ residual]) with a/b/residual fed as bf16."""
    M, K = a.shape
    _, N = b.shape
    tm, Mp = _tile(M, 512, 128)
    tn, Np = _tile(N, 256, 128)
    if K < 128:                      # full-dim contraction, no padding needed
        tk, Kp = K, K
    else:
        tk, Kp = _tile(_round_up(K, 128), 512, 128)

    a = a.astype(jnp.bfloat16)
    b = b.astype(jnp.bfloat16)
    if (Mp, Kp) != (M, K):
        a = jnp.pad(a, ((0, Mp - M), (0, Kp - K)))
    if (Kp, Np) != (K, N):
        b = jnp.pad(b, ((0, Kp - K), (0, Np - N)))
    bias2 = bias.reshape(1, N).astype(jnp.float32)
    if Np != N:
        bias2 = jnp.pad(bias2, ((0, 0), (0, Np - N)))

    has_res = residual is not None
    in_specs = [
        pl.BlockSpec((tm, tk), lambda i, j, k: (i, k)),
        pl.BlockSpec((tk, tn), lambda i, j, k: (k, j)),
        pl.BlockSpec((1, tn), lambda i, j, k: (0, j)),
    ]
    args = [a, b, bias2]
    if has_res:
        residual = residual.astype(jnp.bfloat16)
        if (Mp, Np) != (M, N):
            residual = jnp.pad(residual, ((0, Mp - M), (0, Np - N)))
        in_specs.append(pl.BlockSpec((tm, tn), lambda i, j, k: (i, j)))
        args.append(residual)

    out = pl.pallas_call(
        functools.partial(_mm_kernel, relu, has_res),
        out_shape=jax.ShapeDtypeStruct((Mp, Np), jnp.bfloat16),
        grid_spec=pltpu.PrefetchScalarGridSpec(
            num_scalar_prefetch=0,
            grid=(Mp // tm, Np // tn, Kp // tk),
            in_specs=in_specs,
            out_specs=pl.BlockSpec((tm, tn), lambda i, j, k: (i, j)),
            scratch_shapes=[pltpu.VMEM((tm, tn), jnp.float32)],
        ),
        compiler_params=pltpu.CompilerParams(
            dimension_semantics=("parallel", "parallel", "arbitrary")),
    )(*args)
    if (Mp, Np) != (M, N):
        out = out[:M, :N]
    return out


def _conv1x1(x, w, stride, bias, relu, residual=None):
    if stride != 1:
        x = x[:, ::stride, ::stride, :]      # 1x1/stride-s == subsample + 1x1
    nb, ho, wo, cin = x.shape
    cout = w.shape[-1]
    res = None if residual is None else residual.reshape(nb * ho * wo, cout)
    out = _matmul_bias_act(x.reshape(nb * ho * wo, cin), w.reshape(cin, cout),
                           bias, relu, res)
    return out.reshape(nb, ho, wo, cout)


def _conv_s1_fused(x, w, pad, bias, relu):
    nb, h, ww, cin = x.shape
    kh_sz, kw_sz, _, cout = w.shape
    hp, wp = h + 2 * pad, ww + 2 * pad
    ho, wo = hp - kh_sz + 1, wp - kw_sz + 1
    xp = jnp.pad(x, ((0, 0), (pad, pad), (pad, pad), (0, 0)))
    tn, _ = _tile(cout, 256, 128)
    out = pl.pallas_call(
        functools.partial(_conv_s1_kernel, ho, wo, kh_sz, kw_sz, relu),
        out_shape=jax.ShapeDtypeStruct((nb, ho, wo, cout), jnp.bfloat16),
        grid_spec=pltpu.PrefetchScalarGridSpec(
            num_scalar_prefetch=0,
            grid=(nb, cout // tn),
            in_specs=[
                # full padded spatial tile of one image; index ignores j so it
                # is DMA'd once per image and stays resident in VMEM
                pl.BlockSpec((1, hp, wp, cin), lambda b, j: (b, 0, 0, 0)),
                pl.BlockSpec((kh_sz, kw_sz, cin, tn), lambda b, j: (0, 0, 0, j)),
                pl.BlockSpec((1, tn), lambda b, j: (0, j)),
            ],
            out_specs=pl.BlockSpec((1, ho, wo, tn), lambda b, j: (b, 0, 0, j)),
        ),
        compiler_params=pltpu.CompilerParams(
            dimension_semantics=("parallel", "parallel")),
    )(xp, w, bias.reshape(1, cout))
    return out


def _conv_im2col(x, w, stride, pad, bias, relu):
    # Fallback for the 7x7 conv0 (Cin=3, contraction kept 128-aligned) and the
    # three tiny stride-2 3x3 convs; patches are materialized in the wrapper.
    nb, h, ww, cin = x.shape
    kh_sz, kw_sz, _, cout = w.shape
    ho = (h + 2 * pad - kh_sz) // stride + 1
    wo = (ww + 2 * pad - kw_sz) // stride + 1
    xp = jnp.pad(x, ((0, 0), (pad, pad), (pad, pad), (0, 0)))
    cols = []
    for kh in range(kh_sz):
        for kw in range(kw_sz):
            cols.append(xp[:, kh:kh + stride * ho:stride,
                           kw:kw + stride * wo:stride, :])
    a = jnp.concatenate(cols, axis=-1).reshape(nb * ho * wo,
                                               kh_sz * kw_sz * cin)
    out = _matmul_bias_act(a, w.reshape(kh_sz * kw_sz * cin, cout), bias, relu)
    return out.reshape(nb, ho, wo, cout)


def conv_bn_relu(x, w, stride, pad, relu=True, residual=None):
    """Conv with folded BN (scale pre-multiplied into w), optional fused
    residual add and optional ReLU, all in the Pallas epilogue."""
    kh_sz, kw_sz, cin, cout = w.shape
    bias = jnp.zeros((cout,), jnp.float32)   # folded BN bias (beta=0, mean=0)
    if kh_sz == 1 and kw_sz == 1:
        return _conv1x1(x, w, stride, bias, relu, residual)
    assert residual is None
    if stride == 1 and cin % 8 == 0 and (cout <= 256 or cout % 128 == 0):
        return _conv_s1_fused(x, w, pad, bias, relu)
    return _conv_im2col(x, w, stride, pad, bias, relu)


# ---------------------------- non-matmul glue ops ---------------------------- #
def score_head(x, w_vec):
    # Cout=1 1x1 conv (no BN, no bias): a lane-wise channel reduction on the
    # VPU is cheaper than padding N=1 up to a 128-wide MXU tile.
    return jnp.einsum('nhwc,c->nhw', x.astype(jnp.float32), w_vec)[..., None]


def maxpool2x2(x):
    n, h, w, c = x.shape
    return jnp.max(x.reshape(n, h // 2, 2, w // 2, 2, c), axis=(2, 4))


def upsample_bilinear_x2(x):
    """UpsamplingBilinear2d(scale_factor=2) == bilinear, align_corners=True."""
    n, h, w, c = x.shape

    def coords(n_in, n_out):
        if n_in == 1:
            z = jnp.zeros((n_out,), jnp.int32)
            return jnp.zeros((n_out,), jnp.float32), z, z
        src = jnp.arange(n_out, dtype=jnp.float32) * (n_in - 1) / (n_out - 1)
        lo = jnp.floor(src).astype(jnp.int32)
        hi = jnp.minimum(lo + 1, n_in - 1)
        return (src - lo.astype(jnp.float32)), lo, hi

    wh, hlo, hhi = coords(h, 2 * h)
    ww, wlo, whi = coords(w, 2 * w)
    top = (x[:, hlo, :, :] * (1.0 - wh)[None, :, None, None]
           + x[:, hhi, :, :] * wh[None, :, None, None])
    out = (top[:, :, wlo, :] * (1.0 - ww)[None, None, :, None]
           + top[:, :, whi, :] * ww[None, None, :, None])
    return out


# ------------------------------- parameters --------------------------------- #
def kaiming(key, kh, kw, cin, cout):
    fan_out = cout * kh * kw
    std = math.sqrt(2.0 / fan_out)
    return jax.random.normal(key, (kh, kw, cin, cout), jnp.float32) * std


def build_params(key, layers=(1, 1, 1, 1)):
    keys = iter(jax.random.split(key, 256))

    def conv_w(kh, kw, cin, cout):
        # fold inference-form BN scale into the weights, store bf16 for the MXU
        return (kaiming(next(keys), kh, kw, cin, cout)
                * BN_SCALE).astype(jnp.bfloat16)

    def score_w(cin):
        return kaiming(next(keys), 1, 1, cin, 1).reshape(cin)   # f32, no BN

    p = {
        'conv0': conv_w(7, 7, 3, 64),
        'conv1': conv_w(3, 3, 64, 128),
        'score_pool1': score_w(128),
        'score_pool2': score_w(128),
        'score_pool3': score_w(256),
        'score_pool4': score_w(512),
        'score_pool5': score_w(1024),
    }
    inplanes = 128
    cfg = [(32, layers[0], 1), (64, layers[1], 2),
           (128, layers[2], 2), (256, layers[3], 2)]
    for s, (planes, blocks, stride) in enumerate(cfg):
        stage = []
        for b in range(blocks):
            inp = inplanes if b == 0 else planes * 4
            st = stride if b == 0 else 1
            blk = {
                'conv1': conv_w(1, 1, inp, planes),
                'conv2': conv_w(3, 3, planes, planes),
                'conv3': conv_w(1, 1, planes, planes * 4),
                'stride': st,
            }
            if b == 0 and (stride != 1 or inplanes != planes * 4):
                # TODO(synk): reference resets block stride to 1 after building
                # a stride-2 downsample (shape-inconsistent); standard ResNet
                # behaviour (stride on first block + downsample) is used here.
                blk['down'] = conv_w(1, 1, inp, planes * 4)
            stage.append(blk)
        p['stage%d' % (s + 1)] = stage
        inplanes = planes * 4
    return p


# --------------------------------- forward ----------------------------------- #
def bottleneck(x, blk):
    if 'down' in blk:
        identity = conv_bn_relu(x, blk['down'], blk['stride'], 0, relu=False)
    else:
        identity = x
    out = conv_bn_relu(x, blk['conv1'], 1, 0)
    out = conv_bn_relu(out, blk['conv2'], blk['stride'], 1)
    # residual add + final ReLU are fused into the conv3 matmul epilogue
    return conv_bn_relu(out, blk['conv3'], 1, 0, relu=True, residual=identity)


def forward(params, x_nchw):
    x = jnp.transpose(x_nchw, (0, 2, 3, 1)).astype(jnp.bfloat16)   # -> NHWC bf16

    x = conv_bn_relu(x, params['conv0'], 1, 3)
    x = maxpool2x2(x)                                              # pool0
    x = conv_bn_relu(x, params['conv1'], 1, 1)
    x = maxpool2x2(x)                                              # pool1

    sp1 = score_head(x, params['score_pool1'])
    for blk in params['stage1']:
        x = bottleneck(x, blk)
    sp2 = score_head(x, params['score_pool2'])
    for blk in params['stage2']:
        x = bottleneck(x, blk)
    sp3 = score_head(x, params['score_pool3'])
    for blk in params['stage3']:
        x = bottleneck(x, blk)
    sp4 = score_head(x, params['score_pool4'])
    for blk in params['stage4']:
        x = bottleneck(x, blk)
    sp5 = score_head(x, params['score_pool5'])

    up = upsample_bilinear_x2
    # Reference also computes fuse_pool4/3/2; they never reach the output so
    # they are dead code under jit (XLA DCE) and are skipped here.
    # TODO(synk): reference `up(score_pool2) + score_pool1` is shape-mismatched
    # (H/2 vs H/4); both operands are upsampled here so the add is well-defined.
    fuse_pool1 = up(sp2) + up(sp1)
    # TODO(synk): reference calls undefined free function `upsample`;
    # interpreted as self.upsample (bilinear x2, align_corners=True).
    disparity = up(fuse_pool1)

    return jnp.transpose(disparity, (0, 3, 1, 2))                  # -> NCHW


if __name__ == "__main__":
    key = jax.random.PRNGKey(0)
    k_param, k_x = jax.random.split(key)
    params = build_params(k_param, layers=(1, 1, 1, 1))

    # small input: batch=2, 3 channels, 32x32 spatial (needs /32 for stage4)
    x = jax.random.normal(k_x, (2, 3, 32, 32), jnp.float32)

    fwd = jax.jit(lambda inp: forward(params, inp))
    out = jax.block_until_ready(fwd(x))
    assert out.shape == (2, 1, 32, 32), out.shape
    assert bool(jnp.all(jnp.isfinite(out)))
    print("KERNEL_OK")
</pallas_src>

<mosaic_0001>
module attributes {stable_mosaic.version = 11 : i64} {
  func.func @_mm_kernel(%arg0: i32, %arg1: i32, %arg2: i32, %arg3: memref<512x256xbf16, #tpu.memory_space<vmem>>, %arg4: memref<256x64xbf16, #tpu.memory_space<vmem>>, %arg5: memref<1x64xf32, #tpu.memory_space<vmem>>, %arg6: memref<512x64xbf16, #tpu.memory_space<vmem>>, %arg7: memref<512x64xf32, #tpu.memory_space<vmem>>) attributes {dimension_semantics = [#tpu.dimension_semantics<parallel>, #tpu.dimension_semantics<parallel>, #tpu.dimension_semantics<arbitrary>], iteration_bounds = array<i64: 4, 1, 1>, scalar_prefetch = 0 : i64, scratch_operands = 1 : i64, tpu.core_type = #tpu.core_type<tc>, window_params = [{transform_indices = @transform_0, window_bounds = array<i64: 512, 256>}, {transform_indices = @transform_1, window_bounds = array<i64: 256, 64>}, {transform_indices = @transform_2, window_bounds = array<i64: 1, 64>}, {transform_indices = @transform_3, window_bounds = array<i64: 512, 64>}]} {
    %c0_i32 = arith.constant 0 : i32
    %0 = arith.cmpi eq, %arg2, %c0_i32 : i32
    %1 = arith.extui %0 : i1 to i32
    %c0_i32_0 = arith.constant 0 : i32
    %2 = arith.cmpi ne, %1, %c0_i32_0 : i32
    scf.if %2 {
      %cst_10 = arith.constant 0.000000e+00 : f32
      %12 = vector.broadcast %cst_10 : f32 to vector<512x64xf32>
      %c0_11 = arith.constant 0 : index
      %c0_12 = arith.constant 0 : index
      %13 = vector.load %arg7[%c0_11, %c0_12] : memref<512x64xf32, #tpu.memory_space<vmem>>, vector<512x64xf32>
      tpu.vector_store %arg7[%c0_11, %c0_12], %12 {strides = array<i32>} : memref<512x64xf32, #tpu.memory_space<vmem>>, vector<512x64xf32>,
    } else {
    }
    %c0 = arith.constant 0 : index
    %c0_1 = arith.constant 0 : index
    %3 = vector.load %arg7[%c0, %c0_1] : memref<512x64xf32, #tpu.memory_space<vmem>>, vector<512x64xf32>
    %c0_2 = arith.constant 0 : index
    %c0_3 = arith.constant 0 : index
    %4 = vector.load %arg3[%c0_2, %c0_3] : memref<512x256xbf16, #tpu.memory_space<vmem>>, vector<512x256xbf16>
    %c0_4 = arith.constant 0 : index
    %c0_5 = arith.constant 0 : index
    %5 = vector.load %arg4[%c0_4, %c0_5] : memref<256x64xbf16, #tpu.memory_space<vmem>>, vector<256x64xbf16>
    %cst = arith.constant dense<0.000000e+00> : vector<512x64xf32>
    %6 = tpu.matmul %4, %5, %cst {dimension_numbers = #tpu.dot_dimension_numbers<[1], [0], [0], [1], [0, 0, 1, 1], [], []>} : vector<512x256xbf16>, vector<256x64xbf16>, vector<512x64xf32> -> vector<512x64xf32>
    %7 = arith.addf %3, %6 : vector<512x64xf32>
    %c0_6 = arith.constant 0 : index
    %c0_7 = arith.constant 0 : index
    %8 = vector.load %arg7[%c0_6, %c0_7] : memref<512x64xf32, #tpu.memory_space<vmem>>, vector<512x64xf32>
    tpu.vector_store %arg7[%c0_6, %c0_7], %7 {strides = array<i32>} : memref<512x64xf32, #tpu.memory_space<vmem>>, vector<512x64xf32>,
    %c0_i32_8 = arith.constant 0 : i32
    %9 = arith.cmpi eq, %arg2, %c0_i32_8 : i32
    %10 = arith.extui %9 : i1 to i32
    %c0_i32_9 = arith.constant 0 : i32
    %11 = arith.cmpi ne, %10, %c0_i32_9 : i32
    scf.if %11 {
      %c0_10 = arith.constant 0 : index
      %c0_11 = arith.constant 0 : index
      %12 = vector.load %arg7[%c0_10, %c0_11] : memref<512x64xf32, #tpu.memory_space<vmem>>, vector<512x64xf32>
      %c0_12 = arith.constant 0 : index
      %c0_13 = arith.constant 0 : index
      %13 = vector.load %arg5[%c0_12, %c0_13] : memref<1x64xf32, #tpu.memory_space<vmem>>, vector<1x64xf32>
      %14 = vector.broadcast %13 : vector<1x64xf32> to vector<512x64xf32>
      %15 = arith.addf %12, %14 : vector<512x64xf32>
      %cst_14 = arith.constant 0.000000e+00 : f32
      %16 = vector.broadcast %cst_14 : f32 to vector<512x64xf32>
      %17 = arith.maximumf %15, %16 : vector<512x64xf32>
      %18 = arith.truncf %17 : vector<512x64xf32> to vector<512x64xbf16>
      %c0_15 = arith.constant 0 : index
      %c0_16 = arith.constant 0 : index
      %19 = vector.load %arg6[%c0_15, %c0_16] : memref<512x64xbf16, #tpu.memory_space<vmem>>, vector<512x64xbf16>
      tpu.vector_store %arg6[%c0_15, %c0_16], %18 {strides = array<i32>} : memref<512x64xbf16, #tpu.memory_space<vmem>>, vector<512x64xbf16>,
    } else {
    }
    return
  }
  func.func @transform_0(%arg0: i32, %arg1: i32, %arg2: i32) -> (i32, i32) {
    %c0_i32 = arith.constant 0 : i32
    return %arg0, %arg2 : i32, i32
  }
  func.func @transform_1(%arg0: i32, %arg1: i32, %arg2: i32) -> (i32, i32) {
    %c0_i32 = arith.constant 0 : i32
    return %arg2, %arg1 : i32, i32
  }
  func.func @transform_2(%arg0: i32, %arg1: i32, %arg2: i32) -> (i32, i32) {
    %c0_i32 = arith.constant 0 : i32
    %c0_i32_0 = arith.constant 0 : i32
    return %c0_i32, %arg1 : i32, i32
  }
  func.func @transform_3(%arg0: i32, %arg1: i32, %arg2: i32) -> (i32, i32) {
    %c0_i32 = arith.constant 0 : i32
    return %arg0, %arg1 : i32, i32
  }
}

module attributes {stable_mosaic.version = 11 : i64} {
  func.func @_conv_s1_kernel(%arg0: i32, %arg1: i32, %arg2: memref<1x18x18x64xbf16, #tpu.memory_space<vmem>>, %arg3: memref<3x3x64x128xbf16, #tpu.memory_space<vmem>>, %arg4: memref<1x128xf32, #tpu.memory_space<vmem>>, %arg5: memref<1x16x16x128xbf16, #tpu.memory_space<vmem>>) attributes {dimension_semantics = [#tpu.dimension_semantics<parallel>, #tpu.dimension_semantics<parallel>], iteration_bounds = array<i64: 2, 1>, scalar_prefetch = 0 : i64, scratch_operands = 0 : i64, tpu.core_type = #tpu.core_type<tc>, window_params = [{transform_indices = @transform_0, window_bounds = array<i64: 1, 18, 18, 64>}, {transform_indices = @transform_1, window_bounds = array<i64: 3, 3, 64, 128>}, {transform_indices = @transform_2, window_bounds = array<i64: 1, 128>}, {transform_indices = @transform_3, window_bounds = array<i64: 1, 16, 16, 128>}]} {
    %cst = arith.constant 0.000000e+00 : f32
    %0 = vector.broadcast %cst : f32 to vector<256x128xf32>
    %c0 = arith.constant 0 : index
    %c0_0 = arith.constant 0 : index
    %c0_1 = arith.constant 0 : index
    %c0_2 = arith.constant 0 : index
    %1 = vector.load %arg2[%c0, %c0_0, %c0_1, %c0_2] : memref<1x18x18x64xbf16, #tpu.memory_space<vmem>>, vector<1x16x16x64xbf16>
    %2 = vector.shape_cast %1 : vector<1x16x16x64xbf16> to vector<16x16x64xbf16>
    %3 = vector.shape_cast %2 : vector<16x16x64xbf16> to vector<256x64xbf16>
    %c0_3 = arith.constant 0 : index
    %c0_4 = arith.constant 0 : index
    %c0_5 = arith.constant 0 : index
    %c0_6 = arith.constant 0 : index
    %4 = vector.load %arg3[%c0_3, %c0_4, %c0_5, %c0_6] : memref<3x3x64x128xbf16, #tpu.memory_space<vmem>>, vector<1x1x64x128xbf16>
    %5 = vector.shape_cast %4 : vector<1x1x64x128xbf16> to vector<64x128xbf16>
    %cst_7 = arith.constant dense<0.000000e+00> : vector<256x128xf32>
    %6 = tpu.matmul %3, %5, %cst_7 {dimension_numbers = #tpu.dot_dimension_numbers<[1], [0], [0], [1], [0, 0, 1, 1], [], []>} : vector<256x64xbf16>, vector<64x128xbf16>, vector<256x128xf32> -> vector<256x128xf32>
    %7 = arith.addf %0, %6 : vector<256x128xf32>
    %c0_8 = arith.constant 0 : index
    %c0_9 = arith.constant 0 : index
    %c1 = arith.constant 1 : index
    %c0_10 = arith.constant 0 : index
    %8 = vector.load %arg2[%c0_8, %c0_9, %c1, %c0_10] : memref<1x18x18x64xbf16, #tpu.memory_space<vmem>>, vector<1x16x16x64xbf16>
    %9 = vector.shape_cast %8 : vector<1x16x16x64xbf16> to vector<16x16x64xbf16>
    %10 = vector.shape_cast %9 : vector<16x16x64xbf16> to vector<256x64xbf16>
    %c0_11 = arith.constant 0 : index
    %c1_12 = arith.constant 1 : index
    %c0_13 = arith.constant 0 : index
    %c0_14 = arith.constant 0 : index
    %11 = vector.load %arg3[%c0_11, %c1_12, %c0_13, %c0_14] : memref<3x3x64x128xbf16, #tpu.memory_space<vmem>>, vector<1x1x64x128xbf16>
    %12 = vector.shape_cast %11 : vector<1x1x64x128xbf16> to vector<64x128xbf16>
    %cst_15 = arith.constant dense<0.000000e+00> : vector<256x128xf32>
    %13 = tpu.matmul %10, %12, %cst_15 {dimension_numbers = #tpu.dot_dimension_numbers<[1], [0], [0], [1], [0, 0, 1, 1], [], []>} : vector<256x64xbf16>, vector<64x128xbf16>, vector<256x128xf32> -> vector<256x128xf32>
    %14 = arith.addf %7, %13 : vector<256x128xf32>
    %c0_16 = arith.constant 0 : index
    %c0_17 = arith.constant 0 : index
    %c2 = arith.constant 2 : index
    %c0_18 = arith.constant 0 : index
    %15 = vector.load %arg2[%c0_16, %c0_17, %c2, %c0_18] : memref<1x18x18x64xbf16, #tpu.memory_space<vmem>>, vector<1x16x16x64xbf16>
    %16 = vector.shape_cast %15 : vector<1x16x16x64xbf16> to vector<16x16x64xbf16>
    %17 = vector.shape_cast %16 : vector<16x16x64xbf16> to vector<256x64xbf16>
    %c0_19 = arith.constant 0 : index
    %c2_20 = arith.constant 2 : index
    %c0_21 = arith.constant 0 : index
    %c0_22 = arith.constant 0 : index
    %18 = vector.load %arg3[%c0_19, %c2_20, %c0_21, %c0_22] : memref<3x3x64x128xbf16, #tpu.memory_space<vmem>>, vector<1x1x64x128xbf16>
    %19 = vector.shape_cast %18 : vector<1x1x64x128xbf16> to vector<64x128xbf16>
    %cst_23 = arith.constant dense<0.000000e+00> : vector<256x128xf32>
    %20 = tpu.matmul %17, %19, %cst_23 {dimension_numbers = #tpu.dot_dimension_numbers<[1], [0], [0], [1], [0, 0, 1, 1], [], []>} : vector<256x64xbf16>, vector<64x128xbf16>, vector<256x128xf32> -> vector<256x128xf32>
    %21 = arith.addf %14, %20 : vector<256x128xf32>
    %c0_24 = arith.constant 0 : index
    %c1_25 = arith.constant 1 : index
    %c0_26 = arith.constant 0 : index
    %c0_27 = arith.constant 0 : index
    %22 = vector.load %arg2[%c0_24, %c1_25, %c0_26, %c0_27] : memref<1x18x18x64xbf16, #tpu.memory_space<vmem>>, vector<1x16x16x64xbf16>
    %23 = vector.shape_cast %22 : vector<1x16x16x64xbf16> to vector<16x16x64xbf16>
    %24 = vector.shape_cast %23 : vector<16x16x64xbf16> to vector<256x64xbf16>
    %c1_28 = arith.constant 1 : index
    %c0_29 = arith.constant 0 : index
    %c0_30 = arith.constant 0 : index
    %c0_31 = arith.constant 0 : index
    %25 = vector.load %arg3[%c1_28, %c0_29, %c0_30, %c0_31] : memref<3x3x64x128xbf16, #tpu.memory_space<vmem>>, vector<1x1x64x128xbf16>
    %26 = vector.shape_cast %25 : vector<1x1x64x128xbf16> to vector<64x128xbf16>
    %cst_32 = arith.constant dense<0.000000e+00> : vector<256x128xf32>
    %27 = tpu.matmul %24, %26, %cst_32 {dimension_numbers = #tpu.dot_dimension_numbers<[1], [0], [0], [1], [0, 0, 1, 1], [], []>} : vector<256x64xbf16>, vector<64x128xbf16>, vector<256x128xf32> -> vector<256x128xf32>
    %28 = arith.addf %21, %27 : vector<256x128xf32>
    %c0_33 = arith.constant 0 : index
    %c1_34 = arith.constant 1 : index
    %c1_35 = arith.constant 1 : index
    %c0_36 = arith.constant 0 : index
    %29 = vector.load %arg2[%c0_33, %c1_34, %c1_35, %c0_36] : memref<1x18x18x64xbf16, #tpu.memory_space<vmem>>, vector<1x16x16x64xbf16>
    %30 = vector.shape_cast %29 : vector<1x16x16x64xbf16> to vector<16x16x64xbf16>
    %31 = vector.shape_cast %30 : vector<16x16x64xbf16> to vector<256x64xbf16>
    %c1_37 = arith.constant 1 : index
    %c1_38 = arith.constant 1 : index
    %c0_39 = arith.constant 0 : index
    %c0_40 = arith.constant 0 : index
    %32 = vector.load %arg3[%c1_37, %c1_38, %c0_39, %c0_40] : memref<3x3x64x128xbf16, #tpu.memory_space<vmem>>, vector<1x1x64x128xbf16>
    %33 = vector.shape_cast %32 : vector<1x1x64x128xbf16> to vector<64x128xbf16>
    %cst_41 = arith.constant dense<0.000000e+00> : vector<256x128xf32>
    %34 = tpu.matmul %31, %33, %cst_41 {dimension_numbers = #tpu.dot_dimension_numbers<[1], [0], [0], [1], [0, 0, 1, 1], [], []>} : vector<256x64xbf16>, vector<64x128xbf16>, vector<256x128xf32> -> vector<256x128xf32>
    %35 = arith.addf %28, %34 : vector<256x128xf32>
    %c0_42 = arith.constant 0 : index
    %c1_43 = arith.constant 1 : index
    %c2_44 = arith.constant 2 : index
    %c0_45 = arith.constant 0 : index
    %36 = vector.load %arg2[%c0_42, %c1_43, %c2_44, %c0_45] : memref<1x18x18x64xbf16, #tpu.memory_space<vmem>>, vector<1x16x16x64xbf16>
    %37 = vector.shape_cast %36 : vector<1x16x16x64xbf16> to vector<16x16x64xbf16>
    %38 = vector.shape_cast %37 : vector<16x16x64xbf16> to vector<256x64xbf16>
    %c1_46 = arith.constant 1 : index
    %c2_47 = arith.constant 2 : index
    %c0_48 = arith.constant 0 : index
    %c0_49 = arith.constant 0 : index
    %39 = vector.load %arg3[%c1_46, %c2_47, %c0_48, %c0_49] : memref<3x3x64x128xbf16, #tpu.memory_space<vmem>>, vector<1x1x64x128xbf16>
    %40 = vector.shape_cast %39 : vector<1x1x64x128xbf16> to vector<64x128xbf16>
    %cst_50 = arith.constant dense<0.000000e+00> : vector<256x128xf32>
    %41 = tpu.matmul %38, %40, %cst_50 {dimension_numbers = #tpu.dot_dimension_numbers<[1], [0], [0], [1], [0, 0, 1, 1], [], []>} : vector<256x64xbf16>, vector<64x128xbf16>, vector<256x128xf32> -> vector<256x128xf32>
    %42 = arith.addf %35, %41 : vector<256x128xf32>
    %c0_51 = arith.constant 0 : index
    %c2_52 = arith.constant 2 : index
    %c0_53 = arith.constant 0 : index
    %c0_54 = arith.constant 0 : index
    %43 = vector.load %arg2[%c0_51, %c2_52, %c0_53, %c0_54] : memref<1x18x18x64xbf16, #tpu.memory_space<vmem>>, vector<1x16x16x64xbf16>
    %44 = vector.shape_cast %43 : vector<1x16x16x64xbf16> to vector<16x16x64xbf16>
    %45 = vector.shape_cast %44 : vector<16x16x64xbf16> to vector<256x64xbf16>
    %c2_55 = arith.constant 2 : index
    %c0_56 = arith.constant 0 : index
    %c0_57 = arith.constant 0 : index
    %c0_58 = arith.constant 0 : index
    %46 = vector.load %arg3[%c2_55, %c0_56, %c0_57, %c0_58] : memref<3x3x64x128xbf16, #tpu.memory_space<vmem>>, vector<1x1x64x128xbf16>
    %47 = vector.shape_cast %46 : vector<1x1x64x128xbf16> to vector<64x128xbf16>
    %cst_59 = arith.constant dense<0.000000e+00> : vector<256x128xf32>
    %48 = tpu.matmul %45, %47, %cst_59 {dimension_numbers = #tpu.dot_dimension_numbers<[1], [0], [0], [1], [0, 0, 1, 1], [], []>} : vector<256x64xbf16>, vector<64x128xbf16>, vector<256x128xf32> -> vector<256x128xf32>
    %49 = arith.addf %42, %48 : vector<256x128xf32>
    %c0_60 = arith.constant 0 : index
    %c2_61 = arith.constant 2 : index
    %c1_62 = arith.constant 1 : index
    %c0_63 = arith.constant 0 : index
    %50 = vector.load %arg2[%c0_60, %c2_61, %c1_62, %c0_63] : memref<1x18x18x64xbf16, #tpu.memory_space<vmem>>, vector<1x16x16x64xbf16>
    %51 = vector.shape_cast %50 : vector<1x16x16x64xbf16> to vector<16x16x64xbf16>
    %52 = vector.shape_cast %51 : vector<16x16x64xbf16> to vector<256x64xbf16>
    %c2_64 = arith.constant 2 : index
    %c1_65 = arith.constant 1 : index
    %c0_66 = arith.constant 0 : index
    %c0_67 = arith.constant 0 : index
    %53 = vector.load %arg3[%c2_64, %c1_65, %c0_66, %c0_67] : memref<3x3x64x128xbf16, #tpu.memory_space<vmem>>, vector<1x1x64x128xbf16>
    %54 = vector.shape_cast %53 : vector<1x1x64x128xbf16> to vector<64x128xbf16>
    %cst_68 = arith.constant dense<0.000000e+00> : vector<256x128xf32>
    %55 = tpu.matmul %52, %54, %cst_68 {dimension_numbers = #tpu.dot_dimension_numbers<[1], [0], [0], [1], [0, 0, 1, 1], [], []>} : vector<256x64xbf16>, vector<64x128xbf16>, vector<256x128xf32> -> vector<256x128xf32>
    %56 = arith.addf %49, %55 : vector<256x128xf32>
    %c0_69 = arith.constant 0 : index
    %c2_70 = arith.constant 2 : index
    %c2_71 = arith.constant 2 : index
    %c0_72 = arith.constant 0 : index
    %57 = vector.load %arg2[%c0_69, %c2_70, %c2_71, %c0_72] : memref<1x18x18x64xbf16, #tpu.memory_space<vmem>>, vector<1x16x16x64xbf16>
    %58 = vector.shape_cast %57 : vector<1x16x16x64xbf16> to vector<16x16x64xbf16>
    %59 = vector.shape_cast %58 : vector<16x16x64xbf16> to vector<256x64xbf16>
    %c2_73 = arith.constant 2 : index
    %c2_74 = arith.constant 2 : index
    %c0_75 = arith.constant 0 : index
    %c0_76 = arith.constant 0 : index
    %60 = vector.load %arg3[%c2_73, %c2_74, %c0_75, %c0_76] : memref<3x3x64x128xbf16, #tpu.memory_space<vmem>>, vector<1x1x64x128xbf16>
    %61 = vector.shape_cast %60 : vector<1x1x64x128xbf16> to vector<64x128xbf16>
    %cst_77 = arith.constant dense<0.000000e+00> : vector<256x128xf32>
    %62 = tpu.matmul %59, %61, %cst_77 {dimension_numbers = #tpu.dot_dimension_numbers<[1], [0], [0], [1], [0, 0, 1, 1], [], []>} : vector<256x64xbf16>, vector<64x128xbf16>, vector<256x128xf32> -> vector<256x128xf32>
    %63 = arith.addf %56, %62 : vector<256x128xf32>
    %c0_78 = arith.constant 0 : index
    %c0_79 = arith.constant 0 : index
    %64 = vector.load %arg4[%c0_78, %c0_79] : memref<1x128xf32, #tpu.memory_space<vmem>>, vector<1x128xf32>
    %65 = vector.broadcast %64 : vector<1x128xf32> to vector<256x128xf32>
    %66 = arith.addf %63, %65 : vector<256x128xf32>
    %cst_80 = arith.constant 0.000000e+00 : f32
    %67 = vector.broadcast %cst_80 : f32 to vector<256x128xf32>
    %68 = arith.maximumf %66, %67 : vector<256x128xf32>
    %69 = vector.shape_cast %68 : vector<256x128xf32> to vector<1x16x16x128xf32>
    %70 = arith.truncf %69 : vector<1x16x16x128xf32> to vector<1x16x16x128xbf16>
    %c0_81 = arith.constant 0 : index
    %c0_82 = arith.constant 0 : index
    %c0_83 = arith.constant 0 : index
    %c0_84 = arith.constant 0 : index
    %71 = vector.load %arg5[%c0_81, %c0_82, %c0_83, %c0_84] : memref<1x16x16x128xbf16, #tpu.memory_space<vmem>>, vector<1x16x16x128xbf16>
    tpu.vector_store %arg5[%c0_81, %c0_82, %c0_83, %c0_84], %70 {strides = array<i32>} : memref<1x16x16x128xbf16, #tpu.memory_space<vmem>>, vector<1x16x16x128xbf16>,
    return
  }
  func.func @transform_0(%arg0: i32, %arg1: i32) -> (i32, i32, i32, i32) {
    %c0_i32 = arith.constant 0 : i32
    %c0_i32_0 = arith.constant 0 : i32
    %c0_i32_1 = arith.constant 0 : i32
    %c0_i32_2 = arith.constant 0 : i32
    return %arg0, %c0_i32, %c0_i32_0, %c0_i32_1 : i32, i32, i32, i32
  }
  func.func @transform_1(%arg0: i32, %arg1: i32) -> (i32, i32, i32, i32) {
    %c0_i32 = arith.constant 0 : i32
    %c0_i32_0 = arith.constant 0 : i32
    %c0_i32_1 = arith.constant 0 : i32
    %c0_i32_2 = arith.constant 0 : i32
    return %c0_i32, %c0_i32_0, %c0_i32_1, %arg1 : i32, i32, i32, i32
  }
  func.func @transform_2(%arg0: i32, %arg1: i32) -> (i32, i32) {
    %c0_i32 = arith.constant 0 : i32
    %c0_i32_0 = arith.constant 0 : i32
    return %c0_i32, %arg1 : i32, i32
  }
  func.func @transform_3(%arg0: i32, %arg1: i32) -> (i32, i32, i32, i32) {
    %c0_i32 = arith.constant 0 : i32
    %c0_i32_0 = arith.constant 0 : i32
    %c0_i32_1 = arith.constant 0 : i32
    return %arg0, %c0_i32, %c0_i32_0, %arg1 : i32, i32, i32, i32
  }
}

module attributes {stable_mosaic.version = 11 : i64} {
  func.func @_mm_kernel(%arg0: i32, %arg1: i32, %arg2: i32, %arg3: memref<128x128xbf16, #tpu.memory_space<vmem>>, %arg4: memref<128x32xbf16, #tpu.memory_space<vmem>>, %arg5: memref<1x32xf32, #tpu.memory_space<vmem>>, %arg6: memref<128x32xbf16, #tpu.memory_space<vmem>>, %arg7: memref<128x32xf32, #tpu.memory_space<vmem>>) attributes {dimension_semantics = [#tpu.dimension_semantics<parallel>, #tpu.dimension_semantics<parallel>, #tpu.dimension_semantics<arbitrary>], iteration_bounds = array<i64: 1, 1, 1>, scalar_prefetch = 0 : i64, scratch_operands = 1 : i64, tpu.core_type = #tpu.core_type<tc>, window_params = [{transform_indices = @transform_0, window_bounds = array<i64: 128, 128>}, {transform_indices = @transform_1, window_bounds = array<i64: 128, 32>}, {transform_indices = @transform_2, window_bounds = array<i64: 1, 32>}, {transform_indices = @transform_3, window_bounds = array<i64: 128, 32>}]} {
    %c0_i32 = arith.constant 0 : i32
    %0 = arith.cmpi eq, %arg2, %c0_i32 : i32
    %1 = arith.extui %0 : i1 to i32
    %c0_i32_0 = arith.constant 0 : i32
    %2 = arith.cmpi ne, %1, %c0_i32_0 : i32
    scf.if %2 {
      %cst_10 = arith.constant 0.000000e+00 : f32
      %12 = vector.broadcast %cst_10 : f32 to vector<128x32xf32>
      %c0_11 = arith.constant 0 : index
      %c0_12 = arith.constant 0 : index
      %13 = vector.load %arg7[%c0_11, %c0_12] : memref<128x32xf32, #tpu.memory_space<vmem>>, vector<128x32xf32>
      tpu.vector_store %arg7[%c0_11, %c0_12], %12 {strides = array<i32>} : memref<128x32xf32, #tpu.memory_space<vmem>>, vector<128x32xf32>,
    } else {
    }
    %c0 = arith.constant 0 : index
    %c0_1 = arith.constant 0 : index
    %3 = vector.load %arg7[%c0, %c0_1] : memref<128x32xf32, #tpu.memory_space<vmem>>, vector<128x32xf32>
    %c0_2 = arith.constant 0 : index
    %c0_3 = arith.constant 0 : index
    %4 = vector.load %arg3[%c0_2, %c0_3] : memref<128x128xbf16, #tpu.memory_space<vmem>>, vector<128x128xbf16>
    %c0_4 = arith.constant 0 : index
    %c0_5 = arith.constant 0 : index
    %5 = vector.load %arg4[%c0_4, %c0_5] : memref<128x32xbf16, #tpu.memory_space<vmem>>, vector<128x32xbf16>
    %cst = arith.constant dense<0.000000e+00> : vector<128x32xf32>
    %6 = tpu.matmul %4, %5, %cst {dimension_numbers = #tpu.dot_dimension_numbers<[1], [0], [0], [1], [0, 0, 1, 1], [], []>} : vector<128x128xbf16>, vector<128x32xbf16>, vector<128x32xf32> -> vector<128x32xf32>
    %7 = arith.addf %3, %6 : vector<128x32xf32>
    %c0_6 = arith.constant 0 : index
    %c0_7 = arith.constant 0 : index
    %8 = vector.load %arg7[%c0_6, %c0_7] : memref<128x32xf32, #tpu.memory_space<vmem>>, vector<128x32xf32>
    tpu.vector_store %arg7[%c0_6, %c0_7], %7 {strides = array<i32>} : memref<128x32xf32, #tpu.memory_space<vmem>>, vector<128x32xf32>,
    %c0_i32_8 = arith.constant 0 : i32
    %9 = arith.cmpi eq, %arg2, %c0_i32_8 : i32
    %10 = arith.extui %9 : i1 to i32
    %c0_i32_9 = arith.constant 0 : i32
    %11 = arith.cmpi ne, %10, %c0_i32_9 : i32
    scf.if %11 {
      %c0_10 = arith.constant 0 : index
      %c0_11 = arith.constant 0 : index
      %12 = vector.load %arg7[%c0_10, %c0_11] : memref<128x32xf32, #tpu.memory_space<vmem>>, vector<128x32xf32>
      %c0_12 = arith.constant 0 : index
      %c0_13 = arith.constant 0 : index
      %13 = vector.load %arg5[%c0_12, %c0_13] : memref<1x32xf32, #tpu.memory_space<vmem>>, vector<1x32xf32>
      %14 = vector.broadcast %13 : vector<1x32xf32> to vector<128x32xf32>
      %15 = arith.addf %12, %14 : vector<128x32xf32>
      %cst_14 = arith.constant 0.000000e+00 : f32
      %16 = vector.broadcast %cst_14 : f32 to vector<128x32xf32>
      %17 = arith.maximumf %15, %16 : vector<128x32xf32>
      %18 = arith.truncf %17 : vector<128x32xf32> to vector<128x32xbf16>
      %c0_15 = arith.constant 0 : index
      %c0_16 = arith.constant 0 : index
      %19 = vector.load %arg6[%c0_15, %c0_16] : memref<128x32xbf16, #tpu.memory_space<vmem>>, vector<128x32xbf16>
      tpu.vector_store %arg6[%c0_15, %c0_16], %18 {strides = array<i32>} : memref<128x32xbf16, #tpu.memory_space<vmem>>, vector<128x32xbf16>,
    } else {
    }
    return
  }
  func.func @transform_0(%arg0: i32, %arg1: i32, %arg2: i32) -> (i32, i32) {
    %c0_i32 = arith.constant 0 : i32
    return %arg0, %arg2 : i32, i32
  }
  func.func @transform_1(%arg0: i32, %arg1: i32, %arg2: i32) -> (i32, i32) {
    %c0_i32 = arith.constant 0 : i32
    return %arg2, %arg1 : i32, i32
  }
  func.func @transform_2(%arg0: i32, %arg1: i32, %arg2: i32) -> (i32, i32) {
    %c0_i32 = arith.constant 0 : i32
    %c0_i32_0 = arith.constant 0 : i32
    return %c0_i32, %arg1 : i32, i32
  }
  func.func @transform_3(%arg0: i32, %arg1: i32, %arg2: i32) -> (i32, i32) {
    %c0_i32 = arith.constant 0 : i32
    return %arg0, %arg1 : i32, i32
  }
}

module attributes {stable_mosaic.version = 11 : i64} {
  func.func @_conv_s1_kernel(%arg0: i32, %arg1: i32, %arg2: memref<1x10x10x32xbf16, #tpu.memory_space<vmem>>, %arg3: memref<3x3x32x32xbf16, #tpu.memory_space<vmem>>, %arg4: memref<1x32xf32, #tpu.memory_space<vmem>>, %arg5: memref<1x8x8x32xbf16, #tpu.memory_space<vmem>>) attributes {dimension_semantics = [#tpu.dimension_semantics<parallel>, #tpu.dimension_semantics<parallel>], iteration_bounds = array<i64: 2, 1>, scalar_prefetch = 0 : i64, scratch_operands = 0 : i64, tpu.core_type = #tpu.core_type<tc>, window_params = [{transform_indices = @transform_0, window_bounds = array<i64: 1, 10, 10, 32>}, {transform_indices = @transform_1, window_bounds = array<i64: 3, 3, 32, 32>}, {transform_indices = @transform_2, window_bounds = array<i64: 1, 32>}, {transform_indices = @transform_3, window_bounds = array<i64: 1, 8, 8, 32>}]} {
    %cst = arith.constant 0.000000e+00 : f32
    %0 = vector.broadcast %cst : f32 to vector<64x32xf32>
    %c0 = arith.constant 0 : index
    %c0_0 = arith.constant 0 : index
    %c0_1 = arith.constant 0 : index
    %c0_2 = arith.constant 0 : index
    %1 = vector.load %arg2[%c0, %c0_0, %c0_1, %c0_2] : memref<1x10x10x32xbf16, #tpu.memory_space<vmem>>, vector<1x8x8x32xbf16>
    %2 = vector.shape_cast %1 : vector<1x8x8x32xbf16> to vector<8x8x32xbf16>
    %3 = vector.shape_cast %2 : vector<8x8x32xbf16> to vector<64x32xbf16>
    %c0_3 = arith.constant 0 : index
    %c0_4 = arith.constant 0 : index
    %c0_5 = arith.constant 0 : index
    %c0_6 = arith.constant 0 : index
    %4 = vector.load %arg3[%c0_3, %c0_4, %c0_5, %c0_6] : memref<3x3x32x32xbf16, #tpu.memory_space<vmem>>, vector<1x1x32x32xbf16>
    %5 = vector.shape_cast %4 : vector<1x1x32x32xbf16> to vector<32x32xbf16>
    %cst_7 = arith.constant dense<0.000000e+00> : vector<64x32xf32>
    %6 = tpu.matmul %3, %5, %cst_7 {dimension_numbers = #tpu.dot_dimension_numbers<[1], [0], [0], [1], [0, 0, 1, 1], [], []>} : vector<64x32xbf16>, vector<32x32xbf16>, vector<64x32xf32> -> vector<64x32xf32>
    %7 = arith.addf %0, %6 : vector<64x32xf32>
    %c0_8 = arith.constant 0 : index
    %c0_9 = arith.constant 0 : index
    %c1 = arith.constant 1 : index
    %c0_10 = arith.constant 0 : index
    %8 = vector.load %arg2[%c0_8, %c0_9, %c1, %c0_10] : memref<1x10x10x32xbf16, #tpu.memory_space<vmem>>, vector<1x8x8x32xbf16>
    %9 = vector.shape_cast %8 : vector<1x8x8x32xbf16> to vector<8x8x32xbf16>
    %10 = vector.shape_cast %9 : vector<8x8x32xbf16> to vector<64x32xbf16>
    %c0_11 = arith.constant 0 : index
    %c1_12 = arith.constant 1 : index
    %c0_13 = arith.constant 0 : index
    %c0_14 = arith.constant 0 : index
    %11 = vector.load %arg3[%c0_11, %c1_12, %c0_13, %c0_14] : memref<3x3x32x32xbf16, #tpu.memory_space<vmem>>, vector<1x1x32x32xbf16>
    %12 = vector.shape_cast %11 : vector<1x1x32x32xbf16> to vector<32x32xbf16>
    %cst_15 = arith.constant dense<0.000000e+00> : vector<64x32xf32>
    %13 = tpu.matmul %10, %12, %cst_15 {dimension_numbers = #tpu.dot_dimension_numbers<[1], [0], [0], [1], [0, 0, 1, 1], [], []>} : vector<64x32xbf16>, vector<32x32xbf16>, vector<64x32xf32> -> vector<64x32xf32>
    %14 = arith.addf %7, %13 : vector<64x32xf32>
    %c0_16 = arith.constant 0 : index
    %c0_17 = arith.constant 0 : index
    %c2 = arith.constant 2 : index
    %c0_18 = arith.constant 0 : index
    %15 = vector.load %arg2[%c0_16, %c0_17, %c2, %c0_18] : memref<1x10x10x32xbf16, #tpu.memory_space<vmem>>, vector<1x8x8x32xbf16>
    %16 = vector.shape_cast %15 : vector<1x8x8x32xbf16> to vector<8x8x32xbf16>
    %17 = vector.shape_cast %16 : vector<8x8x32xbf16> to vector<64x32xbf16>
    %c0_19 = arith.constant 0 : index
    %c2_20 = arith.constant 2 : index
    %c0_21 = arith.constant 0 : index
    %c0_22 = arith.constant 0 : index
    %18 = vector.load %arg3[%c0_19, %c2_20, %c0_21, %c0_22] : memref<3x3x32x32xbf16, #tpu.memory_space<vmem>>, vector<1x1x32x32xbf16>
    %19 = vector.shape_cast %18 : vector<1x1x32x32xbf16> to vector<32x32xbf16>
    %cst_23 = arith.constant dense<0.000000e+00> : vector<64x32xf32>
    %20 = tpu.matmul %17, %19, %cst_23 {dimension_numbers = #tpu.dot_dimension_numbers<[1], [0], [0], [1], [0, 0, 1, 1], [], []>} : vector<64x32xbf16>, vector<32x32xbf16>, vector<64x32xf32> -> vector<64x32xf32>
    %21 = arith.addf %14, %20 : vector<64x32xf32>
    %c0_24 = arith.constant 0 : index
    %c1_25 = arith.constant 1 : index
    %c0_26 = arith.constant 0 : index
    %c0_27 = arith.constant 0 : index
    %22 = vector.load %arg2[%c0_24, %c1_25, %c0_26, %c0_27] : memref<1x10x10x32xbf16, #tpu.memory_space<vmem>>, vector<1x8x8x32xbf16>
    %23 = vector.shape_cast %22 : vector<1x8x8x32xbf16> to vector<8x8x32xbf16>
    %24 = vector.shape_cast %23 : vector<8x8x32xbf16> to vector<64x32xbf16>
    %c1_28 = arith.constant 1 : index
    %c0_29 = arith.constant 0 : index
    %c0_30 = arith.constant 0 : index
    %c0_31 = arith.constant 0 : index
    %25 = vector.load %arg3[%c1_28, %c0_29, %c0_30, %c0_31] : memref<3x3x32x32xbf16, #tpu.memory_space<vmem>>, vector<1x1x32x32xbf16>
    %26 = vector.shape_cast %25 : vector<1x1x32x32xbf16> to vector<32x32xbf16>
    %cst_32 = arith.constant dense<0.000000e+00> : vector<64x32xf32>
    %27 = tpu.matmul %24, %26, %cst_32 {dimension_numbers = #tpu.dot_dimension_numbers<[1], [0], [0], [1], [0, 0, 1, 1], [], []>} : vector<64x32xbf16>, vector<32x32xbf16>, vector<64x32xf32> -> vector<64x32xf32>
    %28 = arith.addf %21, %27 : vector<64x32xf32>
    %c0_33 = arith.constant 0 : index
    %c1_34 = arith.constant 1 : index
    %c1_35 = arith.constant 1 : index
    %c0_36 = arith.constant 0 : index
    %29 = vector.load %arg2[%c0_33, %c1_34, %c1_35, %c0_36] : memref<1x10x10x32xbf16, #tpu.memory_space<vmem>>, vector<1x8x8x32xbf16>
    %30 = vector.shape_cast %29 : vector<1x8x8x32xbf16> to vector<8x8x32xbf16>
    %31 = vector.shape_cast %30 : vector<8x8x32xbf16> to vector<64x32xbf16>
    %c1_37 = arith.constant 1 : index
    %c1_38 = arith.constant 1 : index
    %c0_39 = arith.constant 0 : index
    %c0_40 = arith.constant 0 : index
    %32 = vector.load %arg3[%c1_37, %c1_38, %c0_39, %c0_40] : memref<3x3x32x32xbf16, #tpu.memory_space<vmem>>, vector<1x1x32x32xbf16>
    %33 = vector.shape_cast %32 : vector<1x1x32x32xbf16> to vector<32x32xbf16>
    %cst_41 = arith.constant dense<0.000000e+00> : vector<64x32xf32>
    %34 = tpu.matmul %31, %33, %cst_41 {dimension_numbers = #tpu.dot_dimension_numbers<[1], [0], [0], [1], [0, 0, 1, 1], [], []>} : vector<64x32xbf16>, vector<32x32xbf16>, vector<64x32xf32> -> vector<64x32xf32>
    %35 = arith.addf %28, %34 : vector<64x32xf32>
    %c0_42 = arith.constant 0 : index
    %c1_43 = arith.constant 1 : index
    %c2_44 = arith.constant 2 : index
    %c0_45 = arith.constant 0 : index
    %36 = vector.load %arg2[%c0_42, %c1_43, %c2_44, %c0_45] : memref<1x10x10x32xbf16, #tpu.memory_space<vmem>>, vector<1x8x8x32xbf16>
    %37 = vector.shape_cast %36 : vector<1x8x8x32xbf16> to vector<8x8x32xbf16>
    %38 = vector.shape_cast %37 : vector<8x8x32xbf16> to vector<64x32xbf16>
    %c1_46 = arith.constant 1 : index
    %c2_47 = arith.constant 2 : index
    %c0_48 = arith.constant 0 : index
    %c0_49 = arith.constant 0 : index
    %39 = vector.load %arg3[%c1_46, %c2_47, %c0_48, %c0_49] : memref<3x3x32x32xbf16, #tpu.memory_space<vmem>>, vector<1x1x32x32xbf16>
    %40 = vector.shape_cast %39 : vector<1x1x32x32xbf16> to vector<32x32xbf16>
    %cst_50 = arith.constant dense<0.000000e+00> : vector<64x32xf32>
    %41 = tpu.matmul %38, %40, %cst_50 {dimension_numbers = #tpu.dot_dimension_numbers<[1], [0], [0], [1], [0, 0, 1, 1], [], []>} : vector<64x32xbf16>, vector<32x32xbf16>, vector<64x32xf32> -> vector<64x32xf32>
    %42 = arith.addf %35, %41 : vector<64x32xf32>
    %c0_51 = arith.constant 0 : index
    %c2_52 = arith.constant 2 : index
    %c0_53 = arith.constant 0 : index
    %c0_54 = arith.constant 0 : index
    %43 = vector.load %arg2[%c0_51, %c2_52, %c0_53, %c0_54] : memref<1x10x10x32xbf16, #tpu.memory_space<vmem>>, vector<1x8x8x32xbf16>
    %44 = vector.shape_cast %43 : vector<1x8x8x32xbf16> to vector<8x8x32xbf16>
    %45 = vector.shape_cast %44 : vector<8x8x32xbf16> to vector<64x32xbf16>
    %c2_55 = arith.constant 2 : index
    %c0_56 = arith.constant 0 : index
    %c0_57 = arith.constant 0 : index
    %c0_58 = arith.constant 0 : index
    %46 = vector.load %arg3[%c2_55, %c0_56, %c0_57, %c0_58] : memref<3x3x32x32xbf16, #tpu.memory_space<vmem>>, vector<1x1x32x32xbf16>
    %47 = vector.shape_cast %46 : vector<1x1x32x32xbf16> to vector<32x32xbf16>
    %cst_59 = arith.constant dense<0.000000e+00> : vector<64x32xf32>
    %48 = tpu.matmul %45, %47, %cst_59 {dimension_numbers = #tpu.dot_dimension_numbers<[1], [0], [0], [1], [0, 0, 1, 1], [], []>} : vector<64x32xbf16>, vector<32x32xbf16>, vector<64x32xf32> -> vector<64x32xf32>
    %49 = arith.addf %42, %48 : vector<64x32xf32>
    %c0_60 = arith.constant 0 : index
    %c2_61 = arith.constant 2 : index
    %c1_62 = arith.constant 1 : index
    %c0_63 = arith.constant 0 : index
    %50 = vector.load %arg2[%c0_60, %c2_61, %c1_62, %c0_63] : memref<1x10x10x32xbf16, #tpu.memory_space<vmem>>, vector<1x8x8x32xbf16>
    %51 = vector.shape_cast %50 : vector<1x8x8x32xbf16> to vector<8x8x32xbf16>
    %52 = vector.shape_cast %51 : vector<8x8x32xbf16> to vector<64x32xbf16>
    %c2_64 = arith.constant 2 : index
    %c1_65 = arith.constant 1 : index
    %c0_66 = arith.constant 0 : index
    %c0_67 = arith.constant 0 : index
    %53 = vector.load %arg3[%c2_64, %c1_65, %c0_66, %c0_67] : memref<3x3x32x32xbf16, #tpu.memory_space<vmem>>, vector<1x1x32x32xbf16>
    %54 = vector.shape_cast %53 : vector<1x1x32x32xbf16> to vector<32x32xbf16>
    %cst_68 = arith.constant dense<0.000000e+00> : vector<64x32xf32>
    %55 = tpu.matmul %52, %54, %cst_68 {dimension_numbers = #tpu.dot_dimension_numbers<[1], [0], [0], [1], [0, 0, 1, 1], [], []>} : vector<64x32xbf16>, vector<32x32xbf16>, vector<64x32xf32> -> vector<64x32xf32>
    %56 = arith.addf %49, %55 : vector<64x32xf32>
    %c0_69 = arith.constant 0 : index
    %c2_70 = arith.constant 2 : index
    %c2_71 = arith.constant 2 : index
    %c0_72 = arith.constant 0 : index
    %57 = vector.load %arg2[%c0_69, %c2_70, %c2_71, %c0_72] : memref<1x10x10x32xbf16, #tpu.memory_space<vmem>>, vector<1x8x8x32xbf16>
    %58 = vector.shape_cast %57 : vector<1x8x8x32xbf16> to vector<8x8x32xbf16>
    %59 = vector.shape_cast %58 : vector<8x8x32xbf16> to vector<64x32xbf16>
    %c2_73 = arith.constant 2 : index
    %c2_74 = arith.constant 2 : index
    %c0_75 = arith.constant 0 : index
    %c0_76 = arith.constant 0 : index
    %60 = vector.load %arg3[%c2_73, %c2_74, %c0_75, %c0_76] : memref<3x3x32x32xbf16, #tpu.memory_space<vmem>>, vector<1x1x32x32xbf16>
    %61 = vector.shape_cast %60 : vector<1x1x32x32xbf16> to vector<32x32xbf16>
    %cst_77 = arith.constant dense<0.000000e+00> : vector<64x32xf32>
    %62 = tpu.matmul %59, %61, %cst_77 {dimension_numbers = #tpu.dot_dimension_numbers<[1], [0], [0], [1], [0, 0, 1, 1], [], []>} : vector<64x32xbf16>, vector<32x32xbf16>, vector<64x32xf32> -> vector<64x32xf32>
    %63 = arith.addf %56, %62 : vector<64x32xf32>
    %c0_78 = arith.constant 0 : index
    %c0_79 = arith.constant 0 : index
    %64 = vector.load %arg4[%c0_78, %c0_79] : memref<1x32xf32, #tpu.memory_space<vmem>>, vector<1x32xf32>
    %65 = vector.broadcast %64 : vector<1x32xf32> to vector<64x32xf32>
    %66 = arith.addf %63, %65 : vector<64x32xf32>
    %cst_80 = arith.constant 0.000000e+00 : f32
    %67 = vector.broadcast %cst_80 : f32 to vector<64x32xf32>
    %68 = arith.maximumf %66, %67 : vector<64x32xf32>
    %69 = vector.shape_cast %68 : vector<64x32xf32> to vector<1x8x8x32xf32>
    %70 = arith.truncf %69 : vector<1x8x8x32xf32> to vector<1x8x8x32xbf16>
    %c0_81 = arith.constant 0 : index
    %c0_82 = arith.constant 0 : index
    %c0_83 = arith.constant 0 : index
    %c0_84 = arith.constant 0 : index
    %71 = vector.load %arg5[%c0_81, %c0_82, %c0_83, %c0_84] : memref<1x8x8x32xbf16, #tpu.memory_space<vmem>>, vector<1x8x8x32xbf16>
    tpu.vector_store %arg5[%c0_81, %c0_82, %c0_83, %c0_84], %70 {strides = array<i32>} : memref<1x8x8x32xbf16, #tpu.memory_space<vmem>>, vector<1x8x8x32xbf16>,
    return
  }
  func.func @transform_0(%arg0: i32, %arg1: i32) -> (i32, i32, i32, i32) {
    %c0_i32 = arith.constant 0 : i32
    %c0_i32_0 = arith.constant 0 : i32
    %c0_i32_1 = arith.constant 0 : i32
    %c0_i32_2 = arith.constant 0 : i32
    return %arg0, %c0_i32, %c0_i32_0, %c0_i32_1 : i32, i32, i32, i32
  }
  func.func @transform_1(%arg0: i32, %arg1: i32) -> (i32, i32, i32, i32) {
    %c0_i32 = arith.constant 0 : i32
    %c0_i32_0 = arith.constant 0 : i32
    %c0_i32_1 = arith.constant 0 : i32
    %c0_i32_2 = arith.constant 0 : i32
    return %c0_i32, %c0_i32_0, %c0_i32_1, %arg1 : i32, i32, i32, i32
  }
  func.func @transform_2(%arg0: i32, %arg1: i32) -> (i32, i32) {
    %c0_i32 = arith.constant 0 : i32
    %c0_i32_0 = arith.constant 0 : i32
    return %c0_i32, %arg1 : i32, i32
  }
  func.func @transform_3(%arg0: i32, %arg1: i32) -> (i32, i32, i32, i32) {
    %c0_i32 = arith.constant 0 : i32
    %c0_i32_0 = arith.constant 0 : i32
    %c0_i32_1 = arith.constant 0 : i32
    return %arg0, %c0_i32, %c0_i32_0, %arg1 : i32, i32, i32, i32
  }
}

module attributes {stable_mosaic.version = 11 : i64} {
  func.func @_mm_kernel(%arg0: i32, %arg1: i32, %arg2: i32, %arg3: memref<128x32xbf16, #tpu.memory_space<vmem>>, %arg4: memref<32x128xbf16, #tpu.memory_space<vmem>>, %arg5: memref<1x128xf32, #tpu.memory_space<vmem>>, %arg6: memref<128x128xbf16, #tpu.memory_space<vmem>>, %arg7: memref<128x128xbf16, #tpu.memory_space<vmem>>, %arg8: memref<128x128xf32, #tpu.memory_space<vmem>>) attributes {dimension_semantics = [#tpu.dimension_semantics<parallel>, #tpu.dimension_semantics<parallel>, #tpu.dimension_semantics<arbitrary>], iteration_bounds = array<i64: 1, 1, 1>, scalar_prefetch = 0 : i64, scratch_operands = 1 : i64, tpu.core_type = #tpu.core_type<tc>, window_params = [{transform_indices = @transform_0, window_bounds = array<i64: 128, 32>}, {transform_indices = @transform_1, window_bounds = array<i64: 32, 128>}, {transform_indices = @transform_2, window_bounds = array<i64: 1, 128>}, {transform_indices = @transform_3, window_bounds = array<i64: 128, 128>}, {transform_indices = @transform_4, window_bounds = array<i64: 128, 128>}]} {
    %c0_i32 = arith.constant 0 : i32
    %0 = arith.cmpi eq, %arg2, %c0_i32 : i32
    %1 = arith.extui %0 : i1 to i32
    %c0_i32_0 = arith.constant 0 : i32
    %2 = arith.cmpi ne, %1, %c0_i32_0 : i32
    scf.if %2 {
      %cst_10 = arith.constant 0.000000e+00 : f32
      %12 = vector.broadcast %cst_10 : f32 to vector<128x128xf32>
      %c0_11 = arith.constant 0 : index
      %c0_12 = arith.constant 0 : index
      %13 = vector.load %arg8[%c0_11, %c0_12] : memref<128x128xf32, #tpu.memory_space<vmem>>, vector<128x128xf32>
      tpu.vector_store %arg8[%c0_11, %c0_12], %12 {strides = array<i32>} : memref<128x128xf32, #tpu.memory_space<vmem>>, vector<128x128xf32>,
    } else {
    }
    %c0 = arith.constant 0 : index
    %c0_1 = arith.constant 0 : index
    %3 = vector.load %arg8[%c0, %c0_1] : memref<128x128xf32, #tpu.memory_space<vmem>>, vector<128x128xf32>
    %c0_2 = arith.constant 0 : index
    %c0_3 = arith.constant 0 : index
    %4 = vector.load %arg3[%c0_2, %c0_3] : memref<128x32xbf16, #tpu.memory_space<vmem>>, vector<128x32xbf16>
    %c0_4 = arith.constant 0 : index
    %c0_5 = arith.constant 0 : index
    %5 = vector.load %arg4[%c0_4, %c0_5] : memref<32x128xbf16, #tpu.memory_space<vmem>>, vector<32x128xbf16>
    %cst = arith.constant dense<0.000000e+00> : vector<128x128xf32>
    %6 = tpu.matmul %4, %5, %cst {dimension_numbers = #tpu.dot_dimension_numbers<[1], [0], [0], [1], [0, 0, 1, 1], [], []>} : vector<128x32xbf16>, vector<32x128xbf16>, vector<128x128xf32> -> vector<128x128xf32>
    %7 = arith.addf %3, %6 : vector<128x128xf32>
    %c0_6 = arith.constant 0 : index
    %c0_7 = arith.constant 0 : index
    %8 = vector.load %arg8[%c0_6, %c0_7] : memref<128x128xf32, #tpu.memory_space<vmem>>, vector<128x128xf32>
    tpu.vector_store %arg8[%c0_6, %c0_7], %7 {strides = array<i32>} : memref<128x128xf32, #tpu.memory_space<vmem>>, vector<128x128xf32>,
    %c0_i32_8 = arith.constant 0 : i32
    %9 = arith.cmpi eq, %arg2, %c0_i32_8 : i32
    %10 = arith.extui %9 : i1 to i32
    %c0_i32_9 = arith.constant 0 : i32
    %11 = arith.cmpi ne, %10, %c0_i32_9 : i32
    scf.if %11 {
      %c0_10 = arith.constant 0 : index
      %c0_11 = arith.constant 0 : index
      %12 = vector.load %arg8[%c0_10, %c0_11] : memref<128x128xf32, #tpu.memory_space<vmem>>, vector<128x128xf32>
      %c0_12 = arith.constant 0 : index
      %c0_13 = arith.constant 0 : index
      %13 = vector.load %arg5[%c0_12, %c0_13] : memref<1x128xf32, #tpu.memory_space<vmem>>, vector<1x128xf32>
      %14 = vector.broadcast %13 : vector<1x128xf32> to vector<128x128xf32>
      %15 = arith.addf %12, %14 : vector<128x128xf32>
      %c0_14 = arith.constant 0 : index
      %c0_15 = arith.constant 0 : index
      %16 = vector.load %arg6[%c0_14, %c0_15] : memref<128x128xbf16, #tpu.memory_space<vmem>>, vector<128x128xbf16>
      %17 = arith.extf %16 : vector<128x128xbf16> to vector<128x128xf32>
      %18 = arith.addf %15, %17 : vector<128x128xf32>
      %cst_16 = arith.constant 0.000000e+00 : f32
      %19 = vector.broadcast %cst_16 : f32 to vector<128x128xf32>
      %20 = arith.maximumf %18, %19 : vector<128x128xf32>
      %21 = arith.truncf %20 : vector<128x128xf32> to vector<128x128xbf16>
      %c0_17 = arith.constant 0 : index
      %c0_18 = arith.constant 0 : index
      %22 = vector.load %arg7[%c0_17, %c0_18] : memref<128x128xbf16, #tpu.memory_space<vmem>>, vector<128x128xbf16>
      tpu.vector_store %arg7[%c0_17, %c0_18], %21 {strides = array<i32>} : memref<128x128xbf16, #tpu.memory_space<vmem>>, vector<128x128xbf16>,
    } else {
    }
    return
  }
  func.func @transform_0(%arg0: i32, %arg1: i32, %arg2: i32) -> (i32, i32) {
    %c0_i32 = arith.constant 0 : i32
    return %arg0, %arg2 : i32, i32
  }
  func.func @transform_1(%arg0: i32, %arg1: i32, %arg2: i32) -> (i32, i32) {
    %c0_i32 = arith.constant 0 : i32
    return %arg2, %arg1 : i32, i32
  }
  func.func @transform_2(%arg0: i32, %arg1: i32, %arg2: i32) -> (i32, i32) {
    %c0_i32 = arith.constant 0 : i32
    %c0_i32_0 = arith.constant 0 : i32
    return %c0_i32, %arg1 : i32, i32
  }
  func.func @transform_3(%arg0: i32, %arg1: i32, %arg2: i32) -> (i32, i32) {
    %c0_i32 = arith.constant 0 : i32
    return %arg0, %arg1 : i32, i32
  }
  func.func @transform_4(%arg0: i32, %arg1: i32, %arg2: i32) -> (i32, i32) {
    %c0_i32 = arith.constant 0 : i32
    return %arg0, %arg1 : i32, i32
  }
}

</mosaic_0001>

<bundles_post_ra>
// kernel: _lambda_.5
= control target key start
LH: loop header
LB: loop body
LE: loop exit
PB: predicated region body
PF: predicated region fallthrough
CT: control target
= control target key end

     0   :  { %s2324_s12 = smov 0   ;;  %s2326_s13 = smov 0   ;;  %s2938_s0 = inlined_call_operand.vmem [shape: bf16[2048,256], index: 0, kind: input, shape index: {}]   ;;  %s2939_s1 = inlined_call_operand.vmem [shape: bf16[256,64], index: 1, kind: input, shape index: {}]   ;;  %s2940_s2 = inlined_call_operand.vmem [shape: f32[1,64], index: 2, kind: input, shape index: {}]   ;;  %s2941_s3 = inlined_call_operand.vmem [shape: bf16[2048,64], index: 3, kind: output, shape index: {}]  }
   0x1   :  { %s2328_s14 = smov 0  }
   0x2 LB: > { %s32_s15 = sadd.s32 1, %s2297_s13  ;;  %p1827_p0 = scmp.ge.s32.totalorder %s2301_s14, 1  ;;  %s2301_s14 = sphi %s2328_s14, %s13_s14   ;;  %s2297_s13 = sphi %s2326_s13, %s2943_s13   ;;  %s2293_s12 = sphi %s2324_s12, %s2942_s12  }
   0x3   : > { %p34_p1 = scmp.ge.s32.totalorder %s32_s15, 4  ;;  %p191_p2 = scmp.lt.s32.totalorder %s2301_s14, 5 }
   0x5   : > { %s2945_s15 = smov (%p34_p1, %s32_s15), 0  ;;  %p192_p3 = pnand %p1827_p0, %p191_p2 }
   0x6   : > { %s1828_s28 = sshll.u32 (!%p192_p3), %s2293_s12, 6 }
   0x7   : > { %195 = sbr.rel (%p192_p3) target bundleno = 445 (0x1bd), region = 32  ;;  %p236_p4 = scmp.lt.s32.totalorder (!%p192_p3), %s1828_s28, 255 }
   0xc   : > { %v2227_v0 = vld [vmem:[%s2939_s1 + $0x38] sm:$0xff]  ;;  %v2226_v2 = vld [vmem:[%s2939_s1 + $0x30] sm:$0xff]  ;;  %v2225_v4 = vld [vmem:[%s2939_s1 + $0x28] sm:$0xff]  ;;  %s2947_s28 = smov (!%p236_p4, %s1828_s28), 255  ;;  %vm271_vm0 = vcmask 523264   ;;  %vm1642_vm1 = vcmask 519168  }
   0xd   : > { %v2235_v1 = vld [vmem:[%s2939_s1 + $0x78] sm:$0xff]  ;;  %912 = vmatpush.bf16.msra.mxu0 %v2227_v0  ;;  %2236 = vmatpush.bf16.msra.mxu2 %v2227_v0  ;;  %v2234_v3 = vld [vmem:[%s2939_s1 + $0x70] sm:$0xff]  ;;  %v2233_v5 = vld [vmem:[%s2939_s1 + $0x68] sm:$0xff]  ;;  %s2155_s17 = sshll.u32 %s2947_s28, 3  ;;  %s1832_s5 = sshll.u32 %s2947_s28, 2 }
   0xe   : > { %1081 = vmatpush.bf16.msra.mxu1 %v2235_v1  ;;  %2244 = vmatpush.bf16.msra.mxu3 %v2235_v1  ;;  %v2224_v6 = vld [vmem:[%s2939_s1 + $0x20] sm:$0xff]  ;;  %v2223_v8 = vld [vmem:[%s2939_s1 + $0x18] sm:$0xff]  ;;  %v2222_v10 = vld [vmem:[%s2939_s1 + $0x10] sm:$0xff]  ;;  %s2390_s22 = scalar_lea.vmem %s2938_s0, %s2155_s17  ;;  %s2586_s7 = scalar_lea.vmem %s2941_s3, %s1832_s5 }
   0xf   : > { %v2232_v7 = vld [vmem:[%s2939_s1 + $0x60] sm:$0xff]  ;;  %v2231_v9 = vld [vmem:[%s2939_s1 + $0x58] sm:$0xff]  ;;  %v2230_v11 = vld [vmem:[%s2939_s1 + $0x50] sm:$0xff] }
  0x10   : > { %v2221_v12 = vld [vmem:[%s2939_s1 + $0x8] sm:$0xff]  ;;  %v2220_v14 = vld [vmem:[%s2939_s1] sm:$0xff]  ;;  %v1843_v28 = vld [vmem:[%s2390_s22 + $0x10] sm:$0xf] }
  0x11   : > { %913 = vmatpush.bf16.msra.mxu0 %v2226_v2  ;;  %2237 = vmatpush.bf16.msra.mxu2 %v2226_v2  ;;  %v2229_v13 = vld [vmem:[%s2939_s1 + $0x48] sm:$0xff]  ;;  %v2228_v15 = vld [vmem:[%s2939_s1 + $0x40] sm:$0xff]  ;;  %v2159_v29 = vld [vmem:[%s2390_s22 + $0x14] sm:$0xf0] }
  0x12   : > { %1082 = vmatpush.bf16.msra.mxu1 %v2234_v3  ;;  %2245 = vmatpush.bf16.msra.mxu3 %v2234_v3  ;;  %v1835_v16 = vld [vmem:[%s2390_s22] sm:$0xf]  ;;  %v2157_v17 = vld [vmem:[%s2390_s22 + $0x4] sm:$0xf0]  ;;  %v2156_v20 = vld [vmem:[%s2390_s22 + $0x4] sm:$0xf]  ;;  %v1844_v36 = vor.u32 %v2159_v29, %v1843_v28 }
  0x13   : > { %v1963_v18 = vld [vmem:[%s2390_s22 + $0x100] sm:$0xf]  ;;  %v2189_v19 = vld [vmem:[%s2390_s22 + $0x104] sm:$0xf0]  ;;  %v1837_v21 = vld [vmem:[%s2390_s22 + $0x8] sm:$0xf0]  ;;  %v1836_v24 = vor.u32 %v2157_v17, %v1835_v16 }
  0x14   : > { %v2188_v22 = vld [vmem:[%s2390_s22 + $0x104] sm:$0xf]  ;;  %v1965_v23 = vld [vmem:[%s2390_s22 + $0x108] sm:$0xf0]  ;;  %v1964_v25 = vor.u32 %v2189_v19, %v1963_v18  ;;  %v1840_v26 = vor.u32 %v2156_v20, %v1837_v21  ;;  %v1971_v30 = vld [vmem:[%s2390_s22 + $0x110] sm:$0xf] }
  0x15   : > { %914 = vmatpush.bf16.msra.mxu0 %v2225_v4  ;;  %2238 = vmatpush.bf16.msra.mxu2 %v2225_v4  ;;  %v1968_v27 = vor.u32 %v2188_v22, %v1965_v23  ;;  %v2191_v31 = vld [vmem:[%s2390_s22 + $0x114] sm:$0xf0]  ;;  %v2158_v32 = vld [vmem:[%s2390_s22 + $0x14] sm:$0xf]  ;;  %v1845_v33 = vld [vmem:[%s2390_s22 + $0x18] sm:$0xf0] }
  0x16   : > { %1083 = vmatpush.bf16.msra.mxu1 %v2233_v5  ;;  %2246 = vmatpush.bf16.msra.mxu3 %v2233_v5  ;;  %v2190_v34 = vld [vmem:[%s2390_s22 + $0x114] sm:$0xf]  ;;  %v1973_v35 = vld [vmem:[%s2390_s22 + $0x118] sm:$0xf0]  ;;  %v1972_v37 = vor.u32 %v2191_v31, %v1971_v30  ;;  %v1848_v38 = vor.u32 %v2158_v32, %v1845_v33  ;;  %v1851_v40 = vld [vmem:[%s2390_s22 + $0x20] sm:$0xf] }
  0x17   : > { %v1976_v39 = vor.u32 %v2190_v34, %v1973_v35  ;;  %v2161_v41 = vld [vmem:[%s2390_s22 + $0x24] sm:$0xf0]  ;;  %v1979_v42 = vld [vmem:[%s2390_s22 + $0x120] sm:$0xf]  ;;  %v2160_v44 = vld [vmem:[%s2390_s22 + $0x24] sm:$0xf] }
  0x18   : > { %v2193_v43 = vld [vmem:[%s2390_s22 + $0x124] sm:$0xf0]  ;;  %v1853_v45 = vld [vmem:[%s2390_s22 + $0x28] sm:$0xf0]  ;;  %v2192_v46 = vld [vmem:[%s2390_s22 + $0x124] sm:$0xf]  ;;  %v1852_v48 = vor.u32 %v2161_v41, %v1851_v40 }
  0x19   : > { %915 = vmatpush.bf16.msra.mxu0 %v2224_v6  ;;  %2239 = vmatpush.bf16.msra.mxu2 %v2224_v6  ;;  %v1981_v47 = vld [vmem:[%s2390_s22 + $0x128] sm:$0xf0]  ;;  %v1980_v49 = vor.u32 %v2193_v43, %v1979_v42  ;;  %v1856_v50 = vor.u32 %v2160_v44, %v1853_v45  ;;  %v1859_v52 = vld [vmem:[%s2390_s22 + $0x30] sm:$0xf]  ;;  %v2163_v53 = vld [vmem:[%s2390_s22 + $0x34] sm:$0xf0] }
  0x1a   : > { %1084 = vmatpush.bf16.msra.mxu1 %v2232_v7  ;;  %2247 = vmatpush.bf16.msra.mxu3 %v2232_v7  ;;  %v1984_v51 = vor.u32 %v2192_v46, %v1981_v47  ;;  %v1987_v54 = vld [vmem:[%s2390_s22 + $0x130] sm:$0xf]  ;;  %v2195_v55 = vld [vmem:[%s2390_s22 + $0x134] sm:$0xf0]  ;;  %v2162_v56 = vld [vmem:[%s2390_s22 + $0x34] sm:$0xf]  ;;  %v1860_v60 = vor.u32 %v2163_v53, %v1859_v52 }
  0x1b   : > { %v1861_v57 = vld [vmem:[%s2390_s22 + $0x38] sm:$0xf0]  ;;  %v2194_v58 = vld [vmem:[%s2390_s22 + $0x134] sm:$0xf]  ;;  %v1988_v61 = vor.u32 %v2195_v55, %v1987_v54  ;;  %v1867_v0 = vld [vmem:[%s2390_s22 + $0x40] sm:$0xf] }
  0x1c   : > { %v1989_v59 = vld [vmem:[%s2390_s22 + $0x138] sm:$0xf0]  ;;  %v1864_v62 = vor.u32 %v2162_v56, %v1861_v57  ;;  %v2165_v1 = vld [vmem:[%s2390_s22 + $0x44] sm:$0xf0]  ;;  %v1995_v2 = vld [vmem:[%s2390_s22 + $0x140] sm:$0xf] }
  0x1d   : > { %916 = vmatpush.bf16.msra.mxu0 %v2223_v8  ;;  %2240 = vmatpush.bf16.msra.mxu2 %v2223_v8  ;;  %v1992_v63 = vor.u32 %v2194_v58, %v1989_v59  ;;  %v2197_v3 = vld [vmem:[%s2390_s22 + $0x144] sm:$0xf0]  ;;  %v2164_v4 = vld [vmem:[%s2390_s22 + $0x44] sm:$0xf]  ;;  %v1869_v5 = vld [vmem:[%s2390_s22 + $0x48] sm:$0xf0]  ;;  %v1868_v8 = vor.u32 %v2165_v1, %v1867_v0 }
  0x1e   : > { %1085 = vmatpush.bf16.msra.mxu1 %v2231_v9  ;;  %2248 = vmatpush.bf16.msra.mxu3 %v2231_v9  ;;  %v2196_v6 = vld [vmem:[%s2390_s22 + $0x144] sm:$0xf]  ;;  %v1997_v7 = vld [vmem:[%s2390_s22 + $0x148] sm:$0xf0]  ;;  %v1996_v9 = vor.u32 %v2197_v3, %v1995_v2  ;;  %v2166_v16 = vld [vmem:[%s2390_s22 + $0x54] sm:$0xf] }
  0x1f   : > { %v1877_v17 = vld [vmem:[%s2390_s22 + $0x58] sm:$0xf0]  ;;  %v2198_v18 = vld [vmem:[%s2390_s22 + $0x154] sm:$0xf]  ;;  %v2168_v28 = vld [vmem:[%s2390_s22 + $0x64] sm:$0xf] }
  0x20   : > { %v2005_v19 = vld [vmem:[%s2390_s22 + $0x158] sm:$0xf0]  ;;  %v1880_v22 = vor.u32 %v2166_v16, %v1877_v17  ;;  %v1885_v29 = vld [vmem:[%s2390_s22 + $0x68] sm:$0xf0]  ;;  %v2200_v30 = vld [vmem:[%s2390_s22 + $0x164] sm:$0xf] }
  0x21   : > { %917 = vmatpush.bf16.msra.mxu0 %v2222_v10  ;;  %2241 = vmatpush.bf16.msra.mxu2 %v2222_v10  ;;  %v1872_v10 = vor.u32 %v2164_v4, %v1869_v5  ;;  %v2008_v23 = vor.u32 %v2198_v18, %v2005_v19  ;;  %v2013_v31 = vld [vmem:[%s2390_s22 + $0x168] sm:$0xf0]  ;;  %v1888_v34 = vor.u32 %v2168_v28, %v1885_v29  ;;  %v2203_v40 = vld [vmem:[%s2390_s22 + $0x174] sm:$0xf0]  ;;  %v2170_v41 = vld [vmem:[%s2390_s22 + $0x74] sm:$0xf] }
  0x22   : > { %1086 = vmatpush.bf16.msra.mxu1 %v2230_v11  ;;  %2249 = vmatpush.bf16.msra.mxu3 %v2230_v11  ;;  %v2000_v11 = vor.u32 %v2196_v6, %v1997_v7  ;;  %v2016_v35 = vor.u32 %v2200_v30, %v2013_v31  ;;  %v1893_v42 = vld [vmem:[%s2390_s22 + $0x78] sm:$0xf0]  ;;  %v2202_v43 = vld [vmem:[%s2390_s22 + $0x174] sm:$0xf]  ;;  %v2205_v52 = vld [vmem:[%s2390_s22 + $0x184] sm:$0xf0] }
  0x23   : > { %v2021_v44 = vld [vmem:[%s2390_s22 + $0x178] sm:$0xf0]  ;;  %v1896_v47 = vor.u32 %v2170_v41, %v1893_v42  ;;  %v2172_v53 = vld [vmem:[%s2390_s22 + $0x84] sm:$0xf]  ;;  %v1901_v54 = vld [vmem:[%s2390_s22 + $0x88] sm:$0xf0] }
  0x24   : > { %v2204_v55 = vld [vmem:[%s2390_s22 + $0x184] sm:$0xf]  ;;  %v2029_v56 = vld [vmem:[%s2390_s22 + $0x188] sm:$0xf0]  ;;  %v2555_v5 = vld [vmem:[%s2940_s2] ss:$0 sm:$0xff] }
  0x25   : > { %918 = vmatpush.bf16.msra.mxu0 %v2221_v12  ;;  %2242 = vmatpush.bf16.msra.mxu2 %v2221_v12  ;;  %v1875_v12 = vld [vmem:[%s2390_s22 + $0x50] sm:$0xf]  ;;  %v1915_v31 = vld [vmem:[%s2390_s22 + $0xa0] sm:$0xf] }
  0x26   : > { %1087 = vmatpush.bf16.msra.mxu1 %v2229_v13  ;;  %2250 = vmatpush.bf16.msra.mxu3 %v2229_v13  ;;  %v2167_v13 = vld [vmem:[%s2390_s22 + $0x54] sm:$0xf0]  ;;  %v1907_v7 = vld [vmem:[%s2390_s22 + $0x90] sm:$0xf] }
  0x27   : > { %v1876_v20 = vor.u32 %v2167_v13, %v1875_v12  ;;  %v1909_v12 = vld [vmem:[%s2390_s22 + $0x98] sm:$0xf0] }
  0x29   : > { %919 = vmatpush.bf16.msra.mxu0 %v2220_v14  ;;  %2243 = vmatpush.bf16.msra.mxu2 %v2220_v14  ;;  %v2003_v14 = vld [vmem:[%s2390_s22 + $0x150] sm:$0xf] }
  0x2a   : > { %1088 = vmatpush.bf16.msra.mxu1 %v2228_v15  ;;  %2251 = vmatpush.bf16.msra.mxu3 %v2228_v15  ;;  %v2199_v15 = vld [vmem:[%s2390_s22 + $0x154] sm:$0xf0] }
  0x2b   : > { %v2004_v21 = vor.u32 %v2199_v15, %v2003_v14  ;;  %v2206_v14 = vld [vmem:[%s2390_s22 + $0x194] sm:$0xf]  ;;  %v2037_v15 = vld [vmem:[%s2390_s22 + $0x198] sm:$0xf0] }
  0x2c   : > { %920 = vmatmul.bf16.vlgmr.msra.gmra.mxu0 %v1836_v24  ;;  %1000 = vmatmul.bf16.vlgmr.msra.gmra.mxu2 %v1964_v25  ;;  %v1883_v24 = vld [vmem:[%s2390_s22 + $0x60] sm:$0xf]  ;;  %v2169_v25 = vld [vmem:[%s2390_s22 + $0x64] sm:$0xf0] }
  0x2d   : > { %1089 = vmatmul.bf16.vlgmr.msra.gmra.mxu1 %v1840_v26  ;;  %1169 = vmatmul.bf16.vlgmr.msra.gmra.mxu3 %v1968_v27  ;;  %v2011_v26 = vld [vmem:[%s2390_s22 + $0x160] sm:$0xf]  ;;  %v2201_v27 = vld [vmem:[%s2390_s22 + $0x164] sm:$0xf0]  ;;  %v1884_v32 = vor.u32 %v2169_v25, %v1883_v24  ;;  %v2040_v24 = vor.u32 %v2206_v14, %v2037_v15 }
  0x2e   : > { %v2012_v33 = vor.u32 %v2201_v27, %v2011_v26 }
  0x3c   : > { %925 = vmatmul.bf16.gmra.mxu0 %v1844_v36  ;;  %1005 = vmatmul.bf16.gmra.mxu2 %v1972_v37  ;;  %v2303_v36 = vmov 0.0   ;;  %v1891_v37 = vld [vmem:[%s2390_s22 + $0x70] sm:$0xf] }
  0x3d   : > { %1094 = vmatmul.bf16.gmra.mxu1 %v1848_v38  ;;  %1174 = vmatmul.bf16.gmra.mxu3 %v1976_v39  ;;  %272 = vst.msk [vmem:[#allocation2] sm:$0xff] %vm271_vm0, %v2303_v36  ;;  %v2171_v38 = vld [vmem:[%s2390_s22 + $0x74] sm:$0xf0]  ;;  %v2019_v39 = vld [vmem:[%s2390_s22 + $0x170] sm:$0xf] }
  0x3e   : > { %273 = vst.msk [vmem:[#allocation2 + $0x8] sm:$0xff] %vm271_vm0, %v2303_v36  ;;  %v1892_v45 = vor.u32 %v2171_v38, %v1891_v37  ;;  %v2020_v46 = vor.u32 %v2203_v40, %v2019_v39  ;;  %v2176_v39 = vld [vmem:[%s2390_s22 + $0xa4] sm:$0xf]  ;;  %v1917_v40 = vld [vmem:[%s2390_s22 + $0xa8] sm:$0xf0] }
  0x3f   : > { %274 = vst.msk [vmem:[#allocation2 + $0x10] sm:$0xff] %vm271_vm0, %v2303_v36 }
  0x40   : > { %275 = vst.msk [vmem:[#allocation2 + $0x18] sm:$0xff] %vm271_vm0, %v2303_v36 }
  0x41   : > { %276 = vst.msk [vmem:[#allocation2 + $0x20] sm:$0xff] %vm271_vm0, %v2303_v36 }
  0x42   : > { %277 = vst.msk [vmem:[#allocation2 + $0x28] sm:$0xff] %vm271_vm0, %v2303_v36 }
  0x43   : > { %278 = vst.msk [vmem:[#allocation2 + $0x30] sm:$0xff] %vm271_vm0, %v2303_v36 }
  0x44   : > { %279 = vst.msk [vmem:[#allocation2 + $0x38] sm:$0xff] %vm271_vm0, %v2303_v36 }
  0x45   : > { %280 = vst.msk [vmem:[#allocation2 + $0x40] sm:$0xff] %vm271_vm0, %v2303_v36  ;;  %v337_v41 = vld [vmem:[#allocation2 + $0x8] sm:$0xff] }
  0x46   : > { %281 = vst.msk [vmem:[#allocation2 + $0x48] sm:$0xff] %vm271_vm0, %v2303_v36 }
  0x47   : > { %282 = vst.msk [vmem:[#allocation2 + $0x50] sm:$0xff] %vm271_vm0, %v2303_v36 }
  0x48   : > { %283 = vst.msk [vmem:[#allocation2 + $0x58] sm:$0xff] %vm271_vm0, %v2303_v36 }
  0x49   : > { %284 = vst.msk [vmem:[#allocation2 + $0x60] sm:$0xff] %vm271_vm0, %v2303_v36 }
  0x4a   : > { %285 = vst.msk [vmem:[#allocation2 + $0x68] sm:$0xff] %vm271_vm0, %v2303_v36 }
  0x4b   : > { %286 = vst.msk [vmem:[#allocation2 + $0x70] sm:$0xff] %vm271_vm0, %v2303_v36 }
  0x4c   : > { %930 = vmatmul.bf16.gmra.mxu0 %v1852_v48  ;;  %1010 = vmatmul.bf16.gmra.mxu2 %v1980_v49  ;;  %v2024_v48 = vor.u32 %v2202_v43, %v2021_v44  ;;  %287 = vst.msk [vmem:[#allocation2 + $0x78] sm:$0xff] %vm271_vm0, %v2303_v36  ;;  %v1899_v49 = vld [vmem:[%s2390_s22 + $0x80] sm:$0xf]  ;;  %v2208_v43 = vld [vmem:[%s2390_s22 + $0x1a4] sm:$0xf] }
  0x4d   : > { %1099 = vmatmul.bf16.gmra.mxu1 %v1856_v50  ;;  %1179 = vmatmul.bf16.gmra.mxu3 %v1984_v51  ;;  %288 = vst.msk [vmem:[#allocation2 + $0x80] sm:$0xff] %vm271_vm0, %v2303_v36  ;;  %v2173_v50 = vld [vmem:[%s2390_s22 + $0x84] sm:$0xf0]  ;;  %v2027_v51 = vld [vmem:[%s2390_s22 + $0x180] sm:$0xf] }
  0x4e   : > { %289 = vst.msk [vmem:[#allocation2 + $0x88] sm:$0xff] %vm271_vm0, %v2303_v36  ;;  %v1900_v57 = vor.u32 %v2173_v50, %v1899_v49  ;;  %v2028_v58 = vor.u32 %v2205_v52, %v2027_v51  ;;  %v2045_v44 = vld [vmem:[%s2390_s22 + $0x1a8] sm:$0xf0]  ;;  %v338_v49 = vld [vmem:[#allocation2 + $0x10] sm:$0xff] }
  0x4f   : > { %290 = vst.msk [vmem:[#allocation2 + $0x90] sm:$0xff] %vm271_vm0, %v2303_v36 }
  0x50   : > { %291 = vst.msk [vmem:[#allocation2 + $0x98] sm:$0xff] %vm271_vm0, %v2303_v36 }
  0x51   : > { %292 = vst.msk [vmem:[#allocation2 + $0xa0] sm:$0xff] %vm271_vm0, %v2303_v36 }
  0x52   : > { %293 = vst.msk [vmem:[#allocation2 + $0xa8] sm:$0xff] %vm271_vm0, %v2303_v36 }
  0x53   : > { %294 = vst.msk [vmem:[#allocation2 + $0xb0] sm:$0xff] %vm271_vm0, %v2303_v36 }
  0x54   : > { %295 = vst.msk [vmem:[#allocation2 + $0xb8] sm:$0xff] %vm271_vm0, %v2303_v36 }
  0x55   : > { %296 = vst.msk [vmem:[#allocation2 + $0xc0] sm:$0xff] %vm271_vm0, %v2303_v36 }
  0x56   : > { %297 = vst.msk [vmem:[#allocation2 + $0xc8] sm:$0xff] %vm271_vm0, %v2303_v36 }
  0x57   : > { %298 = vst.msk [vmem:[#allocation2 + $0xd0] sm:$0xff] %vm271_vm0, %v2303_v36 }
  0x58   : > { %299 = vst.msk [vmem:[#allocation2 + $0xd8] sm:$0xff] %vm271_vm0, %v2303_v36 }
  0x59   : > { %300 = vst.msk [vmem:[#allocation2 + $0xe0] sm:$0xff] %vm271_vm0, %v2303_v36 }
  0x5a   : > { %301 = vst.msk [vmem:[#allocation2 + $0xe8] sm:$0xff] %vm271_vm0, %v2303_v36 }
  0x5b   : > { %302 = vst.msk [vmem:[#allocation2 + $0xf0] sm:$0xff] %vm271_vm0, %v2303_v36 }
  0x5c   : > { %935 = vmatmul.bf16.gmra.mxu0 %v1860_v60  ;;  %1015 = vmatmul.bf16.gmra.mxu2 %v1988_v61  ;;  %303 = vst.msk [vmem:[#allocation2 + $0xf8] sm:$0xff] %vm271_vm0, %v2303_v36  ;;  %v1904_v60 = vor.u32 %v2172_v53, %v1901_v54  ;;  %v2032_v61 = vor.u32 %v2204_v55, %v2029_v56 }
  0x5d   : > { %1104 = vmatmul.bf16.gmra.mxu1 %v1864_v62  ;;  %1184 = vmatmul.bf16.gmra.mxu3 %v1992_v63  ;;  %v336_v62 = vld [vmem:[#allocation2] sm:$0xff]  ;;  %304 = vst.msk [vmem:[#allocation2 + $0x100] sm:$0xff] %vm271_vm0, %v2303_v36 }
  0x5e   : > { %305 = vst.msk [vmem:[#allocation2 + $0x108] sm:$0xff] %vm271_vm0, %v2303_v36 }
  0x5f   : > { %306 = vst.msk [vmem:[#allocation2 + $0x110] sm:$0xff] %vm271_vm0, %v2303_v36 }
  0x60   : > { %307 = vst.msk [vmem:[#allocation2 + $0x118] sm:$0xff] %vm271_vm0, %v2303_v36 }
  0x61   : > { %308 = vst.msk [vmem:[#allocation2 + $0x120] sm:$0xff] %vm271_vm0, %v2303_v36 }
  0x62   : > { %309 = vst.msk [vmem:[#allocation2 + $0x128] sm:$0xff] %vm271_vm0, %v2303_v36 }
  0x63   : > { %310 = vst.msk [vmem:[#allocation2 + $0x130] sm:$0xff] %vm271_vm0, %v2303_v36 }
  0x64   : > { %311 = vst.msk [vmem:[#allocation2 + $0x138] sm:$0xff] %vm271_vm0, %v2303_v36  ;;  %v368_v37 = vld [vmem:[#allocation2 + $0x100] sm:$0xff] }
  0x65   : > { %312 = vst.msk [vmem:[#allocation2 + $0x140] sm:$0xff] %vm271_vm0, %v2303_v36 }
  0x66   : > { %313 = vst.msk [vmem:[#allocation2 + $0x148] sm:$0xff] %vm271_vm0, %v2303_v36  ;;  %v370_v55 = vld [vmem:[#allocation2 + $0x110] sm:$0xff] }
  0x67   : > { %314 = vst.msk [vmem:[#allocation2 + $0x150] sm:$0xff] %vm271_vm0, %v2303_v36 }
  0x68   : > { %315 = vst.msk [vmem:[#allocation2 + $0x158] sm:$0xff] %vm271_vm0, %v2303_v36 }
  0x69   : > { %316 = vst.msk [vmem:[#allocation2 + $0x160] sm:$0xff] %vm271_vm0, %v2303_v36 }
  0x6a   : > { %317 = vst.msk [vmem:[#allocation2 + $0x168] sm:$0xff] %vm271_vm0, %v2303_v36 }
  0x6b   : > { %318 = vst.msk [vmem:[#allocation2 + $0x170] sm:$0xff] %vm271_vm0, %v2303_v36 }
  0x6c   : > { %940 = vmatmul.bf16.gmra.mxu0 %v1868_v8  ;;  %1020 = vmatmul.bf16.gmra.mxu2 %v1996_v9  ;;  %v2175_v8 = vld [vmem:[%s2390_s22 + $0x94] sm:$0xf0]  ;;  %v2035_v9 = vld [vmem:[%s2390_s22 + $0x190] sm:$0xf]  ;;  %319 = vst.msk [vmem:[#allocation2 + $0x178] sm:$0xff] %vm271_vm0, %v2303_v36 }
  0x6d   : > { %1109 = vmatmul.bf16.gmra.mxu1 %v1872_v10  ;;  %1189 = vmatmul.bf16.gmra.mxu3 %v2000_v11  ;;  %v2207_v10 = vld [vmem:[%s2390_s22 + $0x194] sm:$0xf0]  ;;  %v2174_v11 = vld [vmem:[%s2390_s22 + $0x94] sm:$0xf]  ;;  %v1908_v19 = vor.u32 %v2175_v8, %v1907_v7  ;;  %320 = vst.msk [vmem:[#allocation2 + $0x180] sm:$0xff] %vm271_vm0, %v2303_v36 }
  0x6e   : > { %321 = vst.msk [vmem:[#allocation2 + $0x188] sm:$0xff] %vm271_vm0, %v2303_v36 }
  0x6f   : > { %322 = vst.msk [vmem:[#allocation2 + $0x190] sm:$0xff] %vm271_vm0, %v2303_v36 }
  0x70   : > { %323 = vst.msk [vmem:[#allocation2 + $0x198] sm:$0xff] %vm271_vm0, %v2303_v36 }
  0x71   : > { %324 = vst.msk [vmem:[#allocation2 + $0x1a0] sm:$0xff] %vm271_vm0, %v2303_v36 }
  0x72   : > { %325 = vst.msk [vmem:[#allocation2 + $0x1a8] sm:$0xff] %vm271_vm0, %v2303_v36 }
  0x73   : > { %326 = vst.msk [vmem:[#allocation2 + $0x1b0] sm:$0xff] %vm271_vm0, %v2303_v36 }
  0x74   : > { %327 = vst.msk [vmem:[#allocation2 + $0x1b8] sm:$0xff] %vm271_vm0, %v2303_v36 }
  0x75   : > { %328 = vst.msk [vmem:[#allocation2 + $0x1c0] sm:$0xff] %vm271_vm0, %v2303_v36 }
  0x76   : > { %329 = vst.msk [vmem:[#allocation2 + $0x1c8] sm:$0xff] %vm271_vm0, %v2303_v36 }
  0x77   : > { %330 = vst.msk [vmem:[#allocation2 + $0x1d0] sm:$0xff] %vm271_vm0, %v2303_v36 }
  0x78   : > { %331 = vst.msk [vmem:[#allocation2 + $0x1d8] sm:$0xff] %vm271_vm0, %v2303_v36 }
  0x79   : > { %332 = vst.msk [vmem:[#allocation2 + $0x1e0] sm:$0xff] %vm271_vm0, %v2303_v36 }
  0x7a   : > { %333 = vst.msk [vmem:[#allocation2 + $0x1e8] sm:$0xff] %vm271_vm0, %v2303_v36 }
  0x7b   : > { %334 = vst.msk [vmem:[#allocation2 + $0x1f0] sm:$0xff] %vm271_vm0, %v2303_v36 }
  0x7c   : > { %945 = vmatmul.bf16.gmra.mxu0 %v1876_v20  ;;  %1025 = vmatmul.bf16.gmra.mxu2 %v2004_v21  ;;  %v2036_v20 = vor.u32 %v2207_v10, %v2035_v9  ;;  %335 = vst.msk [vmem:[#allocation2 + $0x1f8] sm:$0xff] %vm271_vm0, %v2303_v36  ;;  %v372_v9 = vld [vmem:[#allocation2 + $0x120] sm:$0xff] }
  0x7d   : > { %1114 = vmatmul.bf16.gmra.mxu1 %v1880_v22  ;;  %1194 = vmatmul.bf16.gmra.mxu3 %v2008_v23  ;;  %v1912_v23 = vor.u32 %v2174_v11, %v1909_v12 }
  0x8c   : > { %950 = vmatmul.bf16.gmra.mxu0 %v1884_v32  ;;  %1030 = vmatmul.bf16.gmra.mxu2 %v2012_v33  ;;  %v2177_v32 = vld [vmem:[%s2390_s22 + $0xa4] sm:$0xf0] }
  0x8d   : > { %1119 = vmatmul.bf16.gmra.mxu1 %v1888_v34  ;;  %1199 = vmatmul.bf16.gmra.mxu3 %v2016_v35  ;;  %v2043_v34 = vld [vmem:[%s2390_s22 + $0x1a0] sm:$0xf]  ;;  %v2209_v35 = vld [vmem:[%s2390_s22 + $0x1a4] sm:$0xf0]  ;;  %v1916_v52 = vor.u32 %v2177_v32, %v1915_v31  ;;  %v2210_v32 = vld [vmem:[%s2390_s22 + $0x1b4] sm:$0xf] }
  0x8e   : > { %v2044_v53 = vor.u32 %v2209_v35, %v2043_v34 }
  0x9c   : > { %955 = vmatmul.bf16.gmra.mxu0 %v1892_v45  ;;  %1035 = vmatmul.bf16.gmra.mxu2 %v2020_v46  ;;  %v369_v45 = vld [vmem:[#allocation2 + $0x108] sm:$0xff] }
  0x9d   : > { %1124 = vmatmul.bf16.gmra.mxu1 %v1896_v47  ;;  %1204 = vmatmul.bf16.gmra.mxu3 %v2024_v48 }
  0xa9   : > { %v921_v59 = vpop.f32.mrf.mxu0 }
  0xaa   : > { %v1090_v63 = vpop.f32.mrf.mxu1 }
  0xab   : > { %v1091_v0 = vadd.f32 %v1090_v63, %v921_v59  ;;  %v2048_v59 = vor.u32 %v2208_v43, %v2045_v44 }
  0xac   : > { %960 = vmatmul.bf16.gmra.mxu0 %v1900_v57  ;;  %1040 = vmatmul.bf16.gmra.mxu2 %v2028_v58  ;;  %v1920_v58 = vor.u32 %v2176_v39, %v1917_v40 }
  0xad   : > { %v1250_v1 = vadd.f32 %v1091_v0, %v336_v62  ;;  %1129 = vmatmul.bf16.gmra.mxu1 %v1904_v60  ;;  %1209 = vmatmul.bf16.gmra.mxu3 %v2032_v61  ;;  %v339_v61 = vld [vmem:[#allocation2 + $0x18] sm:$0xff] }
  0xaf   : > { %1315 = vst.msk [vmem:[#allocation2] sm:$0xff] %vm271_vm0, %v1250_v1  ;;  %v1001_v2 = vpop.f32.mrf.mxu2  ;;  %v371_v1 = vld [vmem:[#allocation2 + $0x118] sm:$0xff] }
  0xb0   : > { %v1170_v3 = vpop.f32.mrf.mxu3 }
  0xb1   : > { %v923_v4 = vpop.f32.mrf.mxu0  ;;  %v1171_v33 = vadd.f32 %v1170_v3, %v1001_v2 }
  0xb2   : > { %v1092_v6 = vpop.f32.mrf.mxu1 }
  0xb3   : > { %v1093_v38 = vadd.f32 %v1092_v6, %v923_v4  ;;  %v1282_v48 = vadd.f32 %v1171_v33, %v368_v37  ;;  %v340_v4 = vld [vmem:[#allocation2 + $0x20] sm:$0xff]  ;;  %v2053_v33 = vld [vmem:[%s2390_s22 + $0x1b8] sm:$0xf0] }
  0xb5   : > { %v1251_v54 = vadd.f32 %v1093_v38, %v337_v41  ;;  %1347 = vst.msk [vmem:[#allocation2 + $0x100] sm:$0xff] %vm271_vm0, %v1282_v48 }
  0xb6   : > { %v1382_v13 = vld [vmem:[#allocation2] sm:$0xff] }
  0xb7   : > { %v1450_v16 = vadd.f32 %v2555_v5, %v1382_v13  ;;  %v1003_v17 = vpop.f32.mrf.mxu2  ;;  %1316 = vst.msk [vmem:[#allocation2 + $0x8] sm:$0xff] %vm271_vm0, %v1251_v54  ;;  %v341_v13 = vld [vmem:[#allocation2 + $0x28] sm:$0xff] }
  0xb8   : > { %v1172_v18 = vpop.f32.mrf.mxu3 }
  0xb9   : > { %v1514_v21 = vmax.f32 %v1450_v16, 0.0  ;;  %v926_v22 = vpop.f32.mrf.mxu0  ;;  %v1173_v42 = vadd.f32 %v1172_v18, %v1003_v17  ;;  %v1923_v18 = vld [vmem:[%s2390_s22 + $0xb0] sm:$0xf] }
  0xba   : > { %v1095_v25 = vpop.f32.mrf.mxu1 }
  0xbb   : > { %v1578_v26 = vpack.c.bf16 %v1514_v21, %v1514_v21  ;;  %v1096_v46 = vadd.f32 %v1095_v25, %v926_v22  ;;  %v1283_v60 = vadd.f32 %v1173_v42, %v369_v45  ;;  %v2051_v22 = vld [vmem:[%s2390_s22 + $0x1b0] sm:$0xf] }
  0xbc   : > { %965 = vmatmul.bf16.gmra.mxu0 %v1908_v19  ;;  %1045 = vmatmul.bf16.gmra.mxu2 %v2036_v20  ;;  %v1414_v15 = vld [vmem:[#allocation2 + $0x100] sm:$0xff]  ;;  %v2179_v19 = vld [vmem:[%s2390_s22 + $0xb4] sm:$0xf0] }
  0xbd   : > { %1643 = vst.msk [vmem:[%s2586_s7] sm:$0xf] %vm1642_vm1, %v1578_v26  ;;  %1134 = vmatmul.bf16.gmra.mxu1 %v1912_v23  ;;  %1214 = vmatmul.bf16.gmra.mxu3 %v2040_v24  ;;  %v1252_v0 = vadd.f32 %v1096_v46, %v338_v49  ;;  %v1482_v20 = vadd.f32 %v2555_v5, %v1414_v15  ;;  %v2211_v23 = vld [vmem:[%s2390_s22 + $0x1b4] sm:$0xf0]  ;;  %v374_v15 = vld [vmem:[#allocation2 + $0x130] sm:$0xff] }
  0xbe   : > { %1348 = vst.msk [vmem:[#allocation2 + $0x108] sm:$0xff] %vm271_vm0, %v1283_v60  ;;  %v1383_v21 = vld [vmem:[#allocation2 + $0x8] sm:$0xff]  ;;  %v1924_v39 = vor.u32 %v2179_v19, %v1923_v18  ;;  %v2052_v40 = vor.u32 %v2211_v23, %v2051_v22 }
  0xbf   : > { %v1006_v27 = vpop.f32.mrf.mxu2  ;;  %1317 = vst.msk [vmem:[#allocation2 + $0x10] sm:$0xff] %vm271_vm0, %v1252_v0  ;;  %v1451_v24 = vadd.f32 %v2555_v5, %v1383_v21  ;;  %v343_v21 = vld [vmem:[#allocation2 + $0x38] sm:$0xff] }
  0xc0   : > { %v1175_v28 = vpop.f32.mrf.mxu3 }
  0xc1   : > { %v928_v29 = vpop.f32.mrf.mxu0  ;;  %v1176_v50 = vadd.f32 %v1175_v28, %v1006_v27  ;;  %v2178_v27 = vld [vmem:[%s2390_s22 + $0xb4] sm:$0xf]  ;;  %v1925_v28 = vld [vmem:[%s2390_s22 + $0xb8] sm:$0xf0]  ;;  %v1515_v34 = vmax.f32 %v1451_v24, 0.0 }
  0xc2   : > { %v1097_v30 = vpop.f32.mrf.mxu1  ;;  %v1928_v46 = vor.u32 %v2178_v27, %v1925_v28  ;;  %v2181_v27 = vld [vmem:[%s2390_s22 + $0xc4] sm:$0xf0]  ;;  %v2059_v28 = vld [vmem:[%s2390_s22 + $0x1c0] sm:$0xf] }
  0xc3   : > { %v1098_v56 = vadd.f32 %v1097_v30, %v928_v29  ;;  %v1284_v3 = vadd.f32 %v1176_v50, %v370_v55  ;;  %v1546_v29 = vmax.f32 %v1482_v20, 0.0 }
  0xc5   : > { %v1253_v6 = vadd.f32 %v1098_v56, %v339_v61  ;;  %1349 = vst.msk [vmem:[#allocation2 + $0x110] sm:$0xff] %vm271_vm0, %v1284_v3  ;;  %v1415_v25 = vld [vmem:[#allocation2 + $0x108] sm:$0xff]  ;;  %v1610_v41 = vpack.c.bf16 %v1546_v29, %v1546_v29 }
  0xc6   : > { %v1483_v30 = vadd.f32 %v2555_v5, %v1415_v25  ;;  %v1384_v31 = vld [vmem:[#allocation2 + $0x10] sm:$0xff]  ;;  %v2213_v29 = vld [vmem:[%s2390_s22 + $0x1c4] sm:$0xf0] }
  0xc7   : > { %v1008_v47 = vpop.f32.mrf.mxu2  ;;  %1318 = vst.msk [vmem:[#allocation2 + $0x18] sm:$0xff] %vm271_vm0, %v1253_v6  ;;  %v1452_v35 = vadd.f32 %v2555_v5, %v1384_v31  ;;  %v2180_v31 = vld [vmem:[%s2390_s22 + $0xc4] sm:$0xf] }
  0xc8   : > { %v1177_v51 = vpop.f32.mrf.mxu3  ;;  %v1547_v42 = vmax.f32 %v1483_v30, 0.0  ;;  %1675 = vst.msk [vmem:[%s2586_s7 + $0x80] sm:$0xf] %vm1642_vm1, %v1610_v41 }
  0xc9   : > { %v931_v57 = vpop.f32.mrf.mxu0  ;;  %v1178_v62 = vadd.f32 %v1177_v51, %v1008_v47  ;;  %v1579_v47 = vpack.c.bf16 %v1515_v34, %v1515_v34  ;;  %v1516_v48 = vmax.f32 %v1452_v35, 0.0  ;;  %v2061_v34 = vld [vmem:[%s2390_s22 + $0x1c8] sm:$0xf0] }
  0xca   : > { %v1100_v63 = vpop.f32.mrf.mxu1 }
  0xcb   : > { %v1101_v2 = vadd.f32 %v1100_v63, %v931_v57  ;;  %v1285_v7 = vadd.f32 %v1178_v62, %v371_v1  ;;  %1644 = vst.msk [vmem:[%s2586_s7 + $0x4] sm:$0xf] %vm1642_vm1, %v1579_v47  ;;  %v373_v62 = vld [vmem:[#allocation2 + $0x128] sm:$0xff]  ;;  %v344_v47 = vld [vmem:[#allocation2 + $0x40] sm:$0xff] }
  0xcc   : > { %970 = vmatmul.bf16.gmra.mxu0 %v1916_v52  ;;  %1050 = vmatmul.bf16.gmra.mxu2 %v2044_v53  ;;  %v1416_v37 = vld [vmem:[#allocation2 + $0x110] sm:$0xff]  ;;  %v2056_v52 = vor.u32 %v2210_v32, %v2053_v33  ;;  %v1611_v53 = vpack.c.bf16 %v1547_v42, %v1547_v42  ;;  %v1933_v32 = vld [vmem:[%s2390_s22 + $0xc8] sm:$0xf0]  ;;  %v2212_v33 = vld [vmem:[%s2390_s22 + $0x1c4] sm:$0xf] }
  0xcd   : > { %1139 = vmatmul.bf16.gmra.mxu1 %v1920_v58  ;;  %1219 = vmatmul.bf16.gmra.mxu3 %v2048_v59  ;;  %v1254_v36 = vadd.f32 %v1101_v2, %v340_v4  ;;  %1350 = vst.msk [vmem:[#allocation2 + $0x118] sm:$0xff] %vm271_vm0, %v1285_v7  ;;  %v1484_v43 = vadd.f32 %v2555_v5, %v1416_v37  ;;  %v342_v7 = vld [vmem:[#allocation2 + $0x30] sm:$0xff]  ;;  %v375_v37 = vld [vmem:[#allocation2 + $0x138] sm:$0xff] }
  0xce   : > { %v1385_v44 = vld [vmem:[#allocation2 + $0x18] sm:$0xff]  ;;  %v1580_v59 = vpack.c.bf16 %v1516_v48, %v1516_v48  ;;  %1676 = vst.msk [vmem:[%s2586_s7 + $0x84] sm:$0xf] %vm1642_vm1, %v1611_v53 }
  0xcf   : > { %v1011_v8 = vpop.f32.mrf.mxu2  ;;  %1319 = vst.msk [vmem:[#allocation2 + $0x20] sm:$0xff] %vm271_vm0, %v1254_v36  ;;  %v1453_v49 = vadd.f32 %v2555_v5, %v1385_v44  ;;  %v1548_v54 = vmax.f32 %v1484_v43, 0.0  ;;  %v1936_v44 = vor.u32 %v2180_v31, %v1933_v32 }
  0xd0   : > { %v1180_v10 = vpop.f32.mrf.mxu3  ;;  %1645 = vst.msk [vmem:[%s2586_s7 + $0x8] sm:$0xf] %vm1642_vm1, %v1580_v59 }
  0xd1   : > { %v1181_v11 = vadd.f32 %v1180_v10, %v1011_v8  ;;  %v933_v12 = vpop.f32.mrf.mxu0  ;;  %v1517_v60 = vmax.f32 %v1453_v49, 0.0  ;;  %v1612_v63 = vpack.c.bf16 %v1548_v54, %v1548_v54 }
  0xd2   : > { %v1102_v14 = vpop.f32.mrf.mxu1 }
  0xd3   : > { %v1286_v16 = vadd.f32 %v1181_v11, %v372_v9  ;;  %v1103_v17 = vadd.f32 %v1102_v14, %v933_v12  ;;  %v1581_v3 = vpack.c.bf16 %v1517_v60, %v1517_v60  ;;  %1677 = vst.msk [vmem:[%s2586_s7 + $0x88] sm:$0xf] %vm1642_vm1, %v1612_v63 }
  0xd4   : > { %v1417_v50 = vld [vmem:[#allocation2 + $0x118] sm:$0xff] }
  0xd5   : > { %1351 = vst.msk [vmem:[#allocation2 + $0x120] sm:$0xff] %vm271_vm0, %v1286_v16  ;;  %v1255_v26 = vadd.f32 %v1103_v17, %v341_v13  ;;  %v1485_v55 = vadd.f32 %v2555_v5, %v1417_v50 }
  0xd6   : > { %v1386_v56 = vld [vmem:[#allocation2 + $0x20] sm:$0xff]  ;;  %1646 = vst.msk [vmem:[%s2586_s7 + $0xc] sm:$0xf] %vm1642_vm1, %v1581_v3 }
  0xd7   : > { %1320 = vst.msk [vmem:[#allocation2 + $0x28] sm:$0xff] %vm271_vm0, %v1255_v26  ;;  %v1013_v38 = vpop.f32.mrf.mxu2  ;;  %v1454_v61 = vadd.f32 %v2555_v5, %v1386_v56  ;;  %v1549_v0 = vmax.f32 %v1485_v55, 0.0  ;;  %v1931_v26 = vld [vmem:[%s2390_s22 + $0xc0] sm:$0xf] }
  0xd8   : > { %v1182_v45 = vpop.f32.mrf.mxu3 }
  0xd9   : > { %v936_v51 = vpop.f32.mrf.mxu0  ;;  %v1183_v57 = vadd.f32 %v1182_v45, %v1013_v38  ;;  %v1518_v4 = vmax.f32 %v1454_v61, 0.0  ;;  %v1613_v36 = vpack.c.bf16 %v1549_v0, %v1549_v0  ;;  %v2064_v45 = vor.u32 %v2212_v33, %v2061_v34  ;;  %v376_v0 = vld [vmem:[#allocation2 + $0x140] sm:$0xff] }
  0xda   : > { %v1105_v58 = vpop.f32.mrf.mxu1 }
  0xdb   : > { %v1106_v2 = vadd.f32 %v1105_v58, %v936_v51  ;;  %v1287_v9 = vadd.f32 %v1183_v57, %v373_v62  ;;  %v1582_v10 = vpack.c.bf16 %v1518_v4, %v1518_v4  ;;  %1678 = vst.msk [vmem:[%s2586_s7 + $0x8c] sm:$0xf] %vm1642_vm1, %v1613_v36 }
  0xdc   : > { %v1418_v1 = vld [vmem:[#allocation2 + $0x120] sm:$0xff]  ;;  %975 = vmatmul.bf16.gmra.mxu0 %v1924_v39  ;;  %1055 = vmatmul.bf16.gmra.mxu2 %v2052_v40  ;;  %v1932_v39 = vor.u32 %v2181_v27, %v1931_v26  ;;  %v2060_v40 = vor.u32 %v2213_v29, %v2059_v28  ;;  %v377_v26 = vld [vmem:[#allocation2 + $0x148] sm:$0xff] }
  0xdd   : > { %v1486_v6 = vadd.f32 %v2555_v5, %v1418_v1  ;;  %1144 = vmatmul.bf16.gmra.mxu1 %v1928_v46  ;;  %1224 = vmatmul.bf16.gmra.mxu3 %v2056_v52  ;;  %v1256_v14 = vadd.f32 %v1106_v2, %v342_v7  ;;  %1647 = vst.msk [vmem:[%s2586_s7 + $0x10] sm:$0xf] %vm1642_vm1, %v1582_v10  ;;  %v345_v7 = vld [vmem:[#allocation2 + $0x48] sm:$0xff] }
  0xde   : > { %v1387_v8 = vld [vmem:[#allocation2 + $0x28] sm:$0xff]  ;;  %1352 = vst.msk [vmem:[#allocation2 + $0x128] sm:$0xff] %vm271_vm0, %v1287_v9 }
  0xdf   : > { %v1550_v11 = vmax.f32 %v1486_v6, 0.0  ;;  %v1455_v12 = vadd.f32 %v2555_v5, %v1387_v8  ;;  %v1016_v13 = vpop.f32.mrf.mxu2  ;;  %1321 = vst.msk [vmem:[#allocation2 + $0x30] sm:$0xff] %vm271_vm0, %v1256_v14 }
  0xe0   : > { %v1185_v16 = vpop.f32.mrf.mxu3 }
  0xe1   : > { %v1614_v17 = vpack.c.bf16 %v1550_v11, %v1550_v11  ;;  %v1519_v18 = vmax.f32 %v1455_v12, 0.0  ;;  %v1186_v19 = vadd.f32 %v1185_v16, %v1016_v13  ;;  %v938_v20 = vpop.f32.mrf.mxu0  ;;  %v1939_v11 = vld [vmem:[%s2390_s22 + $0xd0] sm:$0xf]  ;;  %v2183_v12 = vld [vmem:[%s2390_s22 + $0xd4] sm:$0xf0] }
  0xe2   : > { %v1107_v22 = vpop.f32.mrf.mxu1  ;;  %v2067_v13 = vld [vmem:[%s2390_s22 + $0x1d0] sm:$0xf]  ;;  %v1940_v28 = vor.u32 %v2183_v12, %v1939_v11  ;;  %v379_v11 = vld [vmem:[#allocation2 + $0x158] sm:$0xff] }
  0xe3   : > { %1679 = vst.msk [vmem:[%s2586_s7 + $0x90] sm:$0xf] %vm1642_vm1, %v1614_v17  ;;  %v1583_v23 = vpack.c.bf16 %v1519_v18, %v1519_v18  ;;  %v1288_v24 = vadd.f32 %v1186_v19, %v374_v15  ;;  %v1108_v25 = vadd.f32 %v1107_v22, %v938_v20  ;;  %v2215_v15 = vld [vmem:[%s2390_s22 + $0x1d4] sm:$0xf0]  ;;  %v2182_v18 = vld [vmem:[%s2390_s22 + $0xd4] sm:$0xf] }
  0xe4   : > { %v1941_v19 = vld [vmem:[%s2390_s22 + $0xd8] sm:$0xf0]  ;;  %v2068_v29 = vor.u32 %v2215_v15, %v2067_v13 }
  0xe5   : > { %1648 = vst.msk [vmem:[%s2586_s7 + $0x14] sm:$0xf] %vm1642_vm1, %v1583_v23  ;;  %v1257_v30 = vadd.f32 %v1108_v25, %v343_v21  ;;  %v1419_v41 = vld [vmem:[#allocation2 + $0x128] sm:$0xff]  ;;  %v2214_v21 = vld [vmem:[%s2390_s22 + $0x1d4] sm:$0xf] }
  0xe6   : > { %1353 = vst.msk [vmem:[#allocation2 + $0x130] sm:$0xff] %vm271_vm0, %v1288_v24  ;;  %v1487_v46 = vadd.f32 %v2555_v5, %v1419_v41  ;;  %v1388_v49 = vld [vmem:[#allocation2 + $0x30] sm:$0xff]  ;;  %v2069_v22 = vld [vmem:[%s2390_s22 + $0x1d8] sm:$0xf0] }
  0xe7   : > { %1322 = vst.msk [vmem:[#allocation2 + $0x38] sm:$0xff] %vm271_vm0, %v1257_v30  ;;  %v1018_v35 = vpop.f32.mrf.mxu2  ;;  %v1456_v53 = vadd.f32 %v2555_v5, %v1388_v49  ;;  %v1944_v30 = vor.u32 %v2182_v18, %v1941_v19  ;;  %v378_v49 = vld [vmem:[#allocation2 + $0x150] sm:$0xff] }
  0xe8   : > { %v1187_v38 = vpop.f32.mrf.mxu3  ;;  %v1551_v52 = vmax.f32 %v1487_v46, 0.0 }
  0xe9   : > { %v1188_v42 = vadd.f32 %v1187_v38, %v1018_v35  ;;  %v941_v43 = vpop.f32.mrf.mxu0  ;;  %v1520_v57 = vmax.f32 %v1456_v53, 0.0  ;;  %v2072_v35 = vor.u32 %v2214_v21, %v2069_v22  ;;  %v348_v21 = vld [vmem:[#allocation2 + $0x60] sm:$0xff] }
  0xea   : > { %v1110_v48 = vpop.f32.mrf.mxu1  ;;  %v1615_v56 = vpack.c.bf16 %v1551_v52, %v1551_v52 }
  0xeb   : > { %v1289_v50 = vadd.f32 %v1188_v42, %v375_v37  ;;  %v1111_v51 = vadd.f32 %v1110_v48, %v941_v43  ;;  %v1584_v62 = vpack.c.bf16 %v1520_v57, %v1520_v57  ;;  %v346_v37 = vld [vmem:[#allocation2 + $0x50] sm:$0xff] }
  0xec   : > { %980 = vmatmul.bf16.gmra.mxu0 %v1932_v39  ;;  %1060 = vmatmul.bf16.gmra.mxu2 %v2060_v40  ;;  %1680 = vst.msk [vmem:[%s2586_s7 + $0x94] sm:$0xf] %vm1642_vm1, %v1615_v56 }
  0xed   : > { %v1420_v54 = vld [vmem:[#allocation2 + $0x130] sm:$0xff]  ;;  %1354 = vst.msk [vmem:[#allocation2 + $0x138] sm:$0xff] %vm271_vm0, %v1289_v50  ;;  %v1258_v55 = vadd.f32 %v1111_v51, %v344_v47  ;;  %1149 = vmatmul.bf16.gmra.mxu1 %v1936_v44  ;;  %1229 = vmatmul.bf16.gmra.mxu3 %v2064_v45 }
  0xee   : > { %v1488_v58 = vadd.f32 %v2555_v5, %v1420_v54  ;;  %v1389_v59 = vld [vmem:[#allocation2 + $0x38] sm:$0xff]  ;;  %1649 = vst.msk [vmem:[%s2586_s7 + $0x18] sm:$0xf] %vm1642_vm1, %v1584_v62  ;;  %v2075_v62 = vld [vmem:[%s2390_s22 + $0x1e0] sm:$0xf] }
  0xef   : > { %v1457_v60 = vadd.f32 %v2555_v5, %v1389_v59  ;;  %1323 = vst.msk [vmem:[#allocation2 + $0x40] sm:$0xff] %vm271_vm0, %v1258_v55  ;;  %v1021_v61 = vpop.f32.mrf.mxu2  ;;  %v347_v55 = vld [vmem:[#allocation2 + $0x58] sm:$0xff] }
  0xf0   : > { %v1552_v63 = vmax.f32 %v1488_v58, 0.0  ;;  %v1190_v1 = vpop.f32.mrf.mxu3 }
  0xf1   : > { %v1521_v2 = vmax.f32 %v1457_v60, 0.0  ;;  %v1191_v3 = vadd.f32 %v1190_v1, %v1021_v61  ;;  %v943_v4 = vpop.f32.mrf.mxu0  ;;  %v1947_v60 = vld [vmem:[%s2390_s22 + $0xe0] sm:$0xf]  ;;  %v2185_v61 = vld [vmem:[%s2390_s22 + $0xe4] sm:$0xf0] }
  0xf2   : > { %v1616_v6 = vpack.c.bf16 %v1552_v63, %v1552_v63  ;;  %v1112_v36 = vpop.f32.mrf.mxu1  ;;  %v2217_v63 = vld [vmem:[%s2390_s22 + $0x1e4] sm:$0xf0]  ;;  %v1948_v13 = vor.u32 %v2185_v61, %v1947_v60 }
  0xf3   : > { %v1585_v8 = vpack.c.bf16 %v1521_v2, %v1521_v2  ;;  %v1290_v9 = vadd.f32 %v1191_v3, %v376_v0  ;;  %v1113_v10 = vadd.f32 %v1112_v36, %v943_v4  ;;  %v2184_v0 = vld [vmem:[%s2390_s22 + $0xe4] sm:$0xf]  ;;  %v1949_v3 = vld [vmem:[%s2390_s22 + $0xe8] sm:$0xf0] }
  0xf4   : > { %1681 = vst.msk [vmem:[%s2586_s7 + $0x98] sm:$0xf] %vm1642_vm1, %v1616_v6  ;;  %v1421_v14 = vld [vmem:[#allocation2 + $0x138] sm:$0xff]  ;;  %v2077_v36 = vld [vmem:[%s2390_s22 + $0x1e8] sm:$0xf0]  ;;  %v1952_v18 = vor.u32 %v2184_v0, %v1949_v3 }
  0xf5   : > { %1650 = vst.msk [vmem:[%s2586_s7 + $0x1c] sm:$0xf] %vm1642_vm1, %v1585_v8  ;;  %v1489_v16 = vadd.f32 %v2555_v5, %v1421_v14  ;;  %v1259_v17 = vadd.f32 %v1113_v10, %v345_v7  ;;  %v2216_v7 = vld [vmem:[%s2390_s22 + $0x1e4] sm:$0xf]  ;;  %v2076_v14 = vor.u32 %v2217_v63, %v2075_v62  ;;  %v381_v60 = vld [vmem:[#allocation2 + $0x168] sm:$0xff] }
  0xf6   : > { %v1390_v20 = vld [vmem:[#allocation2 + $0x40] sm:$0xff]  ;;  %1355 = vst.msk [vmem:[#allocation2 + $0x140] sm:$0xff] %vm271_vm0, %v1290_v9  ;;  %v2080_v19 = vor.u32 %v2216_v7, %v2077_v36  ;;  %v350_v7 = vld [vmem:[#allocation2 + $0x70] sm:$0xff] }
  0xf7   : > { %v1553_v23 = vmax.f32 %v1489_v16, 0.0  ;;  %v1458_v24 = vadd.f32 %v2555_v5, %v1390_v20  ;;  %1324 = vst.msk [vmem:[#allocation2 + $0x48] sm:$0xff] %vm271_vm0, %v1259_v17  ;;  %v1023_v25 = vpop.f32.mrf.mxu2 }
  0xf8   : > { %v1192_v27 = vpop.f32.mrf.mxu3 }
  0xf9   : > { %v1617_v31 = vpack.c.bf16 %v1553_v23, %v1553_v23  ;;  %v1522_v32 = vmax.f32 %v1458_v24, 0.0  ;;  %v1193_v33 = vadd.f32 %v1192_v27, %v1023_v25  ;;  %v946_v34 = vpop.f32.mrf.mxu0 }
  0xfa   : > { %v1115_v38 = vpop.f32.mrf.mxu1 }
  0xfb   : > { %1682 = vst.msk [vmem:[%s2586_s7 + $0x9c] sm:$0xf] %vm1642_vm1, %v1617_v31  ;;  %v1586_v39 = vpack.c.bf16 %v1522_v32, %v1522_v32  ;;  %v1291_v40 = vadd.f32 %v1193_v33, %v377_v26  ;;  %v1116_v41 = vadd.f32 %v1115_v38, %v946_v34  ;;  %v380_v33 = vld [vmem:[#allocation2 + $0x160] sm:$0xff] }
  0xfc   : > { %985 = vmatmul.bf16.gmra.mxu0 %v1940_v28  ;;  %1065 = vmatmul.bf16.gmra.mxu2 %v2068_v29 }
  0xfd   : > { %1651 = vst.msk [vmem:[%s2586_s7 + $0x20] sm:$0xf] %vm1642_vm1, %v1586_v39  ;;  %v1422_v42 = vld [vmem:[#allocation2 + $0x140] sm:$0xff]  ;;  %v1260_v43 = vadd.f32 %v1116_v41, %v346_v37  ;;  %1154 = vmatmul.bf16.gmra.mxu1 %v1944_v30  ;;  %1234 = vmatmul.bf16.gmra.mxu3 %v2072_v35 }
  0xfe   : > { %v1490_v44 = vadd.f32 %v2555_v5, %v1422_v42  ;;  %v1391_v45 = vld [vmem:[#allocation2 + $0x48] sm:$0xff]  ;;  %1356 = vst.msk [vmem:[#allocation2 + $0x148] sm:$0xff] %vm271_vm0, %v1291_v40 }
  0xff   : > { %v1459_v46 = vadd.f32 %v2555_v5, %v1391_v45  ;;  %1325 = vst.msk [vmem:[#allocation2 + $0x50] sm:$0xff] %vm271_vm0, %v1260_v43  ;;  %v1026_v47 = vpop.f32.mrf.mxu2  ;;  %v349_v40 = vld [vmem:[#allocation2 + $0x68] sm:$0xff]  ;;  %v1955_v45 = vld [vmem:[%s2390_s22 + $0xf0] sm:$0xf] }
 0x100   : > { %v1554_v48 = vmax.f32 %v1490_v44, 0.0  ;;  %v1195_v50 = vpop.f32.mrf.mxu3 }
 0x101   : > { %v1523_v51 = vmax.f32 %v1459_v46, 0.0  ;;  %v1196_v52 = vadd.f32 %v1195_v50, %v1026_v47  ;;  %v948_v53 = vpop.f32.mrf.mxu0  ;;  %v2187_v46 = vld [vmem:[%s2390_s22 + $0xf4] sm:$0xf0]  ;;  %v2083_v47 = vld [vmem:[%s2390_s22 + $0x1f0] sm:$0xf] }
 0x102   : > { %v1618_v54 = vpack.c.bf16 %v1554_v48, %v1554_v48  ;;  %v1117_v56 = vpop.f32.mrf.mxu1  ;;  %v2219_v48 = vld [vmem:[%s2390_s22 + $0x1f4] sm:$0xf0]  ;;  %v1956_v62 = vor.u32 %v2187_v46, %v1955_v45 }
 0x103   : > { %v1587_v57 = vpack.c.bf16 %v1523_v51, %v1523_v51  ;;  %v1292_v58 = vadd.f32 %v1196_v52, %v378_v49  ;;  %v1118_v59 = vadd.f32 %v1117_v56, %v948_v53  ;;  %v2186_v49 = vld [vmem:[%s2390_s22 + $0xf4] sm:$0xf]  ;;  %v1957_v52 = vld [vmem:[%s2390_s22 + $0xf8] sm:$0xf0]  ;;  %v2084_v63 = vor.u32 %v2219_v48, %v2083_v47 }
 0x104   : > { %1683 = vst.msk [vmem:[%s2586_s7 + $0xa0] sm:$0xf] %vm1642_vm1, %v1618_v54  ;;  %v2085_v56 = vld [vmem:[%s2390_s22 + $0x1f8] sm:$0xf0]  ;;  %v1960_v3 = vor.u32 %v2186_v49, %v1957_v52 }
 0x105   : > { %1652 = vst.msk [vmem:[%s2586_s7 + $0x24] sm:$0xf] %vm1642_vm1, %v1587_v57  ;;  %v1423_v1 = vld [vmem:[#allocation2 + $0x148] sm:$0xff]  ;;  %v1261_v2 = vadd.f32 %v1118_v59, %v347_v55  ;;  %v2218_v55 = vld [vmem:[%s2390_s22 + $0x1f4] sm:$0xf] }
 0x106   : > { %v1491_v4 = vadd.f32 %v2555_v5, %v1423_v1  ;;  %v1392_v6 = vld [vmem:[#allocation2 + $0x50] sm:$0xff]  ;;  %1357 = vst.msk [vmem:[#allocation2 + $0x150] sm:$0xff] %vm271_vm0, %v1292_v58 }
 0x107   : > { %v1460_v8 = vadd.f32 %v2555_v5, %v1392_v6  ;;  %1326 = vst.msk [vmem:[#allocation2 + $0x58] sm:$0xff] %vm271_vm0, %v1261_v2  ;;  %v1028_v9 = vpop.f32.mrf.mxu2 }
 0x108   : > { %v1555_v10 = vmax.f32 %v1491_v4, 0.0  ;;  %v1197_v12 = vpop.f32.mrf.mxu3  ;;  %v2088_v4 = vor.u32 %v2218_v55, %v2085_v56  ;;  %v384_v55 = vld [vmem:[#allocation2 + $0x180] sm:$0xff] }
 0x109   : > { %v1524_v15 = vmax.f32 %v1460_v8, 0.0  ;;  %v1198_v16 = vadd.f32 %v1197_v12, %v1028_v9  ;;  %v951_v17 = vpop.f32.mrf.mxu0 }
 0x10a   : > { %v1619_v20 = vpack.c.bf16 %v1555_v10, %v1555_v10  ;;  %v1120_v22 = vpop.f32.mrf.mxu1 }
 0x10b   : > { %v1588_v23 = vpack.c.bf16 %v1524_v15, %v1524_v15  ;;  %v1293_v24 = vadd.f32 %v1198_v16, %v379_v11  ;;  %v1121_v25 = vadd.f32 %v1120_v22, %v951_v17 }
 0x10c   : > { %1684 = vst.msk [vmem:[%s2586_s7 + $0xa4] sm:$0xf] %vm1642_vm1, %v1619_v20  ;;  %990 = vmatmul.bf16.gmra.mxu0 %v1948_v13  ;;  %1070 = vmatmul.bf16.gmra.mxu2 %v2076_v14 }
 0x10d   : > { %1653 = vst.msk [vmem:[%s2586_s7 + $0x28] sm:$0xf] %vm1642_vm1, %v1588_v23  ;;  %v1424_v26 = vld [vmem:[#allocation2 + $0x150] sm:$0xff]  ;;  %v1262_v27 = vadd.f32 %v1121_v25, %v348_v21  ;;  %1159 = vmatmul.bf16.gmra.mxu1 %v1952_v18  ;;  %1239 = vmatmul.bf16.gmra.mxu3 %v2080_v19 }
 0x10e   : > { %v1492_v28 = vadd.f32 %v2555_v5, %v1424_v26  ;;  %v1393_v29 = vld [vmem:[#allocation2 + $0x58] sm:$0xff]  ;;  %1358 = vst.msk [vmem:[#allocation2 + $0x158] sm:$0xff] %vm271_vm0, %v1293_v24  ;;  %v382_v18 = vld [vmem:[#allocation2 + $0x170] sm:$0xff] }
 0x10f   : > { %v1461_v30 = vadd.f32 %v2555_v5, %v1393_v29  ;;  %1327 = vst.msk [vmem:[#allocation2 + $0x60] sm:$0xff] %vm271_vm0, %v1262_v27  ;;  %v1031_v31 = vpop.f32.mrf.mxu2  ;;  %v351_v24 = vld [vmem:[#allocation2 + $0x78] sm:$0xff] }
 0x110   : > { %v1556_v32 = vmax.f32 %v1492_v28, 0.0  ;;  %v1200_v34 = vpop.f32.mrf.mxu3 }
 0x111   : > { %v1525_v35 = vmax.f32 %v1461_v30, 0.0  ;;  %v1201_v37 = vadd.f32 %v1200_v34, %v1031_v31  ;;  %v953_v38 = vpop.f32.mrf.mxu0 }
 0x112   : > { %v1620_v39 = vpack.c.bf16 %v1556_v32, %v1556_v32  ;;  %v1122_v41 = vpop.f32.mrf.mxu1 }
 0x113   : > { %v1589_v42 = vpack.c.bf16 %v1525_v35, %v1525_v35  ;;  %v1294_v43 = vadd.f32 %v1201_v37, %v380_v33  ;;  %v1123_v44 = vadd.f32 %v1122_v41, %v953_v38  ;;  %v383_v37 = vld [vmem:[#allocation2 + $0x178] sm:$0xff] }
 0x114   : > { %1685 = vst.msk [vmem:[%s2586_s7 + $0xa8] sm:$0xf] %vm1642_vm1, %v1620_v39 }
 0x115   : > { %1654 = vst.msk [vmem:[%s2586_s7 + $0x2c] sm:$0xf] %vm1642_vm1, %v1589_v42  ;;  %v1425_v50 = vld [vmem:[#allocation2 + $0x158] sm:$0xff]  ;;  %v1263_v51 = vadd.f32 %v1123_v44, %v349_v40 }
 0x116   : > { %v1493_v53 = vadd.f32 %v2555_v5, %v1425_v50  ;;  %v1394_v54 = vld [vmem:[#allocation2 + $0x60] sm:$0xff]  ;;  %1359 = vst.msk [vmem:[#allocation2 + $0x160] sm:$0xff] %vm271_vm0, %v1294_v43 }
 0x117   : > { %v1462_v57 = vadd.f32 %v2555_v5, %v1394_v54  ;;  %1328 = vst.msk [vmem:[#allocation2 + $0x68] sm:$0xff] %vm271_vm0, %v1263_v51  ;;  %v1033_v58 = vpop.f32.mrf.mxu2  ;;  %v352_v43 = vld [vmem:[#allocation2 + $0x80] sm:$0xff] }
 0x118   : > { %v1557_v59 = vmax.f32 %v1493_v53, 0.0  ;;  %v1202_v61 = vpop.f32.mrf.mxu3 }
 0x119   : > { %v1526_v0 = vmax.f32 %v1462_v57, 0.0  ;;  %v1203_v1 = vadd.f32 %v1202_v61, %v1033_v58  ;;  %v956_v2 = vpop.f32.mrf.mxu0  ;;  %v353_v61 = vld [vmem:[#allocation2 + $0x88] sm:$0xff] }
 0x11a   : > { %v1621_v6 = vpack.c.bf16 %v1557_v59, %v1557_v59  ;;  %v1125_v36 = vpop.f32.mrf.mxu1 }
 0x11b   : > { %v1590_v8 = vpack.c.bf16 %v1526_v0, %v1526_v0  ;;  %v1295_v9 = vadd.f32 %v1203_v1, %v381_v60  ;;  %v1126_v10 = vadd.f32 %v1125_v36, %v956_v2 }
 0x11c   : > { %1686 = vst.msk [vmem:[%s2586_s7 + $0xac] sm:$0xf] %vm1642_vm1, %v1621_v6  ;;  %995 = vmatmul.bf16.gmra.mxu0 %v1956_v62  ;;  %1075 = vmatmul.bf16.gmra.mxu2 %v2084_v63 }
 0x11d   : > { %1655 = vst.msk [vmem:[%s2586_s7 + $0x30] sm:$0xf] %vm1642_vm1, %v1590_v8  ;;  %v1426_v11 = vld [vmem:[#allocation2 + $0x160] sm:$0xff]  ;;  %v1264_v12 = vadd.f32 %v1126_v10, %v350_v7  ;;  %1164 = vmatmul.bf16.gmra.mxu1 %v1960_v3  ;;  %1244 = vmatmul.bf16.gmra.mxu3 %v2088_v4 }
 0x11e   : > { %v1494_v13 = vadd.f32 %v2555_v5, %v1426_v11  ;;  %v1395_v14 = vld [vmem:[#allocation2 + $0x68] sm:$0xff]  ;;  %1360 = vst.msk [vmem:[#allocation2 + $0x168] sm:$0xff] %vm271_vm0, %v1295_v9 }
 0x11f   : > { %v1463_v15 = vadd.f32 %v2555_v5, %v1395_v14  ;;  %1329 = vst.msk [vmem:[#allocation2 + $0x70] sm:$0xff] %vm271_vm0, %v1264_v12  ;;  %v1036_v16 = vpop.f32.mrf.mxu2  ;;  %v385_v9 = vld [vmem:[#allocation2 + $0x188] sm:$0xff] }
 0x120   : > { %v1558_v17 = vmax.f32 %v1494_v13, 0.0  ;;  %v1205_v19 = vpop.f32.mrf.mxu3 }
 0x121   : > { %v1527_v20 = vmax.f32 %v1463_v15, 0.0  ;;  %v1206_v21 = vadd.f32 %v1205_v19, %v1036_v16  ;;  %v958_v22 = vpop.f32.mrf.mxu0  ;;  %v354_v15 = vld [vmem:[#allocation2 + $0x90] sm:$0xff] }
 0x122   : > { %v1622_v23 = vpack.c.bf16 %v1558_v17, %v1558_v17  ;;  %v1127_v25 = vpop.f32.mrf.mxu1 }
 0x123   : > { %v1591_v26 = vpack.c.bf16 %v1527_v20, %v1527_v20  ;;  %v1296_v27 = vadd.f32 %v1206_v21, %v382_v18  ;;  %v1128_v28 = vadd.f32 %v1127_v25, %v958_v22  ;;  %v2805_v21 = vld [vmem:[%s2940_s2] ss:$0 sm:$0xff] }
 0x124   : > { %1687 = vst.msk [vmem:[%s2586_s7 + $0xb0] sm:$0xf] %vm1642_vm1, %v1622_v23 }
 0x125   : > { %1656 = vst.msk [vmem:[%s2586_s7 + $0x34] sm:$0xf] %vm1642_vm1, %v1591_v26  ;;  %v1427_v29 = vld [vmem:[#allocation2 + $0x168] sm:$0xff]  ;;  %v1265_v30 = vadd.f32 %v1128_v28, %v351_v24 }
 0x126   : > { %v1495_v31 = vadd.f32 %v2555_v5, %v1427_v29  ;;  %v1396_v32 = vld [vmem:[#allocation2 + $0x70] sm:$0xff]  ;;  %1361 = vst.msk [vmem:[#allocation2 + $0x170] sm:$0xff] %vm271_vm0, %v1296_v27 }
 0x127   : > { %v1464_v33 = vadd.f32 %v2555_v5, %v1396_v32  ;;  %1330 = vst.msk [vmem:[#allocation2 + $0x78] sm:$0xff] %vm271_vm0, %v1265_v30  ;;  %v1038_v34 = vpop.f32.mrf.mxu2  ;;  %v386_v27 = vld [vmem:[#allocation2 + $0x190] sm:$0xff] }
 0x128   : > { %v1559_v35 = vmax.f32 %v1495_v31, 0.0  ;;  %v1207_v38 = vpop.f32.mrf.mxu3 }
 0x129   : > { %v1528_v39 = vmax.f32 %v1464_v33, 0.0  ;;  %v1208_v40 = vadd.f32 %v1207_v38, %v1038_v34  ;;  %v961_v41 = vpop.f32.mrf.mxu0  ;;  %v355_v33 = vld [vmem:[#allocation2 + $0x98] sm:$0xff] }
 0x12a   : > { %v1623_v42 = vpack.c.bf16 %v1559_v35, %v1559_v35  ;;  %v1130_v44 = vpop.f32.mrf.mxu1 }
 0x12b   : > { %v1592_v45 = vpack.c.bf16 %v1528_v39, %v1528_v39  ;;  %v1297_v46 = vadd.f32 %v1208_v40, %v383_v37  ;;  %v1131_v47 = vadd.f32 %v1130_v44, %v961_v41 }
 0x12c   : > { %1688 = vst.msk [vmem:[%s2586_s7 + $0xb4] sm:$0xf] %vm1642_vm1, %v1623_v42 }
 0x12d   : > { %1657 = vst.msk [vmem:[%s2586_s7 + $0x38] sm:$0xf] %vm1642_vm1, %v1592_v45  ;;  %v1428_v48 = vld [vmem:[#allocation2 + $0x170] sm:$0xff]  ;;  %v1266_v49 = vadd.f32 %v1131_v47, %v352_v43 }
 0x12e   : > { %v1496_v50 = vadd.f32 %v2555_v5, %v1428_v48  ;;  %v1397_v51 = vld [vmem:[#allocation2 + $0x78] sm:$0xff]  ;;  %1362 = vst.msk [vmem:[#allocation2 + $0x178] sm:$0xff] %vm271_vm0, %v1297_v46 }
 0x12f   : > { %v1465_v52 = vadd.f32 %v2555_v5, %v1397_v51  ;;  %1331 = vst.msk [vmem:[#allocation2 + $0x80] sm:$0xff] %vm271_vm0, %v1266_v49  ;;  %v1041_v53 = vpop.f32.mrf.mxu2  ;;  %v387_v46 = vld [vmem:[#allocation2 + $0x198] sm:$0xff] }
 0x130   : > { %v1560_v54 = vmax.f32 %v1496_v50, 0.0  ;;  %v1210_v56 = vpop.f32.mrf.mxu3 }
 0x131   : > { %v1529_v57 = vmax.f32 %v1465_v52, 0.0  ;;  %v1211_v58 = vadd.f32 %v1210_v56, %v1041_v53  ;;  %v963_v59 = vpop.f32.mrf.mxu0  ;;  %v356_v52 = vld [vmem:[#allocation2 + $0xa0] sm:$0xff] }
 0x132   : > { %v1624_v60 = vpack.c.bf16 %v1560_v54, %v1560_v54  ;;  %v1132_v62 = vpop.f32.mrf.mxu1 }
 0x133   : > { %v1593_v63 = vpack.c.bf16 %v1529_v57, %v1529_v57  ;;  %v1298_v0 = vadd.f32 %v1211_v58, %v384_v55  ;;  %v1133_v1 = vadd.f32 %v1132_v62, %v963_v59 }
 0x134   : > { %1689 = vst.msk [vmem:[%s2586_s7 + $0xb8] sm:$0xf] %vm1642_vm1, %v1624_v60 }
 0x135   : > { %1658 = vst.msk [vmem:[%s2586_s7 + $0x3c] sm:$0xf] %vm1642_vm1, %v1593_v63  ;;  %v1429_v2 = vld [vmem:[#allocation2 + $0x178] sm:$0xff]  ;;  %v1267_v3 = vadd.f32 %v1133_v1, %v353_v61 }
 0x136   : > { %v1497_v4 = vadd.f32 %v2555_v5, %v1429_v2  ;;  %v1398_v6 = vld [vmem:[#allocation2 + $0x80] sm:$0xff]  ;;  %1363 = vst.msk [vmem:[#allocation2 + $0x180] sm:$0xff] %vm271_vm0, %v1298_v0 }
 0x137   : > { %v1466_v7 = vadd.f32 %v2555_v5, %v1398_v6  ;;  %1332 = vst.msk [vmem:[#allocation2 + $0x88] sm:$0xff] %vm271_vm0, %v1267_v3  ;;  %v1043_v36 = vpop.f32.mrf.mxu2  ;;  %v388_v0 = vld [vmem:[#allocation2 + $0x1a0] sm:$0xff] }
 0x138   : > { %v1561_v8 = vmax.f32 %v1497_v4, 0.0  ;;  %v1212_v10 = vpop.f32.mrf.mxu3 }
 0x139   : > { %v1530_v11 = vmax.f32 %v1466_v7, 0.0  ;;  %v1213_v12 = vadd.f32 %v1212_v10, %v1043_v36  ;;  %v966_v13 = vpop.f32.mrf.mxu0  ;;  %v357_v7 = vld [vmem:[#allocation2 + $0xa8] sm:$0xff] }
 0x13a   : > { %v1625_v14 = vpack.c.bf16 %v1561_v8, %v1561_v8  ;;  %v1135_v16 = vpop.f32.mrf.mxu1 }
 0x13b   : > { %v1594_v17 = vpack.c.bf16 %v1530_v11, %v1530_v11  ;;  %v1299_v18 = vadd.f32 %v1213_v12, %v385_v9  ;;  %v1136_v19 = vadd.f32 %v1135_v16, %v966_v13 }
 0x13c   : > { %1690 = vst.msk [vmem:[%s2586_s7 + $0xbc] sm:$0xf] %vm1642_vm1, %v1625_v14 }
 0x13d   : > { %1659 = vst.msk [vmem:[%s2586_s7 + $0x40] sm:$0xf] %vm1642_vm1, %v1594_v17  ;;  %v1430_v5 = vld [vmem:[#allocation2 + $0x180] sm:$0xff]  ;;  %v1268_v20 = vadd.f32 %v1136_v19, %v354_v15 }
 0x13e   : > { %v1498_v22 = vadd.f32 %v2805_v21, %v1430_v5  ;;  %v1399_v23 = vld [vmem:[#allocation2 + $0x88] sm:$0xff]  ;;  %1364 = vst.msk [vmem:[#allocation2 + $0x188] sm:$0xff] %vm271_vm0, %v1299_v18 }
 0x13f   : > { %v1467_v24 = vadd.f32 %v2805_v21, %v1399_v23  ;;  %1333 = vst.msk [vmem:[#allocation2 + $0x90] sm:$0xff] %vm271_vm0, %v1268_v20  ;;  %v1046_v25 = vpop.f32.mrf.mxu2  ;;  %v389_v18 = vld [vmem:[#allocation2 + $0x1a8] sm:$0xff] }
 0x140   : > { %v1562_v26 = vmax.f32 %v1498_v22, 0.0  ;;  %v1215_v28 = vpop.f32.mrf.mxu3 }
 0x141   : > { %v1531_v29 = vmax.f32 %v1467_v24, 0.0  ;;  %v1216_v30 = vadd.f32 %v1215_v28, %v1046_v25  ;;  %v968_v31 = vpop.f32.mrf.mxu0  ;;  %v358_v24 = vld [vmem:[#allocation2 + $0xb0] sm:$0xff] }
 0x142   : > { %v1626_v32 = vpack.c.bf16 %v1562_v26, %v1562_v26  ;;  %v1137_v34 = vpop.f32.mrf.mxu1 }
 0x143   : > { %v1595_v35 = vpack.c.bf16 %v1531_v29, %v1531_v29  ;;  %v1300_v37 = vadd.f32 %v1216_v30, %v386_v27  ;;  %v1138_v38 = vadd.f32 %v1137_v34, %v968_v31 }
 0x144   : > { %1691 = vst.msk [vmem:[%s2586_s7 + $0xc0] sm:$0xf] %vm1642_vm1, %v1626_v32 }
 0x145   : > { %1660 = vst.msk [vmem:[%s2586_s7 + $0x44] sm:$0xf] %vm1642_vm1, %v1595_v35  ;;  %v1431_v39 = vld [vmem:[#allocation2 + $0x188] sm:$0xff]  ;;  %v1269_v40 = vadd.f32 %v1138_v38, %v355_v33 }
 0x146   : > { %v1499_v41 = vadd.f32 %v2805_v21, %v1431_v39  ;;  %v1400_v42 = vld [vmem:[#allocation2 + $0x90] sm:$0xff]  ;;  %1365 = vst.msk [vmem:[#allocation2 + $0x190] sm:$0xff] %vm271_vm0, %v1300_v37 }
 0x147   : > { %v1468_v43 = vadd.f32 %v2805_v21, %v1400_v42  ;;  %1334 = vst.msk [vmem:[#allocation2 + $0x98] sm:$0xff] %vm271_vm0, %v1269_v40  ;;  %v1048_v44 = vpop.f32.mrf.mxu2  ;;  %v390_v37 = vld [vmem:[#allocation2 + $0x1b0] sm:$0xff] }
 0x148   : > { %v1563_v45 = vmax.f32 %v1499_v41, 0.0  ;;  %v1217_v47 = vpop.f32.mrf.mxu3 }
 0x149   : > { %v1532_v48 = vmax.f32 %v1468_v43, 0.0  ;;  %v1218_v49 = vadd.f32 %v1217_v47, %v1048_v44  ;;  %v971_v50 = vpop.f32.mrf.mxu0  ;;  %v359_v43 = vld [vmem:[#allocation2 + $0xb8] sm:$0xff] }
 0x14a   : > { %v1627_v51 = vpack.c.bf16 %v1563_v45, %v1563_v45  ;;  %v1140_v53 = vpop.f32.mrf.mxu1 }
 0x14b   : > { %v1596_v54 = vpack.c.bf16 %v1532_v48, %v1532_v48  ;;  %v1301_v55 = vadd.f32 %v1218_v49, %v387_v46  ;;  %v1141_v56 = vadd.f32 %v1140_v53, %v971_v50 }
 0x14c   : > { %1692 = vst.msk [vmem:[%s2586_s7 + $0xc4] sm:$0xf] %vm1642_vm1, %v1627_v51 }
 0x14d   : > { %1661 = vst.msk [vmem:[%s2586_s7 + $0x48] sm:$0xf] %vm1642_vm1, %v1596_v54  ;;  %v1432_v57 = vld [vmem:[#allocation2 + $0x190] sm:$0xff]  ;;  %v1270_v58 = vadd.f32 %v1141_v56, %v356_v52 }
 0x14e   : > { %v1500_v59 = vadd.f32 %v2805_v21, %v1432_v57  ;;  %v1401_v60 = vld [vmem:[#allocation2 + $0x98] sm:$0xff]  ;;  %1366 = vst.msk [vmem:[#allocation2 + $0x198] sm:$0xff] %vm271_vm0, %v1301_v55 }
 0x14f   : > { %v1469_v61 = vadd.f32 %v2805_v21, %v1401_v60  ;;  %1335 = vst.msk [vmem:[#allocation2 + $0xa0] sm:$0xff] %vm271_vm0, %v1270_v58  ;;  %v1051_v62 = vpop.f32.mrf.mxu2  ;;  %v391_v55 = vld [vmem:[#allocation2 + $0x1b8] sm:$0xff] }
 0x150   : > { %v1564_v63 = vmax.f32 %v1500_v59, 0.0  ;;  %v1220_v1 = vpop.f32.mrf.mxu3 }
 0x151   : > { %v1533_v2 = vmax.f32 %v1469_v61, 0.0  ;;  %v1221_v3 = vadd.f32 %v1220_v1, %v1051_v62  ;;  %v973_v4 = vpop.f32.mrf.mxu0  ;;  %v360_v61 = vld [vmem:[#allocation2 + $0xc0] sm:$0xff] }
 0x152   : > { %v1628_v6 = vpack.c.bf16 %v1564_v63, %v1564_v63  ;;  %v1142_v36 = vpop.f32.mrf.mxu1 }
 0x153   : > { %v1597_v8 = vpack.c.bf16 %v1533_v2, %v1533_v2  ;;  %v1302_v9 = vadd.f32 %v1221_v3, %v388_v0  ;;  %v1143_v10 = vadd.f32 %v1142_v36, %v973_v4 }
 0x154   : > { %1693 = vst.msk [vmem:[%s2586_s7 + $0xc8] sm:$0xf] %vm1642_vm1, %v1628_v6 }
 0x155   : > { %1662 = vst.msk [vmem:[%s2586_s7 + $0x4c] sm:$0xf] %vm1642_vm1, %v1597_v8  ;;  %v1433_v11 = vld [vmem:[#allocation2 + $0x198] sm:$0xff]  ;;  %v1271_v12 = vadd.f32 %v1143_v10, %v357_v7 }
 0x156   : > { %v1501_v13 = vadd.f32 %v2805_v21, %v1433_v11  ;;  %v1402_v14 = vld [vmem:[#allocation2 + $0xa0] sm:$0xff]  ;;  %1367 = vst.msk [vmem:[#allocation2 + $0x1a0] sm:$0xff] %vm271_vm0, %v1302_v9 }
 0x157   : > { %v1470_v15 = vadd.f32 %v2805_v21, %v1402_v14  ;;  %1336 = vst.msk [vmem:[#allocation2 + $0xa8] sm:$0xff] %vm271_vm0, %v1271_v12  ;;  %v1053_v16 = vpop.f32.mrf.mxu2  ;;  %v392_v9 = vld [vmem:[#allocation2 + $0x1c0] sm:$0xff] }
 0x158   : > { %v1565_v17 = vmax.f32 %v1501_v13, 0.0  ;;  %v1222_v19 = vpop.f32.mrf.mxu3 }
 0x159   : > { %v1534_v5 = vmax.f32 %v1470_v15, 0.0  ;;  %v1223_v20 = vadd.f32 %v1222_v19, %v1053_v16  ;;  %v976_v22 = vpop.f32.mrf.mxu0  ;;  %v361_v15 = vld [vmem:[#allocation2 + $0xc8] sm:$0xff] }
 0x15a   : > { %v1629_v23 = vpack.c.bf16 %v1565_v17, %v1565_v17  ;;  %v1145_v25 = vpop.f32.mrf.mxu1 }
 0x15b   : > { %v1598_v26 = vpack.c.bf16 %v1534_v5, %v1534_v5  ;;  %v1303_v27 = vadd.f32 %v1223_v20, %v389_v18  ;;  %v1146_v28 = vadd.f32 %v1145_v25, %v976_v22 }
 0x15c   : > { %1694 = vst.msk [vmem:[%s2586_s7 + $0xcc] sm:$0xf] %vm1642_vm1, %v1629_v23 }
 0x15d   : > { %1663 = vst.msk [vmem:[%s2586_s7 + $0x50] sm:$0xf] %vm1642_vm1, %v1598_v26  ;;  %v1434_v29 = vld [vmem:[#allocation2 + $0x1a0] sm:$0xff]  ;;  %v1272_v30 = vadd.f32 %v1146_v28, %v358_v24 }
 0x15e   : > { %v1502_v31 = vadd.f32 %v2805_v21, %v1434_v29  ;;  %v1403_v32 = vld [vmem:[#allocation2 + $0xa8] sm:$0xff]  ;;  %1368 = vst.msk [vmem:[#allocation2 + $0x1a8] sm:$0xff] %vm271_vm0, %v1303_v27 }
 0x15f   : > { %v1471_v33 = vadd.f32 %v2805_v21, %v1403_v32  ;;  %1337 = vst.msk [vmem:[#allocation2 + $0xb0] sm:$0xff] %vm271_vm0, %v1272_v30  ;;  %v1056_v34 = vpop.f32.mrf.mxu2  ;;  %v393_v27 = vld [vmem:[#allocation2 + $0x1c8] sm:$0xff] }
 0x160   : > { %v1566_v35 = vmax.f32 %v1502_v31, 0.0  ;;  %v1225_v38 = vpop.f32.mrf.mxu3 }
 0x161   : > { %v1535_v39 = vmax.f32 %v1471_v33, 0.0  ;;  %v1226_v40 = vadd.f32 %v1225_v38, %v1056_v34  ;;  %v978_v41 = vpop.f32.mrf.mxu0  ;;  %v362_v33 = vld [vmem:[#allocation2 + $0xd0] sm:$0xff] }
 0x162   : > { %v1630_v42 = vpack.c.bf16 %v1566_v35, %v1566_v35  ;;  %v1147_v44 = vpop.f32.mrf.mxu1 }
 0x163   : > { %v1599_v45 = vpack.c.bf16 %v1535_v39, %v1535_v39  ;;  %v1304_v46 = vadd.f32 %v1226_v40, %v390_v37  ;;  %v1148_v47 = vadd.f32 %v1147_v44, %v978_v41 }
 0x164   : > { %1695 = vst.msk [vmem:[%s2586_s7 + $0xd0] sm:$0xf] %vm1642_vm1, %v1630_v42 }
 0x165   : > { %1664 = vst.msk [vmem:[%s2586_s7 + $0x54] sm:$0xf] %vm1642_vm1, %v1599_v45  ;;  %v1435_v48 = vld [vmem:[#allocation2 + $0x1a8] sm:$0xff]  ;;  %v1273_v49 = vadd.f32 %v1148_v47, %v359_v43 }
 0x166   : > { %v1503_v50 = vadd.f32 %v2805_v21, %v1435_v48  ;;  %v1404_v51 = vld [vmem:[#allocation2 + $0xb0] sm:$0xff]  ;;  %1369 = vst.msk [vmem:[#allocation2 + $0x1b0] sm:$0xff] %vm271_vm0, %v1304_v46 }
 0x167   : > { %v1472_v52 = vadd.f32 %v2805_v21, %v1404_v51  ;;  %1338 = vst.msk [vmem:[#allocation2 + $0xb8] sm:$0xff] %vm271_vm0, %v1273_v49  ;;  %v1058_v53 = vpop.f32.mrf.mxu2  ;;  %v394_v46 = vld [vmem:[#allocation2 + $0x1d0] sm:$0xff] }
 0x168   : > { %v1567_v54 = vmax.f32 %v1503_v50, 0.0  ;;  %v1227_v56 = vpop.f32.mrf.mxu3 }
 0x169   : > { %v1536_v57 = vmax.f32 %v1472_v52, 0.0  ;;  %v1228_v58 = vadd.f32 %v1227_v56, %v1058_v53  ;;  %v981_v59 = vpop.f32.mrf.mxu0  ;;  %v363_v52 = vld [vmem:[#allocation2 + $0xd8] sm:$0xff] }
 0x16a   : > { %v1631_v60 = vpack.c.bf16 %v1567_v54, %v1567_v54  ;;  %v1150_v62 = vpop.f32.mrf.mxu1 }
 0x16b   : > { %v1600_v63 = vpack.c.bf16 %v1536_v57, %v1536_v57  ;;  %v1305_v0 = vadd.f32 %v1228_v58, %v391_v55  ;;  %v1151_v1 = vadd.f32 %v1150_v62, %v981_v59 }
 0x16c   : > { %1696 = vst.msk [vmem:[%s2586_s7 + $0xd4] sm:$0xf] %vm1642_vm1, %v1631_v60 }
 0x16d   : > { %1665 = vst.msk [vmem:[%s2586_s7 + $0x58] sm:$0xf] %vm1642_vm1, %v1600_v63  ;;  %v1436_v2 = vld [vmem:[#allocation2 + $0x1b0] sm:$0xff]  ;;  %v1274_v3 = vadd.f32 %v1151_v1, %v360_v61 }
 0x16e   : > { %v1504_v4 = vadd.f32 %v2805_v21, %v1436_v2  ;;  %v1405_v6 = vld [vmem:[#allocation2 + $0xb8] sm:$0xff]  ;;  %1370 = vst.msk [vmem:[#allocation2 + $0x1b8] sm:$0xff] %vm271_vm0, %v1305_v0 }
 0x16f   : > { %v1473_v7 = vadd.f32 %v2805_v21, %v1405_v6  ;;  %1339 = vst.msk [vmem:[#allocation2 + $0xc0] sm:$0xff] %vm271_vm0, %v1274_v3  ;;  %v1061_v36 = vpop.f32.mrf.mxu2  ;;  %v395_v0 = vld [vmem:[#allocation2 + $0x1d8] sm:$0xff] }
 0x170   : > { %v1568_v8 = vmax.f32 %v1504_v4, 0.0  ;;  %v1230_v10 = vpop.f32.mrf.mxu3 }
 0x171   : > { %v1537_v11 = vmax.f32 %v1473_v7, 0.0  ;;  %v1231_v12 = vadd.f32 %v1230_v10, %v1061_v36  ;;  %v983_v13 = vpop.f32.mrf.mxu0  ;;  %v364_v7 = vld [vmem:[#allocation2 + $0xe0] sm:$0xff] }
 0x172   : > { %v1632_v14 = vpack.c.bf16 %v1568_v8, %v1568_v8  ;;  %v1152_v16 = vpop.f32.mrf.mxu1 }
 0x173   : > { %v1601_v17 = vpack.c.bf16 %v1537_v11, %v1537_v11  ;;  %v1306_v18 = vadd.f32 %v1231_v12, %v392_v9  ;;  %v1153_v19 = vadd.f32 %v1152_v16, %v983_v13 }
 0x174   : > { %1697 = vst.msk [vmem:[%s2586_s7 + $0xd8] sm:$0xf] %vm1642_vm1, %v1632_v14 }
 0x175   : > { %1666 = vst.msk [vmem:[%s2586_s7 + $0x5c] sm:$0xf] %vm1642_vm1, %v1601_v17  ;;  %v1437_v5 = vld [vmem:[#allocation2 + $0x1b8] sm:$0xff]  ;;  %v1275_v20 = vadd.f32 %v1153_v19, %v361_v15 }
 0x176   : > { %v1505_v22 = vadd.f32 %v2805_v21, %v1437_v5  ;;  %v1406_v23 = vld [vmem:[#allocation2 + $0xc0] sm:$0xff]  ;;  %1371 = vst.msk [vmem:[#allocation2 + $0x1c0] sm:$0xff] %vm271_vm0, %v1306_v18 }
 0x177   : > { %v1474_v24 = vadd.f32 %v2805_v21, %v1406_v23  ;;  %1340 = vst.msk [vmem:[#allocation2 + $0xc8] sm:$0xff] %vm271_vm0, %v1275_v20  ;;  %v1063_v25 = vpop.f32.mrf.mxu2  ;;  %v396_v18 = vld [vmem:[#allocation2 + $0x1e0] sm:$0xff] }
 0x178   : > { %v1569_v26 = vmax.f32 %v1505_v22, 0.0  ;;  %v1232_v28 = vpop.f32.mrf.mxu3 }
 0x179   : > { %v1538_v29 = vmax.f32 %v1474_v24, 0.0  ;;  %v1233_v30 = vadd.f32 %v1232_v28, %v1063_v25  ;;  %v986_v31 = vpop.f32.mrf.mxu0  ;;  %v365_v24 = vld [vmem:[#allocation2 + $0xe8] sm:$0xff] }
 0x17a   : > { %v1633_v32 = vpack.c.bf16 %v1569_v26, %v1569_v26  ;;  %v1155_v34 = vpop.f32.mrf.mxu1 }
 0x17b   : > { %v1602_v35 = vpack.c.bf16 %v1538_v29, %v1538_v29  ;;  %v1307_v37 = vadd.f32 %v1233_v30, %v393_v27  ;;  %v1156_v38 = vadd.f32 %v1155_v34, %v986_v31 }
 0x17c   : > { %1698 = vst.msk [vmem:[%s2586_s7 + $0xdc] sm:$0xf] %vm1642_vm1, %v1633_v32 }
 0x17d   : > { %1667 = vst.msk [vmem:[%s2586_s7 + $0x60] sm:$0xf] %vm1642_vm1, %v1602_v35  ;;  %v1438_v39 = vld [vmem:[#allocation2 + $0x1c0] sm:$0xff]  ;;  %v1276_v40 = vadd.f32 %v1156_v38, %v362_v33 }
 0x17e   : > { %v1506_v41 = vadd.f32 %v2805_v21, %v1438_v39  ;;  %v1407_v42 = vld [vmem:[#allocation2 + $0xc8] sm:$0xff]  ;;  %1372 = vst.msk [vmem:[#allocation2 + $0x1c8] sm:$0xff] %vm271_vm0, %v1307_v37 }
 0x17f   : > { %v1475_v43 = vadd.f32 %v2805_v21, %v1407_v42  ;;  %1341 = vst.msk [vmem:[#allocation2 + $0xd0] sm:$0xff] %vm271_vm0, %v1276_v40  ;;  %v1066_v44 = vpop.f32.mrf.mxu2  ;;  %v397_v37 = vld [vmem:[#allocation2 + $0x1e8] sm:$0xff] }
 0x180   : > { %v1570_v45 = vmax.f32 %v1506_v41, 0.0  ;;  %v1235_v47 = vpop.f32.mrf.mxu3 }
 0x181   : > { %v1539_v48 = vmax.f32 %v1475_v43, 0.0  ;;  %v1236_v49 = vadd.f32 %v1235_v47, %v1066_v44  ;;  %v988_v50 = vpop.f32.mrf.mxu0  ;;  %v366_v43 = vld [vmem:[#allocation2 + $0xf0] sm:$0xff] }
 0x182   : > { %v1634_v51 = vpack.c.bf16 %v1570_v45, %v1570_v45  ;;  %v1157_v53 = vpop.f32.mrf.mxu1 }
 0x183   : > { %v1603_v54 = vpack.c.bf16 %v1539_v48, %v1539_v48  ;;  %v1308_v55 = vadd.f32 %v1236_v49, %v394_v46  ;;  %v1158_v56 = vadd.f32 %v1157_v53, %v988_v50 }
 0x184   : > { %1699 = vst.msk [vmem:[%s2586_s7 + $0xe0] sm:$0xf] %vm1642_vm1, %v1634_v51 }
 0x185   : > { %1668 = vst.msk [vmem:[%s2586_s7 + $0x64] sm:$0xf] %vm1642_vm1, %v1603_v54  ;;  %v1439_v57 = vld [vmem:[#allocation2 + $0x1c8] sm:$0xff]  ;;  %v1277_v58 = vadd.f32 %v1158_v56, %v363_v52 }
 0x186   : > { %v1507_v59 = vadd.f32 %v2805_v21, %v1439_v57  ;;  %v1408_v60 = vld [vmem:[#allocation2 + $0xd0] sm:$0xff]  ;;  %1373 = vst.msk [vmem:[#allocation2 + $0x1d0] sm:$0xff] %vm271_vm0, %v1308_v55 }
 0x187   : > { %v1476_v61 = vadd.f32 %v2805_v21, %v1408_v60  ;;  %1342 = vst.msk [vmem:[#allocation2 + $0xd8] sm:$0xff] %vm271_vm0, %v1277_v58  ;;  %v1068_v62 = vpop.f32.mrf.mxu2  ;;  %v398_v55 = vld [vmem:[#allocation2 + $0x1f0] sm:$0xff] }
 0x188   : > { %v1571_v63 = vmax.f32 %v1507_v59, 0.0  ;;  %v1237_v1 = vpop.f32.mrf.mxu3 }
 0x189   : > { %v1540_v2 = vmax.f32 %v1476_v61, 0.0  ;;  %v1238_v3 = vadd.f32 %v1237_v1, %v1068_v62  ;;  %v991_v4 = vpop.f32.mrf.mxu0  ;;  %v367_v61 = vld [vmem:[#allocation2 + $0xf8] sm:$0xff] }
 0x18a   : > { %v1635_v6 = vpack.c.bf16 %v1571_v63, %v1571_v63  ;;  %v1160_v36 = vpop.f32.mrf.mxu1 }
 0x18b   : > { %v1604_v8 = vpack.c.bf16 %v1540_v2, %v1540_v2  ;;  %v1309_v9 = vadd.f32 %v1238_v3, %v395_v0  ;;  %v1161_v10 = vadd.f32 %v1160_v36, %v991_v4 }
 0x18c   : > { %1700 = vst.msk [vmem:[%s2586_s7 + $0xe4] sm:$0xf] %vm1642_vm1, %v1635_v6 }
 0x18d   : > { %1669 = vst.msk [vmem:[%s2586_s7 + $0x68] sm:$0xf] %vm1642_vm1, %v1604_v8  ;;  %v1440_v11 = vld [vmem:[#allocation2 + $0x1d0] sm:$0xff]  ;;  %v1278_v12 = vadd.f32 %v1161_v10, %v364_v7 }
 0x18e   : > { %v1508_v13 = vadd.f32 %v2805_v21, %v1440_v11  ;;  %v1409_v14 = vld [vmem:[#allocation2 + $0xd8] sm:$0xff]  ;;  %1374 = vst.msk [vmem:[#allocation2 + $0x1d8] sm:$0xff] %vm271_vm0, %v1309_v9 }
 0x18f   : > { %v1477_v15 = vadd.f32 %v2805_v21, %v1409_v14  ;;  %1343 = vst.msk [vmem:[#allocation2 + $0xe0] sm:$0xff] %vm271_vm0, %v1278_v12  ;;  %v1071_v16 = vpop.f32.mrf.mxu2  ;;  %v399_v9 = vld [vmem:[#allocation2 + $0x1f8] sm:$0xff] }
 0x190   : > { %v1572_v17 = vmax.f32 %v1508_v13, 0.0  ;;  %v1240_v19 = vpop.f32.mrf.mxu3 }
 0x191   : > { %v1541_v5 = vmax.f32 %v1477_v15, 0.0  ;;  %v1241_v20 = vadd.f32 %v1240_v19, %v1071_v16  ;;  %v993_v22 = vpop.f32.mrf.mxu0 }
 0x192   : > { %v1636_v23 = vpack.c.bf16 %v1572_v17, %v1572_v17  ;;  %v1162_v25 = vpop.f32.mrf.mxu1 }
 0x193   : > { %v1605_v26 = vpack.c.bf16 %v1541_v5, %v1541_v5  ;;  %v1310_v27 = vadd.f32 %v1241_v20, %v396_v18  ;;  %v1163_v28 = vadd.f32 %v1162_v25, %v993_v22 }
 0x194   : > { %1701 = vst.msk [vmem:[%s2586_s7 + $0xe8] sm:$0xf] %vm1642_vm1, %v1636_v23 }
 0x195   : > { %1670 = vst.msk [vmem:[%s2586_s7 + $0x6c] sm:$0xf] %vm1642_vm1, %v1605_v26  ;;  %v1441_v29 = vld [vmem:[#allocation2 + $0x1d8] sm:$0xff]  ;;  %v1279_v30 = vadd.f32 %v1163_v28, %v365_v24 }
 0x196   : > { %v1509_v31 = vadd.f32 %v2805_v21, %v1441_v29  ;;  %v1410_v32 = vld [vmem:[#allocation2 + $0xe0] sm:$0xff]  ;;  %1375 = vst.msk [vmem:[#allocation2 + $0x1e0] sm:$0xff] %vm271_vm0, %v1310_v27 }
 0x197   : > { %v1478_v33 = vadd.f32 %v2805_v21, %v1410_v32  ;;  %1344 = vst.msk [vmem:[#allocation2 + $0xe8] sm:$0xff] %vm271_vm0, %v1279_v30  ;;  %v1073_v34 = vpop.f32.mrf.mxu2 }
 0x198   : > { %v1573_v35 = vmax.f32 %v1509_v31, 0.0  ;;  %v1242_v38 = vpop.f32.mrf.mxu3 }
 0x199   : > { %v1542_v39 = vmax.f32 %v1478_v33, 0.0  ;;  %v1243_v40 = vadd.f32 %v1242_v38, %v1073_v34  ;;  %v996_v41 = vpop.f32.mrf.mxu0 }
 0x19a   : > { %v1637_v42 = vpack.c.bf16 %v1573_v35, %v1573_v35  ;;  %v1165_v44 = vpop.f32.mrf.mxu1 }
 0x19b   : > { %v1606_v45 = vpack.c.bf16 %v1542_v39, %v1542_v39  ;;  %v1311_v46 = vadd.f32 %v1243_v40, %v397_v37  ;;  %v1166_v47 = vadd.f32 %v1165_v44, %v996_v41 }
 0x19c   : > { %1702 = vst.msk [vmem:[%s2586_s7 + $0xec] sm:$0xf] %vm1642_vm1, %v1637_v42 }
 0x19d   : > { %1671 = vst.msk [vmem:[%s2586_s7 + $0x70] sm:$0xf] %vm1642_vm1, %v1606_v45  ;;  %v1442_v48 = vld [vmem:[#allocation2 + $0x1e0] sm:$0xff]  ;;  %v1280_v49 = vadd.f32 %v1166_v47, %v366_v43 }
 0x19e   : > { %v1510_v50 = vadd.f32 %v2805_v21, %v1442_v48  ;;  %v1411_v51 = vld [vmem:[#allocation2 + $0xe8] sm:$0xff]  ;;  %1376 = vst.msk [vmem:[#allocation2 + $0x1e8] sm:$0xff] %vm271_vm0, %v1311_v46 }
 0x19f   : > { %v1479_v52 = vadd.f32 %v2805_v21, %v1411_v51  ;;  %1345 = vst.msk [vmem:[#allocation2 + $0xf0] sm:$0xff] %vm271_vm0, %v1280_v49  ;;  %v1076_v53 = vpop.f32.mrf.mxu2 }
 0x1a0   : > { %v1574_v54 = vmax.f32 %v1510_v50, 0.0  ;;  %v1245_v56 = vpop.f32.mrf.mxu3 }
 0x1a1   : > { %v1543_v57 = vmax.f32 %v1479_v52, 0.0  ;;  %v1246_v58 = vadd.f32 %v1245_v56, %v1076_v53  ;;  %v998_v59 = vpop.f32.mrf.mxu0 }
 0x1a2   : > { %v1638_v60 = vpack.c.bf16 %v1574_v54, %v1574_v54  ;;  %v1167_v62 = vpop.f32.mrf.mxu1 }
 0x1a3   : > { %v1607_v63 = vpack.c.bf16 %v1543_v57, %v1543_v57  ;;  %v1312_v0 = vadd.f32 %v1246_v58, %v398_v55  ;;  %v1168_v1 = vadd.f32 %v1167_v62, %v998_v59 }
 0x1a4   : > { %1703 = vst.msk [vmem:[%s2586_s7 + $0xf0] sm:$0xf] %vm1642_vm1, %v1638_v60 }
 0x1a5   : > { %1672 = vst.msk [vmem:[%s2586_s7 + $0x74] sm:$0xf] %vm1642_vm1, %v1607_v63  ;;  %v1443_v2 = vld [vmem:[#allocation2 + $0x1e8] sm:$0xff]  ;;  %v1281_v3 = vadd.f32 %v1168_v1, %v367_v61 }
 0x1a6   : > { %v1511_v4 = vadd.f32 %v2805_v21, %v1443_v2  ;;  %v1412_v6 = vld [vmem:[#allocation2 + $0xf0] sm:$0xff]  ;;  %1377 = vst.msk [vmem:[#allocation2 + $0x1f0] sm:$0xff] %vm271_vm0, %v1312_v0 }
 0x1a7   : > { %v1480_v7 = vadd.f32 %v2805_v21, %v1412_v6  ;;  %1346 = vst.msk [vmem:[#allocation2 + $0xf8] sm:$0xff] %vm271_vm0, %v1281_v3  ;;  %v1078_v36 = vpop.f32.mrf.mxu2 }
 0x1a8   : > { %v1575_v8 = vmax.f32 %v1511_v4, 0.0  ;;  %v1247_v10 = vpop.f32.mrf.mxu3 }
 0x1a9   : > { %v1544_v11 = vmax.f32 %v1480_v7, 0.0  ;;  %v1248_v12 = vadd.f32 %v1247_v10, %v1078_v36 }
 0x1aa   : > { %v1639_v13 = vpack.c.bf16 %v1575_v8, %v1575_v8 }
 0x1ab   : > { %v1608_v14 = vpack.c.bf16 %v1544_v11, %v1544_v11  ;;  %v1313_v15 = vadd.f32 %v1248_v12, %v399_v9 }
 0x1ac   : > { %1704 = vst.msk [vmem:[%s2586_s7 + $0xf4] sm:$0xf] %vm1642_vm1, %v1639_v13 }
 0x1ad   : > { %1673 = vst.msk [vmem:[%s2586_s7 + $0x78] sm:$0xf] %vm1642_vm1, %v1608_v14  ;;  %v1444_v16 = vld [vmem:[#allocation2 + $0x1f0] sm:$0xff] }
 0x1ae   : > { %v1512_v17 = vadd.f32 %v2805_v21, %v1444_v16  ;;  %v1413_v18 = vld [vmem:[#allocation2 + $0xf8] sm:$0xff]  ;;  %1378 = vst.msk [vmem:[#allocation2 + $0x1f8] sm:$0xff] %vm271_vm0, %v1313_v15 }
 0x1af   : > { %v1481_v19 = vadd.f32 %v2805_v21, %v1413_v18 }
 0x1b0   : > { %v1576_v5 = vmax.f32 %v1512_v17, 0.0 }
 0x1b1   : > { %v1545_v20 = vmax.f32 %v1481_v19, 0.0 }
 0x1b2   : > { %v1640_v22 = vpack.c.bf16 %v1576_v5, %v1576_v5 }
 0x1b3   : > { %v1609_v23 = vpack.c.bf16 %v1545_v20, %v1545_v20 }
 0x1b4   : > { %1705 = vst.msk [vmem:[%s2586_s7 + $0xf8] sm:$0xf] %vm1642_vm1, %v1640_v22 }
 0x1b5   : > { %1674 = vst.msk [vmem:[%s2586_s7 + $0x7c] sm:$0xf] %vm1642_vm1, %v1609_v23  ;;  %v1445_v24 = vld [vmem:[#allocation2 + $0x1f8] sm:$0xff] }
 0x1b6   : > { %v1513_v25 = vadd.f32 %v2805_v21, %v1445_v24 }
 0x1b8   : > { %v1577_v26 = vmax.f32 %v1513_v25, 0.0 }
 0x1ba   : > { %v1641_v27 = vpack.c.bf16 %v1577_v26, %v1577_v26 }
 0x1bc   : > { %1706 = vst.msk [vmem:[%s2586_s7 + $0xfc] sm:$0xf] %vm1642_vm1, %v1641_v27 }
 0x1bd PF: > { %s13_s14 = sadd.s32 1, %s2301_s14   ;;  %s2942_s12 = smov %s2297_s13 }
 0x1be   : > { %p10_p5 = scmp.ge.s32.totalorder %s13_s14, 6   ;;  %s2943_s13 = smov %s2945_s15 }
 0x1c0   :  { %12 = sbr.rel (!%p10_p5) target bundleno = 2 (0x2), region = 76 }

// kernel: _lambda_.6
= control target key start
LH: loop header
LB: loop body
LE: loop exit
PB: predicated region body
PF: predicated region fallthrough
CT: control target
= control target key end

     0   :  { %s5733_s12 = smov 0   ;;  %s5735_s13 = smov 0   ;;  %s7205_s0 = inlined_call_operand.vmem [shape: bf16[2,18,18,64], index: 0, kind: input, shape index: {}]   ;;  %s7206_s1 = inlined_call_operand.vmem [shape: bf16[3,3,64,128], index: 1, kind: input, shape index: {}]   ;;  %s7207_s2 = inlined_call_operand.vmem [shape: f32[1,128], index: 2, kind: input, shape index: {}]   ;;  %s7208_s3 = inlined_call_operand.vmem [shape: bf16[2,16,16,128], index: 3, kind: output, shape index: {}]  }
   0x1   :  { %s5737_s14 = smov 0  }
   0x2 LB: > { %s25_s15 = sadd.s32 1, %s5707_s13  ;;  %p4628_p0 = scmp.ge.s32.totalorder %s5711_s14, 1  ;;  %s5711_s14 = sphi %s5737_s14, %s13_s14   ;;  %s5707_s13 = sphi %s5735_s13, %s7218_s13   ;;  %s5703_s12 = sphi %s5733_s12, %s7217_s12  }
   0x3   : > { %p27_p1 = scmp.ge.s32.totalorder %s25_s15, 2  ;;  %p168_p2 = scmp.lt.s32.totalorder %s5711_s14, 3 }
   0x5   : > { %s7220_s15 = smov (%p27_p1, %s25_s15), 0  ;;  %p169_p3 = pnand %p4628_p0, %p168_p2 }
   0x7   : > { %172 = sbr.rel (%p169_p3) target bundleno = 761 (0x2f9), region = 32 }
   0xc   : > { %v5442_v0 = vld [vmem:[%s7206_s1 + $0x38] sm:$0xff]  ;;  %p202_p4 = scmp.lt.s32.totalorder %s5703_s12, 1  ;;  %v5441_v1 = vld [vmem:[%s7206_s1 + $0x30] sm:$0xff]  ;;  %v5440_v2 = vld [vmem:[%s7206_s1 + $0x28] sm:$0xff]  ;;  %vm279_vm0 = vsmask.f32 3328 }
   0xd   : > { %5598 = vmatpush.bf16.msra.mxu1 %v5442_v0  ;;  %5599 = vmatpush.bf16.msra.mxu2 %v5442_v0  ;;  %vm280_vm1 = vsmask.f32 7440  ;;  %v5439_v6 = vld [vmem:[%s7206_s1 + $0x20] sm:$0xff]  ;;  %v5446_v30 = vld [vmem:[%s7206_s1 + $0x58] sm:$0xff]  ;;  %vm747_vm3 = vcmask 523264   ;;  %vm1174_vm4 = vcmask 1042432  }
   0xe   : > { %s7222_s12 = smov (!%p202_p4, %s5703_s12), 1  ;;  %5600 = vmatpush.bf16.msra.mxu3 %v5442_v0  ;;  %800 = vmatpush.bf16.msra.mxu0 %v5442_v0  ;;  %v5466_v31 = vld [vmem:[%s7206_s1 + $0x78] sm:$0xff]  ;;  %vm5787_vm2 = vmor %vm279_vm0, %vm280_vm1  ;;  %vm1175_vm5 = vcmask 1046532  }
   0xf   : > { %s5610_s20 = smul.u32 216, %s7222_s12  ;;  %v5438_v36 = vld [vmem:[%s7206_s1 + $0x18] sm:$0xff]  ;;  %vm6005_vm6 = vmor %vm1174_vm4, %vm1175_vm5  ;;  %s5418_s28 = sshll.u32 %s7222_s12, 7 }
  0x10   : > { %v5470_v37 = vld [vmem:[%s7206_s1 + $0x98] sm:$0xff]  ;;  %s6930_s30 = scalar_lea.vmem %s7208_s3, %s5418_s28 }
  0x11   : > { %5601 = vmatpush.bf16.msra.mxu1 %v5441_v1  ;;  %5602 = vmatpush.bf16.msra.mxu2 %v5441_v1  ;;  %s5766_s25 = scalar_lea.vmem %s7205_s0, %s5610_s20 }
  0x12   : > { %5603 = vmatpush.bf16.msra.mxu3 %v5441_v1  ;;  %801 = vmatpush.bf16.msra.mxu0 %v5441_v1  ;;  %v231_v3 = vld [vmem:[%s5766_s25 + $0x30] sm:$0xf]  ;;  %v232_v4 = vld [vmem:[%s5766_s25 + $0x34] sm:$0xf]  ;;  %v267_v5 = vld [vmem:[%s5766_s25 + $0x38] sm:$0x1] }
  0x13   : > { %v379_v7 = vshrl.u32 %v231_v3, 16  ;;  %v382_v8 = vshll.u32 %v231_v3, 16  ;;  %v388_v9 = vshll.u32 %v232_v4, 16  ;;  %v392_v10 = vshrl.u32 %v232_v4, 16  ;;  %v239_v11 = vld [vmem:[%s5766_s25 + $0x60] sm:$0xf] }
  0x14   : > { %v398_v12 = vshll.u32 %v267_v5, 16  ;;  %v240_v13 = vld [vmem:[%s5766_s25 + $0x64] sm:$0xf]  ;;  %v271_v14 = vld [vmem:[%s5766_s25 + $0x68] sm:$0x1]  ;;  %v475_v15 = vshrl.u32 %v239_v11, 16 }
  0x15   : > { %5604 = vmatpush.bf16.msra.mxu1 %v5440_v2  ;;  %5605 = vmatpush.bf16.msra.mxu2 %v5440_v2  ;;  %v381_v16 = vrot.slane %v379_v7, 4  ;;  %v384_v17 = vrot.slane %v382_v8, 5  ;;  %v390_v18 = vrot.slane %v388_v9, 5  ;;  %v394_v19 = vrot.slane %v392_v10, 4  ;;  %v247_v20 = vld [vmem:[%s5766_s25 + $0x90] sm:$0xf] }
  0x16   : > { %5606 = vmatpush.bf16.msra.mxu3 %v5440_v2  ;;  %802 = vmatpush.bf16.msra.mxu0 %v5440_v2  ;;  %v400_v21 = vrot.slane %v398_v12, 5  ;;  %v477_v22 = vrot.slane %v475_v15, 4  ;;  %v478_v23 = vshll.u32 %v239_v11, 16  ;;  %v484_v24 = vshll.u32 %v240_v13, 16  ;;  %v248_v29 = vld [vmem:[%s5766_s25 + $0x94] sm:$0xf] }
  0x17   : > { %v385_v25 = vor.u32 %v384_v17, %v381_v16  ;;  %v395_v26 = vor.u32 %v394_v19, %v390_v18  ;;  %v488_v27 = vshrl.u32 %v240_v13, 16  ;;  %v494_v28 = vshll.u32 %v271_v14, 16  ;;  %v275_v43 = vld [vmem:[%s5766_s25 + $0x98] sm:$0x1]  ;;  %v223_v59 = vld [vmem:[%s5766_s25] sm:$0xf] }
  0x18   : > { %v480_v33 = vrot.slane %v478_v23, 5  ;;  %v486_v34 = vrot.slane %v484_v24, 5  ;;  %v571_v35 = vshrl.u32 %v247_v20, 16  ;;  %v574_v45 = vshll.u32 %v247_v20, 16  ;;  %v5806_v63 = vld [vmem:[%s5766_s25 + $0x4] sm:$0xf] }
  0x19   : > { %5607 = vmatpush.bf16.msra.mxu1 %v5439_v6  ;;  %5608 = vmatpush.bf16.msra.mxu2 %v5439_v6  ;;  %v386_v38 = vrot.slane %v385_v25, 4  ;;  %v396_v39 = vrot.slane %v395_v26, 4  ;;  %v490_v40 = vrot.slane %v488_v27, 4  ;;  %v496_v41 = vrot.slane %v494_v28, 5  ;;  %v5809_v0 = vld [vmem:[%s5766_s25 + $0x8] sm:$0x1] }
  0x1a   : > { %5609 = vmatpush.bf16.msra.mxu3 %v5439_v6  ;;  %803 = vmatpush.bf16.msra.mxu0 %v5439_v6  ;;  %v481_v42 = vor.u32 %v480_v33, %v477_v22  ;;  %v573_v44 = vrot.slane %v571_v35, 4  ;;  %v580_v46 = vshll.u32 %v248_v29, 16  ;;  %v584_v50 = vshrl.u32 %v248_v29, 16  ;;  %v5445_v1 = vld [vmem:[%s7206_s1 + $0x50] sm:$0xff]  ;;  %v233_v10 = vld [vmem:[%s5766_s25 + $0x3c] sm:$0xf] }
  0x1b   : > { %v391_v47 = vsel %vm5787_vm2, %v386_v38, %v390_v18  ;;  %v401_v48 = vsel %vm5787_vm2, %v396_v39, %v400_v21  ;;  %v491_v49 = vor.u32 %v490_v40, %v486_v34  ;;  %v576_v54 = vrot.slane %v574_v45, 5  ;;  %v234_v15 = vld [vmem:[%s5766_s25 + $0x40] sm:$0xf]  ;;  %v5465_v20 = vld [vmem:[%s7206_s1 + $0x70] sm:$0xff]  ;;  %v268_v27 = vld [vmem:[%s5766_s25 + $0x44] sm:$0x1] }
  0x1c   : > { %v683_v51 = vunpack.c.l.b16 %v391_v47  ;;  %v684_v52 = vunpack.c.l.b16 %v401_v48  ;;  %v482_v53 = vrot.slane %v481_v42, 4  ;;  %v582_v56 = vrot.slane %v580_v46, 5  ;;  %v5437_v21 = vld [vmem:[%s7206_s1 + $0x10] sm:$0xff] }
  0x1d   : > { %1422 = vmatpush.bf16.msrb.mxu2 %v5446_v30  ;;  %1041 = vmatpush.bf16.msrb.mxu1 %v5438_v36  ;;  %v492_v55 = vrot.slane %v491_v49, 4  ;;  %v586_v57 = vrot.slane %v584_v50, 4  ;;  %v590_v58 = vshll.u32 %v275_v43, 16  ;;  %v577_v62 = vor.u32 %v576_v54, %v573_v44  ;;  %v5469_v22 = vld [vmem:[%s7206_s1 + $0x90] sm:$0xff]  ;;  %v241_v36 = vld [vmem:[%s5766_s25 + $0x6c] sm:$0xf] }
  0x1e   : > { %1737 = vmatpush.bf16.msrb.mxu3 %v5466_v31  ;;  %2419 = vmatpush.bf16.msrb.mxu0 %v5470_v37  ;;  %v711_v60 = vpack.c.b16 %v684_v52, %v683_v51  ;;  %v487_v61 = vsel %vm5787_vm2, %v482_v53, %v486_v34  ;;  %v283_v8 = vshrl.u32 %v223_v59, 16  ;;  %v286_v9 = vshll.u32 %v223_v59, 16  ;;  %v242_v45 = vld [vmem:[%s5766_s25 + $0x70] sm:$0xf]  ;;  %v272_v49 = vld [vmem:[%s5766_s25 + $0x74] sm:$0x1] }
  0x1f   : > { %v497_v2 = vsel %vm5787_vm2, %v492_v55, %v496_v41  ;;  %v691_v3 = vunpack.c.l.b16 %v487_v61  ;;  %v587_v4 = vor.u32 %v586_v57, %v582_v56  ;;  %v592_v5 = vrot.slane %v590_v58, 5 }
  0x20   : > { %4660 = vmatmul.msk.bf16.vlgmr.msra.gmra.mxu1 %vm747_vm3, %v711_v60  ;;  %v692_v6 = vunpack.c.l.b16 %v497_v2  ;;  %v578_v7 = vrot.slane %v577_v62, 4  ;;  %v292_v12 = vshll.u32 %v5806_v63, 16  ;;  %v296_v13 = vshrl.u32 %v5806_v63, 16 }
  0x21   : > { %1423 = vmatpush.bf16.msrb.mxu2 %v5445_v1  ;;  %v588_v11 = vrot.slane %v587_v4, 4  ;;  %v302_v14 = vshll.u32 %v5809_v0, 16  ;;  %v285_v18 = vrot.slane %v283_v8, 4  ;;  %v288_v19 = vrot.slane %v286_v9, 5  ;;  %1042 = vmatpush.bf16.msrb.mxu1 %v5437_v21  ;;  %v249_v1 = vld [vmem:[%s5766_s25 + $0x9c] sm:$0xf] }
  0x22   : > { %v715_v16 = vpack.c.b16 %v692_v6, %v691_v3  ;;  %v583_v17 = vsel %vm5787_vm2, %v578_v7, %v582_v56  ;;  %v294_v25 = vrot.slane %v292_v12, 5  ;;  %v298_v26 = vrot.slane %v296_v13, 4  ;;  %1738 = vmatpush.bf16.msrb.mxu3 %v5465_v20  ;;  %2420 = vmatpush.bf16.msrb.mxu0 %v5469_v22 }
  0x23   : > { %v593_v23 = vsel %vm5787_vm2, %v588_v11, %v592_v5  ;;  %v699_v24 = vunpack.c.l.b16 %v583_v17  ;;  %v289_v29 = vor.u32 %v288_v19, %v285_v18  ;;  %v304_v30 = vrot.slane %v302_v14, 5  ;;  %v250_v5 = vld [vmem:[%s5766_s25 + $0xa0] sm:$0xf]  ;;  %v225_v19 = vld [vmem:[%s5766_s25 + $0xc] sm:$0xf] }
  0x24   : > { %4664 = vmatmul.msk.bf16.vlgmr.msra.gmra.mxu2 %vm747_vm3, %v715_v16  ;;  %v700_v28 = vunpack.c.l.b16 %v593_v23  ;;  %v299_v31 = vor.u32 %v298_v26, %v294_v25  ;;  %v403_v33 = vshrl.u32 %v233_v10, 16  ;;  %v406_v34 = vshll.u32 %v233_v10, 16  ;;  %v276_v10 = vld [vmem:[%s5766_s25 + $0xa4] sm:$0x1] }
  0x25   : > { %v412_v35 = vshll.u32 %v234_v15, 16  ;;  %v290_v38 = vrot.slane %v289_v29, 4  ;;  %v416_v39 = vshrl.u32 %v234_v15, 16  ;;  %v422_v40 = vshll.u32 %v268_v27, 16  ;;  %v5860_v29 = vld [vmem:[%s5766_s25 + $0x10] sm:$0xf] }
  0x26   : > { %v719_v37 = vpack.c.b16 %v700_v28, %v699_v24  ;;  %v300_v41 = vrot.slane %v299_v31, 4  ;;  %v405_v42 = vrot.slane %v403_v33, 4  ;;  %v408_v43 = vrot.slane %v406_v34, 5  ;;  %v5444_v24 = vld [vmem:[%s7206_s1 + $0x48] sm:$0xff]  ;;  %v5863_v34 = vld [vmem:[%s5766_s25 + $0x14] sm:$0x1] }
  0x27   : > { %v414_v44 = vrot.slane %v412_v35, 5  ;;  %v295_v46 = vsel %vm5787_vm2, %v290_v38, %v294_v25  ;;  %v418_v47 = vrot.slane %v416_v39, 4  ;;  %v424_v48 = vrot.slane %v422_v40, 5  ;;  %1424 = vmatpush.bf16.msrb.mxu2 %v5444_v24 }
  0x28   : > { %4668 = vmatmul.msk.bf16.vlgmr.msra.gmra.mxu3 %vm747_vm3, %v719_v37  ;;  %v499_v50 = vshrl.u32 %v241_v36, 16  ;;  %v305_v51 = vsel %vm5787_vm2, %v300_v41, %v304_v30  ;;  %v675_v52 = vunpack.c.l.b16 %v295_v46  ;;  %v409_v53 = vor.u32 %v408_v43, %v405_v42  ;;  %v235_v43 = vld [vmem:[%s5766_s25 + $0x48] sm:$0xf] }
  0x29   : > { %v502_v54 = vshll.u32 %v241_v36, 16  ;;  %v676_v55 = vunpack.c.l.b16 %v305_v51  ;;  %v419_v56 = vor.u32 %v418_v47, %v414_v44  ;;  %v508_v58 = vshll.u32 %v242_v45, 16 }
  0x2a   : > { %v501_v57 = vrot.slane %v499_v50, 4  ;;  %v410_v59 = vrot.slane %v409_v53, 4  ;;  %v512_v61 = vshrl.u32 %v242_v45, 16  ;;  %v518_v62 = vshll.u32 %v272_v49, 16  ;;  %v5464_v49 = vld [vmem:[%s7206_s1 + $0x68] sm:$0xff] }
  0x2b   : > { %v504_v60 = vrot.slane %v502_v54, 5  ;;  %v707_v2 = vpack.c.b16 %v676_v55, %v675_v52  ;;  %v420_v3 = vrot.slane %v419_v56, 4  ;;  %v510_v4 = vrot.slane %v508_v58, 5  ;;  %v5436_v50 = vld [vmem:[%s7206_s1 + $0x8] sm:$0xff]  ;;  %1739 = vmatpush.bf16.msrb.mxu3 %v5464_v49 }
  0x2c   : > { %v415_v6 = vsel %vm5787_vm2, %v410_v59, %v414_v44  ;;  %v514_v8 = vrot.slane %v512_v61, 4  ;;  %v520_v9 = vrot.slane %v518_v62, 5  ;;  %v595_v13 = vshrl.u32 %v249_v1, 16  ;;  %v5871_v44 = vld [vmem:[%s5766_s25 + $0x4c] sm:$0xf]  ;;  %1043 = vmatpush.bf16.msrb.mxu1 %v5436_v50 }
  0x2d   : > { %v505_v7 = vor.u32 %v504_v60, %v501_v57  ;;  %4656 = vmatmul.msk.bf16.vlgmr.msra.gmra.mxu0 %vm747_vm3, %v707_v2  ;;  %v425_v11 = vsel %vm5787_vm2, %v420_v3, %v424_v48  ;;  %v685_v12 = vunpack.c.l.b16 %v415_v6  ;;  %v598_v14 = vshll.u32 %v249_v1, 16  ;;  %v5468_v55 = vld [vmem:[%s7206_s1 + $0x88] sm:$0xff]  ;;  %v5887_v60 = vld [vmem:[%s5766_s25 + $0x50] sm:$0x1] }
  0x2e   : > { %v686_v15 = vunpack.c.l.b16 %v425_v11  ;;  %v515_v17 = vor.u32 %v514_v8, %v510_v4  ;;  %v604_v18 = vshll.u32 %v250_v5, 16  ;;  %v597_v20 = vrot.slane %v595_v13, 4  ;;  %2421 = vmatpush.bf16.msrb.mxu0 %v5468_v55 }
  0x2f   : > { %v506_v16 = vrot.slane %v505_v7, 4  ;;  %v600_v21 = vrot.slane %v598_v14, 5  ;;  %v608_v22 = vshrl.u32 %v250_v5, 16  ;;  %v614_v23 = vshll.u32 %v276_v10, 16  ;;  %v243_v7 = vld [vmem:[%s5766_s25 + $0x78] sm:$0xf] }
  0x30   : > { %v712_v25 = vpack.c.b16 %v686_v15, %v685_v12  ;;  %v516_v27 = vrot.slane %v515_v17, 4  ;;  %v606_v28 = vrot.slane %v604_v18, 5  ;;  %v307_v37 = vshrl.u32 %v225_v19, 16  ;;  %v244_v12 = vld [vmem:[%s5766_s25 + $0x7c] sm:$0xf] }
  0x31   : > { %v511_v26 = vsel %vm5787_vm2, %v506_v16, %v510_v4  ;;  %v601_v31 = vor.u32 %v600_v21, %v597_v20  ;;  %v610_v33 = vrot.slane %v608_v22, 4  ;;  %v616_v36 = vrot.slane %v614_v23, 5  ;;  %v273_v20 = vld [vmem:[%s5766_s25 + $0x80] sm:$0x1] }
  0x32   : > { %v693_v30 = vunpack.c.l.b16 %v511_v26  ;;  %4661 = vmatmul.msk.bf16.gmra.mxu1 %vm747_vm3, %v712_v25  ;;  %v521_v35 = vsel %vm5787_vm2, %v516_v27, %v520_v9  ;;  %v310_v38 = vshll.u32 %v225_v19, 16  ;;  %v316_v42 = vshll.u32 %v5860_v29, 16 }
  0x33   : > { %v694_v39 = vunpack.c.l.b16 %v521_v35  ;;  %v602_v40 = vrot.slane %v601_v31, 4  ;;  %v611_v41 = vor.u32 %v610_v33, %v606_v28  ;;  %v309_v45 = vrot.slane %v307_v37, 4  ;;  %v251_v37 = vld [vmem:[%s5766_s25 + $0xa8] sm:$0xf] }
  0x34   : > { %v312_v46 = vrot.slane %v310_v38, 5  ;;  %v320_v47 = vshrl.u32 %v5860_v29, 16  ;;  %v326_v48 = vshll.u32 %v5863_v34, 16  ;;  %v318_v54 = vrot.slane %v316_v42, 5  ;;  %v277_v42 = vld [vmem:[%s5766_s25 + $0xb0] sm:$0x1] }
  0x35   : > { %v716_v51 = vpack.c.b16 %v694_v39, %v693_v30  ;;  %v607_v52 = vsel %vm5787_vm2, %v602_v40, %v606_v28  ;;  %v612_v53 = vrot.slane %v611_v41, 4  ;;  %v427_v62 = vshrl.u32 %v235_v43, 16  ;;  %v252_v41 = vld [vmem:[%s5766_s25 + $0xac] sm:$0xf] }
  0x36   : > { %v701_v56 = vunpack.c.l.b16 %v607_v52  ;;  %v313_v57 = vor.u32 %v312_v46, %v309_v45  ;;  %v322_v58 = vrot.slane %v320_v47, 4  ;;  %v328_v59 = vrot.slane %v326_v48, 5 }
  0x37   : > { %4665 = vmatmul.msk.bf16.gmra.mxu2 %vm747_vm3, %v716_v51  ;;  %v617_v61 = vsel %vm5787_vm2, %v612_v53, %v616_v36  ;;  %v430_v1 = vshll.u32 %v235_v43, 16  ;;  %v436_v2 = vshll.u32 %v5871_v44, 16  ;;  %v440_v6 = vshrl.u32 %v5871_v44, 16 }
  0x38   : > { %v702_v3 = vunpack.c.l.b16 %v617_v61  ;;  %v314_v4 = vrot.slane %v313_v57, 4  ;;  %v323_v5 = vor.u32 %v322_v58, %v318_v54  ;;  %v429_v8 = vrot.slane %v427_v62, 4  ;;  %v227_v61 = vld [vmem:[%s5766_s25 + $0x18] sm:$0xf]  ;;  %v5443_v62 = vld [vmem:[%s7206_s1 + $0x40] sm:$0xff] }
  0x39   : > { %v432_v9 = vrot.slane %v430_v1, 5  ;;  %v438_v10 = vrot.slane %v436_v2, 5  ;;  %v446_v11 = vshll.u32 %v5887_v60, 16  ;;  %v442_v16 = vrot.slane %v440_v6, 4  ;;  %1425 = vmatpush.bf16.msrb.mxu2 %v5443_v62 }
  0x3a   : > { %v720_v13 = vpack.c.b16 %v702_v3, %v701_v56  ;;  %v319_v14 = vsel %vm5787_vm2, %v314_v4, %v318_v54  ;;  %v324_v15 = vrot.slane %v323_v5, 4  ;;  %v523_v21 = vshrl.u32 %v243_v7, 16  ;;  %v5918_v4 = vld [vmem:[%s5766_s25 + $0x1c] sm:$0xf]  ;;  %v5921_v5 = vld [vmem:[%s5766_s25 + $0x20] sm:$0x1] }
  0x3b   : > { %v677_v17 = vunpack.c.l.b16 %v319_v14  ;;  %v433_v18 = vor.u32 %v432_v9, %v429_v8  ;;  %v448_v19 = vrot.slane %v446_v11, 5  ;;  %v443_v23 = vor.u32 %v442_v16, %v438_v10  ;;  %v237_v14 = vld [vmem:[%s5766_s25 + $0x54] sm:$0xf] }
  0x3c   : > { %4669 = vmatmul.msk.bf16.gmra.mxu3 %vm747_vm3, %v720_v13  ;;  %v329_v22 = vsel %vm5787_vm2, %v324_v15, %v328_v59  ;;  %v526_v24 = vshll.u32 %v243_v7, 16  ;;  %v532_v25 = vshll.u32 %v244_v12, 16  ;;  %v525_v28 = vrot.slane %v523_v21, 4 }
  0x3d   : > { %v678_v26 = vunpack.c.l.b16 %v329_v22  ;;  %v434_v27 = vrot.slane %v433_v18, 4  ;;  %v536_v30 = vshrl.u32 %v244_v12, 16  ;;  %v444_v31 = vrot.slane %v443_v23, 4 }
  0x3e   : > { %v528_v33 = vrot.slane %v526_v24, 5  ;;  %v534_v35 = vrot.slane %v532_v25, 5  ;;  %v542_v36 = vshll.u32 %v273_v20, 16  ;;  %v619_v50 = vshrl.u32 %v251_v37, 16  ;;  %v5463_v24 = vld [vmem:[%s7206_s1 + $0x60] sm:$0xff] }
  0x3f   : > { %v708_v38 = vpack.c.b16 %v678_v26, %v677_v17  ;;  %v439_v39 = vsel %vm5787_vm2, %v434_v27, %v438_v10  ;;  %v538_v40 = vrot.slane %v536_v30, 4  ;;  %v449_v43 = vsel %vm5787_vm2, %v444_v31, %v448_v19  ;;  %v5931_v19 = vld [vmem:[%s5766_s25 + $0x58] sm:$0xf]  ;;  %v5435_v25 = vld [vmem:[%s7206_s1] sm:$0xff]  ;;  %1740 = vmatpush.bf16.msrb.mxu3 %v5463_v24 }
  0x40   : > { %v687_v45 = vunpack.c.l.b16 %v439_v39  ;;  %v529_v46 = vor.u32 %v528_v33, %v525_v28  ;;  %v544_v47 = vrot.slane %v542_v36, 5  ;;  %v688_v48 = vunpack.c.l.b16 %v449_v43  ;;  %v5467_v26 = vld [vmem:[%s7206_s1 + $0x80] sm:$0xff]  ;;  %v5945_v33 = vld [vmem:[%s5766_s25 + $0x5c] sm:$0x1]  ;;  %1044 = vmatpush.bf16.msrb.mxu1 %v5435_v25 }
  0x41   : > { %4657 = vmatmul.msk.bf16.gmra.mxu0 %vm747_vm3, %v708_v38  ;;  %v539_v49 = vor.u32 %v538_v40, %v534_v35  ;;  %v622_v51 = vshll.u32 %v251_v37, 16  ;;  %v628_v53 = vshll.u32 %v252_v41, 16  ;;  %v632_v54 = vshrl.u32 %v252_v41, 16  ;;  %v245_v43 = vld [vmem:[%s5766_s25 + $0x84] sm:$0xf] }
  0x42   : > { %v530_v52 = vrot.slane %v529_v46, 4  ;;  %v638_v55 = vshll.u32 %v277_v42, 16  ;;  %v713_v56 = vpack.c.b16 %v688_v48, %v687_v45  ;;  %v621_v58 = vrot.slane %v619_v50, 4  ;;  %2422 = vmatpush.bf16.msrb.mxu0 %v5467_v26 }
  0x43   : > { %v540_v57 = vrot.slane %v539_v49, 4  ;;  %v624_v59 = vrot.slane %v622_v51, 5  ;;  %v630_v2 = vrot.slane %v628_v53, 5  ;;  %v634_v3 = vrot.slane %v632_v54, 4  ;;  %v246_v53 = vld [vmem:[%s5766_s25 + $0x88] sm:$0xf] }
  0x44   : > { %v535_v1 = vsel %vm5787_vm2, %v530_v52, %v534_v35  ;;  %4662 = vmatmul.msk.bf16.gmra.mxu1 %vm747_vm3, %v713_v56  ;;  %v640_v9 = vrot.slane %v638_v55, 5  ;;  %v331_v12 = vshrl.u32 %v227_v61, 16  ;;  %v334_v13 = vshll.u32 %v227_v61, 16 }
  0x45   : > { %v545_v6 = vsel %vm5787_vm2, %v540_v57, %v544_v47  ;;  %v695_v7 = vunpack.c.l.b16 %v535_v1  ;;  %v625_v8 = vor.u32 %v624_v59, %v621_v58  ;;  %v635_v11 = vor.u32 %v634_v3, %v630_v2  ;;  %v274_v57 = vld [vmem:[%s5766_s25 + $0x8c] sm:$0x1] }
  0x46   : > { %v696_v10 = vunpack.c.l.b16 %v545_v6  ;;  %v340_v16 = vshll.u32 %v5918_v4, 16  ;;  %v344_v17 = vshrl.u32 %v5918_v4, 16  ;;  %v350_v18 = vshll.u32 %v5921_v5, 16 }
  0x47   : > { %v626_v15 = vrot.slane %v625_v8, 4  ;;  %v636_v21 = vrot.slane %v635_v11, 4  ;;  %v333_v22 = vrot.slane %v331_v12, 4  ;;  %v336_v23 = vrot.slane %v334_v13, 5  ;;  %v253_v12 = vld [vmem:[%s5766_s25 + $0xb4] sm:$0xf] }
  0x48   : > { %v717_v20 = vpack.c.b16 %v696_v10, %v695_v7  ;;  %v342_v28 = vrot.slane %v340_v16, 5  ;;  %v346_v30 = vrot.slane %v344_v17, 4  ;;  %v352_v31 = vrot.slane %v350_v18, 5  ;;  %v254_v16 = vld [vmem:[%s5766_s25 + $0xb8] sm:$0xf] }
  0x49   : > { %v631_v27 = vsel %vm5787_vm2, %v626_v15, %v630_v2  ;;  %v641_v35 = vsel %vm5787_vm2, %v636_v21, %v640_v9  ;;  %v337_v37 = vor.u32 %v336_v23, %v333_v22  ;;  %v451_v38 = vshrl.u32 %v237_v14, 16  ;;  %v278_v22 = vld [vmem:[%s5766_s25 + $0xbc] sm:$0x1] }
  0x4a   : > { %4666 = vmatmul.msk.bf16.gmra.mxu2 %vm747_vm3, %v717_v20  ;;  %v703_v36 = vunpack.c.l.b16 %v631_v27  ;;  %v704_v39 = vunpack.c.l.b16 %v641_v35  ;;  %v347_v40 = vor.u32 %v346_v30, %v342_v28  ;;  %v454_v41 = vshll.u32 %v237_v14, 16  ;;  %v5494_v23 = vld [vmem:[%s7206_s1 + $0xd8] sm:$0xff] }
  0x4b   : > { %v460_v42 = vshll.u32 %v5931_v19, 16  ;;  %v338_v45 = vrot.slane %v337_v37, 4  ;;  %v453_v46 = vrot.slane %v451_v38, 4  ;;  %v464_v47 = vshrl.u32 %v5931_v19, 16  ;;  %3160 = vmatpush.bf16.msra.mxu2 %v5494_v23 }
  0x4c   : > { %v470_v48 = vshll.u32 %v5945_v33, 16  ;;  %v721_v49 = vpack.c.b16 %v704_v39, %v703_v36  ;;  %v348_v50 = vrot.slane %v347_v40, 4  ;;  %v456_v51 = vrot.slane %v454_v41, 5  ;;  %v229_v40 = vld [vmem:[%s5766_s25 + $0x24] sm:$0xf] }
  0x4d   : > { %v462_v52 = vrot.slane %v460_v42, 5  ;;  %v343_v54 = vsel %vm5787_vm2, %v338_v45, %v342_v28  ;;  %v466_v55 = vrot.slane %v464_v47, 4  ;;  %v547_v58 = vshrl.u32 %v245_v43, 16  ;;  %v5979_v47 = vld [vmem:[%s5766_s25 + $0x2c] sm:$0x1] }
  0x4e   : > { %v472_v56 = vrot.slane %v470_v48, 5  ;;  %4670 = vmatmul.msk.bf16.gmra.mxu3 %vm747_vm3, %v721_v49  ;;  %v353_v59 = vsel %vm5787_vm2, %v348_v50, %v352_v31  ;;  %v679_v61 = vunpack.c.l.b16 %v343_v54  ;;  %v457_v62 = vor.u32 %v456_v51, %v453_v46  ;;  %v5976_v46 = vld [vmem:[%s5766_s25 + $0x28] sm:$0xf]  ;;  %v5502_v54 = vld [vmem:[%s7206_s1 + $0x118] sm:$0xff] }
  0x4f   : > { %v550_v1 = vshll.u32 %v245_v43, 16  ;;  %v680_v2 = vunpack.c.l.b16 %v353_v59  ;;  %v467_v3 = vor.u32 %v466_v55, %v462_v52  ;;  %v549_v6 = vrot.slane %v547_v58, 4  ;;  %4268 = vmatpush.bf16.msra.mxu0 %v5502_v54 }
  0x50   : > { %v556_v7 = vshll.u32 %v246_v53, 16  ;;  %v458_v8 = vrot.slane %v457_v62, 4  ;;  %v560_v10 = vshrl.u32 %v246_v53, 16  ;;  %v566_v11 = vshll.u32 %v274_v57, 16  ;;  %v5474_v53 = vld [vmem:[%s7206_s1 + $0xb8] sm:$0xff] }
  0x51   : > { %v552_v9 = vrot.slane %v550_v1, 5  ;;  %v709_v13 = vpack.c.b16 %v680_v2, %v679_v61  ;;  %v468_v14 = vrot.slane %v467_v3, 4  ;;  %v643_v26 = vshrl.u32 %v253_v12, 16  ;;  %2845 = vmatpush.bf16.msra.mxu1 %v5474_v53  ;;  %v5419_v53 = vld [vmem:[%s5766_s25] sm:$0xff] }
  0x52   : > { %v558_v15 = vrot.slane %v556_v7, 5  ;;  %v463_v17 = vsel %vm5787_vm2, %v458_v8, %v462_v52  ;;  %v562_v20 = vrot.slane %v560_v10, 4  ;;  %v568_v21 = vrot.slane %v566_v11, 5  ;;  %v5498_v52 = vld [vmem:[%s7206_s1 + $0xf8] sm:$0xff]  ;;  %v1126_v8 = vld [vmem:[%s5766_s25] sm:$0xe] }
  0x53   : > { %v553_v18 = vor.u32 %v552_v9, %v549_v6  ;;  %4658 = vmatmul.msk.bf16.gmra.mxu0 %vm747_vm3, %v709_v13  ;;  %v473_v24 = vsel %vm5787_vm2, %v468_v14, %v472_v56  ;;  %v689_v25 = vunpack.c.l.b16 %v463_v17  ;;  %v646_v27 = vshll.u32 %v253_v12, 16  ;;  %3842 = vmatpush.bf16.msra.mxu3 %v5498_v52  ;;  %v4960_v17 = vld [vmem:[%s5766_s25 + $0xc] sm:$0xf] }
  0x54   : > { %v690_v28 = vunpack.c.l.b16 %v473_v24  ;;  %v563_v31 = vor.u32 %v562_v20, %v558_v15  ;;  %v652_v35 = vshll.u32 %v254_v16, 16  ;;  %v645_v36 = vrot.slane %v643_v26, 4 }
  0x55   : > { %v554_v30 = vrot.slane %v553_v18, 4  ;;  %v648_v37 = vrot.slane %v646_v27, 5  ;;  %v656_v38 = vshrl.u32 %v254_v16, 16  ;;  %v662_v39 = vshll.u32 %v278_v22, 16  ;;  %v4961_v18 = vld [vmem:[%s5766_s25 + $0x10] sm:$0xf] }
  0x56   : > { %v714_v41 = vpack.c.b16 %v690_v28, %v689_v25  ;;  %v564_v43 = vrot.slane %v563_v31, 4  ;;  %v654_v45 = vrot.slane %v652_v35, 5  ;;  %v1182_v48 = vrot.slane %v5809_v0, 5  ;;  %v4963_v0 = vld [vmem:[%s5766_s25 + $0x18] sm:$0xf] }
  0x57   : > { %v559_v42 = vsel %vm5787_vm2, %v554_v30, %v558_v15  ;;  %v649_v50 = vor.u32 %v648_v37, %v645_v36  ;;  %v658_v51 = vrot.slane %v656_v38, 4  ;;  %v664_v56 = vrot.slane %v662_v39, 5 }
  0x58   : > { %v697_v49 = vunpack.c.l.b16 %v559_v42  ;;  %4663 = vmatmul.msk.bf16.gmra.mxu1 %vm747_vm3, %v714_v41  ;;  %v569_v55 = vsel %vm5787_vm2, %v564_v43, %v568_v21  ;;  %v355_v57 = vshrl.u32 %v229_v40, 16  ;;  %v358_v58 = vshll.u32 %v229_v40, 16  ;;  %v4962_v42 = vld [vmem:[%s5766_s25 + $0x14] sm:$0x1] }
  0x59   : > { %v698_v59 = vunpack.c.l.b16 %v569_v55  ;;  %v650_v61 = vrot.slane %v649_v50, 4  ;;  %v659_v62 = vor.u32 %v658_v51, %v654_v45  ;;  %v364_v1 = vshll.u32 %v5976_v46, 16 }
  0x5a   : > { %v357_v2 = vrot.slane %v355_v57, 4  ;;  %v360_v3 = vrot.slane %v358_v58, 5  ;;  %v368_v6 = vshrl.u32 %v5976_v46, 16  ;;  %v374_v7 = vshll.u32 %v5979_v47, 16 }
  0x5b   : > { %v718_v9 = vpack.c.b16 %v698_v59, %v697_v49  ;;  %v655_v10 = vsel %vm5787_vm2, %v650_v61, %v654_v45  ;;  %v660_v11 = vrot.slane %v659_v62, 4  ;;  %v366_v12 = vrot.slane %v364_v1, 5 }
  0x5c   : > { %v705_v13 = vunpack.c.l.b16 %v655_v10  ;;  %v361_v14 = vor.u32 %v360_v3, %v357_v2  ;;  %v370_v15 = vrot.slane %v368_v6, 4  ;;  %v376_v16 = vrot.slane %v374_v7, 5  ;;  %v4964_v2 = vld [vmem:[%s5766_s25 + $0x1c] sm:$0xf]  ;;  %v1127_v3 = vld [vmem:[%s5766_s25 + $0xc] sm:$0xe] }
  0x5d   : > { %4667 = vmatmul.msk.bf16.gmra.mxu2 %vm747_vm3, %v718_v9  ;;  %v665_v20 = vsel %vm5787_vm2, %v660_v11, %v664_v56  ;;  %v4768_v21 = vrot.slane %v1126_v8, 9  ;;  %v1179_v26 = vrot.slane %v5806_v63, 5  ;;  %v1903_v27 = vshrl.u32 %v4960_v17, 16 }
  0x5e   : > { %v706_v22 = vunpack.c.l.b16 %v665_v20  ;;  %v362_v23 = vrot.slane %v361_v14, 4  ;;  %v371_v24 = vor.u32 %v370_v15, %v366_v12  ;;  %v1906_v28 = vshll.u32 %v4960_v17, 16 }
  0x5f   : > { %v1912_v30 = vshll.u32 %v4961_v18, 16  ;;  %v1916_v31 = vshrl.u32 %v4961_v18, 16  ;;  %v1180_v38 = vsel %vm6005_vm6, %v4768_v21, %v1179_v26  ;;  %v1181_v40 = vrot.slane %v1179_v26, 4 }
  0x60   : > { %v722_v35 = vpack.c.b16 %v706_v22, %v705_v13  ;;  %v367_v36 = vsel %vm5787_vm2, %v362_v23, %v366_v12  ;;  %v372_v37 = vrot.slane %v371_v24, 4  ;;  %v1298_v41 = vunpack.c.l.b16 %v1180_v38  ;;  %v5447_v12 = vld [vmem:[%s5766_s25 + $0xc] sm:$0xff]  ;;  %v4965_v22 = vld [vmem:[%s5766_s25 + $0x20] sm:$0x1] }
  0x61   : > { %v681_v39 = vunpack.c.l.b16 %v367_v36  ;;  %v1905_v43 = vrot.slane %v1903_v27, 4  ;;  %v1908_v45 = vrot.slane %v1906_v28, 5  ;;  %v1914_v49 = vrot.slane %v1912_v30, 5  ;;  %v5420_v27 = vld [vmem:[%s5766_s25 + $0xc] sm:$0xff] }
  0x62   : > { %4671 = vmatmul.msk.bf16.gmra.mxu3 %vm747_vm3, %v722_v35  ;;  %v377_v63 = vsel %vm5787_vm2, %v372_v37, %v376_v16  ;;  %v1918_v50 = vrot.slane %v1916_v31, 4  ;;  %v1183_v52 = vsel %vm6005_vm6, %v1181_v40, %v1182_v48  ;;  %v1922_v57 = vshll.u32 %v4962_v42, 16  ;;  %v4966_v37 = vld [vmem:[%s5766_s25 + $0x24] sm:$0xf]  ;;  %v4967_v40 = vld [vmem:[%s5766_s25 + $0x28] sm:$0xf] }
  0x63   : > { %v682_v51 = vunpack.c.l.b16 %v377_v63  ;;  %v1299_v54 = vunpack.c.l.b16 %v1183_v52  ;;  %v1909_v55 = vor.u32 %v1908_v45, %v1905_v43  ;;  %v1186_v48 = vrot.slane %v5860_v29, 5  ;;  %v1128_v42 = vld [vmem:[%s5766_s25 + $0x18] sm:$0xe] }
  0x64   : > { %v1919_v56 = vor.u32 %v1918_v50, %v1914_v49  ;;  %v1924_v1 = vrot.slane %v1922_v57, 5  ;;  %v1927_v6 = vshrl.u32 %v4963_v0, 16  ;;  %v1930_v7 = vshll.u32 %v4963_v0, 16 }
  0x65   : > { %v710_v58 = vpack.c.b16 %v682_v51, %v681_v39  ;;  %v1330_v59 = vpack.c.b16 %v1299_v54, %v1298_v41  ;;  %v1910_v61 = vrot.slane %v1909_v55, 4  ;;  %v1936_v10 = vshll.u32 %v4964_v2, 16  ;;  %v5448_v54 = vld [vmem:[%s5766_s25 + $0x18] sm:$0xff] }
  0x66   : > { %v1920_v62 = vrot.slane %v1919_v56, 4  ;;  %v1940_v11 = vshrl.u32 %v4964_v2, 16  ;;  %v4769_v13 = vrot.slane %v1127_v3, 9  ;;  %v1188_v14 = vrot.slane %v1186_v48, 4 }
  0x67   : > { %4659 = vmatmul.msk.bf16.gmra.mxu0 %vm747_vm3, %v710_v58  ;;  %v1915_v8 = vsel %vm5787_vm2, %v1910_v61, %v1914_v49  ;;  %v1189_v29 = vrot.slane %v5863_v34, 5  ;;  %v1929_v17 = vrot.slane %v1927_v6, 4  ;;  %v1932_v18 = vrot.slane %v1930_v7, 5  ;;  %v5421_v7 = vld [vmem:[%s5766_s25 + $0x18] sm:$0xff] }
  0x68   : > { %4752 = vmatmul.msk.bf16.vlgmr.msrb.gmra.mxu1 %vm747_vm3, %v5419_v53  ;;  %v1925_v9 = vsel %vm5787_vm2, %v1920_v62, %v1924_v1  ;;  %v2295_v15 = vunpack.c.l.b16 %v1915_v8  ;;  %v1938_v20 = vrot.slane %v1936_v10, 5  ;;  %v1942_v21 = vrot.slane %v1940_v11, 4  ;;  %v4968_v1 = vld [vmem:[%s5766_s25 + $0x2c] sm:$0x1] }
  0x69   : > { %v2296_v16 = vunpack.c.l.b16 %v1925_v9  ;;  %v1187_v23 = vsel %vm6005_vm6, %v4769_v13, %v1186_v48  ;;  %v1190_v24 = vsel %vm6005_vm6, %v1188_v14, %v1189_v29  ;;  %v1933_v34 = vor.u32 %v1932_v18, %v1929_v17  ;;  %v4969_v14 = vld [vmem:[%s5766_s25 + $0x30] sm:$0xf]  ;;  %v4970_v29 = vld [vmem:[%s5766_s25 + $0x34] sm:$0xf]  ;;  %v1129_v18 = vld [vmem:[%s5766_s25 + $0x24] sm:$0xe] }
  0x6a   : > { %v1943_v28 = vor.u32 %v1942_v21, %v1938_v20  ;;  %v1946_v30 = vshll.u32 %v4965_v22, 16  ;;  %v1300_v31 = vunpack.c.l.b16 %v1187_v23  ;;  %v1301_v35 = vunpack.c.l.b16 %v1190_v24  ;;  %v5449_v24 = vld [vmem:[%s5766_s25 + $0x24] sm:$0xff] }
  0x6b   : > { %v2327_v26 = vpack.c.b16 %v2296_v16, %v2295_v15  ;;  %v1934_v36 = vrot.slane %v1933_v34, 4  ;;  %v1193_v43 = vrot.slane %v5918_v4, 5  ;;  %v1951_v63 = vshrl.u32 %v4966_v37, 16 }
  0x6c   : > { %v1944_v38 = vrot.slane %v1943_v28, 4  ;;  %v1948_v39 = vrot.slane %v1946_v30, 5  ;;  %v1331_v41 = vpack.c.b16 %v1301_v35, %v1300_v31  ;;  %v1954_v49 = vshll.u32 %v4966_v37, 16  ;;  %v4971_v37 = vld [vmem:[%s5766_s25 + $0x38] sm:$0x1] }
  0x6d   : > { %4808 = vmatmul.msk.bf16.vlgmr.msrb.gmra.mxu2 %vm747_vm3, %v1330_v59  ;;  %v1939_v45 = vsel %vm5787_vm2, %v1934_v36, %v1938_v20  ;;  %v1960_v50 = vshll.u32 %v4967_v40, 16  ;;  %v1964_v51 = vshrl.u32 %v4967_v40, 16  ;;  %v4770_v53 = vrot.slane %v1128_v42, 9 }
  0x6e   : > { %v1949_v52 = vsel %vm5787_vm2, %v1944_v38, %v1948_v39  ;;  %v2297_v55 = vunpack.c.l.b16 %v1939_v45  ;;  %v1195_v56 = vrot.slane %v1193_v43, 4  ;;  %v1196_v4 = vrot.slane %v5921_v5, 5 }
  0x6f   : > { %v1953_v57 = vrot.slane %v1951_v63, 4  ;;  %v2298_v58 = vunpack.c.l.b16 %v1949_v52  ;;  %v1956_v59 = vrot.slane %v1954_v49, 5  ;;  %v1962_v61 = vrot.slane %v1960_v50, 5  ;;  %v4972_v50 = vld [vmem:[%s5766_s25 + $0x3c] sm:$0xf]  ;;  %v5497_v52 = vld [vmem:[%s7206_s1 + $0xf0] sm:$0xff] }
  0x70   : > { %v1966_v62 = vrot.slane %v1964_v51, 4  ;;  %v1194_v0 = vsel %vm6005_vm6, %v4770_v53, %v1193_v43  ;;  %v1197_v2 = vsel %vm6005_vm6, %v1195_v56, %v1196_v4  ;;  %v1970_v5 = vshll.u32 %v4968_v1, 16  ;;  %v4973_v51 = vld [vmem:[%s5766_s25 + $0x40] sm:$0xf]  ;;  %v5473_v53 = vld [vmem:[%s7206_s1 + $0xb0] sm:$0xff]  ;;  %3843 = vmatpush.bf16.msra.mxu3 %v5497_v52 }
  0x71   : > { %v2328_v48 = vpack.c.b16 %v2298_v58, %v2297_v55  ;;  %v1957_v3 = vor.u32 %v1956_v59, %v1953_v57  ;;  %v1302_v8 = vunpack.c.l.b16 %v1194_v0  ;;  %v1303_v9 = vunpack.c.l.b16 %v1197_v2  ;;  %v5636_v58 = vld [vmem:[%s5766_s25 + $0x34] sm:$0xf]  ;;  %2846 = vmatpush.bf16.msra.mxu1 %v5473_v53  ;;  %v5451_v52 = vld [vmem:[%s5766_s25 + $0x3c] sm:$0xff] }
  0x72   : > { %4944 = vmatmul.msk.bf16.vlgmr.msrb.gmra.mxu3 %vm747_vm3, %v5447_v12  ;;  %v1967_v6 = vor.u32 %v1966_v62, %v1962_v61  ;;  %v1972_v12 = vrot.slane %v1970_v5, 5  ;;  %v1200_v15 = vrot.slane %v5976_v46, 5  ;;  %v1975_v20 = vshrl.u32 %v4969_v14, 16 }
  0x73   : > { %v1958_v10 = vrot.slane %v1957_v3, 4  ;;  %v1332_v13 = vpack.c.b16 %v1303_v9, %v1302_v8  ;;  %v1978_v21 = vshll.u32 %v4969_v14, 16  ;;  %v1984_v22 = vshll.u32 %v4970_v29, 16  ;;  %v5637_v8 = vld [vmem:[%s5766_s25 + $0x38] sm:$0x1] }
  0x74   : > { %v1968_v11 = vrot.slane %v1967_v6, 4  ;;  %v1988_v23 = vshrl.u32 %v4970_v29, 16  ;;  %v1202_v34 = vrot.slane %v1200_v15, 4  ;;  %v1203_v46 = vrot.slane %v5979_v47, 5  ;;  %v5493_v47 = vld [vmem:[%s7206_s1 + $0xd0] sm:$0xff] }
  0x75   : > { %v1963_v16 = vsel %vm5787_vm2, %v1958_v10, %v1962_v61  ;;  %v1977_v30 = vrot.slane %v1975_v20, 4  ;;  %v1980_v31 = vrot.slane %v1978_v21, 5  ;;  %v1986_v35 = vrot.slane %v1984_v22, 5  ;;  %3161 = vmatpush.bf16.msra.mxu2 %v5493_v47  ;;  %v1130_v61 = vld [vmem:[%s5766_s25 + $0x30] sm:$0xe] }
  0x76   : > { %v1973_v17 = vsel %vm5787_vm2, %v1968_v11, %v1972_v12  ;;  %v1990_v36 = vrot.slane %v1988_v23, 4  ;;  %v1204_v39 = vsel %vm6005_vm6, %v1202_v34, %v1203_v46  ;;  %v1994_v63 = vshll.u32 %v4971_v37, 16  ;;  %v5450_v10 = vld [vmem:[%s5766_s25 + $0x30] sm:$0xff] }
  0x77   : > { %5032 = vmatmul.msk.bf16.vlgmr.msrb.gmra.mxu0 %vm747_vm3, %v2327_v26  ;;  %v4771_v26 = vrot.slane %v1129_v18, 9  ;;  %v2300_v28 = vunpack.c.l.b16 %v1973_v17  ;;  %v1981_v42 = vor.u32 %v1980_v31, %v1977_v30  ;;  %v1305_v49 = vunpack.c.l.b16 %v1204_v39 }
  0x78   : > { %4753 = vmatmul.msk.bf16.gmra.mxu1 %vm747_vm3, %v5420_v27  ;;  %v2299_v27 = vunpack.c.l.b16 %v1963_v16  ;;  %v1991_v43 = vor.u32 %v1990_v36, %v1986_v35  ;;  %v1996_v4 = vrot.slane %v1994_v63, 5  ;;  %v1207_v59 = vrot.slane %v5636_v58, 5  ;;  %v4974_v16 = vld [vmem:[%s5766_s25 + $0x44] sm:$0x1]  ;;  %v4976_v36 = vld [vmem:[%s5766_s25 + $0x4c] sm:$0xf] }
  0x79   : > { %v1201_v38 = vsel %vm6005_vm6, %v4771_v26, %v1200_v15  ;;  %v1982_v55 = vrot.slane %v1981_v42, 4  ;;  %v1999_v62 = vshrl.u32 %v4972_v50, 16  ;;  %v2002_v1 = vshll.u32 %v4972_v50, 16 }
  0x7a   : > { %v2329_v40 = vpack.c.b16 %v2300_v28, %v2299_v27  ;;  %v1304_v45 = vunpack.c.l.b16 %v1201_v38  ;;  %v1992_v56 = vrot.slane %v1991_v43, 4  ;;  %v2008_v0 = vshll.u32 %v4973_v51, 16  ;;  %v1131_v43 = vld [vmem:[%s5766_s25 + $0x3c] sm:$0xe] }
  0x7b   : > { %v2012_v2 = vshrl.u32 %v4973_v51, 16  ;;  %v1987_v3 = vsel %vm5787_vm2, %v1982_v55, %v1986_v35  ;;  %v4772_v5 = vrot.slane %v1130_v61, 9  ;;  %v1210_v9 = vrot.slane %v5637_v8, 5  ;;  %v4975_v35 = vld [vmem:[%s5766_s25 + $0x48] sm:$0xf] }
  0x7c   : > { %v1333_v57 = vpack.c.b16 %v1305_v49, %v1304_v45  ;;  %v1997_v6 = vsel %vm5787_vm2, %v1992_v56, %v1996_v4  ;;  %v2001_v11 = vrot.slane %v1999_v62, 4  ;;  %v2004_v12 = vrot.slane %v2002_v1, 5  ;;  %v5639_v4 = vld [vmem:[%s5766_s25 + $0x44] sm:$0x1] }
  0x7d   : > { %4809 = vmatmul.msk.bf16.gmra.mxu2 %vm747_vm3, %v1331_v41  ;;  %v5422_v41 = vld [vmem:[%s5766_s25 + $0x24] sm:$0xff]  ;;  %v2014_v14 = vrot.slane %v2012_v2, 4  ;;  %v2301_v29 = vunpack.c.l.b16 %v1987_v3  ;;  %v2302_v15 = vunpack.c.l.b16 %v1997_v6  ;;  %v1208_v17 = vsel %vm6005_vm6, %v4772_v5, %v1207_v59 }
  0x7e   : > { %v2005_v20 = vor.u32 %v2004_v12, %v2001_v11  ;;  %v2018_v22 = vshll.u32 %v4974_v16, 16  ;;  %v1306_v34 = vunpack.c.l.b16 %v1208_v17  ;;  %v2023_v63 = vshrl.u32 %v4975_v35, 16  ;;  %v5424_v11 = vld [vmem:[%s5766_s25 + $0x3c] sm:$0xff] }
  0x7f   : > { %v2330_v23 = vpack.c.b16 %v2302_v15, %v2301_v29  ;;  %v2026_v45 = vshll.u32 %v4975_v35, 16  ;;  %v2032_v49 = vshll.u32 %v4976_v36, 16  ;;  %v2036_v50 = vshrl.u32 %v4976_v36, 16  ;;  %v5452_v36 = vld [vmem:[%s5766_s25 + $0x48] sm:$0xff] }
  0x80   : > { %v2006_v28 = vrot.slane %v2005_v20, 4  ;;  %v2020_v31 = vrot.slane %v2018_v22, 5  ;;  %v4773_v55 = vrot.slane %v1131_v43, 9  ;;  %v4978_v20 = vld [vmem:[%s5766_s25 + $0x54] sm:$0xf]  ;;  %v1221_v22 = vrot.slane %v5871_v44, 5 }
  0x81   : > { %v2028_v61 = vrot.slane %v2026_v45, 5  ;;  %v2034_v62 = vrot.slane %v2032_v49, 5  ;;  %v2038_v1 = vrot.slane %v2036_v50, 4 }
  0x82   : > { %4945 = vmatmul.msk.bf16.gmra.mxu3 %vm747_vm3, %v5448_v54  ;;  %v5501_v54 = vld [vmem:[%s7206_s1 + $0x110] sm:$0xff] }
  0x83   : > { %4269 = vmatpush.bf16.msra.mxu0 %v5501_v54  ;;  %v2039_v8 = vor.u32 %v2038_v1, %v2034_v62 }
  0x85   : > { %v2040_v29 = vrot.slane %v2039_v8, 4 }
  0x87   : > { %5033 = vmatmul.msk.bf16.gmra.mxu0 %vm747_vm3, %v2328_v48 }
  0x88   : > { %4754 = vmatmul.msk.bf16.gmra.mxu1 %vm747_vm3, %v5421_v7  ;;  %v1209_v7 = vrot.slane %v1207_v59, 4  ;;  %v2025_v59 = vrot.slane %v2023_v63, 4 }
  0x8a   : > { %v1211_v18 = vsel %vm6005_vm6, %v1209_v7, %v1210_v9  ;;  %v2029_v7 = vor.u32 %v2028_v61, %v2025_v59 }
  0x8b   : > { %v1307_v46 = vunpack.c.l.b16 %v1211_v18 }
  0x8d   : > { %4810 = vmatmul.msk.bf16.gmra.mxu2 %vm747_vm3, %v1332_v13  ;;  %v2010_v13 = vrot.slane %v2008_v0, 5  ;;  %v1334_v38 = vpack.c.b16 %v1307_v46, %v1306_v34  ;;  %v4977_v0 = vld [vmem:[%s5766_s25 + $0x50] sm:$0x1]  ;;  %v1132_v34 = vld [vmem:[%s5766_s25 + $0x48] sm:$0xe]  ;;  %v2047_v46 = vshrl.u32 %v4978_v20, 16 }
  0x8e   : > { %v2042_v9 = vshll.u32 %v4977_v0, 16  ;;  %v4774_v44 = vrot.slane %v1132_v34, 9  ;;  %v4981_v0 = vld [vmem:[%s5766_s25 + $0x60] sm:$0xf] }
  0x8f   : > { %v2015_v21 = vor.u32 %v2014_v14, %v2010_v13  ;;  %v2011_v39 = vsel %vm5787_vm2, %v2006_v28, %v2010_v13  ;;  %v2030_v14 = vrot.slane %v2029_v7, 4  ;;  %v2050_v28 = vshll.u32 %v4978_v20, 16 }
  0x90   : > { %v2303_v51 = vunpack.c.l.b16 %v2011_v39  ;;  %v2044_v15 = vrot.slane %v2042_v9, 5  ;;  %v1223_v39 = vrot.slane %v1221_v22, 4  ;;  %v2049_v43 = vrot.slane %v2047_v46, 4  ;;  %v5453_v46 = vld [vmem:[%s5766_s25 + $0x54] sm:$0xff] }
  0x91   : > { %v2016_v30 = vrot.slane %v2015_v21, 4  ;;  %v4979_v21 = vld [vmem:[%s5766_s25 + $0x58] sm:$0xf]  ;;  %v2052_v63 = vrot.slane %v2050_v28, 5 }
  0x92   : > { %4946 = vmatmul.msk.bf16.gmra.mxu3 %vm747_vm3, %v5449_v24  ;;  %v5423_v24 = vld [vmem:[%s5766_s25 + $0x30] sm:$0xff] }
  0x93   : > { %v2021_v47 = vsel %vm5787_vm2, %v2016_v30, %v2020_v31  ;;  %v2056_v30 = vshll.u32 %v4979_v21, 16  ;;  %v2060_v31 = vshrl.u32 %v4979_v21, 16 }
  0x94   : > { %v2304_v53 = vunpack.c.l.b16 %v2021_v47  ;;  %v1224_v47 = vrot.slane %v5887_v60, 5 }
  0x95   : > { %v2058_v45 = vrot.slane %v2056_v30, 5  ;;  %v2062_v49 = vrot.slane %v2060_v31, 4  ;;  %v1231_v30 = vrot.slane %v5945_v33, 5 }
  0x96   : > { %v2331_v6 = vpack.c.b16 %v2304_v53, %v2303_v51  ;;  %v4980_v51 = vld [vmem:[%s5766_s25 + $0x5c] sm:$0x1]  ;;  %v1222_v53 = vsel %vm6005_vm6, %v4774_v44, %v1221_v22  ;;  %v1225_v60 = vsel %vm6005_vm6, %v1223_v39, %v1224_v47  ;;  %v4983_v39 = vld [vmem:[%s5766_s25 + $0x68] sm:$0x1] }
  0x97   : > { %5034 = vmatmul.msk.bf16.gmra.mxu0 %vm747_vm3, %v2329_v40  ;;  %v2066_v59 = vshll.u32 %v4980_v51, 16  ;;  %v1310_v61 = vunpack.c.l.b16 %v1222_v53  ;;  %v5426_v51 = vld [vmem:[%s5766_s25 + $0x54] sm:$0xff]  ;;  %v5492_v53 = vld [vmem:[%s7206_s1 + $0xc8] sm:$0xff] }
  0x98   : > { %4755 = vmatmul.msk.bf16.gmra.mxu1 %vm747_vm3, %v5422_v41  ;;  %v5638_v41 = vld [vmem:[%s5766_s25 + $0x40] sm:$0xf]  ;;  %3162 = vmatpush.bf16.msra.mxu2 %v5492_v53 }
  0x99   : > { %v1214_v42 = vrot.slane %v5638_v41, 5  ;;  %v2068_v8 = vrot.slane %v2066_v59, 5 }
  0x9b   : > { %v1216_v56 = vrot.slane %v1214_v42, 4  ;;  %v1215_v2 = vsel %vm6005_vm6, %v4773_v55, %v1214_v42 }
  0x9c   : > { %v1308_v12 = vunpack.c.l.b16 %v1215_v2  ;;  %v4982_v2 = vld [vmem:[%s5766_s25 + $0x64] sm:$0xf] }
  0x9d   : > { %v6101_v48 = vpop.f32.mrf.mxu1  ;;  %4811 = vmatmul.msk.bf16.gmra.mxu2 %vm747_vm3, %v1333_v57  ;;  %v1217_v57 = vrot.slane %v5639_v4, 5  ;;  %v2053_v4 = vor.u32 %v2052_v63, %v2049_v43 }
  0x9f   : > { %v1218_v3 = vsel %vm6005_vm6, %v1216_v56, %v1217_v57  ;;  %v5425_v56 = vld [vmem:[%s5766_s25 + $0x48] sm:$0xff]  ;;  %v2063_v57 = vor.u32 %v2062_v49, %v2058_v45  ;;  %v2090_v49 = vshll.u32 %v4983_v39, 16 }
  0xa0   : > { %v1309_v13 = vunpack.c.l.b16 %v1218_v3 }
  0xa1   : > { %v2064_v7 = vrot.slane %v2063_v57, 4 }
  0xa2   : > { %4947 = vmatmul.msk.bf16.gmra.mxu3 %vm747_vm3, %v5450_v10  ;;  %v1335_v17 = vpack.c.b16 %v1309_v13, %v1308_v12  ;;  %v2074_v12 = vshll.u32 %v4981_v0, 16  ;;  %v2080_v13 = vshll.u32 %v4982_v2, 16 }
  0xa3   : > { %v2069_v21 = vsel %vm5787_vm2, %v2064_v7, %v2068_v8 }
  0xa4   : > { %v2082_v34 = vrot.slane %v2080_v13, 5  ;;  %v2308_v44 = vunpack.c.l.b16 %v2069_v21 }
  0xa5   : > { %v6117_v26 = vpop.f32.mrf.mxu1 }
  0xa7   : > { %v6119_v27 = vpop.f32.mrf.mxu2  ;;  %5035 = vmatmul.msk.bf16.gmra.mxu0 %vm747_vm3, %v2330_v23  ;;  %v2035_v23 = vsel %vm5787_vm2, %v2030_v14, %v2034_v62  ;;  %v1311_v62 = vunpack.c.l.b16 %v1225_v60  ;;  %v1228_v14 = vrot.slane %v5931_v19, 5 }
  0xa8   : > { %4756 = vmatmul.msk.bf16.gmra.mxu1 %vm747_vm3, %v5423_v24  ;;  %v2045_v24 = vsel %vm5787_vm2, %v2040_v29, %v2044_v15  ;;  %v2305_v41 = vunpack.c.l.b16 %v2035_v23  ;;  %v2084_v29 = vshrl.u32 %v4982_v2, 16  ;;  %v4984_v2 = vld [vmem:[%s5766_s25 + $0x6c] sm:$0xf] }
  0xa9   : > { %v2306_v42 = vunpack.c.l.b16 %v2045_v24  ;;  %v1336_v9 = vpack.c.b16 %v1311_v62, %v1310_v61  ;;  %v2076_v24 = vrot.slane %v2074_v12, 5  ;;  %v1230_v28 = vrot.slane %v1228_v14, 4  ;;  %v5496_v62 = vld [vmem:[%s7206_s1 + $0xe8] sm:$0xff]  ;;  %v5640_v12 = vld [vmem:[%s5766_s25 + $0x64] sm:$0xf] }
  0xaa   : > { %v6125_v37 = vpop.f32.mrf.mxu0  ;;  %v2086_v31 = vrot.slane %v2084_v29, 4  ;;  %v2092_v61 = vrot.slane %v2090_v49, 5  ;;  %3844 = vmatpush.bf16.msra.mxu3 %v5496_v62  ;;  %v1235_v13 = vrot.slane %v5640_v12, 5  ;;  %v1134_v29 = vld [vmem:[%s5766_s25 + $0x60] sm:$0xe] }
  0xab   : > { %v6131_v40 = vpop.f32.mrf.mxu3  ;;  %v2332_v55 = vpack.c.b16 %v2306_v42, %v2305_v41  ;;  %v1232_v63 = vsel %vm6005_vm6, %v1230_v28, %v1231_v30  ;;  %v5454_v28 = vld [vmem:[%s5766_s25 + $0x60] sm:$0xff]  ;;  %v4986_v49 = vld [vmem:[%s5766_s25 + $0x74] sm:$0x1] }
  0xad   : > { %4812 = vmatmul.msk.bf16.gmra.mxu2 %vm747_vm3, %v1334_v38 }
  0xaf   : > { %v6137_v54 = vpop.f32.mrf.mxu1  ;;  %v6140_v58 = vpop.f32.mrf.mxu2 }
  0xb2   : > { %4948 = vmatmul.msk.bf16.gmra.mxu3 %vm747_vm3, %v5451_v52  ;;  %v6148_v5 = vpop.f32.mrf.mxu0 }
  0xb3   : > { %v6150_v10 = vpop.f32.mrf.mxu3 }
  0xb7   : > { %5036 = vmatmul.msk.bf16.gmra.mxu0 %vm747_vm3, %v2331_v6  ;;  %v6154_v16 = vpop.f32.mrf.mxu1  ;;  %v2054_v6 = vrot.slane %v2053_v4, 4 }
  0xb8   : > { %4757 = vmatmul.msk.bf16.gmra.mxu1 %vm747_vm3, %v5424_v11  ;;  %v2071_v11 = vshrl.u32 %v4981_v0, 16  ;;  %v5472_v0 = vld [vmem:[%s7206_s1 + $0xa8] sm:$0xff] }
  0xb9   : > { %v2059_v20 = vsel %vm5787_vm2, %v2054_v6, %v2058_v45  ;;  %v2087_v45 = vor.u32 %v2086_v31, %v2082_v34  ;;  %v4985_v6 = vld [vmem:[%s5766_s25 + $0x70] sm:$0xf]  ;;  %2847 = vmatpush.bf16.msra.mxu1 %v5472_v0 }
  0xba   : > { %v6157_v18 = vpop.f32.mrf.mxu2  ;;  %v2073_v23 = vrot.slane %v2071_v11, 4  ;;  %v2104_v21 = vshll.u32 %v4985_v6, 16 }
  0xbb   : > { %v2088_v59 = vrot.slane %v2087_v45, 4 }
  0xbc   : > { %v2077_v42 = vor.u32 %v2076_v24, %v2073_v23  ;;  %v2108_v23 = vshrl.u32 %v4985_v6, 16  ;;  %v5500_v24 = vld [vmem:[%s7206_s1 + $0x108] sm:$0xff] }
  0xbd   : > { %4813 = vmatmul.msk.bf16.gmra.mxu2 %vm747_vm3, %v1335_v17  ;;  %v1133_v17 = vld [vmem:[%s5766_s25 + $0x54] sm:$0xe]  ;;  %v2093_v11 = vsel %vm5787_vm2, %v2088_v59, %v2092_v61  ;;  %4270 = vmatpush.bf16.msra.mxu0 %v5500_v24  ;;  %v5427_v61 = vld [vmem:[%s5766_s25 + $0x60] sm:$0xff] }
  0xbe   : > { %v6167_v35 = vpop.f32.mrf.mxu0  ;;  %v4775_v19 = vrot.slane %v1133_v17, 9  ;;  %v2078_v57 = vrot.slane %v2077_v42, 4  ;;  %v2095_v17 = vshrl.u32 %v4984_v2, 16  ;;  %v2310_v31 = vunpack.c.l.b16 %v2093_v11 }
  0xbf   : > { %v6171_v38 = vpop.f32.mrf.mxu3 }
  0xc0   : > { %v1229_v43 = vsel %vm6005_vm6, %v4775_v19, %v1228_v14  ;;  %v2097_v39 = vrot.slane %v2095_v17, 4  ;;  %v4987_v17 = vld [vmem:[%s5766_s25 + $0x78] sm:$0xf] }
  0xc1   : > { %v6174_v50 = vpop.f32.mrf.mxu1 }
  0xc2   : > { %4949 = vmatmul.msk.bf16.gmra.mxu3 %vm747_vm3, %v5452_v36  ;;  %v6178_v52 = vpop.f32.mrf.mxu2  ;;  %v2307_v36 = vunpack.c.l.b16 %v2059_v20  ;;  %v2098_v20 = vshll.u32 %v4984_v2, 16 }
  0xc4   : > { %v2333_v33 = vpack.c.b16 %v2308_v44, %v2307_v36  ;;  %v4776_v36 = vrot.slane %v1134_v29, 9  ;;  %v1237_v44 = vrot.slane %v1235_v13, 4  ;;  %v2100_v42 = vrot.slane %v2098_v20, 5  ;;  %v4988_v20 = vld [vmem:[%s5766_s25 + $0x7c] sm:$0xf] }
  0xc6   : > { %v6185_v1 = vpop.f32.mrf.mxu0 }
  0xc7   : > { %5037 = vmatmul.msk.bf16.gmra.mxu0 %vm747_vm3, %v2332_v55  ;;  %v6190_v3 = vpop.f32.mrf.mxu3  ;;  %v1312_v55 = vunpack.c.l.b16 %v1229_v43  ;;  %v2106_v43 = vrot.slane %v2104_v21, 5  ;;  %v5642_v21 = vld [vmem:[%s5766_s25 + $0x70] sm:$0xf] }
  0xc8   : > { %4758 = vmatmul.msk.bf16.gmra.mxu1 %vm747_vm3, %v5425_v56  ;;  %v1313_v56 = vunpack.c.l.b16 %v1232_v63  ;;  %v2110_v63 = vrot.slane %v2108_v23, 4  ;;  %v1242_v23 = vrot.slane %v5642_v21, 5 }
  0xc9   : > { %v6194_v15 = vpop.f32.mrf.mxu1 }
  0xca   : > { %v1337_v7 = vpack.c.b16 %v1313_v56, %v1312_v55  ;;  %v2101_v55 = vor.u32 %v2100_v42, %v2097_v39  ;;  %v2111_v56 = vor.u32 %v2110_v63, %v2106_v43  ;;  %v5643_v42 = vld [vmem:[%s5766_s25 + $0x74] sm:$0x1] }
  0xcb   : > { %v1245_v63 = vrot.slane %v5643_v42, 5 }
  0xcc   : > { %v2112_v11 = vrot.slane %v2111_v56, 4 }
  0xcd   : > { %v6201_v22 = vpop.f32.mrf.mxu2  ;;  %4814 = vmatmul.msk.bf16.gmra.mxu2 %vm747_vm3, %v1336_v9  ;;  %v2083_v9 = vsel %vm5787_vm2, %v2078_v57, %v2082_v34  ;;  %v2114_v57 = vshll.u32 %v4986_v49, 16  ;;  %v5455_v49 = vld [vmem:[%s5766_s25 + $0x6c] sm:$0xff] }
  0xce   : > { %v2309_v30 = vunpack.c.l.b16 %v2083_v9  ;;  %v2102_v9 = vrot.slane %v2101_v55, 4 }
  0xcf   : > { %v2116_v12 = vrot.slane %v2114_v57, 5 }
  0xd0   : > { %v6207_v47 = vpop.f32.mrf.mxu0  ;;  %v2334_v53 = vpack.c.b16 %v2310_v31, %v2309_v30  ;;  %v2107_v24 = vsel %vm5787_vm2, %v2102_v9, %v2106_v43  ;;  %v2122_v30 = vshll.u32 %v4987_v17, 16  ;;  %v2128_v31 = vshll.u32 %v4988_v20, 16  ;;  %v4989_v9 = vld [vmem:[%s5766_s25 + $0x80] sm:$0x1] }
  0xd1   : > { %v6209_v41 = vpop.f32.mrf.mxu3 }
  0xd2   : > { %4950 = vmatmul.msk.bf16.gmra.mxu3 %vm747_vm3, %v5453_v46  ;;  %v5641_v46 = vld [vmem:[%s5766_s25 + $0x68] sm:$0x1] }
  0xd3   : > { %v1238_v19 = vrot.slane %v5641_v46, 5  ;;  %v1135_v46 = vld [vmem:[%s5766_s25 + $0x6c] sm:$0xe] }
  0xd5   : > { %v6220_v60 = vpop.f32.mrf.mxu1  ;;  %v6222_v4 = vpop.f32.mrf.mxu2 }
  0xd7   : > { %5038 = vmatmul.msk.bf16.gmra.mxu0 %vm747_vm3, %v2333_v33  ;;  %v1236_v33 = vsel %vm6005_vm6, %v4776_v36, %v1235_v13  ;;  %v2132_v36 = vshrl.u32 %v4988_v20, 16 }
  0xd8   : > { %4759 = vmatmul.msk.bf16.gmra.mxu1 %vm747_vm3, %v5426_v51  ;;  %v6234_v8 = vpop.f32.mrf.mxu0  ;;  %v1239_v51 = vsel %vm6005_vm6, %v1237_v44, %v1238_v19  ;;  %v1314_v2 = vunpack.c.l.b16 %v1236_v33  ;;  %v4777_v33 = vrot.slane %v1135_v46, 9 }
  0xd9   : > { %v6241_v14 = vpop.f32.mrf.mxu3  ;;  %v1315_v6 = vunpack.c.l.b16 %v1239_v51  ;;  %v1244_v51 = vrot.slane %v1242_v23, 4 }
  0xdb   : > { %v1338_v29 = vpack.c.b16 %v1315_v6, %v1314_v2  ;;  %v2134_v2 = vrot.slane %v2132_v36, 4 }
  0xdd   : > { %4815 = vmatmul.msk.bf16.gmra.mxu2 %vm747_vm3, %v1337_v7  ;;  %v6249_v34 = vpop.f32.mrf.mxu1 }
  0xe0   : > { %v6252_v45 = vpop.f32.mrf.mxu2 }
  0xe2   : > { %4951 = vmatmul.msk.bf16.gmra.mxu3 %vm747_vm3, %v5454_v28  ;;  %v2119_v28 = vshrl.u32 %v4987_v17, 16  ;;  %v5428_v17 = vld [vmem:[%s5766_s25 + $0x6c] sm:$0xff] }
  0xe4   : > { %v6260_v59 = vpop.f32.mrf.mxu0  ;;  %v2121_v57 = vrot.slane %v2119_v28, 4 }
  0xe5   : > { %v6263_v62 = vpop.f32.mrf.mxu3  ;;  %v1046_v0 = vpop.f32.mrf.mxu1 }
  0xe6   : > { %v1047_v7 = vadd.f32 %v1046_v0, %v6125_v37  ;;  %v2117_v37 = vsel %vm5787_vm2, %v2112_v11, %v2116_v12  ;;  %v2130_v0 = vrot.slane %v2128_v31, 5  ;;  %v1243_v11 = vsel %vm6005_vm6, %v4777_v33, %v1242_v23 }
  0xe7   : > { %5039 = vmatmul.msk.bf16.gmra.mxu0 %vm747_vm3, %v2334_v53  ;;  %v2311_v53 = vunpack.c.l.b16 %v2107_v24  ;;  %v2312_v55 = vunpack.c.l.b16 %v2117_v37  ;;  %v2138_v24 = vshll.u32 %v4989_v9, 16 }
  0xe8   : > { %v6267_v13 = vpop.f32.mrf.mxu2  ;;  %4760 = vmatmul.msk.bf16.gmra.mxu1 %vm747_vm3, %v5427_v61  ;;  %v2124_v61 = vrot.slane %v2122_v30, 5  ;;  %v2135_v21 = vor.u32 %v2134_v2, %v2130_v0 }
  0xe9   : > { %v2335_v12 = vpack.c.b16 %v2312_v55, %v2311_v53  ;;  %v2140_v42 = vrot.slane %v2138_v24, 5  ;;  %v4991_v53 = vld [vmem:[%s5766_s25 + $0x88] sm:$0xf]  ;;  %v5644_v55 = vld [vmem:[%s5766_s25 + $0x7c] sm:$0xf] }
  0xea   : > { %v2125_v20 = vor.u32 %v2124_v61, %v2121_v57  ;;  %v1136_v57 = vld [vmem:[%s5766_s25 + $0x78] sm:$0xe] }
  0xec   : > { %v6278_v19 = vpop.f32.mrf.mxu0  ;;  %v2126_v36 = vrot.slane %v2125_v20, 4 }
  0xed   : > { %v6280_v44 = vpop.f32.mrf.mxu3  ;;  %4816 = vmatmul.msk.bf16.gmra.mxu2 %vm747_vm3, %v1338_v29  ;;  %v1048_v39 = vpop.f32.mrf.mxu1 }
  0xee   : > { %v1049_v43 = vadd.f32 %v1048_v39, %v6148_v5  ;;  %v1246_v5 = vsel %vm6005_vm6, %v1244_v51, %v1245_v63  ;;  %v2136_v39 = vrot.slane %v2135_v21, 4  ;;  %v4990_v63 = vld [vmem:[%s5766_s25 + $0x84] sm:$0xf]  ;;  %v5456_v21 = vld [vmem:[%s5766_s25 + $0x78] sm:$0xff] }
  0xef   : > { %v1317_v28 = vunpack.c.l.b16 %v1246_v5  ;;  %v2146_v61 = vshll.u32 %v4990_v63, 16  ;;  %v2156_v5 = vshrl.u32 %v4991_v53, 16 }
  0xf0   : > { %v1427_v56 = vpop.f32.mrf.mxu2  ;;  %v2141_v9 = vsel %vm5787_vm2, %v2136_v39, %v2140_v42 }
  0xf1   : > { %v1507_v6 = vadd.f32 %v1427_v56, %v1047_v7  ;;  %v1316_v7 = vunpack.c.l.b16 %v1243_v11  ;;  %v1249_v56 = vrot.slane %v5644_v55, 5  ;;  %v2152_v11 = vshll.u32 %v4991_v53, 16 }
  0xf2   : > { %4952 = vmatmul.msk.bf16.gmra.mxu3 %vm747_vm3, %v5455_v49  ;;  %v2158_v39 = vrot.slane %v2156_v5, 4 }
  0xf3   : > { %v1339_v51 = vpack.c.b16 %v1317_v28, %v1316_v7 }
  0xf4   : > { %v2424_v29 = vpop.f32.mrf.mxu0 }
  0xf5   : > { %v1742_v37 = vpop.f32.mrf.mxu3  ;;  %v1051_v46 = vpop.f32.mrf.mxu1 }
  0xf6   : > { %v1822_v30 = vadd.f32 %v1742_v37, %v1507_v6  ;;  %v1052_v23 = vadd.f32 %v1051_v46, %v6167_v35  ;;  %v2143_v35 = vshrl.u32 %v4990_v63, 16  ;;  %v2131_v6 = vsel %vm5787_vm2, %v2126_v36, %v2130_v0 }
  0xf7   : > { %5040 = vmatmul.msk.bf16.gmra.mxu0 %vm747_vm3, %v2335_v12  ;;  %v5645_v12 = vld [vmem:[%s5766_s25 + $0x80] sm:$0x1]  ;;  %v4778_v37 = vrot.slane %v1136_v57, 9  ;;  %v1251_v46 = vrot.slane %v1249_v56, 4  ;;  %v2313_v7 = vunpack.c.l.b16 %v2131_v6  ;;  %v2314_v0 = vunpack.c.l.b16 %v2141_v9 }
  0xf8   : > { %v1429_v31 = vpop.f32.mrf.mxu2  ;;  %4761 = vmatmul.msk.bf16.gmra.mxu1 %vm747_vm3, %v5428_v17  ;;  %v6297_v49 = vadd.f32 %v2424_v29, %v1822_v30  ;;  %v1252_v29 = vrot.slane %v5645_v12, 5  ;;  %v2145_v28 = vrot.slane %v2143_v35, 4  ;;  %v2148_v30 = vrot.slane %v2146_v61, 5  ;;  %v5429_v35 = vld [vmem:[%s5766_s25 + $0x78] sm:$0xff] }
  0xf9   : > { %v1508_v33 = vadd.f32 %v1429_v31, %v1049_v43  ;;  %v2154_v36 = vrot.slane %v2152_v11, 5  ;;  %v2336_v53 = vpack.c.b16 %v2314_v0, %v2313_v7  ;;  %v4994_v7 = vld [vmem:[%s5766_s25 + $0x94] sm:$0xf]  ;;  %v5646_v0 = vld [vmem:[%s5766_s25 + $0x88] sm:$0xf] }
  0xfa   : > { %v2149_v55 = vor.u32 %v2148_v30, %v2145_v28  ;;  %v1256_v28 = vrot.slane %v5646_v0, 5  ;;  %v1137_v30 = vld [vmem:[%s5766_s25 + $0x84] sm:$0xe] }
  0xfb   : > { %v2159_v61 = vor.u32 %v2158_v39, %v2154_v36 }
  0xfc   : > { %v2426_v2 = vpop.f32.mrf.mxu0  ;;  %v2150_v12 = vrot.slane %v2149_v55, 4 }
  0xfd   : > { %v1744_v43 = vpop.f32.mrf.mxu3  ;;  %4817 = vmatmul.msk.bf16.gmra.mxu2 %vm747_vm3, %v1339_v51  ;;  %v1053_v17 = vpop.f32.mrf.mxu1  ;;  %v4992_v51 = vld [vmem:[%s5766_s25 + $0x8c] sm:$0x1] }
  0xfe   : > { %v1823_v20 = vadd.f32 %v1744_v43, %v1508_v33  ;;  %v1054_v24 = vadd.f32 %v1053_v17, %v6185_v1  ;;  %v1250_v33 = vsel %vm6005_vm6, %v4778_v37, %v1249_v56  ;;  %v1253_v1 = vsel %vm6005_vm6, %v1251_v46, %v1252_v29 }
  0xff   : > { %v2162_v6 = vshll.u32 %v4992_v51, 16  ;;  %v1319_v11 = vunpack.c.l.b16 %v1253_v1  ;;  %v2160_v43 = vrot.slane %v2159_v61, 4  ;;  %v2180_v1 = vshrl.u32 %v4994_v7, 16  ;;  %v5457_v61 = vld [vmem:[%s5766_s25 + $0x84] sm:$0xff] }
 0x100   : > { %v1432_v31 = vpop.f32.mrf.mxu2  ;;  %v6310_v42 = vadd.f32 %v2426_v2, %v1823_v20  ;;  %v4993_v20 = vld [vmem:[%s5766_s25 + $0x90] sm:$0xf] }
 0x101   : > { %v1509_v63 = vadd.f32 %v1432_v31, %v1052_v23  ;;  %v1318_v23 = vunpack.c.l.b16 %v1250_v33  ;;  %v2164_v17 = vrot.slane %v2162_v6, 5  ;;  %v2167_v31 = vshrl.u32 %v4993_v20, 16 }
 0x102   : > { %4953 = vmatmul.msk.bf16.gmra.mxu3 %vm747_vm3, %v5456_v21  ;;  %v2170_v51 = vshll.u32 %v4993_v20, 16  ;;  %v2176_v33 = vshll.u32 %v4994_v7, 16  ;;  %v4779_v6 = vrot.slane %v1137_v30, 9 }
 0x103   : > { %v1340_v46 = vpack.c.b16 %v1319_v11, %v1318_v23  ;;  %v2169_v11 = vrot.slane %v2167_v31, 4 }
 0x104   : > { %v2429_v57 = vpop.f32.mrf.mxu0 }
 0x105   : > { %v1747_v9 = vpop.f32.mrf.mxu3  ;;  %v1056_v2 = vpop.f32.mrf.mxu1 }
 0x106   : > { %v1824_v5 = vadd.f32 %v1747_v9, %v1509_v63  ;;  %v1057_v56 = vadd.f32 %v1056_v2, %v6207_v47  ;;  %v2155_v47 = vsel %vm5787_vm2, %v2150_v12, %v2154_v36  ;;  %v2165_v63 = vsel %vm5787_vm2, %v2160_v43, %v2164_v17 }
 0x107   : > { %5041 = vmatmul.msk.bf16.gmra.mxu0 %vm747_vm3, %v2336_v53  ;;  %v5647_v53 = vld [vmem:[%s5766_s25 + $0x8c] sm:$0x1]  ;;  %v1258_v9 = vrot.slane %v1256_v28, 4  ;;  %v2315_v2 = vunpack.c.l.b16 %v2155_v47  ;;  %v2316_v23 = vunpack.c.l.b16 %v2165_v63  ;;  %v2172_v12 = vrot.slane %v2170_v51, 5  ;;  %v5430_v47 = vld [vmem:[%s5766_s25 + $0x84] sm:$0xff] }
 0x108   : > { %v1434_v29 = vpop.f32.mrf.mxu2  ;;  %4762 = vmatmul.msk.bf16.gmra.mxu1 %vm747_vm3, %v5429_v35  ;;  %v6323_v21 = vadd.f32 %v2429_v57, %v1824_v5  ;;  %v1259_v55 = vrot.slane %v5647_v53, 5  ;;  %v2182_v43 = vrot.slane %v2180_v1, 4 }
 0x109   : > { %v1510_v37 = vadd.f32 %v1434_v29, %v1054_v24  ;;  %v2178_v29 = vrot.slane %v2176_v33, 5  ;;  %v2337_v7 = vpack.c.b16 %v2316_v23, %v2315_v2  ;;  %v2173_v30 = vor.u32 %v2172_v12, %v2169_v11  ;;  %v4997_v11 = vld [vmem:[%s5766_s25 + $0xa0] sm:$0xf] }
 0x10b   : > { %v2183_v31 = vor.u32 %v2182_v43, %v2178_v29  ;;  %v1138_v43 = vld [vmem:[%s5766_s25 + $0x90] sm:$0xe] }
 0x10c   : > { %v2431_v39 = vpop.f32.mrf.mxu0 }
 0x10d   : > { %v1749_v24 = vpop.f32.mrf.mxu3  ;;  %4818 = vmatmul.msk.bf16.gmra.mxu2 %vm747_vm3, %v1340_v46  ;;  %v1058_v57 = vpop.f32.mrf.mxu1  ;;  %v4995_v46 = vld [vmem:[%s5766_s25 + $0x98] sm:$0x1] }
 0x10e   : > { %v1825_v35 = vadd.f32 %v1749_v24, %v1510_v37  ;;  %v1059_v36 = vadd.f32 %v1058_v57, %v6234_v8  ;;  %v1257_v37 = vsel %vm6005_vm6, %v4779_v6, %v1256_v28  ;;  %v1260_v8 = vsel %vm6005_vm6, %v1258_v9, %v1259_v55  ;;  %v5495_v55 = vld [vmem:[%s7206_s1 + $0xe0] sm:$0xff] }
 0x10f   : > { %v2186_v63 = vshll.u32 %v4995_v46, 16  ;;  %v1320_v33 = vunpack.c.l.b16 %v1257_v37  ;;  %v1321_v1 = vunpack.c.l.b16 %v1260_v8  ;;  %v5471_v24 = vld [vmem:[%s7206_s1 + $0xa0] sm:$0xff]  ;;  %3845 = vmatpush.bf16.msra.mxu3 %v5495_v55 }
 0x110   : > { %v1437_v5 = vpop.f32.mrf.mxu2  ;;  %v6336_v17 = vadd.f32 %v2431_v39, %v1825_v35  ;;  %v5491_v39 = vld [vmem:[%s7206_s1 + $0xc0] sm:$0xff]  ;;  %v2174_v35 = vrot.slane %v2173_v30, 4  ;;  %2848 = vmatpush.bf16.msra.mxu1 %v5471_v24  ;;  %v5649_v30 = vld [vmem:[%s5766_s25 + $0x98] sm:$0x1] }
 0x111   : > { %v1511_v20 = vadd.f32 %v1437_v5, %v1057_v56  ;;  %3163 = vmatpush.bf16.msra.mxu2 %v5491_v39  ;;  %v2188_v6 = vrot.slane %v2186_v63, 5  ;;  %v1341_v23 = vpack.c.b16 %v1321_v1, %v1320_v33  ;;  %v5648_v5 = vld [vmem:[%s5766_s25 + $0x94] sm:$0xf]  ;;  %v4780_v33 = vrot.slane %v1138_v43, 9 }
 0x112   : > { %4954 = vmatmul.msk.bf16.gmra.mxu3 %vm747_vm3, %v5457_v61  ;;  %v2184_v61 = vrot.slane %v2183_v31, 4  ;;  %v1263_v12 = vrot.slane %v5648_v5, 5  ;;  %v2179_v8 = vsel %vm5787_vm2, %v2174_v35, %v2178_v29  ;;  %v1266_v31 = vrot.slane %v5649_v30, 5 }
 0x114   : > { %v2434_v0 = vpop.f32.mrf.mxu0  ;;  %v1265_v1 = vrot.slane %v1263_v12, 4 }
 0x115   : > { %v1752_v56 = vpop.f32.mrf.mxu3  ;;  %v1061_v51 = vpop.f32.mrf.mxu1 }
 0x116   : > { %v1826_v28 = vadd.f32 %v1752_v56, %v1511_v20  ;;  %v1062_v53 = vadd.f32 %v1061_v51, %v6260_v59  ;;  %v4996_v59 = vld [vmem:[%s5766_s25 + $0x9c] sm:$0xf]  ;;  %v5458_v51 = vld [vmem:[%s5766_s25 + $0x90] sm:$0xff] }
 0x117   : > { %5042 = vmatmul.msk.bf16.gmra.mxu0 %vm747_vm3, %v2337_v7  ;;  %v2191_v20 = vshrl.u32 %v4996_v59, 16  ;;  %v2194_v46 = vshll.u32 %v4996_v59, 16  ;;  %v2189_v7 = vsel %vm5787_vm2, %v2184_v61, %v2188_v6 }
 0x118   : > { %v1439_v57 = vpop.f32.mrf.mxu2  ;;  %4763 = vmatmul.msk.bf16.gmra.mxu1 %vm747_vm3, %v5430_v47  ;;  %v6358_v9 = vadd.f32 %v2434_v0, %v1826_v28  ;;  %v2200_v0 = vshll.u32 %v4997_v11, 16  ;;  %v5499_v47 = vld [vmem:[%s7206_s1 + $0x100] sm:$0xff]  ;;  %v2317_v28 = vunpack.c.l.b16 %v2179_v8  ;;  %v2318_v55 = vunpack.c.l.b16 %v2189_v7 }
 0x119   : > { %v1512_v2 = vadd.f32 %v1439_v57, %v1059_v36  ;;  %v2204_v36 = vshrl.u32 %v4997_v11, 16  ;;  %4271 = vmatpush.bf16.msra.mxu0 %v5499_v47  ;;  %v2193_v24 = vrot.slane %v2191_v20, 4  ;;  %v2196_v57 = vrot.slane %v2194_v46, 5  ;;  %v4998_v11 = vld [vmem:[%s5766_s25 + $0xa4] sm:$0x1]  ;;  %v5431_v46 = vld [vmem:[%s5766_s25 + $0x90] sm:$0xff] }
 0x11a   : > { %v2202_v61 = vrot.slane %v2200_v0, 5  ;;  %v2338_v5 = vpack.c.b16 %v2318_v55, %v2317_v28  ;;  %v2210_v7 = vshll.u32 %v4998_v11, 16  ;;  %v5000_v55 = vld [vmem:[%s5766_s25 + $0xac] sm:$0xf] }
 0x11b   : > { %v2206_v6 = vrot.slane %v2204_v36, 4  ;;  %v2197_v43 = vor.u32 %v2196_v57, %v2193_v24  ;;  %v1139_v24 = vld [vmem:[%s5766_s25 + $0x9c] sm:$0xe] }
 0x11c   : > { %v2436_v37 = vpop.f32.mrf.mxu0 }
 0x11d   : > { %v1754_v63 = vpop.f32.mrf.mxu3  ;;  %4819 = vmatmul.msk.bf16.gmra.mxu2 %vm747_vm3, %v1341_v23  ;;  %v1063_v39 = vpop.f32.mrf.mxu1  ;;  %v2207_v8 = vor.u32 %v2206_v6, %v2202_v61 }
 0x11e   : > { %v1827_v56 = vadd.f32 %v1754_v63, %v1512_v2  ;;  %v1064_v29 = vadd.f32 %v1063_v39, %v6278_v19  ;;  %v1264_v19 = vsel %vm6005_vm6, %v4780_v33, %v1263_v12  ;;  %v1267_v2 = vsel %vm6005_vm6, %v1265_v1, %v1266_v31  ;;  %v4999_v39 = vld [vmem:[%s5766_s25 + $0xa8] sm:$0xf]  ;;  %v5650_v1 = vld [vmem:[%s5766_s25 + $0xa0] sm:$0xf] }
 0x11f   : > { %v1323_v36 = vunpack.c.l.b16 %v1267_v2  ;;  %v2198_v12 = vrot.slane %v2197_v43, 4  ;;  %v2208_v31 = vrot.slane %v2207_v8, 4  ;;  %v2212_v63 = vrot.slane %v2210_v7, 5 }
 0x120   : > { %v1442_v35 = vpop.f32.mrf.mxu2  ;;  %v6374_v59 = vadd.f32 %v2436_v37, %v1827_v56  ;;  %v1270_v28 = vrot.slane %v5650_v1, 5  ;;  %v2218_v6 = vshll.u32 %v4999_v39, 16  ;;  %v2228_v2 = vshrl.u32 %v5000_v55, 16 }
 0x121   : > { %v1513_v23 = vadd.f32 %v1442_v35, %v1062_v53  ;;  %v1322_v53 = vunpack.c.l.b16 %v1264_v19  ;;  %v2203_v57 = vsel %vm5787_vm2, %v2198_v12, %v2202_v61  ;;  %v2215_v35 = vshrl.u32 %v4999_v39, 16 }
 0x122   : > { %4955 = vmatmul.msk.bf16.gmra.mxu3 %vm747_vm3, %v5458_v51  ;;  %v2213_v11 = vsel %vm5787_vm2, %v2208_v31, %v2212_v63  ;;  %v2224_v19 = vshll.u32 %v5000_v55, 16  ;;  %v1272_v8 = vrot.slane %v1270_v28, 4  ;;  %v2319_v61 = vunpack.c.l.b16 %v2203_v57  ;;  %v5001_v55 = vld [vmem:[%s5766_s25 + $0xb0] sm:$0x1]  ;;  %v5432_v57 = vld [vmem:[%s5766_s25 + $0x9c] sm:$0xff] }
 0x123   : > { %v1342_v33 = vpack.c.b16 %v1323_v36, %v1322_v53  ;;  %v2320_v36 = vunpack.c.l.b16 %v2213_v11  ;;  %v2220_v12 = vrot.slane %v2218_v6, 5  ;;  %v2230_v63 = vrot.slane %v2228_v2, 4 }
 0x124   : > { %v2439_v20 = vpop.f32.mrf.mxu0  ;;  %v2226_v31 = vrot.slane %v2224_v19, 5  ;;  %v2234_v11 = vshll.u32 %v5001_v55, 16 }
 0x125   : > { %v1757_v37 = vpop.f32.mrf.mxu3  ;;  %v1066_v0 = vpop.f32.mrf.mxu1 }
 0x126   : > { %v1828_v47 = vadd.f32 %v1757_v37, %v1513_v23  ;;  %v5459_v37 = vld [vmem:[%s5766_s25 + $0x9c] sm:$0xff]  ;;  %v1067_v53 = vadd.f32 %v1066_v0, %v6101_v48  ;;  %v2339_v48 = vpack.c.b16 %v2320_v36, %v2319_v61  ;;  %v2236_v61 = vrot.slane %v2234_v11, 5 }
 0x127   : > { %5043 = vmatmul.msk.bf16.gmra.mxu0 %vm747_vm3, %v2338_v5  ;;  %v5651_v5 = vld [vmem:[%s5766_s25 + $0xa4] sm:$0x1] }
 0x128   : > { %v1444_v30 = vpop.f32.mrf.mxu2  ;;  %4764 = vmatmul.msk.bf16.gmra.mxu1 %vm747_vm3, %v5431_v46  ;;  %v6386_v56 = vadd.f32 %v2439_v20, %v1828_v47  ;;  %v1273_v43 = vrot.slane %v5651_v5, 5  ;;  %v4781_v46 = vrot.slane %v1139_v24, 9  ;;  %v2217_v47 = vrot.slane %v2215_v35, 4 }
 0x129   : > { %v1514_v51 = vadd.f32 %v1444_v30, %v1064_v29 }
 0x12a   : > { %v2221_v0 = vor.u32 %v2220_v12, %v2217_v47 }
 0x12c   : > { %v2441_v23 = vpop.f32.mrf.mxu0 }
 0x12d   : > { %v1759_v29 = vpop.f32.mrf.mxu3  ;;  %4820 = vmatmul.msk.bf16.gmra.mxu2 %vm747_vm3, %v1342_v33  ;;  %v1068_v20 = vpop.f32.mrf.mxu1  ;;  %v1271_v33 = vsel %vm6005_vm6, %v4781_v46, %v1270_v28  ;;  %v5002_v28 = vld [vmem:[%s5766_s25 + $0xb4] sm:$0xf]  ;;  %v2222_v46 = vrot.slane %v2221_v0, 4 }
 0x12e   : > { %v1829_v7 = vadd.f32 %v1759_v29, %v1514_v51  ;;  %v1274_v51 = vsel %vm6005_vm6, %v1272_v8, %v1273_v43  ;;  %v1324_v35 = vunpack.c.l.b16 %v1271_v33  ;;  %v5003_v29 = vld [vmem:[%s5766_s25 + $0xb8] sm:$0xf]  ;;  %v1069_v43 = vadd.f32 %v1068_v20, %v6117_v26 }
 0x12f   : > { %v1325_v6 = vunpack.c.l.b16 %v1274_v51  ;;  %v2239_v47 = vshrl.u32 %v5002_v28, 16  ;;  %v2242_v12 = vshll.u32 %v5002_v28, 16  ;;  %v2252_v33 = vshrl.u32 %v5003_v29, 16  ;;  %v1140_v51 = vld [vmem:[%s5766_s25 + $0xa8] sm:$0xe] }
 0x130   : > { %v1447_v30 = vpop.f32.mrf.mxu2  ;;  %v6399_v39 = vadd.f32 %v2441_v23, %v1829_v7  ;;  %v2231_v23 = vor.u32 %v2230_v63, %v2226_v31  ;;  %v5652_v63 = vld [vmem:[%s5766_s25 + $0xac] sm:$0xf]  ;;  %v2227_v20 = vsel %vm5787_vm2, %v2222_v46, %v2226_v31 }
 0x131   : > { %v1515_v1 = vadd.f32 %v1447_v30, %v1067_v53  ;;  %v1343_v7 = vpack.c.b16 %v1325_v6, %v1324_v35  ;;  %v2248_v30 = vshll.u32 %v5003_v29, 16  ;;  %v2241_v35 = vrot.slane %v2239_v47, 4 }
 0x132   : > { %4956 = vmatmul.msk.bf16.gmra.mxu3 %vm747_vm3, %v5459_v37  ;;  %v2232_v37 = vrot.slane %v2231_v23, 4  ;;  %v2244_v6 = vrot.slane %v2242_v12, 5  ;;  %v2254_v29 = vrot.slane %v2252_v33, 4  ;;  %v5433_v33 = vld [vmem:[%s5766_s25 + $0xa8] sm:$0xff] }
 0x133   : > { %v2250_v23 = vrot.slane %v2248_v30, 5 }
 0x134   : > { %v2444_v24 = vpop.f32.mrf.mxu0  ;;  %v2237_v55 = vsel %vm5787_vm2, %v2232_v37, %v2236_v61 }
 0x135   : > { %v1762_v19 = vpop.f32.mrf.mxu3  ;;  %v1071_v2 = vpop.f32.mrf.mxu1  ;;  %v2322_v46 = vunpack.c.l.b16 %v2237_v55  ;;  %v2255_v12 = vor.u32 %v2254_v29, %v2250_v23 }
 0x136   : > { %v1830_v5 = vadd.f32 %v1762_v19, %v1515_v1  ;;  %v1277_v1 = vrot.slane %v5652_v63, 5  ;;  %v5460_v19 = vld [vmem:[%s5766_s25 + $0xa8] sm:$0xff]  ;;  %v1072_v31 = vadd.f32 %v1071_v2, %v6137_v54 }
 0x137   : > { %5044 = vmatmul.msk.bf16.gmra.mxu0 %vm747_vm3, %v2339_v48  ;;  %v5653_v48 = vld [vmem:[%s5766_s25 + $0xb0] sm:$0x1] }
 0x138   : > { %v1449_v8 = vpop.f32.mrf.mxu2  ;;  %4765 = vmatmul.msk.bf16.gmra.mxu1 %vm747_vm3, %v5432_v57  ;;  %v6413_v53 = vadd.f32 %v2444_v24, %v1830_v5  ;;  %v1280_v0 = vrot.slane %v5653_v48, 5  ;;  %v4782_v5 = vrot.slane %v1140_v51, 9  ;;  %v1279_v28 = vrot.slane %v1277_v1, 4 }
 0x139   : > { %v1516_v36 = vadd.f32 %v1449_v8, %v1069_v43  ;;  %v2321_v43 = vunpack.c.l.b16 %v2227_v20  ;;  %v5004_v8 = vld [vmem:[%s5766_s25 + $0xbc] sm:$0x1] }
 0x13a   : > { %v1281_v47 = vsel %vm6005_vm6, %v1279_v28, %v1280_v0  ;;  %v2258_v54 = vshll.u32 %v5004_v8, 16  ;;  %v5006_v28 = vld [vmem:[%s5766_s25 + $0xc4] sm:$0xf] }
 0x13b   : > { %v2340_v2 = vpack.c.b16 %v2322_v46, %v2321_v43  ;;  %v1327_v55 = vunpack.c.l.b16 %v1281_v47  ;;  %v1141_v43 = vld [vmem:[%s5766_s25 + $0xb4] sm:$0xe]  ;;  %v5655_v46 = vld [vmem:[%s5766_s25 + $0xb8] sm:$0xf]  ;;  %v2276_v47 = vshrl.u32 %v5006_v28, 16 }
 0x13c   : > { %v2446_v26 = vpop.f32.mrf.mxu0  ;;  %v1284_v8 = vrot.slane %v5655_v46, 5 }
 0x13d   : > { %v1764_v24 = vpop.f32.mrf.mxu3  ;;  %4821 = vmatmul.msk.bf16.gmra.mxu2 %vm747_vm3, %v1343_v7  ;;  %v1073_v57 = vpop.f32.mrf.mxu1  ;;  %v2245_v7 = vor.u32 %v2244_v6, %v2241_v35  ;;  %v2260_v35 = vrot.slane %v2258_v54, 5  ;;  %v5005_v6 = vld [vmem:[%s5766_s25 + $0xc0] sm:$0xf]  ;;  %v5656_v54 = vld [vmem:[%s5766_s25 + $0x14] sm:$0x1] }
 0x13e   : > { %v1831_v11 = vadd.f32 %v1764_v24, %v1516_v36  ;;  %v1278_v36 = vsel %vm6005_vm6, %v4782_v5, %v1277_v1  ;;  %v2256_v1 = vrot.slane %v2255_v12, 4  ;;  %v1074_v0 = vadd.f32 %v1073_v57, %v6154_v16 }
 0x13f   : > { %v1326_v20 = vunpack.c.l.b16 %v1278_v36  ;;  %v2246_v24 = vrot.slane %v2245_v7, 4  ;;  %v2263_v57 = vshrl.u32 %v5005_v6, 16  ;;  %v2266_v7 = vshll.u32 %v5005_v6, 16  ;;  %v5461_v6 = vld [vmem:[%s5766_s25 + $0xb4] sm:$0xff] }
 0x140   : > { %v1452_v37 = vpop.f32.mrf.mxu2  ;;  %v6426_v61 = vadd.f32 %v2446_v26, %v1831_v11  ;;  %v5654_v11 = vld [vmem:[%s5766_s25 + $0x10] sm:$0xf]  ;;  %v2261_v16 = vsel %vm5787_vm2, %v2256_v1, %v2260_v35  ;;  %v2272_v36 = vshll.u32 %v5006_v28, 16  ;;  %v1286_v1 = vrot.slane %v1284_v8, 4  ;;  %v5048_v35 = vld [vmem:[%s5766_s25 + $0xc] sm:$0xe] }
 0x141   : > { %v1517_v63 = vadd.f32 %v1452_v37, %v1072_v31  ;;  %v1344_v31 = vpack.c.b16 %v1327_v55, %v1326_v20  ;;  %v5657_v20 = vld [vmem:[%s5766_s25 + $0xbc] sm:$0x1]  ;;  %v5064_v28 = vrot.slane %v5048_v35, 9 }
 0x142   : > { %4957 = vmatmul.msk.bf16.gmra.mxu3 %vm747_vm3, %v5460_v19  ;;  %v2602_v19 = vrot.slane %v5654_v11, 5  ;;  %v2265_v11 = vrot.slane %v2263_v57, 4 }
 0x144   : > { %v2449_v30 = vpop.f32.mrf.mxu0  ;;  %v2604_v12 = vrot.slane %v2602_v19, 4 }
 0x145   : > { %v1767_v51 = vpop.f32.mrf.mxu3  ;;  %v1076_v26 = vpop.f32.mrf.mxu1 }
 0x146   : > { %v1832_v48 = vadd.f32 %v1767_v51, %v1517_v63  ;;  %v2251_v63 = vsel %vm5787_vm2, %v2246_v24, %v2250_v23  ;;  %v4783_v51 = vrot.slane %v1141_v43, 9  ;;  %v1077_v46 = vadd.f32 %v1076_v26, %v6174_v50 }
 0x147   : > { %5045 = vmatmul.msk.bf16.gmra.mxu0 %vm747_vm3, %v2340_v2  ;;  %v2605_v2 = vrot.slane %v5656_v54, 5  ;;  %v2323_v23 = vunpack.c.l.b16 %v2251_v63  ;;  %v2274_v43 = vrot.slane %v2272_v36, 5  ;;  %v2278_v54 = vrot.slane %v2276_v47, 4  ;;  %v5007_v63 = vld [vmem:[%s5766_s25 + $0xc8] sm:$0x1] }
 0x148   : > { %v1454_v5 = vpop.f32.mrf.mxu2  ;;  %4766 = vmatmul.msk.bf16.gmra.mxu1 %vm747_vm3, %v5433_v33  ;;  %v6442_v37 = vadd.f32 %v2449_v30, %v1832_v48  ;;  %v1287_v30 = vrot.slane %v5657_v20, 5  ;;  %v2324_v48 = vunpack.c.l.b16 %v2261_v16  ;;  %v2603_v16 = vsel %vm6005_vm6, %v5064_v28, %v2602_v19  ;;  %v5256_v36 = vld [vmem:[%s5766_s25 + $0x18] sm:$0xf] }
 0x149   : > { %v1518_v29 = vadd.f32 %v1454_v5, %v1074_v0  ;;  %v2268_v5 = vrot.slane %v2266_v7, 5  ;;  %v2721_v50 = vunpack.c.l.b16 %v2603_v16  ;;  %v2282_v35 = vshll.u32 %v5007_v63, 16 }
 0x14a   : > { %v1288_v7 = vsel %vm6005_vm6, %v1286_v1, %v1287_v30  ;;  %v2341_v47 = vpack.c.b16 %v2324_v48, %v2323_v23  ;;  %v3326_v30 = vshrl.u32 %v5256_v36, 16  ;;  %v3329_v1 = vshll.u32 %v5256_v36, 16 }
 0x14c   : > { %v2451_v33 = vpop.f32.mrf.mxu0  ;;  %v3328_v63 = vrot.slane %v3326_v30, 4 }
 0x14d   : > { %v1769_v55 = vpop.f32.mrf.mxu3  ;;  %4822 = vmatmul.msk.bf16.gmra.mxu2 %vm747_vm3, %v1344_v31  ;;  %v1078_v24 = vpop.f32.mrf.mxu1  ;;  %v1285_v31 = vsel %vm6005_vm6, %v4783_v51, %v1284_v8  ;;  %v6466_v8 = vld [vmem:[%s5766_s25 + $0x1c] sm:$0xf]  ;;  %v2279_v51 = vor.u32 %v2278_v54, %v2274_v43 }
 0x14e   : > { %v1833_v0 = vadd.f32 %v1769_v55, %v1518_v29  ;;  %v2606_v29 = vsel %vm6005_vm6, %v2604_v12, %v2605_v2  ;;  %v2269_v55 = vor.u32 %v2268_v5, %v2265_v11  ;;  %v5434_v2 = vld [vmem:[%s5766_s25 + $0xb4] sm:$0xff]  ;;  %v3339_v23 = vshrl.u32 %v6466_v8, 16 }
 0x14f   : > { %v2722_v26 = vunpack.c.l.b16 %v2606_v29  ;;  %v1079_v11 = vadd.f32 %v1078_v24, %v6194_v15 }
 0x150   : > { %v1457_v20 = vpop.f32.mrf.mxu2  ;;  %v6470_v28 = vadd.f32 %v2451_v33, %v1833_v0  ;;  %v2270_v33 = vrot.slane %v2269_v55, 4  ;;  %v2280_v0 = vrot.slane %v2279_v51, 4  ;;  %v3341_v36 = vrot.slane %v3339_v23, 4 }
 0x151   : > { %v1519_v57 = vadd.f32 %v1457_v20, %v1077_v46  ;;  %v6468_v19 = vpack.c.b16 %v2722_v26, %v2721_v50  ;;  %v1328_v46 = vunpack.c.l.b16 %v1285_v31  ;;  %v1329_v20 = vunpack.c.l.b16 %v1288_v7 }
 0x152   : > { %4958 = vmatmul.msk.bf16.gmra.mxu3 %vm747_vm3, %v5461_v6  ;;  %7213 = vst [vmem:[#allocation2_spill] sm:$0xff] %v6470_v28  ;;  %v3335_v6 = vshll.u32 %v6466_v8, 16  ;;  %v2284_v31 = vrot.slane %v2282_v35, 5  ;;  %v3331_v7 = vrot.slane %v3329_v1, 5  ;;  %v2275_v15 = vsel %vm5787_vm2, %v2270_v33, %v2274_v43  ;;  %v5344_v33 = vld [vmem:[%s5766_s25 + $0x18] sm:$0xe] }
 0x153   : > { %v1345_v54 = vpack.c.b16 %v1329_v20, %v1328_v46  ;;  %v5462_v20 = vld [vmem:[%s5766_s25 + $0xc0] sm:$0xff]  ;;  %v2325_v43 = vunpack.c.l.b16 %v2275_v15 }
 0x154   : > { %v2454_v12 = vpop.f32.mrf.mxu0  ;;  %v3337_v26 = vrot.slane %v3335_v6, 5  ;;  %v2285_v24 = vsel %vm5787_vm2, %v2280_v0, %v2284_v31  ;;  %v3332_v35 = vor.u32 %v3331_v7, %v3328_v63  ;;  %v5259_v0 = vld [vmem:[%s5766_s25 + $0x24] sm:$0xf]  ;;  %v6496_v31 = vld [vmem:[%s5766_s25 + $0x28] sm:$0xf] }
 0x155   : > { %v1772_v16 = vpop.f32.mrf.mxu3  ;;  %v1081_v29 = vpop.f32.mrf.mxu1  ;;  %v2326_v1 = vunpack.c.l.b16 %v2285_v24 }
 0x156   : > { %v1834_v48 = vadd.f32 %v1772_v16, %v1519_v57  ;;  %v6481_v57 = vld [vmem:[%s5766_s25 + $0x20] sm:$0x1]  ;;  %v1082_v30 = vadd.f32 %v1081_v29, %v6220_v60  ;;  %v3333_v23 = vrot.slane %v3332_v35, 4  ;;  %v5658_v29 = vld [vmem:[%s5766_s25 + $0x1c] sm:$0xf] }
 0x157   : > { %5046 = vmatmul.msk.bf16.gmra.mxu0 %vm747_vm3, %v2341_v47  ;;  %v2609_v7 = vrot.slane %v5658_v29, 5  ;;  %v5049_v35 = vld [vmem:[%s5766_s25 + $0x18] sm:$0xe] }
 0x158   : > { %v1459_v5 = vpop.f32.mrf.mxu2  ;;  %4767 = vmatmul.msk.bf16.gmra.mxu1 %vm747_vm3, %v5434_v2  ;;  %v6478_v28 = vadd.f32 %v2454_v12, %v1834_v48  ;;  %v3342_v2 = vor.u32 %v3341_v36, %v3337_v26  ;;  %v3345_v12 = vshll.u32 %v6481_v57, 16  ;;  %v3338_v15 = vsel %vm5787_vm2, %v3333_v23, %v3337_v26 }
 0x159   : > { %v1520_v50 = vadd.f32 %v1459_v5, %v1079_v11  ;;  %v2342_v5 = vpack.c.b16 %v2326_v1, %v2325_v43  ;;  %v4028_v26 = vrot.slane %v6481_v57, 5  ;;  %v5659_v43 = vld [vmem:[%s5766_s25 + $0x20] sm:$0x1]  ;;  %v5065_v23 = vrot.slane %v5049_v35, 9 }
 0x15a   : > { %v3343_v48 = vrot.slane %v3342_v2, 4  ;;  %v3347_v11 = vrot.slane %v3345_v12, 5  ;;  %v3350_v2 = vshrl.u32 %v5259_v0, 16  ;;  %v3353_v12 = vshll.u32 %v5259_v0, 16 }
 0x15b   : > { %v2612_v1 = vrot.slane %v5659_v43, 5  ;;  %v2610_v35 = vsel %vm6005_vm6, %v5065_v23, %v2609_v7  ;;  %v5262_v23 = vld [vmem:[%s5766_s25 + $0x30] sm:$0xf] }
 0x15c   : > { %v2456_v47 = vpop.f32.mrf.mxu0  ;;  %v3348_v24 = vsel %vm5787_vm2, %v3343_v48, %v3347_v11  ;;  %v2611_v48 = vrot.slane %v2609_v7, 4  ;;  %v3355_v57 = vrot.slane %v3353_v12, 5 }
 0x15d   : > { %v1774_v55 = vpop.f32.mrf.mxu3  ;;  %4823 = vmatmul.msk.bf16.gmra.mxu2 %vm747_vm3, %v1345_v54  ;;  %v1083_v51 = vpop.f32.mrf.mxu1  ;;  %v4025_v54 = vrot.slane %v6466_v8, 5  ;;  %v3719_v0 = vunpack.c.l.b16 %v3348_v24 }
 0x15e   : > { %v1835_v46 = vadd.f32 %v1774_v55, %v1520_v50  ;;  %v5360_v55 = vrot.slane %v5344_v33, 9  ;;  %v5475_v33 = vld [vmem:[%s5766_s25 + $0x18] sm:$0xff]  ;;  %v2613_v24 = vsel %vm6005_vm6, %v2611_v48, %v2612_v1  ;;  %v6536_v48 = vld [vmem:[%s5766_s25 + $0x34] sm:$0xf] }
 0x160   : > { %v1462_v16 = vpop.f32.mrf.mxu2  ;;  %v6498_v63 = vadd.f32 %v2456_v47, %v1835_v46  ;;  %v3359_v47 = vshll.u32 %v6496_v31, 16  ;;  %v3363_v46 = vshrl.u32 %v6496_v31, 16 }
 0x161   : > { %v1521_v6 = vadd.f32 %v1462_v16, %v1082_v30  ;;  %v4027_v30 = vrot.slane %v4025_v54, 4 }
 0x162   : > { %4959 = vmatmul.msk.bf16.gmra.mxu3 %vm747_vm3, %v5462_v20  ;;  %v1084_v20 = vadd.f32 %v1083_v51, %v6249_v34  ;;  %v3352_v51 = vrot.slane %v3350_v2, 4  ;;  %v6519_v29 = vrot.slane %v3359_v47, 5 }
 0x164   : > { %v2459_v60 = vpop.f32.mrf.mxu0  ;;  %v3356_v47 = vor.u32 %v3355_v57, %v3352_v51  ;;  %v5345_v51 = vld [vmem:[%s5766_s25 + $0x24] sm:$0xe] }
 0x165   : > { %v1777_v50 = vpop.f32.mrf.mxu3  ;;  %v1086_v36 = vpop.f32.mrf.mxu1 }
 0x166   : > { %v1836_v8 = vadd.f32 %v1777_v50, %v1521_v6  ;;  %v3718_v6 = vunpack.c.l.b16 %v3338_v15  ;;  %v3365_v50 = vrot.slane %v3363_v46, 4  ;;  %v1087_v7 = vadd.f32 %v1086_v36, %v6119_v27 }
 0x167   : > { %5047 = vmatmul.msk.bf16.gmra.mxu0 %vm747_vm3, %v2342_v5  ;;  %v4026_v5 = vsel %vm6005_vm6, %v5360_v55, %v4025_v54  ;;  %v4032_v27 = vrot.slane %v6496_v31, 5 }
 0x168   : > { %v1464_v16 = vpop.f32.mrf.mxu2  ;;  %5104 = vmatmul.msk.bf16.vlgmr.msra.gmra.mxu1 %vm747_vm3, %v6468_v19  ;;  %v6517_v34 = vadd.f32 %v2459_v60, %v1836_v8  ;;  %v4029_v19 = vsel %vm6005_vm6, %v4027_v30, %v4028_v26  ;;  %v3750_v60 = vpack.c.b16 %v3719_v0, %v3718_v6  ;;  %v4144_v55 = vunpack.c.l.b16 %v4026_v5 }
 0x169   : > { %v1522_v11 = vadd.f32 %v1464_v16, %v1084_v20  ;;  %v6528_v20 = vld [vmem:[%s5766_s25 + $0x2c] sm:$0x1]  ;;  %v4145_v12 = vunpack.c.l.b16 %v4029_v19  ;;  %v3366_v46 = vor.u32 %v3365_v50, %v6519_v29  ;;  %v2723_v30 = vunpack.c.l.b16 %v2610_v35 }
 0x16a   : > { %v2724_v26 = vunpack.c.l.b16 %v2613_v24  ;;  %v3369_v43 = vshll.u32 %v6528_v20, 16  ;;  %v3374_v50 = vshrl.u32 %v5262_v23, 16  ;;  %v3377_v19 = vshll.u32 %v5262_v23, 16 }
 0x16b   : > { %v4176_v6 = vpack.c.b16 %v4145_v12, %v4144_v55  ;;  %v3383_v35 = vshll.u32 %v6536_v48, 16  ;;  %v3387_v24 = vshrl.u32 %v6536_v48, 16  ;;  %v5660_v55 = vld [vmem:[%s5766_s25 + $0x28] sm:$0xf]  ;;  %v4035_v31 = vrot.slane %v6528_v20, 5 }
 0x16c   : > { %v2461_v15 = vpop.f32.mrf.mxu0  ;;  %v2754_v0 = vpack.c.b16 %v2724_v26, %v2723_v30  ;;  %v3371_v5 = vrot.slane %v3369_v43, 5  ;;  %v2616_v12 = vrot.slane %v5660_v55, 5  ;;  %v5361_v30 = vrot.slane %v5345_v51, 9  ;;  %v5476_v55 = vld [vmem:[%s5766_s25 + $0x24] sm:$0xff] }
 0x16d   : > { %v1779_v54 = vpop.f32.mrf.mxu3  ;;  %5240 = vmatmul.msk.bf16.vlgmr.msra.gmra.mxu2 %vm747_vm3, %v5475_v33  ;;  %v1088_v2 = vpop.f32.mrf.mxu1  ;;  %v3367_v33 = vrot.slane %v3366_v46, 4  ;;  %v3379_v51 = vrot.slane %v3377_v19, 5  ;;  %v6557_v20 = vrot.slane %v3383_v35, 5 }
 0x16e   : > { %v1837_v8 = vadd.f32 %v1779_v54, %v1522_v11  ;;  %v3357_v11 = vrot.slane %v3356_v47, 4  ;;  %v5661_v47 = vld [vmem:[%s5766_s25 + $0x2c] sm:$0x1] }
 0x16f   : > { %v2619_v46 = vrot.slane %v5661_v47, 5  ;;  %v3372_v43 = vsel %vm5787_vm2, %v3367_v33, %v3371_v5  ;;  %v4033_v5 = vsel %vm6005_vm6, %v5361_v30, %v4032_v27 }
 0x170   : > { %v1467_v1 = vpop.f32.mrf.mxu2  ;;  %v6541_v36 = vadd.f32 %v2461_v15, %v1837_v8  ;;  %v5050_v15 = vld [vmem:[%s5766_s25 + $0x24] sm:$0xe]  ;;  %v1089_v8 = vadd.f32 %v1088_v2, %v6140_v58  ;;  %v3362_v26 = vsel %vm5787_vm2, %v3357_v11, %v6519_v29  ;;  %v2618_v2 = vrot.slane %v2616_v12, 4 }
 0x171   : > { %v1523_v16 = vadd.f32 %v1467_v1, %v1087_v7  ;;  %v4034_v1 = vrot.slane %v4032_v27, 4  ;;  %v5066_v58 = vrot.slane %v5050_v15, 9  ;;  %v3720_v29 = vunpack.c.l.b16 %v3362_v26 }
 0x172   : > { %5328 = vmatmul.msk.bf16.vlgmr.msra.gmra.mxu3 %vm747_vm3, %v3750_v60  ;;  %7214 = vst [vmem:[#allocation3_spill] sm:$0xff] %v6541_v36  ;;  %v3721_v11 = vunpack.c.l.b16 %v3372_v43  ;;  %v6563_v36 = vld [vmem:[%s5766_s25 + $0x38] sm:$0x1] }
 0x173   : > { %v3393_v27 = vshll.u32 %v6563_v36, 16 }
 0x174   : > { %v2464_v57 = vpop.f32.mrf.mxu0  ;;  %v3751_v15 = vpack.c.b16 %v3721_v11, %v3720_v29  ;;  %v5662_v11 = vld [vmem:[%s5766_s25 + $0x34] sm:$0xf] }
 0x175   : > { %v1782_v54 = vpop.f32.mrf.mxu3  ;;  %v1091_v60 = vpop.f32.mrf.mxu1 }
 0x176   : > { %v1838_v7 = vadd.f32 %v1782_v54, %v1523_v16  ;;  %v3376_v16 = vrot.slane %v3374_v50, 4  ;;  %v3389_v54 = vrot.slane %v3387_v24, 4  ;;  %v2620_v24 = vsel %vm6005_vm6, %v2618_v2, %v2619_v46  ;;  %v6582_v2 = vld [vmem:[%s5766_s25 + $0x40] sm:$0xf] }
 0x177   : > { %5400 = vmatmul.msk.bf16.vlgmr.msra.gmra.mxu0 %vm747_vm3, %v4176_v6 }
 0x178   : > { %v1469_v23 = vpop.f32.mrf.mxu2  ;;  %5105 = vmatmul.msk.bf16.gmra.mxu1 %vm747_vm3, %v2754_v0  ;;  %v6560_v47 = vadd.f32 %v2464_v57, %v1838_v7  ;;  %v4036_v0 = vsel %vm6005_vm6, %v4034_v1, %v4035_v31  ;;  %v3380_v50 = vor.u32 %v3379_v51, %v3376_v16  ;;  %v2617_v57 = vsel %vm6005_vm6, %v5066_v58, %v2616_v12 }
 0x179   : > { %v1524_v6 = vadd.f32 %v1469_v23, %v1089_v8  ;;  %v3390_v7 = vor.u32 %v3389_v54, %v6557_v20  ;;  %v1092_v31 = vadd.f32 %v1091_v60, %v6157_v18  ;;  %v4146_v8 = vunpack.c.l.b16 %v4033_v5  ;;  %v5346_v54 = vld [vmem:[%s5766_s25 + $0x30] sm:$0xe] }
 0x17a   : > { %v4147_v26 = vunpack.c.l.b16 %v4036_v0  ;;  %v2725_v1 = vunpack.c.l.b16 %v2617_v57  ;;  %v2726_v12 = vunpack.c.l.b16 %v2620_v24  ;;  %v3381_v16 = vrot.slane %v3380_v50, 4 }
 0x17b   : > { %v3391_v46 = vrot.slane %v3390_v7, 4  ;;  %v3395_v51 = vrot.slane %v3393_v27, 5  ;;  %v4039_v58 = vrot.slane %v6536_v48, 5  ;;  %v2623_v5 = vrot.slane %v5662_v11, 5  ;;  %v5051_v48 = vld [vmem:[%s5766_s25 + $0x30] sm:$0xe] }
 0x17c   : > { %v2466_v33 = vpop.f32.mrf.mxu0  ;;  %v2755_v29 = vpack.c.b16 %v2726_v12, %v2725_v1  ;;  %v5362_v24 = vrot.slane %v5346_v54, 9 }
 0x17d   : > { %v1784_v19 = vpop.f32.mrf.mxu3  ;;  %5241 = vmatmul.msk.bf16.gmra.mxu2 %vm747_vm3, %v5476_v55  ;;  %v1093_v35 = vpop.f32.mrf.mxu1  ;;  %v5265_v55 = vld [vmem:[%s5766_s25 + $0x3c] sm:$0xf]  ;;  %v3396_v57 = vsel %vm5787_vm2, %v3391_v46, %v3395_v51  ;;  %v5477_v51 = vld [vmem:[%s5766_s25 + $0x30] sm:$0xff] }
 0x17e   : > { %v1839_v30 = vadd.f32 %v1784_v19, %v1524_v6  ;;  %v4177_v6 = vpack.c.b16 %v4147_v26, %v4146_v8  ;;  %v3386_v19 = vsel %vm5787_vm2, %v3381_v16, %v6557_v20  ;;  %v3398_v7 = vshrl.u32 %v5265_v55, 16  ;;  %v5663_v26 = vld [vmem:[%s5766_s25 + $0x38] sm:$0x1] }
 0x17f   : > { %v4041_v8 = vrot.slane %v4039_v58, 4  ;;  %v4042_v20 = vrot.slane %v6563_v36, 5  ;;  %v3722_v12 = vunpack.c.l.b16 %v3386_v19  ;;  %v2625_v16 = vrot.slane %v2623_v5, 4 }
 0x180   : > { %v1472_v43 = vpop.f32.mrf.mxu2  ;;  %v6584_v18 = vadd.f32 %v2466_v33, %v1839_v30  ;;  %v3401_v33 = vshll.u32 %v5265_v55, 16  ;;  %v3407_v30 = vshll.u32 %v6582_v2, 16  ;;  %v3723_v54 = vunpack.c.l.b16 %v3396_v57 }
 0x181   : > { %v1525_v23 = vadd.f32 %v1472_v43, %v1092_v31  ;;  %v1094_v31 = vadd.f32 %v1093_v35, %v6178_v52  ;;  %v2626_v43 = vrot.slane %v5663_v26, 5  ;;  %v4040_v55 = vsel %vm6005_vm6, %v5362_v24, %v4039_v58 }
 0x182   : > { %5329 = vmatmul.msk.bf16.gmra.mxu3 %vm747_vm3, %v3751_v15  ;;  %v3411_v15 = vshrl.u32 %v6582_v2, 16  ;;  %v3400_v52 = vrot.slane %v3398_v7, 4  ;;  %v3403_v35 = vrot.slane %v3401_v33, 5  ;;  %v6605_v36 = vrot.slane %v3407_v30, 5 }
 0x183   : > { %v2627_v57 = vsel %vm6005_vm6, %v2625_v16, %v2626_v43  ;;  %v4148_v24 = vunpack.c.l.b16 %v4040_v55  ;;  %v5347_v55 = vld [vmem:[%s5766_s25 + $0x3c] sm:$0xe] }
 0x184   : > { %v2469_v60 = vpop.f32.mrf.mxu0  ;;  %v3413_v11 = vrot.slane %v3411_v15, 4  ;;  %v3404_v30 = vor.u32 %v3403_v35, %v3400_v52 }
 0x185   : > { %v1787_v0 = vpop.f32.mrf.mxu3  ;;  %v1096_v50 = vpop.f32.mrf.mxu1 }
 0x186   : > { %v1840_v27 = vadd.f32 %v1787_v0, %v1525_v23  ;;  %v5067_v23 = vrot.slane %v5051_v48, 9  ;;  %v6614_v48 = vld [vmem:[%s5766_s25 + $0x44] sm:$0x1]  ;;  %v3414_v15 = vor.u32 %v3413_v11, %v6605_v36  ;;  %v3405_v16 = vrot.slane %v3404_v30, 4 }
 0x187   : > { %5401 = vmatmul.msk.bf16.gmra.mxu0 %vm747_vm3, %v4177_v6 }
 0x188   : > { %v1474_v1 = vpop.f32.mrf.mxu2  ;;  %5106 = vmatmul.msk.bf16.gmra.mxu1 %vm747_vm3, %v2755_v29  ;;  %v6603_v6 = vadd.f32 %v2469_v60, %v1840_v27  ;;  %v4043_v29 = vsel %vm6005_vm6, %v4041_v8, %v4042_v20  ;;  %v2624_v19 = vsel %vm6005_vm6, %v5067_v23, %v2623_v5  ;;  %v3752_v60 = vpack.c.b16 %v3723_v54, %v3722_v12  ;;  %v6622_v23 = vld [vmem:[%s5766_s25 + $0x4c] sm:$0xf] }
 0x189   : > { %v1526_v46 = vadd.f32 %v1474_v1, %v1094_v31  ;;  %v4149_v33 = vunpack.c.l.b16 %v4043_v29  ;;  %v1097_v5 = vadd.f32 %v1096_v50, %v6201_v22  ;;  %v2727_v31 = vunpack.c.l.b16 %v2624_v19  ;;  %v5268_v1 = vld [vmem:[%s5766_s25 + $0x48] sm:$0xf] }
 0x18a   : > { %v2728_v8 = vunpack.c.l.b16 %v2627_v57  ;;  %v3417_v20 = vshll.u32 %v6614_v48, 16  ;;  %v4046_v22 = vrot.slane %v6582_v2, 5  ;;  %v3422_v35 = vshrl.u32 %v5268_v1, 16 }
 0x18b   : > { %v4178_v12 = vpack.c.b16 %v4149_v33, %v4148_v24  ;;  %v3425_v11 = vshll.u32 %v5268_v1, 16  ;;  %v3431_v29 = vshll.u32 %v6622_v23, 16  ;;  %v3435_v19 = vshrl.u32 %v6622_v23, 16  ;;  %v5665_v33 = vld [vmem:[%s5766_s25 + $0x44] sm:$0x1] }
 0x18c   : > { %v2471_v0 = vpop.f32.mrf.mxu0  ;;  %v3419_v54 = vrot.slane %v3417_v20, 5  ;;  %v2633_v30 = vrot.slane %v5665_v33, 5  ;;  %v4049_v2 = vrot.slane %v6614_v48, 5  ;;  %v4048_v20 = vrot.slane %v4046_v22, 4  ;;  %v6649_v33 = vld [vmem:[%s5766_s25 + $0x50] sm:$0x1] }
 0x18d   : > { %v1789_v58 = vpop.f32.mrf.mxu3  ;;  %5242 = vmatmul.msk.bf16.gmra.mxu2 %vm747_vm3, %v5477_v51  ;;  %v1098_v7 = vpop.f32.mrf.mxu1  ;;  %v2756_v51 = vpack.c.b16 %v2728_v8, %v2727_v31  ;;  %v3410_v31 = vsel %vm5787_vm2, %v3405_v16, %v6605_v36  ;;  %v3427_v1 = vrot.slane %v3425_v11, 5  ;;  %v6643_v48 = vrot.slane %v3431_v29, 5 }
 0x18e   : > { %v1841_v27 = vadd.f32 %v1789_v58, %v1526_v46  ;;  %v3415_v46 = vrot.slane %v3414_v15, 4  ;;  %v3724_v36 = vunpack.c.l.b16 %v3410_v31 }
 0x190   : > { %v1477_v26 = vpop.f32.mrf.mxu2  ;;  %v6627_v50 = vadd.f32 %v2471_v0, %v1841_v27  ;;  %v5052_v0 = vld [vmem:[%s5766_s25 + $0x3c] sm:$0xe]  ;;  %v1099_v27 = vadd.f32 %v1098_v7, %v6222_v4  ;;  %v3420_v8 = vsel %vm5787_vm2, %v3415_v46, %v3419_v54 }
 0x191   : > { %v1527_v43 = vadd.f32 %v1477_v26, %v1097_v5  ;;  %v5363_v5 = vrot.slane %v5347_v55, 9  ;;  %v3437_v55 = vrot.slane %v3435_v19, 4  ;;  %v5068_v4 = vrot.slane %v5052_v0, 9 }
 0x192   : > { %5330 = vmatmul.msk.bf16.gmra.mxu3 %vm747_vm3, %v3752_v60  ;;  %v5664_v60 = vld [vmem:[%s5766_s25 + $0x40] sm:$0xf]  ;;  %v3725_v16 = vunpack.c.l.b16 %v3420_v8 }
 0x193   : > { %v2630_v24 = vrot.slane %v5664_v60, 5  ;;  %v4047_v54 = vsel %vm6005_vm6, %v5363_v5, %v4046_v22  ;;  %v3441_v22 = vshll.u32 %v6649_v33, 16 }
 0x194   : > { %v2474_v52 = vpop.f32.mrf.mxu0  ;;  %v3753_v0 = vpack.c.b16 %v3725_v16, %v3724_v36  ;;  %v5666_v16 = vld [vmem:[%s5766_s25 + $0x4c] sm:$0xf] }
 0x195   : > { %v1792_v57 = vpop.f32.mrf.mxu3  ;;  %v1101_v58 = vpop.f32.mrf.mxu1  ;;  %v2632_v7 = vrot.slane %v2630_v24, 4 }
 0x196   : > { %v1842_v15 = vadd.f32 %v1792_v57, %v1527_v43  ;;  %v3424_v43 = vrot.slane %v3422_v35, 4  ;;  %v5478_v57 = vld [vmem:[%s5766_s25 + $0x3c] sm:$0xff] }
 0x197   : > { %5402 = vmatmul.msk.bf16.gmra.mxu0 %vm747_vm3, %v4178_v12  ;;  %v2634_v19 = vsel %vm6005_vm6, %v2632_v7, %v2633_v30  ;;  %v6668_v7 = vld [vmem:[%s5766_s25 + $0x58] sm:$0xf] }
 0x198   : > { %v1479_v26 = vpop.f32.mrf.mxu2  ;;  %5107 = vmatmul.msk.bf16.gmra.mxu1 %vm747_vm3, %v2756_v51  ;;  %v6646_v60 = vadd.f32 %v2474_v52, %v1842_v15  ;;  %v4050_v51 = vsel %vm6005_vm6, %v4048_v20, %v4049_v2  ;;  %v3428_v35 = vor.u32 %v3427_v1, %v3424_v43  ;;  %v2631_v52 = vsel %vm6005_vm6, %v5068_v4, %v2630_v24 }
 0x199   : > { %v1528_v12 = vadd.f32 %v1479_v26, %v1099_v27  ;;  %v3438_v15 = vor.u32 %v3437_v55, %v6643_v48  ;;  %v1102_v2 = vadd.f32 %v1101_v58, %v6252_v45  ;;  %v4150_v27 = vunpack.c.l.b16 %v4047_v54  ;;  %v5348_v55 = vld [vmem:[%s5766_s25 + $0x48] sm:$0xe] }
 0x19a   : > { %v4151_v31 = vunpack.c.l.b16 %v4050_v51  ;;  %v2729_v20 = vunpack.c.l.b16 %v2631_v52  ;;  %v2730_v24 = vunpack.c.l.b16 %v2634_v19  ;;  %v3429_v43 = vrot.slane %v3428_v35, 4 }
 0x19b   : > { %v3439_v30 = vrot.slane %v3438_v15, 4  ;;  %v3443_v1 = vrot.slane %v3441_v22, 5  ;;  %v4053_v4 = vrot.slane %v6622_v23, 5  ;;  %v2637_v54 = vrot.slane %v5666_v16, 5  ;;  %v5053_v23 = vld [vmem:[%s5766_s25 + $0x48] sm:$0xe] }
 0x19c   : > { %v2476_v46 = vpop.f32.mrf.mxu0  ;;  %v2757_v36 = vpack.c.b16 %v2730_v24, %v2729_v20  ;;  %v5364_v19 = vrot.slane %v5348_v55, 9 }
 0x19d   : > { %v1794_v11 = vpop.f32.mrf.mxu3  ;;  %5243 = vmatmul.msk.bf16.gmra.mxu2 %vm747_vm3, %v5478_v57  ;;  %v1103_v29 = vpop.f32.mrf.mxu1  ;;  %v5271_v57 = vld [vmem:[%s5766_s25 + $0x54] sm:$0xf]  ;;  %v3444_v52 = vsel %vm5787_vm2, %v3439_v30, %v3443_v1  ;;  %v5479_v1 = vld [vmem:[%s5766_s25 + $0x48] sm:$0xff] }
 0x19e   : > { %v1843_v5 = vadd.f32 %v1794_v11, %v1528_v12  ;;  %v4179_v12 = vpack.c.b16 %v4151_v31, %v4150_v27  ;;  %v3434_v11 = vsel %vm5787_vm2, %v3429_v43, %v6643_v48  ;;  %v3446_v15 = vshrl.u32 %v5271_v57, 16  ;;  %v5667_v31 = vld [vmem:[%s5766_s25 + $0x50] sm:$0x1] }
 0x19f   : > { %v4055_v27 = vrot.slane %v4053_v4, 4  ;;  %v4056_v48 = vrot.slane %v6649_v33, 5  ;;  %v3726_v24 = vunpack.c.l.b16 %v3434_v11  ;;  %v2639_v43 = vrot.slane %v2637_v54, 4 }
 0x1a0   : > { %v1482_v8 = vpop.f32.mrf.mxu2  ;;  %v6670_v45 = vadd.f32 %v2476_v46, %v1843_v5  ;;  %v3449_v46 = vshll.u32 %v5271_v57, 16  ;;  %v3455_v5 = vshll.u32 %v6668_v7, 16  ;;  %v3727_v55 = vunpack.c.l.b16 %v3444_v52 }
 0x1a1   : > { %v1529_v26 = vadd.f32 %v1482_v8, %v1102_v2  ;;  %v1104_v2 = vadd.f32 %v1103_v29, %v6267_v13  ;;  %v2640_v8 = vrot.slane %v5667_v31, 5  ;;  %v4054_v57 = vsel %vm6005_vm6, %v5364_v19, %v4053_v4 }
 0x1a2   : > { %5331 = vmatmul.msk.bf16.gmra.mxu3 %vm747_vm3, %v3753_v0  ;;  %v3459_v0 = vshrl.u32 %v6668_v7, 16  ;;  %v3448_v13 = vrot.slane %v3446_v15, 4  ;;  %v3451_v29 = vrot.slane %v3449_v46, 5  ;;  %v6691_v33 = vrot.slane %v3455_v5, 5 }
 0x1a3   : > { %v2641_v52 = vsel %vm6005_vm6, %v2639_v43, %v2640_v8  ;;  %v4152_v19 = vunpack.c.l.b16 %v4054_v57  ;;  %v5349_v57 = vld [vmem:[%s5766_s25 + $0x54] sm:$0xe] }
 0x1a4   : > { %v2479_v58 = vpop.f32.mrf.mxu0  ;;  %v3461_v16 = vrot.slane %v3459_v0, 4  ;;  %v3452_v5 = vor.u32 %v3451_v29, %v3448_v13 }
 0x1a5   : > { %v1797_v51 = vpop.f32.mrf.mxu3  ;;  %v1106_v35 = vpop.f32.mrf.mxu1 }
 0x1a6   : > { %v1844_v22 = vadd.f32 %v1797_v51, %v1529_v26  ;;  %v5069_v26 = vrot.slane %v5053_v23, 9  ;;  %v6700_v23 = vld [vmem:[%s5766_s25 + $0x5c] sm:$0x1]  ;;  %v3462_v0 = vor.u32 %v3461_v16, %v6691_v33  ;;  %v3453_v43 = vrot.slane %v3452_v5, 4 }
 0x1a7   : > { %5403 = vmatmul.msk.bf16.gmra.mxu0 %vm747_vm3, %v4179_v12 }
 0x1a8   : > { %v1484_v20 = vpop.f32.mrf.mxu2  ;;  %5108 = vmatmul.msk.bf16.gmra.mxu1 %vm747_vm3, %v2757_v36  ;;  %v6689_v12 = vadd.f32 %v2479_v58, %v1844_v22  ;;  %v4057_v36 = vsel %vm6005_vm6, %v4055_v27, %v4056_v48  ;;  %v2638_v11 = vsel %vm6005_vm6, %v5069_v26, %v2637_v54  ;;  %v3754_v58 = vpack.c.b16 %v3727_v55, %v3726_v24  ;;  %v6708_v26 = vld [vmem:[%s5766_s25 + $0x64] sm:$0xf] }
 0x1a9   : > { %v1530_v30 = vadd.f32 %v1484_v20, %v1104_v2  ;;  %v4153_v46 = vunpack.c.l.b16 %v4057_v36  ;;  %v1107_v54 = vadd.f32 %v1106_v35, %v6131_v40  ;;  %v2731_v2 = vunpack.c.l.b16 %v2638_v11  ;;  %v5274_v20 = vld [vmem:[%s5766_s25 + $0x60] sm:$0xf] }
 0x1aa   : > { %v2732_v27 = vunpack.c.l.b16 %v2641_v52  ;;  %v3465_v48 = vshll.u32 %v6700_v23, 16  ;;  %v4060_v40 = vrot.slane %v6668_v7, 5  ;;  %v3470_v29 = vshrl.u32 %v5274_v20, 16 }
 0x1ab   : > { %v4180_v24 = vpack.c.b16 %v4153_v46, %v4152_v19  ;;  %v3473_v16 = vshll.u32 %v5274_v20, 16  ;;  %v3479_v36 = vshll.u32 %v6708_v26, 16  ;;  %v3483_v11 = vshrl.u32 %v6708_v26, 16  ;;  %v5669_v46 = vld [vmem:[%s5766_s25 + $0x5c] sm:$0x1] }
 0x1ac   : > { %v2481_v51 = vpop.f32.mrf.mxu0  ;;  %v3467_v55 = vrot.slane %v3465_v48, 5  ;;  %v2647_v5 = vrot.slane %v5669_v46, 5  ;;  %v4063_v7 = vrot.slane %v6700_v23, 5  ;;  %v4062_v48 = vrot.slane %v4060_v40, 4  ;;  %v6735_v46 = vld [vmem:[%s5766_s25 + $0x68] sm:$0x1] }
 0x1ad   : > { %v1799_v4 = vpop.f32.mrf.mxu3  ;;  %5244 = vmatmul.msk.bf16.gmra.mxu2 %vm747_vm3, %v5479_v1  ;;  %v1108_v15 = vpop.f32.mrf.mxu1  ;;  %v2758_v1 = vpack.c.b16 %v2732_v27, %v2731_v2  ;;  %v3458_v2 = vsel %vm5787_vm2, %v3453_v43, %v6691_v33  ;;  %v3475_v20 = vrot.slane %v3473_v16, 5  ;;  %v6729_v23 = vrot.slane %v3479_v36, 5 }
 0x1ae   : > { %v1845_v22 = vadd.f32 %v1799_v4, %v1530_v30  ;;  %v3463_v30 = vrot.slane %v3462_v0, 4  ;;  %v3728_v33 = vunpack.c.l.b16 %v3458_v2 }
 0x1b0   : > { %v1487_v31 = vpop.f32.mrf.mxu2  ;;  %v6713_v35 = vadd.f32 %v2481_v51, %v1845_v22  ;;  %v5054_v51 = vld [vmem:[%s5766_s25 + $0x54] sm:$0xe]  ;;  %v1109_v22 = vadd.f32 %v1108_v15, %v6150_v10  ;;  %v3468_v27 = vsel %vm5787_vm2, %v3463_v30, %v3467_v55 }
 0x1b1   : > { %v1531_v8 = vadd.f32 %v1487_v31, %v1107_v54  ;;  %v5365_v54 = vrot.slane %v5349_v57, 9  ;;  %v3485_v57 = vrot.slane %v3483_v11, 4  ;;  %v5070_v10 = vrot.slane %v5054_v51, 9 }
 0x1b2   : > { %5332 = vmatmul.msk.bf16.gmra.mxu3 %vm747_vm3, %v3754_v58  ;;  %v5668_v58 = vld [vmem:[%s5766_s25 + $0x58] sm:$0xf]  ;;  %v3729_v43 = vunpack.c.l.b16 %v3468_v27 }
 0x1b3   : > { %v2644_v19 = vrot.slane %v5668_v58, 5  ;;  %v4061_v55 = vsel %vm6005_vm6, %v5365_v54, %v4060_v40  ;;  %v3489_v40 = vshll.u32 %v6735_v46, 16 }
 0x1b4   : > { %v2484_v13 = vpop.f32.mrf.mxu0  ;;  %v3755_v51 = vpack.c.b16 %v3729_v43, %v3728_v33 }
 0x1b5   : > { %v1802_v52 = vpop.f32.mrf.mxu3  ;;  %v1111_v4 = vpop.f32.mrf.mxu1  ;;  %v2646_v15 = vrot.slane %v2644_v19, 4 }
 0x1b6   : > { %v1846_v0 = vadd.f32 %v1802_v52, %v1531_v8  ;;  %v3472_v8 = vrot.slane %v3470_v29, 4  ;;  %v5480_v52 = vld [vmem:[%s5766_s25 + $0x54] sm:$0xff] }
 0x1b7   : > { %5404 = vmatmul.msk.bf16.gmra.mxu0 %vm747_vm3, %v4180_v24  ;;  %v2648_v11 = vsel %vm6005_vm6, %v2646_v15, %v2647_v5  ;;  %v3491_v5 = vrot.slane %v3489_v40, 5  ;;  %v6754_v15 = vld [vmem:[%s5766_s25 + $0x70] sm:$0xf]  ;;  %v5055_v40 = vld [vmem:[%s5766_s25 + $0x60] sm:$0xe] }
 0x1b8   : > { %v1489_v31 = vpop.f32.mrf.mxu2  ;;  %5109 = vmatmul.msk.bf16.gmra.mxu1 %vm747_vm3, %v2758_v1  ;;  %v6732_v58 = vadd.f32 %v2484_v13, %v1846_v0  ;;  %v4064_v1 = vsel %vm6005_vm6, %v4062_v48, %v4063_v7  ;;  %v3476_v29 = vor.u32 %v3475_v20, %v3472_v8  ;;  %v2645_v13 = vsel %vm6005_vm6, %v5070_v10, %v2644_v19 }
 0x1b9   : > { %v1532_v24 = vadd.f32 %v1489_v31, %v1109_v22  ;;  %v3486_v0 = vor.u32 %v3485_v57, %v6729_v23  ;;  %v1112_v7 = vadd.f32 %v1111_v4, %v6171_v38  ;;  %v4154_v22 = vunpack.c.l.b16 %v4061_v55  ;;  %v5277_v57 = vld [vmem:[%s5766_s25 + $0x6c] sm:$0xf] }
 0x1ba   : > { %v4155_v2 = vunpack.c.l.b16 %v4064_v1  ;;  %v2733_v48 = vunpack.c.l.b16 %v2645_v13  ;;  %v2734_v31 = vunpack.c.l.b16 %v2648_v11  ;;  %v3477_v8 = vrot.slane %v3476_v29, 4  ;;  %v5670_v13 = vld [vmem:[%s5766_s25 + $0x64] sm:$0xf] }
 0x1bb   : > { %v3487_v20 = vrot.slane %v3486_v0, 4  ;;  %v4067_v10 = vrot.slane %v6708_v26, 5  ;;  %v2651_v11 = vrot.slane %v5670_v13, 5  ;;  %v3494_v26 = vshrl.u32 %v5277_v57, 16 }
 0x1bc   : > { %v2486_v30 = vpop.f32.mrf.mxu0  ;;  %v2759_v33 = vpack.c.b16 %v2734_v31, %v2733_v48  ;;  %v3482_v29 = vsel %vm5787_vm2, %v3477_v8, %v6729_v23  ;;  %v4070_v23 = vrot.slane %v6735_v46, 5 }
 0x1bd   : > { %v1804_v16 = vpop.f32.mrf.mxu3  ;;  %5245 = vmatmul.msk.bf16.gmra.mxu2 %vm747_vm3, %v5480_v52  ;;  %v1113_v36 = vpop.f32.mrf.mxu1  ;;  %v5350_v52 = vld [vmem:[%s5766_s25 + $0x60] sm:$0xe]  ;;  %v3730_v31 = vunpack.c.l.b16 %v3482_v29  ;;  %v6782_v29 = vld [vmem:[%s5766_s25 + $0x74] sm:$0x1] }
 0x1be   : > { %v1847_v54 = vadd.f32 %v1804_v16, %v1532_v24  ;;  %v4181_v24 = vpack.c.b16 %v4155_v2, %v4154_v22  ;;  %v5366_v43 = vrot.slane %v5350_v52, 9  ;;  %v3492_v16 = vsel %vm5787_vm2, %v3487_v20, %v3491_v5  ;;  %v5671_v2 = vld [vmem:[%s5766_s25 + $0x68] sm:$0x1]  ;;  %v5481_v5 = vld [vmem:[%s5766_s25 + $0x60] sm:$0xff] }
 0x1bf   : > { %v4069_v22 = vrot.slane %v4067_v10, 4  ;;  %v5071_v52 = vrot.slane %v5055_v40, 9 }
 0x1c0   : > { %v1492_v27 = vpop.f32.mrf.mxu2  ;;  %v6756_v38 = vadd.f32 %v2486_v30, %v1847_v54  ;;  %v3497_v30 = vshll.u32 %v5277_v57, 16  ;;  %v3503_v54 = vshll.u32 %v6754_v15, 16  ;;  %v4068_v8 = vsel %vm6005_vm6, %v5366_v43, %v4067_v10 }
 0x1c1   : > { %v1533_v19 = vadd.f32 %v1492_v27, %v1112_v7  ;;  %v1114_v7 = vadd.f32 %v1113_v36, %v6190_v3  ;;  %v2654_v27 = vrot.slane %v5671_v2, 5  ;;  %v2653_v57 = vrot.slane %v2651_v11, 4 }
 0x1c2   : > { %5333 = vmatmul.msk.bf16.gmra.mxu3 %vm747_vm3, %v3755_v51  ;;  %v3507_v51 = vshrl.u32 %v6754_v15, 16  ;;  %v3496_v3 = vrot.slane %v3494_v26, 4  ;;  %v3499_v36 = vrot.slane %v3497_v30, 5  ;;  %v6777_v46 = vrot.slane %v3503_v54, 5 }
 0x1c3   : > { %v4071_v13 = vsel %vm6005_vm6, %v4069_v22, %v4070_v23  ;;  %v4156_v43 = vunpack.c.l.b16 %v4068_v8  ;;  %v2652_v26 = vsel %vm6005_vm6, %v5071_v52, %v2651_v11  ;;  %v3513_v22 = vshll.u32 %v6782_v29, 16  ;;  %v6794_v8 = vld [vmem:[%s5766_s25 + $0x7c] sm:$0xf]  ;;  %v5351_v52 = vld [vmem:[%s5766_s25 + $0x6c] sm:$0xe] }
 0x1c4   : > { %v2489_v4 = vpop.f32.mrf.mxu0  ;;  %v4157_v30 = vunpack.c.l.b16 %v4071_v13  ;;  %v3500_v54 = vor.u32 %v3499_v36, %v3496_v3  ;;  %v2735_v2 = vunpack.c.l.b16 %v2652_v26  ;;  %v3527_v13 = vshll.u32 %v6794_v8, 16 }
 0x1c5   : > { %v1807_v55 = vpop.f32.mrf.mxu3  ;;  %v1116_v1 = vpop.f32.mrf.mxu1 }
 0x1c6   : > { %v1848_v0 = vadd.f32 %v1807_v55, %v1533_v19  ;;  %v3731_v19 = vunpack.c.l.b16 %v3492_v16  ;;  %v3509_v55 = vrot.slane %v3507_v51, 4  ;;  %v4182_v11 = vpack.c.b16 %v4157_v30, %v4156_v43  ;;  %v5056_v43 = vld [vmem:[%s5766_s25 + $0x6c] sm:$0xe] }
 0x1c7   : > { %5405 = vmatmul.msk.bf16.gmra.mxu0 %vm747_vm3, %v4181_v24 }
 0x1c8   : > { %v1494_v48 = vpop.f32.mrf.mxu2  ;;  %5110 = vmatmul.msk.bf16.gmra.mxu1 %vm747_vm3, %v2759_v33  ;;  %v6775_v24 = vadd.f32 %v2489_v4, %v1848_v0  ;;  %v3756_v10 = vpack.c.b16 %v3731_v19, %v3730_v31  ;;  %v2655_v0 = vsel %vm6005_vm6, %v2653_v57, %v2654_v27  ;;  %v3510_v51 = vor.u32 %v3509_v55, %v6777_v46  ;;  %v5280_v31 = vld [vmem:[%s5766_s25 + $0x78] sm:$0xf] }
 0x1c9   : > { %v1534_v20 = vadd.f32 %v1494_v48, %v1114_v7  ;;  %v1117_v7 = vadd.f32 %v1116_v1, %v6209_v41  ;;  %v2736_v48 = vunpack.c.l.b16 %v2655_v0  ;;  %v3501_v27 = vrot.slane %v3500_v54, 4  ;;  %v5672_v0 = vld [vmem:[%s5766_s25 + $0x70] sm:$0xf] }
 0x1ca   : > { %v4074_v41 = vrot.slane %v6754_v15, 5  ;;  %v3518_v1 = vshrl.u32 %v5280_v31, 16  ;;  %v3521_v55 = vshll.u32 %v5280_v31, 16  ;;  %v2658_v30 = vrot.slane %v5672_v0, 5 }
 0x1cb   : > { %v2760_v36 = vpack.c.b16 %v2736_v48, %v2735_v2  ;;  %v3506_v15 = vsel %vm5787_vm2, %v3501_v27, %v6777_v46  ;;  %v5072_v48 = vrot.slane %v5056_v43, 9  ;;  %v3529_v46 = vrot.slane %v3527_v13, 5 }
 0x1cc   : > { %v2491_v33 = vpop.f32.mrf.mxu0  ;;  %v3523_v31 = vrot.slane %v3521_v55, 5 }
 0x1cd   : > { %v1809_v16 = vpop.f32.mrf.mxu3  ;;  %5246 = vmatmul.msk.bf16.gmra.mxu2 %vm747_vm3, %v5481_v5  ;;  %v1118_v4 = vpop.f32.mrf.mxu1  ;;  %v3515_v5 = vrot.slane %v3513_v22, 5  ;;  %v4076_v22 = vrot.slane %v4074_v41, 4 }
 0x1ce   : > { %v1849_v40 = vadd.f32 %v1809_v16, %v1534_v20  ;;  %v3511_v20 = vrot.slane %v3510_v51, 4  ;;  %v3531_v16 = vshrl.u32 %v6794_v8, 16  ;;  %v1119_v51 = vadd.f32 %v1118_v4, %v6241_v14 }
 0x1cf   : > { %v3732_v14 = vunpack.c.l.b16 %v3506_v15 }
 0x1d0   : > { %v1497_v23 = vpop.f32.mrf.mxu2  ;;  %v6799_v57 = vadd.f32 %v2491_v33, %v1849_v40  ;;  %v5367_v33 = vrot.slane %v5351_v52, 9  ;;  %v4077_v40 = vrot.slane %v6782_v29, 5  ;;  %v5482_v52 = vld [vmem:[%s5766_s25 + $0x6c] sm:$0xff]  ;;  %v2660_v29 = vrot.slane %v2658_v30, 4 }
 0x1d1   : > { %v1535_v19 = vadd.f32 %v1497_v23, %v1117_v7  ;;  %v3516_v7 = vsel %vm5787_vm2, %v3511_v20, %v3515_v5  ;;  %v3520_v23 = vrot.slane %v3518_v1, 4  ;;  %v6819_v20 = vld [vmem:[%s5766_s25 + $0x80] sm:$0x1] }
 0x1d2   : > { %5334 = vmatmul.msk.bf16.gmra.mxu3 %vm747_vm3, %v3756_v10  ;;  %v3733_v4 = vunpack.c.l.b16 %v3516_v7  ;;  %v4075_v1 = vsel %vm6005_vm6, %v5367_v33, %v4074_v41  ;;  %v3537_v15 = vshll.u32 %v6819_v20, 16 }
 0x1d3   : > { %v3524_v55 = vor.u32 %v3523_v31, %v3520_v23 }
 0x1d4   : > { %v2494_v3 = vpop.f32.mrf.mxu0  ;;  %v3757_v33 = vpack.c.b16 %v3733_v4, %v3732_v14  ;;  %v4081_v14 = vrot.slane %v6794_v8, 5 }
 0x1d5   : > { %v1812_v10 = vpop.f32.mrf.mxu3  ;;  %v1121_v26 = vpop.f32.mrf.mxu1 }
 0x1d6   : > { %v1850_v54 = vadd.f32 %v1812_v10, %v1535_v19  ;;  %v3533_v19 = vrot.slane %v3531_v16, 4  ;;  %v5673_v10 = vld [vmem:[%s5766_s25 + $0x74] sm:$0x1] }
 0x1d7   : > { %5406 = vmatmul.msk.bf16.gmra.mxu0 %vm747_vm3, %v4182_v11  ;;  %v2661_v11 = vrot.slane %v5673_v10, 5 }
 0x1d8   : > { %v1499_v2 = vpop.f32.mrf.mxu2  ;;  %5111 = vmatmul.msk.bf16.gmra.mxu1 %vm747_vm3, %v2760_v36  ;;  %v6816_v0 = vadd.f32 %v2494_v3, %v1850_v54  ;;  %v4078_v36 = vsel %vm6005_vm6, %v4076_v22, %v4077_v40  ;;  %v2659_v3 = vsel %vm6005_vm6, %v5072_v48, %v2658_v30  ;;  %v3534_v54 = vor.u32 %v3533_v19, %v3529_v46  ;;  %v5283_v19 = vld [vmem:[%s5766_s25 + $0x84] sm:$0xf] }
 0x1d9   : > { %v1536_v27 = vadd.f32 %v1499_v2, %v1119_v51  ;;  %v2662_v43 = vsel %vm6005_vm6, %v2660_v29, %v2661_v11  ;;  %v1122_v40 = vadd.f32 %v1121_v26, %v6263_v62  ;;  %v4158_v51 = vunpack.c.l.b16 %v4075_v1  ;;  %v5352_v11 = vld [vmem:[%s5766_s25 + $0x78] sm:$0xe] }
 0x1da   : > { %v4159_v7 = vunpack.c.l.b16 %v4078_v36  ;;  %v2737_v23 = vunpack.c.l.b16 %v2659_v3  ;;  %v2738_v2 = vunpack.c.l.b16 %v2662_v43  ;;  %v3525_v30 = vrot.slane %v3524_v55, 4  ;;  %v5674_v3 = vld [vmem:[%s5766_s25 + $0x7c] sm:$0xf] }
 0x1db   : > { %v3535_v48 = vrot.slane %v3534_v54, 4  ;;  %v2665_v43 = vrot.slane %v5674_v3, 5  ;;  %v3542_v54 = vshrl.u32 %v5283_v19, 16 }
 0x1dc   : > { %v2496_v5 = vpop.f32.mrf.mxu0  ;;  %v4183_v29 = vpack.c.b16 %v4159_v7, %v4158_v51  ;;  %v2761_v26 = vpack.c.b16 %v2738_v2, %v2737_v23  ;;  %v3530_v36 = vsel %vm5787_vm2, %v3525_v30, %v3529_v46  ;;  %v5368_v46 = vrot.slane %v5352_v11, 9  ;;  %v5483_v30 = vld [vmem:[%s5766_s25 + $0x78] sm:$0xff] }
 0x1dd   : > { %v1814_v13 = vpop.f32.mrf.mxu3  ;;  %5247 = vmatmul.msk.bf16.gmra.mxu2 %vm747_vm3, %v5482_v52  ;;  %v1123_v16 = vpop.f32.mrf.mxu1  ;;  %v3539_v52 = vrot.slane %v3537_v15, 5  ;;  %v3545_v15 = vshll.u32 %v5283_v19, 16  ;;  %v3734_v7 = vunpack.c.l.b16 %v3530_v36  ;;  %v4083_v23 = vrot.slane %v4081_v14, 4 }
 0x1de   : > { %v1851_v41 = vadd.f32 %v1814_v13, %v1536_v27  ;;  %v6835_v27 = vld [vmem:[%s5766_s25 + $0x88] sm:$0xf]  ;;  %v5057_v13 = vld [vmem:[%s5766_s25 + $0x78] sm:$0xe] }
 0x1df   : > { %v3540_v55 = vsel %vm5787_vm2, %v3535_v48, %v3539_v52  ;;  %v3555_v8 = vshrl.u32 %v6835_v27, 16  ;;  %v5073_v2 = vrot.slane %v5057_v13, 9  ;;  %v2667_v48 = vrot.slane %v2665_v43, 4  ;;  %v5675_v52 = vld [vmem:[%s5766_s25 + $0x80] sm:$0x1] }
 0x1e0   : > { %v1502_v22 = vpop.f32.mrf.mxu2  ;;  %v6837_v10 = vadd.f32 %v2496_v5, %v1851_v41  ;;  %v3551_v41 = vshll.u32 %v6835_v27, 16  ;;  %v2668_v19 = vrot.slane %v5675_v52, 5  ;;  %v5286_v52 = vld [vmem:[%s5766_s25 + $0x90] sm:$0xf] }
 0x1e1   : > { %v1537_v31 = vadd.f32 %v1502_v22, %v1122_v40  ;;  %v4084_v40 = vrot.slane %v6819_v20, 5  ;;  %v3735_v22 = vunpack.c.l.b16 %v3540_v55  ;;  %v3557_v11 = vrot.slane %v3555_v8, 4  ;;  %v6858_v20 = vld [vmem:[%s5766_s25 + $0x8c] sm:$0x1] }
 0x1e2   : > { %5335 = vmatmul.msk.bf16.gmra.mxu3 %vm747_vm3, %v3757_v33  ;;  %v1124_v33 = vadd.f32 %v1123_v16, %v6280_v44  ;;  %v3547_v44 = vrot.slane %v3545_v15, 5  ;;  %v3553_v16 = vrot.slane %v3551_v41, 5 }
 0x1e3   : > { %v4085_v36 = vsel %vm6005_vm6, %v4083_v23, %v4084_v40  ;;  %v3758_v13 = vpack.c.b16 %v3735_v22, %v3734_v7 }
 0x1e4   : > { %v2499_v62 = vpop.f32.mrf.mxu0  ;;  %v3558_v41 = vor.u32 %v3557_v11, %v3553_v16 }
 0x1e5   : > { %v1817_v4 = vpop.f32.mrf.mxu3  ;;  %v2850_v1 = vpop.f32.mrf.mxu1 }
 0x1e6   : > { %v1852_v5 = vadd.f32 %v1817_v4, %v1537_v31  ;;  %v2930_v22 = vadd.f32 %v2850_v1, %v6297_v49  ;;  %v3559_v23 = vrot.slane %v3558_v41, 4 }
 0x1e7   : > { %5407 = vmatmul.msk.bf16.gmra.mxu0 %vm747_vm3, %v4183_v29  ;;  %v3544_v29 = vrot.slane %v3542_v54, 4  ;;  %v2669_v54 = vsel %vm6005_vm6, %v2667_v48, %v2668_v19  ;;  %v4088_v48 = vrot.slane %v6835_v27, 5 }
 0x1e8   : > { %v1504_v51 = vpop.f32.mrf.mxu2  ;;  %5112 = vmatmul.msk.bf16.gmra.mxu1 %vm747_vm3, %v2761_v26  ;;  %v6855_v4 = vadd.f32 %v2499_v62, %v1852_v5  ;;  %v4082_v26 = vsel %vm6005_vm6, %v5368_v46, %v4081_v14  ;;  %v2666_v62 = vsel %vm6005_vm6, %v5073_v2, %v2665_v43  ;;  %v3561_v14 = vshll.u32 %v6858_v20, 16 }
 0x1e9   : > { %v1538_v31 = vadd.f32 %v1504_v51, %v1124_v33  ;;  %v3548_v15 = vor.u32 %v3547_v44, %v3544_v29  ;;  %v4160_v8 = vunpack.c.l.b16 %v4082_v26  ;;  %v4161_v46 = vunpack.c.l.b16 %v4085_v36  ;;  %v5676_v26 = vld [vmem:[%s5766_s25 + $0x88] sm:$0xf] }
 0x1ea   : > { %v2739_v51 = vunpack.c.l.b16 %v2666_v62  ;;  %v2740_v7 = vunpack.c.l.b16 %v2669_v54  ;;  %v3563_v2 = vrot.slane %v3561_v14, 5  ;;  %v2672_v36 = vrot.slane %v5676_v26, 5  ;;  %v5058_v54 = vld [vmem:[%s5766_s25 + $0x84] sm:$0xe] }
 0x1eb   : > { %v3549_v43 = vrot.slane %v3548_v15, 4  ;;  %v4091_v62 = vrot.slane %v6858_v20, 5  ;;  %v3569_v15 = vshll.u32 %v5286_v52, 16  ;;  %v4090_v14 = vrot.slane %v4088_v48, 4 }
 0x1ec   : > { %v2501_v3 = vpop.f32.mrf.mxu0  ;;  %v2762_v11 = vpack.c.b16 %v2740_v7, %v2739_v51  ;;  %v2674_v51 = vrot.slane %v2672_v36, 4  ;;  %v5677_v7 = vld [vmem:[%s5766_s25 + $0x8c] sm:$0x1] }
 0x1ed   : > { %v1819_v55 = vpop.f32.mrf.mxu3  ;;  %5248 = vmatmul.msk.bf16.gmra.mxu2 %vm747_vm3, %v5483_v30  ;;  %v2852_v33 = vpop.f32.mrf.mxu1  ;;  %v4184_v30 = vpack.c.b16 %v4161_v46, %v4160_v8  ;;  %v3554_v27 = vsel %vm5787_vm2, %v3549_v43, %v3553_v16  ;;  %v5074_v16 = vrot.slane %v5058_v54, 9  ;;  %v5484_v43 = vld [vmem:[%s5766_s25 + $0x84] sm:$0xff] }
 0x1ee   : > { %v1853_v5 = vadd.f32 %v1819_v55, %v1538_v31  ;;  %v5353_v31 = vld [vmem:[%s5766_s25 + $0x84] sm:$0xe]  ;;  %v6879_v55 = vld [vmem:[%s5766_s25 + $0x94] sm:$0xf]  ;;  %v2931_v41 = vadd.f32 %v2852_v33, %v6310_v42 }
 0x1ef   : > { %v3575_v8 = vshll.u32 %v6879_v55, 16  ;;  %v3579_v20 = vshrl.u32 %v6879_v55, 16 }
 0x1f0   : > { %v3165_v40 = vpop.f32.mrf.mxu2  ;;  %v6875_v19 = vadd.f32 %v2501_v3, %v1853_v5  ;;  %v3564_v3 = vsel %vm5787_vm2, %v3559_v23, %v3563_v2  ;;  %v3566_v5 = vshrl.u32 %v5286_v52, 16  ;;  %v3736_v23 = vunpack.c.l.b16 %v3554_v27  ;;  %v6910_v27 = vld [vmem:[%s5766_s25 + $0x98] sm:$0x1] }
 0x1f1   : > { %v3245_v44 = vadd.f32 %v3165_v40, %v2930_v22  ;;  %v2675_v22 = vrot.slane %v5677_v7, 5  ;;  %v3737_v33 = vunpack.c.l.b16 %v3564_v3  ;;  %v4092_v52 = vsel %vm6005_vm6, %v4090_v14, %v4091_v62 }
 0x1f2   : > { %5336 = vmatmul.msk.bf16.gmra.mxu3 %vm747_vm3, %v3758_v13  ;;  %v5369_v13 = vrot.slane %v5353_v31, 9  ;;  %v3568_v31 = vrot.slane %v3566_v5, 4 }
 0x1f4   : > { %v4273_v29 = vpop.f32.mrf.mxu0  ;;  %v4089_v2 = vsel %vm6005_vm6, %v5369_v13, %v4088_v48  ;;  %v2673_v48 = vsel %vm6005_vm6, %v5074_v16, %v2672_v36  ;;  %v2676_v13 = vsel %vm6005_vm6, %v2674_v51, %v2675_v22 }
 0x1f5   : > { %v3847_v49 = vpop.f32.mrf.mxu3  ;;  %v2855_v1 = vpop.f32.mrf.mxu1  ;;  %v4162_v3 = vunpack.c.l.b16 %v4089_v2  ;;  %v5289_v2 = vld [vmem:[%s5766_s25 + $0x9c] sm:$0xf] }
 0x1f6   : > { %v3927_v46 = vadd.f32 %v3847_v49, %v3245_v44  ;;  %v6898_v44 = vrot.slane %v3575_v8, 5  ;;  %v6903_v49 = vld [vmem:[%s7207_s2] ss:$0 sm:$0xff]  ;;  %v2741_v8 = vunpack.c.l.b16 %v2673_v48  ;;  %v2932_v22 = vadd.f32 %v2855_v1, %v6323_v21 }
 0x1f7   : > { %5408 = vmatmul.msk.bf16.gmra.mxu0 %vm747_vm3, %v4184_v30  ;;  %v3571_v30 = vrot.slane %v3569_v15, 5  ;;  %v3759_v15 = vpack.c.b16 %v3737_v33, %v3736_v23 }
 0x1f8   : > { %v3167_v40 = vpop.f32.mrf.mxu2  ;;  %5113 = vmatmul.msk.bf16.gmra.mxu1 %vm747_vm3, %v2762_v11  ;;  %v3581_v11 = vrot.slane %v3579_v20, 4  ;;  %v4353_v26 = vadd.f32 %v4273_v29, %v3927_v46  ;;  %v2742_v20 = vunpack.c.l.b16 %v2676_v13  ;;  %v3585_v46 = vshll.u32 %v6910_v27, 16 }
 0x1f9   : > { %v3246_v42 = vadd.f32 %v3167_v40, %v2931_v41  ;;  %v4163_v41 = vunpack.c.l.b16 %v4092_v52  ;;  %v3572_v14 = vor.u32 %v3571_v30, %v3568_v31  ;;  %v5354_v52 = vld [vmem:[%s5766_s25 + $0x90] sm:$0xe] }
 0x1fa   : > { %v3582_v36 = vor.u32 %v3581_v11, %v6898_v44  ;;  %v4389_v40 = vadd.f32 %v6903_v49, %v4353_v26  ;;  %v2763_v33 = vpack.c.b16 %v2742_v20, %v2741_v8  ;;  %v3587_v30 = vrot.slane %v3585_v46, 5 }
 0x1fb   : > { %v3573_v23 = vrot.slane %v3572_v14, 4  ;;  %v4095_v11 = vrot.slane %v6879_v55, 5  ;;  %v5370_v20 = vrot.slane %v5354_v52, 9  ;;  %v5679_v52 = vld [vmem:[%s5766_s25 + $0x98] sm:$0x1] }
 0x1fc   : > { %v4275_v54 = vpop.f32.mrf.mxu0  ;;  %v3583_v31 = vrot.slane %v3582_v36, 4  ;;  %v4421_v26 = vmax.f32 %v4389_v40, 0.0  ;;  %v4098_v36 = vrot.slane %v6910_v27, 5 }
 0x1fd   : > { %v3849_v62 = vpop.f32.mrf.mxu3  ;;  %5249 = vmatmul.msk.bf16.gmra.mxu2 %vm747_vm3, %v5484_v43  ;;  %v2857_v29 = vpop.f32.mrf.mxu1  ;;  %v4185_v43 = vpack.c.b16 %v4163_v41, %v4162_v3  ;;  %v3593_v41 = vshll.u32 %v5289_v2, 16  ;;  %v3578_v40 = vsel %vm5787_vm2, %v3573_v23, %v6898_v44 }
 0x1fe   : > { %v3928_v5 = vadd.f32 %v3849_v62, %v3246_v42  ;;  %v6922_v42 = vld [vmem:[%s5766_s25 + $0xa0] sm:$0xf]  ;;  %v5678_v62 = vld [vmem:[%s5766_s25 + $0x94] sm:$0xf]  ;;  %v2933_v46 = vadd.f32 %v2857_v29, %v6336_v17 }
 0x1ff   : > { %v2679_v21 = vrot.slane %v5678_v62, 5  ;;  %v3599_v14 = vshll.u32 %v6922_v42, 16  ;;  %v3603_v55 = vshrl.u32 %v6922_v42, 16  ;;  %v3595_v29 = vrot.slane %v3593_v41, 5 }
 0x200   : > { %v4354_v16 = vadd.f32 %v4275_v54, %v3928_v5  ;;  %v3170_v51 = vpop.f32.mrf.mxu2  ;;  %v5059_v5 = vld [vmem:[%s5766_s25 + $0x90] sm:$0xe]  ;;  %v3738_v62 = vunpack.c.l.b16 %v3578_v40 }
 0x201   : > { %v3247_v13 = vadd.f32 %v3170_v51, %v2932_v22  ;;  %v4097_v51 = vrot.slane %v4095_v11, 4  ;;  %v2681_v27 = vrot.slane %v2679_v21, 4  ;;  %v3605_v44 = vrot.slane %v3603_v55, 4 }
 0x202   : > { %v4390_v7 = vadd.f32 %v6903_v49, %v4354_v16  ;;  %5337 = vmatmul.msk.bf16.gmra.mxu3 %vm747_vm3, %v3759_v15  ;;  %v3590_v15 = vshrl.u32 %v5289_v2, 16  ;;  %v3588_v16 = vsel %vm5787_vm2, %v3583_v31, %v3587_v30  ;;  %v5075_v2 = vrot.slane %v5059_v5, 9 }
 0x203   : > { %v3739_v31 = vunpack.c.l.b16 %v3588_v16  ;;  %v4096_v30 = vsel %vm6005_vm6, %v5370_v20, %v4095_v11  ;;  %v4099_v5 = vsel %vm6005_vm6, %v4097_v51, %v4098_v36 }
 0x204   : > { %v4422_v54 = vmax.f32 %v4390_v7, 0.0  ;;  %v4278_v48 = vpop.f32.mrf.mxu0  ;;  %v3592_v17 = vrot.slane %v3590_v15, 4  ;;  %v2680_v15 = vsel %vm6005_vm6, %v5075_v2, %v2679_v21  ;;  %v4164_v36 = vunpack.c.l.b16 %v4096_v30  ;;  %v5292_v2 = vld [vmem:[%s5766_s25 + $0xa8] sm:$0xf] }
 0x205   : > { %v3852_v1 = vpop.f32.mrf.mxu3  ;;  %v2860_v3 = vpop.f32.mrf.mxu1  ;;  %v4165_v40 = vunpack.c.l.b16 %v4099_v5  ;;  %v2743_v21 = vunpack.c.l.b16 %v2680_v15  ;;  %v3614_v30 = vshrl.u32 %v5292_v2, 16 }
 0x206   : > { %v5506_v8 = vpack.c.bf16 %v4422_v54, %v4421_v26  ;;  %v3929_v7 = vadd.f32 %v3852_v1, %v3247_v13  ;;  %v5485_v26 = vld [vmem:[%s5766_s25 + $0x90] sm:$0xff]  ;;  %v6947_v54 = vrot.slane %v3599_v14, 5  ;;  %v6952_v13 = vld [vmem:[%s5766_s25 + $0xa4] sm:$0x1] }
 0x207   : > { %5409 = vmatmul.msk.bf16.gmra.mxu0 %vm747_vm3, %v4185_v43  ;;  %v2682_v43 = vrot.slane %v5679_v52, 5 }
 0x208   : > { %5507 = vst [vmem:[%s6930_s30] sm:$0xff] %v5506_v8   ;;  %v3172_v22 = vpop.f32.mrf.mxu2  ;;  %5114 = vmatmul.msk.bf16.gmra.mxu1 %vm747_vm3, %v2763_v33  ;;  %v4355_v1 = vadd.f32 %v4278_v48, %v3929_v7  ;;  %v3596_v8 = vor.u32 %v3595_v29, %v3592_v17  ;;  %v3606_v11 = vor.u32 %v3605_v44, %v6947_v54  ;;  %v5355_v29 = vld [vmem:[%s5766_s25 + $0x9c] sm:$0xe]  ;;  %v4102_v44 = vrot.slane %v6922_v42, 5 }
 0x209   : > { %v3248_v23 = vadd.f32 %v3172_v22, %v2933_v46  ;;  %v2683_v41 = vsel %vm6005_vm6, %v2681_v27, %v2682_v43  ;;  %v3760_v48 = vpack.c.b16 %v3739_v31, %v3738_v62  ;;  %v3609_v46 = vshll.u32 %v6952_v13, 16 }
 0x20a   : > { %v2744_v16 = vunpack.c.l.b16 %v2683_v41  ;;  %v4391_v51 = vadd.f32 %v6903_v49, %v4355_v1  ;;  %v3597_v27 = vrot.slane %v3596_v8, 4  ;;  %v3607_v52 = vrot.slane %v3606_v11, 4 }
 0x20b   : > { %v3611_v17 = vrot.slane %v3609_v46, 5  ;;  %v4186_v62 = vpack.c.b16 %v4165_v40, %v4164_v36  ;;  %v3617_v1 = vshll.u32 %v5292_v2, 16  ;;  %v5371_v11 = vrot.slane %v5355_v29, 9 }
 0x20c   : > { %v4280_v33 = vpop.f32.mrf.mxu0  ;;  %v2764_v31 = vpack.c.b16 %v2744_v16, %v2743_v21  ;;  %v3602_v36 = vsel %vm5787_vm2, %v3597_v27, %v6947_v54  ;;  %v4104_v21 = vrot.slane %v4102_v44, 4 }
 0x20d   : > { %v3854_v14 = vpop.f32.mrf.mxu3  ;;  %5250 = vmatmul.msk.bf16.gmra.mxu2 %vm747_vm3, %v5485_v26  ;;  %v2862_v55 = vpop.f32.mrf.mxu1  ;;  %v2934_v26 = vadd.f32 %v2860_v3, %v6358_v9  ;;  %v3612_v40 = vsel %vm5787_vm2, %v3607_v52, %v3611_v17  ;;  %v5486_v52 = vld [vmem:[%s5766_s25 + $0x9c] sm:$0xff] }
 0x20e   : > { %v3930_v20 = vadd.f32 %v3854_v14, %v3248_v23  ;;  %v6971_v23 = vld [vmem:[%s5766_s25 + $0xac] sm:$0xf]  ;;  %v5680_v14 = vld [vmem:[%s5766_s25 + $0xa0] sm:$0xf]  ;;  %v2935_v16 = vadd.f32 %v2862_v55, %v6374_v59  ;;  %v3741_v59 = vunpack.c.l.b16 %v3612_v40  ;;  %v6990_v55 = vld [vmem:[%s5766_s25 + $0xb0] sm:$0x1] }
 0x20f   : > { %v2686_v8 = vrot.slane %v5680_v14, 5  ;;  %v3627_v42 = vshrl.u32 %v6971_v23, 16 }
 0x210   : > { %v4356_v7 = vadd.f32 %v4280_v33, %v3930_v20  ;;  %v3175_v22 = vpop.f32.mrf.mxu2  ;;  %v4423_v33 = vmax.f32 %v4391_v51, 0.0  ;;  %v5060_v20 = vld [vmem:[%s5766_s25 + $0x9c] sm:$0xe]  ;;  %v4105_v51 = vrot.slane %v6952_v13, 5  ;;  %v4103_v13 = vsel %vm6005_vm6, %v5371_v11, %v4102_v44 }
 0x211   : > { %v3249_v41 = vadd.f32 %v3175_v22, %v2934_v26  ;;  %v3619_v22 = vrot.slane %v3617_v1, 5  ;;  %v5076_v54 = vrot.slane %v5060_v20, 9  ;;  %v2688_v27 = vrot.slane %v2686_v8, 4  ;;  %v5681_v26 = vld [vmem:[%s5766_s25 + $0xa4] sm:$0x1] }
 0x212   : > { %v4392_v43 = vadd.f32 %v6903_v49, %v4356_v7  ;;  %5338 = vmatmul.msk.bf16.gmra.mxu3 %vm747_vm3, %v3760_v48  ;;  %v3623_v48 = vshll.u32 %v6971_v23, 16  ;;  %v3616_v7 = vrot.slane %v3614_v30, 4  ;;  %v2689_v29 = vrot.slane %v5681_v26, 5 }
 0x213   : > { %v2687_v14 = vsel %vm6005_vm6, %v5076_v54, %v2686_v8  ;;  %v3633_v44 = vshll.u32 %v6990_v55, 16  ;;  %v4109_v54 = vrot.slane %v6971_v23, 5 }
 0x214   : > { %v4424_v5 = vmax.f32 %v4392_v43, 0.0  ;;  %v4283_v15 = vpop.f32.mrf.mxu0  ;;  %v3625_v17 = vrot.slane %v3623_v48, 5  ;;  %v3620_v30 = vor.u32 %v3619_v22, %v3616_v7  ;;  %v2745_v40 = vunpack.c.l.b16 %v2687_v14  ;;  %v5356_v22 = vld [vmem:[%s5766_s25 + $0xa8] sm:$0xe] }
 0x215   : > { %v3857_v9 = vpop.f32.mrf.mxu3  ;;  %v2865_v3 = vpop.f32.mrf.mxu1 }
 0x216   : > { %v5511_v46 = vpack.c.bf16 %v4424_v5, %v4423_v33  ;;  %v3931_v2 = vadd.f32 %v3857_v9, %v3249_v41  ;;  %v3629_v33 = vrot.slane %v3627_v42, 4  ;;  %v3740_v5 = vunpack.c.l.b16 %v3602_v36 }
 0x217   : > { %5410 = vmatmul.msk.bf16.gmra.mxu0 %vm747_vm3, %v4186_v62  ;;  %v2690_v9 = vsel %vm6005_vm6, %v2688_v27, %v2689_v29  ;;  %v2936_v26 = vadd.f32 %v2865_v3, %v6386_v56  ;;  %v5295_v29 = vld [vmem:[%s5766_s25 + $0xb4] sm:$0xf] }
 0x218   : > { %5583 = vst [vmem:[%s6930_s30 + $0x8] sm:$0xff] %v5511_v46   ;;  %v3177_v43 = vpop.f32.mrf.mxu2  ;;  %5115 = vmatmul.msk.bf16.gmra.mxu1 %vm747_vm3, %v2764_v31  ;;  %v4357_v1 = vadd.f32 %v4283_v15, %v3931_v2  ;;  %v4106_v31 = vsel %vm6005_vm6, %v4104_v21, %v4105_v51  ;;  %v3630_v42 = vor.u32 %v3629_v33, %v3625_v17  ;;  %v4166_v46 = vunpack.c.l.b16 %v4103_v13 }
 0x219   : > { %v3250_v62 = vadd.f32 %v3177_v43, %v2935_v16  ;;  %v3761_v15 = vpack.c.b16 %v3741_v59, %v3740_v5  ;;  %v4167_v36 = vunpack.c.l.b16 %v4106_v31  ;;  %v2746_v21 = vunpack.c.l.b16 %v2690_v9  ;;  %v7012_v59 = vld [vmem:[%s5766_s25 + $0xb8] sm:$0xf] }
 0x21a   : > { %v3621_v16 = vrot.slane %v3620_v30, 4  ;;  %v4393_v8 = vadd.f32 %v6903_v49, %v4357_v1  ;;  %v3631_v2 = vrot.slane %v3630_v42, 4  ;;  %v3635_v43 = vrot.slane %v3633_v44, 5 }
 0x21b   : > { %v2765_v33 = vpack.c.b16 %v2746_v21, %v2745_v40  ;;  %v5372_v5 = vrot.slane %v5356_v22, 9  ;;  %v4111_v9 = vrot.slane %v4109_v54, 4  ;;  %v3638_v42 = vshrl.u32 %v5295_v29, 16 }
 0x21c   : > { %v4285_v41 = vpop.f32.mrf.mxu0  ;;  %v4425_v13 = vmax.f32 %v4393_v8, 0.0  ;;  %v3636_v14 = vsel %vm5787_vm2, %v3631_v2, %v3635_v43 }
 0x21d   : > { %v3859_v20 = vpop.f32.mrf.mxu3  ;;  %5251 = vmatmul.msk.bf16.gmra.mxu2 %vm747_vm3, %v5486_v52  ;;  %v2867_v48 = vpop.f32.mrf.mxu1  ;;  %v4187_v52 = vpack.c.b16 %v4167_v36, %v4166_v46  ;;  %v3651_v46 = vshrl.u32 %v7012_v59, 16  ;;  %v3743_v2 = vunpack.c.l.b16 %v3636_v14  ;;  %v4110_v43 = vsel %vm6005_vm6, %v5372_v5, %v4109_v54 }
 0x21e   : > { %v3932_v11 = vadd.f32 %v3859_v20, %v3250_v62  ;;  %v3626_v62 = vsel %vm5787_vm2, %v3621_v16, %v3625_v17  ;;  %v5061_v20 = vld [vmem:[%s5766_s25 + $0xa8] sm:$0xe]  ;;  %v3641_v17 = vshll.u32 %v5295_v29, 16  ;;  %v2937_v36 = vadd.f32 %v2867_v48, %v6399_v39 }
 0x21f   : > { %v3742_v40 = vunpack.c.l.b16 %v3626_v62  ;;  %v5077_v8 = vrot.slane %v5061_v20, 9  ;;  %v7034_v62 = vld [vmem:[%s5766_s25 + $0xbc] sm:$0x1]  ;;  %v4168_v5 = vunpack.c.l.b16 %v4110_v43 }
 0x220   : > { %v4358_v51 = vadd.f32 %v4285_v41, %v3932_v11  ;;  %v3180_v7 = vpop.f32.mrf.mxu2  ;;  %v5682_v41 = vld [vmem:[%s5766_s25 + $0xac] sm:$0xf]  ;;  %v4112_v11 = vrot.slane %v6990_v55, 5 }
 0x221   : > { %v3251_v23 = vadd.f32 %v3180_v7, %v2936_v26  ;;  %v2693_v31 = vrot.slane %v5682_v41, 5  ;;  %v5683_v7 = vld [vmem:[%s5766_s25 + $0xb0] sm:$0x1]  ;;  %v5487_v55 = vld [vmem:[%s5766_s25 + $0xa8] sm:$0xff]  ;;  %v3643_v26 = vrot.slane %v3641_v17, 5  ;;  %v3762_v20 = vpack.c.b16 %v3743_v2, %v3742_v40 }
 0x222   : > { %v4394_v27 = vadd.f32 %v6903_v49, %v4358_v51  ;;  %5339 = vmatmul.msk.bf16.gmra.mxu3 %vm747_vm3, %v3761_v15  ;;  %v3647_v15 = vshll.u32 %v7012_v59, 16  ;;  %v2696_v22 = vrot.slane %v5683_v7, 5  ;;  %v4113_v39 = vsel %vm6005_vm6, %v4111_v9, %v4112_v11 }
 0x223   : > { %v2695_v51 = vrot.slane %v2693_v31, 4  ;;  %v4169_v41 = vunpack.c.l.b16 %v4113_v39  ;;  %v4116_v2 = vrot.slane %v7012_v59, 5 }
 0x224   : > { %v4426_v30 = vmax.f32 %v4394_v27, 0.0  ;;  %v4288_v1 = vpop.f32.mrf.mxu0  ;;  %v3640_v27 = vrot.slane %v3638_v42, 4  ;;  %v7031_v48 = vrot.slane %v3647_v15, 5  ;;  %v3657_v42 = vshll.u32 %v7034_v62, 16 }
 0x225   : > { %v3862_v56 = vpop.f32.mrf.mxu3  ;;  %v2870_v3 = vpop.f32.mrf.mxu1 }
 0x226   : > { %v5516_v44 = vpack.c.bf16 %v4426_v30, %v4425_v13  ;;  %v3933_v21 = vadd.f32 %v3862_v56, %v3251_v23  ;;  %v2694_v30 = vsel %vm6005_vm6, %v5077_v8, %v2693_v31  ;;  %v2697_v23 = vsel %vm6005_vm6, %v2695_v51, %v2696_v22 }
 0x227   : > { %5411 = vmatmul.msk.bf16.gmra.mxu0 %vm747_vm3, %v4187_v52  ;;  %v3653_v52 = vrot.slane %v3651_v46, 4  ;;  %v3644_v14 = vor.u32 %v3643_v26, %v3640_v27  ;;  %v2747_v31 = vunpack.c.l.b16 %v2694_v30  ;;  %v2748_v17 = vunpack.c.l.b16 %v2697_v23  ;;  %v5298_v46 = vld [vmem:[%s5766_s25 + $0xc0] sm:$0xf] }
 0x228   : > { %5584 = vst [vmem:[%s6930_s30 + $0x10] sm:$0xff] %v5516_v44   ;;  %v3182_v16 = vpop.f32.mrf.mxu2  ;;  %5116 = vmatmul.msk.bf16.gmra.mxu1 %vm747_vm3, %v2765_v33  ;;  %v4359_v33 = vadd.f32 %v4288_v1, %v3933_v21  ;;  %v2938_v40 = vadd.f32 %v2870_v3, %v6413_v53  ;;  %v3659_v7 = vrot.slane %v3657_v42, 5  ;;  %v3662_v43 = vshrl.u32 %v5298_v46, 16 }
 0x229   : > { %v3252_v29 = vadd.f32 %v3182_v16, %v2937_v36  ;;  %v3654_v1 = vor.u32 %v3653_v52, %v7031_v48  ;;  %v4188_v36 = vpack.c.b16 %v4169_v41, %v4168_v5  ;;  %v3645_v21 = vrot.slane %v3644_v14, 4  ;;  %v7046_v16 = vld [vmem:[%s5766_s25 + $0xc4] sm:$0xf]  ;;  %v5062_v41 = vld [vmem:[%s5766_s25 + $0xb4] sm:$0xe] }
 0x22a   : > { %v4395_v44 = vadd.f32 %v6903_v49, %v4359_v33  ;;  %v2766_v22 = vpack.c.b16 %v2748_v17, %v2747_v31  ;;  %v3665_v27 = vshll.u32 %v5298_v46, 16  ;;  %v3671_v33 = vshll.u32 %v7046_v16, 16 }
 0x22b   : > { %v3655_v51 = vrot.slane %v3654_v1, 4  ;;  %v3675_v23 = vshrl.u32 %v7046_v16, 16  ;;  %v3650_v59 = vsel %vm5787_vm2, %v3645_v21, %v7031_v48  ;;  %v3664_v1 = vrot.slane %v3662_v43, 4 }
 0x22c   : > { %v4290_v13 = vpop.f32.mrf.mxu0  ;;  %v4427_v26 = vmax.f32 %v4395_v44, 0.0  ;;  %v3667_v48 = vrot.slane %v3665_v27, 5  ;;  %v7067_v44 = vrot.slane %v3671_v33, 5 }
 0x22d   : > { %v3864_v54 = vpop.f32.mrf.mxu3  ;;  %5252 = vmatmul.msk.bf16.gmra.mxu2 %vm747_vm3, %v5487_v55  ;;  %v2872_v56 = vpop.f32.mrf.mxu1  ;;  %v5357_v55 = vld [vmem:[%s5766_s25 + $0xb4] sm:$0xe]  ;;  %v3660_v14 = vsel %vm5787_vm2, %v3655_v51, %v3659_v7  ;;  %v7072_v7 = vld [vmem:[%s5766_s25 + $0xc8] sm:$0x1] }
 0x22e   : > { %v3934_v9 = vadd.f32 %v3864_v54, %v3252_v29  ;;  %v5373_v5 = vrot.slane %v5357_v55, 9  ;;  %v2939_v31 = vadd.f32 %v2872_v56, %v6426_v61  ;;  %v3745_v51 = vunpack.c.l.b16 %v3660_v14 }
 0x230   : > { %v4360_v11 = vadd.f32 %v4290_v13, %v3934_v9  ;;  %v3185_v15 = vpop.f32.mrf.mxu2  ;;  %v5684_v13 = vld [vmem:[%s5766_s25 + $0xb8] sm:$0xf]  ;;  %v4118_v9 = vrot.slane %v4116_v2, 4  ;;  %v4117_v61 = vsel %vm6005_vm6, %v5373_v5, %v4116_v2  ;;  %v3681_v2 = vshll.u32 %v7072_v7, 16 }
 0x231   : > { %v3253_v52 = vadd.f32 %v3185_v15, %v2938_v40  ;;  %v2700_v30 = vrot.slane %v5684_v13, 5  ;;  %v5078_v15 = vrot.slane %v5062_v41, 9  ;;  %v4170_v13 = vunpack.c.l.b16 %v4117_v61 }
 0x232   : > { %v4396_v8 = vadd.f32 %v6903_v49, %v4360_v11  ;;  %5340 = vmatmul.msk.bf16.gmra.mxu3 %vm747_vm3, %v3762_v20  ;;  %v4119_v20 = vrot.slane %v7034_v62, 5  ;;  %v5488_v11 = vld [vmem:[%s5766_s25 + $0xb4] sm:$0xff]  ;;  %v3744_v62 = vunpack.c.l.b16 %v3650_v59 }
 0x233   : > { %v2702_v46 = vrot.slane %v2700_v30, 4 }
 0x234   : > { %v4428_v29 = vmax.f32 %v4396_v8, 0.0  ;;  %v4293_v39 = vpop.f32.mrf.mxu0  ;;  %v3677_v8 = vrot.slane %v3675_v23, 4  ;;  %v4120_v56 = vsel %vm6005_vm6, %v4118_v9, %v4119_v20 }
 0x235   : > { %v3867_v53 = vpop.f32.mrf.mxu3  ;;  %v2875_v3 = vpop.f32.mrf.mxu1  ;;  %v4171_v23 = vunpack.c.l.b16 %v4120_v56 }
 0x236   : > { %v5521_v54 = vpack.c.bf16 %v4428_v29, %v4427_v26  ;;  %v3935_v42 = vadd.f32 %v3867_v53, %v3253_v52  ;;  %v2701_v26 = vsel %vm6005_vm6, %v5078_v15, %v2700_v30  ;;  %v3668_v52 = vor.u32 %v3667_v48, %v3664_v1 }
 0x237   : > { %5412 = vmatmul.msk.bf16.gmra.mxu0 %vm747_vm3, %v4188_v36  ;;  %v5685_v36 = vld [vmem:[%s5766_s25 + $0xbc] sm:$0x1]  ;;  %v3763_v53 = vpack.c.b16 %v3745_v51, %v3744_v62  ;;  %v2749_v41 = vunpack.c.l.b16 %v2701_v26  ;;  %v2940_v1 = vadd.f32 %v2875_v3, %v6442_v37  ;;  %v4189_v48 = vpack.c.b16 %v4171_v23, %v4170_v13  ;;  %v5063_v26 = vld [vmem:[%s5766_s25 + $0xc0] sm:$0xe] }
 0x238   : > { %5585 = vst [vmem:[%s6930_s30 + $0x18] sm:$0xff] %v5521_v54   ;;  %v3187_v17 = vpop.f32.mrf.mxu2  ;;  %5117 = vmatmul.msk.bf16.gmra.mxu1 %vm747_vm3, %v2766_v22  ;;  %v2703_v21 = vrot.slane %v5685_v36, 5  ;;  %v4361_v55 = vadd.f32 %v4293_v39, %v3935_v42  ;;  %v3678_v39 = vor.u32 %v3677_v8, %v7067_v44  ;;  %v3669_v14 = vrot.slane %v3668_v52, 4  ;;  %v5301_v8 = vld [vmem:[%s5766_s25 + $0xcc] sm:$0xf]  ;;  %v5489_v23 = vld [vmem:[%s5766_s25 + $0xc0] sm:$0xff] }
 0x239   : > { %v3254_v40 = vadd.f32 %v3187_v17, %v2939_v31  ;;  %v3683_v42 = vrot.slane %v3681_v2, 5  ;;  %v5358_v31 = vld [vmem:[%s5766_s25 + $0xc0] sm:$0xe]  ;;  %v4123_v17 = vrot.slane %v7046_v16, 5  ;;  %v3689_v52 = vshll.u32 %v5301_v8, 16 }
 0x23a   : > { %v2704_v29 = vsel %vm6005_vm6, %v2702_v46, %v2703_v21  ;;  %v4397_v54 = vadd.f32 %v6903_v49, %v4361_v55  ;;  %v3679_v9 = vrot.slane %v3678_v39, 4  ;;  %v3674_v3 = vsel %vm5787_vm2, %v3669_v14, %v7067_v44  ;;  %v5686_v55 = vld [vmem:[%s5766_s25 + $0xc4] sm:$0xf] }
 0x23b   : > { %v2750_v30 = vunpack.c.l.b16 %v2704_v29  ;;  %v5374_v51 = vrot.slane %v5358_v31, 9  ;;  %v2707_v16 = vrot.slane %v5686_v55, 5  ;;  %v4125_v56 = vrot.slane %v4123_v17, 4 }
 0x23c   : > { %v4295_v43 = vpop.f32.mrf.mxu0  ;;  %v3684_v61 = vsel %vm5787_vm2, %v3679_v9, %v3683_v42  ;;  %v3686_v29 = vshrl.u32 %v5301_v8, 16 }
 0x23d   : > { %v3869_v22 = vpop.f32.mrf.mxu3  ;;  %5253 = vmatmul.msk.bf16.gmra.mxu2 %vm747_vm3, %v5488_v11  ;;  %v2877_v27 = vpop.f32.mrf.mxu1  ;;  %v4429_v11 = vmax.f32 %v4397_v54, 0.0  ;;  %v2767_v21 = vpack.c.b16 %v2750_v30, %v2749_v41  ;;  %v5079_v54 = vrot.slane %v5063_v26, 9  ;;  %v3747_v14 = vunpack.c.l.b16 %v3684_v61 }
 0x23e   : > { %v3936_v33 = vadd.f32 %v3869_v22, %v3254_v40  ;;  %v7093_v40 = vld [vmem:[%s5766_s25 + $0xd0] sm:$0xf]  ;;  %v4126_v22 = vrot.slane %v7072_v7, 5  ;;  %v3746_v7 = vunpack.c.l.b16 %v3674_v3  ;;  %v4124_v9 = vsel %vm6005_vm6, %v5374_v51, %v4123_v17 }
 0x23f   : > { %v3695_v39 = vshll.u32 %v7093_v40, 16  ;;  %v3699_v44 = vshrl.u32 %v7093_v40, 16  ;;  %v2708_v8 = vsel %vm6005_vm6, %v5079_v54, %v2707_v16  ;;  %v4172_v51 = vunpack.c.l.b16 %v4124_v9 }
 0x240   : > { %v4362_v59 = vadd.f32 %v4295_v43, %v3936_v33  ;;  %v3190_v5 = vpop.f32.mrf.mxu2  ;;  %v3764_v3 = vpack.c.b16 %v3747_v14, %v3746_v7 }
 0x241   : > { %v3255_v36 = vadd.f32 %v3190_v5, %v2940_v1  ;;  %v5687_v5 = vld [vmem:[%s5766_s25 + $0xc8] sm:$0x1]  ;;  %v3688_v1 = vrot.slane %v3686_v29, 4  ;;  %v3697_v42 = vrot.slane %v3695_v39, 5  ;;  %v3701_v31 = vrot.slane %v3699_v44, 4 }
 0x242   : > { %v4398_v20 = vadd.f32 %v6903_v49, %v4362_v59  ;;  %5341 = vmatmul.msk.bf16.gmra.mxu3 %vm747_vm3, %v3763_v53  ;;  %v7215_v53 = vld [vmem:[#allocation2_spill] sm:$0xff]  ;;  %v2709_v59 = vrot.slane %v2707_v16, 4  ;;  %v2710_v41 = vrot.slane %v5687_v5, 5  ;;  %v2751_v29 = vunpack.c.l.b16 %v2708_v8 }
 0x243   : > { %v2941_v2 = vadd.f32 %v2877_v27, %v7215_v53  ;;  %v3691_v27 = vrot.slane %v3689_v52, 5  ;;  %v3702_v61 = vor.u32 %v3701_v31, %v3697_v42 }
 0x244   : > { %v4430_v15 = vmax.f32 %v4398_v20, 0.0  ;;  %v4298_v46 = vpop.f32.mrf.mxu0  ;;  %v4127_v20 = vsel %vm6005_vm6, %v4125_v56, %v4126_v22  ;;  %v2711_v17 = vsel %vm6005_vm6, %v2709_v59, %v2710_v41  ;;  %v5359_v41 = vld [vmem:[%s5766_s25 + $0xcc] sm:$0xe] }
 0x245   : > { %v3872_v62 = vpop.f32.mrf.mxu3  ;;  %v2880_v37 = vpop.f32.mrf.mxu1  ;;  %v4173_v55 = vunpack.c.l.b16 %v4127_v20  ;;  %v2752_v52 = vunpack.c.l.b16 %v2711_v17  ;;  %v3703_v53 = vrot.slane %v3702_v61, 4  ;;  %v5375_v20 = vrot.slane %v5359_v41, 9 }
 0x246   : > { %v5526_v43 = vpack.c.bf16 %v4430_v15, %v4429_v11  ;;  %v3937_v33 = vadd.f32 %v3872_v62, %v3255_v36  ;;  %v5303_v15 = vld [vmem:[%s5766_s25 + $0xd4] sm:$0x1]  ;;  %v2942_v16 = vadd.f32 %v2880_v37, %v6478_v28 }
 0x247   : > { %5413 = vmatmul.msk.bf16.gmra.mxu0 %vm747_vm3, %v4189_v48  ;;  %v3705_v56 = vshll.u32 %v5303_v15, 16  ;;  %v4190_v44 = vpack.c.b16 %v4173_v55, %v4172_v51  ;;  %v2768_v5 = vpack.c.b16 %v2752_v52, %v2751_v29 }
 0x248   : > { %5586 = vst [vmem:[%s6930_s30 + $0x20] sm:$0xff] %v5526_v43   ;;  %v3192_v13 = vpop.f32.mrf.mxu2  ;;  %5118 = vmatmul.msk.bf16.gmra.mxu1 %vm747_vm3, %v2767_v21  ;;  %v4363_v48 = vadd.f32 %v4298_v46, %v3937_v33  ;;  %v3692_v43 = vor.u32 %v3691_v27, %v3688_v1 }
 0x249   : > { %v3256_v30 = vadd.f32 %v3192_v13, %v2941_v2  ;;  %v3707_v2 = vrot.slane %v3705_v56, 5  ;;  %v4130_v13 = vrot.slane %v7093_v40, 5 }
 0x24a   : > { %v4399_v46 = vadd.f32 %v6903_v49, %v4363_v48  ;;  %v3693_v33 = vrot.slane %v3692_v43, 4  ;;  %v4133_v48 = vrot.slane %v5303_v15, 5 }
 0x24b   : > { %v3708_v37 = vsel %vm5787_vm2, %v3703_v53, %v3707_v2  ;;  %v4132_v31 = vrot.slane %v4130_v13, 4  ;;  %v4131_v32 = vsel %vm6005_vm6, %v5375_v20, %v4130_v13  ;;  %v7216_v13 = vld [vmem:[#allocation3_spill] sm:$0xff] }
 0x24c   : > { %v4300_v11 = vpop.f32.mrf.mxu0  ;;  %v3698_v28 = vsel %vm5787_vm2, %v3693_v33, %v3697_v42  ;;  %v3749_v17 = vunpack.c.l.b16 %v3708_v37  ;;  %v4174_v43 = vunpack.c.l.b16 %v4131_v32 }
 0x24d   : > { %v3874_v36 = vpop.f32.mrf.mxu3  ;;  %5254 = vmatmul.msk.bf16.gmra.mxu2 %vm747_vm3, %v5489_v23  ;;  %v2882_v21 = vpop.f32.mrf.mxu1  ;;  %v4431_v23 = vmax.f32 %v4399_v46, 0.0  ;;  %v3748_v8 = vunpack.c.l.b16 %v3698_v28  ;;  %v4134_v42 = vsel %vm6005_vm6, %v4132_v31, %v4133_v48 }
 0x24e   : > { %v3938_v62 = vadd.f32 %v3874_v36, %v3256_v30  ;;  %v2943_v1 = vadd.f32 %v2882_v21, %v6498_v63  ;;  %v4175_v15 = vunpack.c.l.b16 %v4134_v42 }
 0x24f   : > { %v3765_v55 = vpack.c.b16 %v3749_v17, %v3748_v8 }
 0x250   : > { %v4364_v22 = vadd.f32 %v4300_v11, %v3938_v62  ;;  %v3195_v26 = vpop.f32.mrf.mxu2  ;;  %v5490_v11 = vld [vmem:[%s5766_s25 + $0xcc] sm:$0xff]  ;;  %v4191_v25 = vpack.c.b16 %v4175_v15, %v4174_v43 }
 0x251   : > { %v3257_v59 = vadd.f32 %v3195_v26, %v2942_v16 }
 0x252   : > { %v4400_v39 = vadd.f32 %v6903_v49, %v4364_v22  ;;  %5342 = vmatmul.msk.bf16.gmra.mxu3 %vm747_vm3, %v3764_v3 }
 0x254   : > { %v4432_v7 = vmax.f32 %v4400_v39, 0.0  ;;  %v4303_v54 = vpop.f32.mrf.mxu0 }
 0x255   : > { %v3877_v30 = vpop.f32.mrf.mxu3  ;;  %v2885_v14 = vpop.f32.mrf.mxu1 }
 0x256   : > { %v5531_v9 = vpack.c.bf16 %v4432_v7, %v4431_v23  ;;  %v3939_v40 = vadd.f32 %v3877_v30, %v3257_v59  ;;  %v2944_v26 = vadd.f32 %v2885_v14, %v6517_v34 }
 0x257   : > { %5414 = vmatmul.msk.bf16.gmra.mxu0 %vm747_vm3, %v4190_v44 }
 0x258   : > { %5587 = vst [vmem:[%s6930_s30 + $0x28] sm:$0xff] %v5531_v9   ;;  %v3197_v27 = vpop.f32.mrf.mxu2  ;;  %5119 = vmatmul.msk.bf16.gmra.mxu1 %vm747_vm3, %v2768_v5  ;;  %v4365_v62 = vadd.f32 %v4303_v54, %v3939_v40 }
 0x259   : > { %v3258_v36 = vadd.f32 %v3197_v27, %v2943_v1 }
 0x25a   : > { %v4401_v61 = vadd.f32 %v6903_v49, %v4365_v62 }
 0x25c   : > { %v4305_v3 = vpop.f32.mrf.mxu0  ;;  %v4433_v29 = vmax.f32 %v4401_v61, 0.0 }
 0x25d   : > { %v3879_v51 = vpop.f32.mrf.mxu3  ;;  %5255 = vmatmul.msk.bf16.gmra.mxu2 %vm747_vm3, %v5490_v11  ;;  %v2887_v63 = vpop.f32.mrf.mxu1 }
 0x25e   : > { %v3940_v21 = vadd.f32 %v3879_v51, %v3258_v36  ;;  %v2945_v23 = vadd.f32 %v2887_v63, %v7216_v13 }
 0x260   : > { %v4366_v56 = vadd.f32 %v4305_v3, %v3940_v21  ;;  %v3200_v46 = vpop.f32.mrf.mxu2 }
 0x261   : > { %v3259_v16 = vadd.f32 %v3200_v46, %v2944_v26 }
 0x262   : > { %v4402_v22 = vadd.f32 %v6903_v49, %v4366_v56  ;;  %5343 = vmatmul.msk.bf16.gmra.mxu3 %vm747_vm3, %v3765_v55 }
 0x264   : > { %v4434_v52 = vmax.f32 %v4402_v22, 0.0  ;;  %v4308_v39 = vpop.f32.mrf.mxu0 }
 0x265   : > { %v3882_v44 = vpop.f32.mrf.mxu3  ;;  %v2890_v33 = vpop.f32.mrf.mxu1 }
 0x266   : > { %v5536_v53 = vpack.c.bf16 %v4434_v52, %v4433_v29  ;;  %v3941_v2 = vadd.f32 %v3882_v44, %v3259_v16  ;;  %v2946_v20 = vadd.f32 %v2890_v33, %v6560_v47 }
 0x267   : > { %5415 = vmatmul.msk.bf16.gmra.mxu0 %vm747_vm3, %v4191_v25 }
 0x268   : > { %5588 = vst [vmem:[%s6930_s30 + $0x30] sm:$0xff] %v5536_v53   ;;  %v3202_v7 = vpop.f32.mrf.mxu2  ;;  %v4367_v59 = vadd.f32 %v4308_v39, %v3941_v2 }
 0x269   : > { %v3260_v54 = vadd.f32 %v3202_v7, %v2945_v23 }
 0x26a   : > { %v4403_v14 = vadd.f32 %v6903_v49, %v4367_v59 }
 0x26c   : > { %v4310_v34 = vpop.f32.mrf.mxu0  ;;  %v4435_v40 = vmax.f32 %v4403_v14, 0.0 }
 0x26d   : > { %v3884_v5 = vpop.f32.mrf.mxu3  ;;  %v2892_v41 = vpop.f32.mrf.mxu1 }
 0x26e   : > { %v3942_v30 = vadd.f32 %v3884_v5, %v3260_v54  ;;  %v2947_v17 = vadd.f32 %v2892_v41, %v6584_v18 }
 0x270   : > { %v4368_v9 = vadd.f32 %v4310_v34, %v3942_v30  ;;  %v3205_v28 = vpop.f32.mrf.mxu2 }
 0x271   : > { %v3261_v31 = vadd.f32 %v3205_v28, %v2946_v20 }
 0x272   : > { %v4404_v37 = vadd.f32 %v6903_v49, %v4368_v9 }
 0x274   : > { %v4436_v1 = vmax.f32 %v4404_v37, 0.0  ;;  %v4313_v27 = vpop.f32.mrf.mxu0 }
 0x275   : > { %v3887_v48 = vpop.f32.mrf.mxu3  ;;  %v2895_v11 = vpop.f32.mrf.mxu1 }
 0x276   : > { %v5541_v36 = vpack.c.bf16 %v4436_v1, %v4435_v40  ;;  %v3943_v8 = vadd.f32 %v3887_v48, %v3261_v31  ;;  %v2948_v61 = vadd.f32 %v2895_v11, %v6603_v6 }
 0x278   : > { %5589 = vst [vmem:[%s6930_s30 + $0x38] sm:$0xff] %v5541_v36   ;;  %v3207_v62 = vpop.f32.mrf.mxu2  ;;  %v4369_v32 = vadd.f32 %v4313_v27, %v3943_v8 }
 0x279   : > { %v3262_v3 = vadd.f32 %v3207_v62, %v2947_v17 }
 0x27a   : > { %v4405_v47 = vadd.f32 %v6903_v49, %v4369_v32 }
 0x27c   : > { %v4315_v42 = vpop.f32.mrf.mxu0  ;;  %v4437_v56 = vmax.f32 %v4405_v47, 0.0 }
 0x27d   : > { %v3889_v51 = vpop.f32.mrf.mxu3  ;;  %v2897_v63 = vpop.f32.mrf.mxu1 }
 0x27e   : > { %v3944_v21 = vadd.f32 %v3889_v51, %v3262_v3  ;;  %v2949_v39 = vadd.f32 %v2897_v63, %v6627_v50 }
 0x280   : > { %v4370_v55 = vadd.f32 %v4315_v42, %v3944_v21  ;;  %v3210_v43 = vpop.f32.mrf.mxu2 }
 0x281   : > { %v3263_v18 = vadd.f32 %v3210_v43, %v2948_v61 }
 0x282   : > { %v4406_v15 = vadd.f32 %v6903_v49, %v4370_v55 }
 0x284   : > { %v4438_v46 = vmax.f32 %v4406_v15, 0.0  ;;  %v4318_v22 = vpop.f32.mrf.mxu0 }
 0x285   : > { %v3892_v26 = vpop.f32.mrf.mxu3  ;;  %v2900_v25 = vpop.f32.mrf.mxu1 }
 0x286   : > { %v5546_v29 = vpack.c.bf16 %v4438_v46, %v4437_v56  ;;  %v3945_v52 = vadd.f32 %v3892_v26, %v3263_v18  ;;  %v2950_v34 = vadd.f32 %v2900_v25, %v6646_v60 }
 0x288   : > { %5590 = vst [vmem:[%s6930_s30 + $0x40] sm:$0xff] %v5546_v29   ;;  %v3212_v16 = vpop.f32.mrf.mxu2  ;;  %v4371_v33 = vadd.f32 %v4318_v22, %v3945_v52 }
 0x289   : > { %v3264_v44 = vadd.f32 %v3212_v16, %v2949_v39 }
 0x28a   : > { %v4407_v6 = vadd.f32 %v6903_v49, %v4371_v33 }
 0x28c   : > { %v4320_v53 = vpop.f32.mrf.mxu0  ;;  %v4439_v5 = vmax.f32 %v4407_v6, 0.0 }
 0x28d   : > { %v3894_v2 = vpop.f32.mrf.mxu3  ;;  %v2902_v13 = vpop.f32.mrf.mxu1 }
 0x28e   : > { %v3946_v23 = vadd.f32 %v3894_v2, %v3264_v44  ;;  %v2951_v20 = vadd.f32 %v2902_v13, %v6670_v45 }
 0x290   : > { %v4372_v7 = vadd.f32 %v4320_v53, %v3946_v23  ;;  %v3215_v54 = vpop.f32.mrf.mxu2 }
 0x291   : > { %v3265_v50 = vadd.f32 %v3215_v54, %v2950_v34 }
 0x292   : > { %v4408_v59 = vadd.f32 %v6903_v49, %v4372_v7 }
 0x294   : > { %v4440_v41 = vmax.f32 %v4408_v59, 0.0  ;;  %v4323_v30 = vpop.f32.mrf.mxu0 }
 0x295   : > { %v3897_v14 = vpop.f32.mrf.mxu3  ;;  %v2905_v9 = vpop.f32.mrf.mxu1 }
 0x296   : > { %v5551_v28 = vpack.c.bf16 %v4440_v41, %v4439_v5  ;;  %v3947_v37 = vadd.f32 %v3897_v14, %v3265_v50  ;;  %v2952_v3 = vadd.f32 %v2905_v9, %v6689_v12  ;;  %v7171_v12 = vld [vmem:[%s7207_s2] ss:$0 sm:$0xff] }
 0x298   : > { %5591 = vst [vmem:[%s6930_s30 + $0x48] sm:$0xff] %v5551_v28   ;;  %v3217_v40 = vpop.f32.mrf.mxu2  ;;  %v4373_v27 = vadd.f32 %v4323_v30, %v3947_v37 }
 0x299   : > { %v3266_v1 = vadd.f32 %v3217_v40, %v2951_v20 }
 0x29a   : > { %v4409_v60 = vadd.f32 %v6903_v49, %v4373_v27 }
 0x29c   : > { %v4325_v31 = vpop.f32.mrf.mxu0  ;;  %v4441_v32 = vmax.f32 %v4409_v60, 0.0 }
 0x29d   : > { %v3899_v48 = vpop.f32.mrf.mxu3  ;;  %v2907_v11 = vpop.f32.mrf.mxu1 }
 0x29e   : > { %v3948_v36 = vadd.f32 %v3899_v48, %v3266_v1  ;;  %v2953_v43 = vadd.f32 %v2907_v11, %v6713_v35 }
 0x2a0   : > { %v4374_v8 = vadd.f32 %v4325_v31, %v3948_v36  ;;  %v3220_v17 = vpop.f32.mrf.mxu2 }
 0x2a1   : > { %v3267_v45 = vadd.f32 %v3220_v17, %v2952_v3 }
 0x2a2   : > { %v4410_v62 = vadd.f32 %v6903_v49, %v4374_v8 }
 0x2a4   : > { %v4442_v42 = vmax.f32 %v4410_v62, 0.0  ;;  %v4328_v51 = vpop.f32.mrf.mxu0 }
 0x2a5   : > { %v3902_v63 = vpop.f32.mrf.mxu3  ;;  %v2910_v21 = vpop.f32.mrf.mxu1 }
 0x2a6   : > { %v5556_v47 = vpack.c.bf16 %v4442_v42, %v4441_v32  ;;  %v3949_v55 = vadd.f32 %v3902_v63, %v3267_v45  ;;  %v2954_v35 = vadd.f32 %v2910_v21, %v6732_v58 }
 0x2a8   : > { %5592 = vst [vmem:[%s6930_s30 + $0x50] sm:$0xff] %v5556_v47   ;;  %v3222_v15 = vpop.f32.mrf.mxu2  ;;  %v4375_v56 = vadd.f32 %v4328_v51, %v3949_v55 }
 0x2a9   : > { %v3268_v61 = vadd.f32 %v3222_v15, %v2953_v43 }
 0x2aa   : > { %v4411_v26 = vadd.f32 %v7171_v12, %v4375_v56 }
 0x2ac   : > { %v4330_v46 = vpop.f32.mrf.mxu0  ;;  %v4443_v39 = vmax.f32 %v4411_v26, 0.0 }
 0x2ad   : > { %v3904_v22 = vpop.f32.mrf.mxu3  ;;  %v2912_v49 = vpop.f32.mrf.mxu1 }
 0x2ae   : > { %v3950_v18 = vadd.f32 %v3904_v22, %v3268_v61  ;;  %v2955_v6 = vadd.f32 %v2912_v49, %v6756_v38 }
 0x2b0   : > { %v4376_v25 = vadd.f32 %v4330_v46, %v3950_v18  ;;  %v3225_v29 = vpop.f32.mrf.mxu2 }
 0x2b1   : > { %v3269_v33 = vadd.f32 %v3225_v29, %v2954_v35 }
 0x2b2   : > { %v4412_v52 = vadd.f32 %v7171_v12, %v4376_v25 }
 0x2b4   : > { %v4444_v16 = vmax.f32 %v4412_v52, 0.0  ;;  %v4333_v44 = vpop.f32.mrf.mxu0 }
 0x2b5   : > { %v3907_v53 = vpop.f32.mrf.mxu3  ;;  %v2915_v2 = vpop.f32.mrf.mxu1 }
 0x2b6   : > { %v5561_v13 = vpack.c.bf16 %v4444_v16, %v4443_v39  ;;  %v3951_v23 = vadd.f32 %v3907_v53, %v3269_v33  ;;  %v2956_v28 = vadd.f32 %v2915_v2, %v6775_v24 }
 0x2b8   : > { %5593 = vst [vmem:[%s6930_s30 + $0x58] sm:$0xff] %v5561_v13   ;;  %v3227_v7 = vpop.f32.mrf.mxu2  ;;  %v4377_v59 = vadd.f32 %v4333_v44, %v3951_v23 }
 0x2b9   : > { %v3270_v54 = vadd.f32 %v3227_v7, %v2955_v6 }
 0x2ba   : > { %v4413_v58 = vadd.f32 %v7171_v12, %v4377_v59 }
 0x2bc   : > { %v4335_v34 = vpop.f32.mrf.mxu0  ;;  %v4445_v37 = vmax.f32 %v4413_v58, 0.0 }
 0x2bd   : > { %v3909_v5 = vpop.f32.mrf.mxu3  ;;  %v2917_v41 = vpop.f32.mrf.mxu1 }
 0x2be   : > { %v3952_v30 = vadd.f32 %v3909_v5, %v3270_v54  ;;  %v2957_v11 = vadd.f32 %v2917_v41, %v6799_v57 }
 0x2c0   : > { %v4378_v50 = vadd.f32 %v4335_v34, %v3952_v30  ;;  %v3230_v14 = vpop.f32.mrf.mxu2 }
 0x2c1   : > { %v3271_v38 = vadd.f32 %v3230_v14, %v2956_v28 }
 0x2c2   : > { %v4414_v9 = vadd.f32 %v7171_v12, %v4378_v50 }
 0x2c4   : > { %v4446_v20 = vmax.f32 %v4414_v9, 0.0  ;;  %v4338_v40 = vpop.f32.mrf.mxu0 }
 0x2c5   : > { %v3912_v1 = vpop.f32.mrf.mxu3  ;;  %v2920_v31 = vpop.f32.mrf.mxu1 }
 0x2c6   : > { %v5566_v27 = vpack.c.bf16 %v4446_v20, %v4445_v37  ;;  %v3953_v48 = vadd.f32 %v3912_v1, %v3271_v38  ;;  %v2958_v63 = vadd.f32 %v2920_v31, %v6816_v0 }
 0x2c8   : > { %5594 = vst [vmem:[%s6930_s30 + $0x60] sm:$0xff] %v5566_v27   ;;  %v3232_v36 = vpop.f32.mrf.mxu2  ;;  %v4379_v8 = vadd.f32 %v4338_v40, %v3953_v48 }
 0x2c9   : > { %v3272_v60 = vadd.f32 %v3232_v36, %v2957_v11 }
 0x2ca   : > { %v4415_v24 = vadd.f32 %v7171_v12, %v4379_v8 }
 0x2cc   : > { %v4340_v17 = vpop.f32.mrf.mxu0  ;;  %v4447_v21 = vmax.f32 %v4415_v24, 0.0 }
 0x2cd   : > { %v3914_v62 = vpop.f32.mrf.mxu3  ;;  %v2922_v51 = vpop.f32.mrf.mxu1 }
 0x2ce   : > { %v3954_v3 = vadd.f32 %v3914_v62, %v3272_v60  ;;  %v2959_v56 = vadd.f32 %v2922_v51, %v6837_v10 }
 0x2d0   : > { %v4380_v32 = vadd.f32 %v4340_v17, %v3954_v3  ;;  %v3235_v42 = vpop.f32.mrf.mxu2 }
 0x2d1   : > { %v3273_v57 = vadd.f32 %v3235_v42, %v2958_v63 }
 0x2d2   : > { %v4416_v45 = vadd.f32 %v7171_v12, %v4380_v32 }
 0x2d4   : > { %v4448_v47 = vmax.f32 %v4416_v45, 0.0  ;;  %v4343_v55 = vpop.f32.mrf.mxu0 }
 0x2d5   : > { %v3917_v43 = vpop.f32.mrf.mxu3  ;;  %v2925_v49 = vpop.f32.mrf.mxu1 }
 0x2d6   : > { %v5571_v15 = vpack.c.bf16 %v4448_v47, %v4447_v21  ;;  %v3955_v61 = vadd.f32 %v3917_v43, %v3273_v57  ;;  %v2960_v16 = vadd.f32 %v2925_v49, %v6855_v4 }
 0x2d8   : > { %5595 = vst [vmem:[%s6930_s30 + $0x68] sm:$0xff] %v5571_v15   ;;  %v3237_v46 = vpop.f32.mrf.mxu2  ;;  %v4381_v18 = vadd.f32 %v4343_v55, %v3955_v61 }
 0x2d9   : > { %v3274_v22 = vadd.f32 %v3237_v46, %v2959_v56 }
 0x2da   : > { %v4417_v0 = vadd.f32 %v7171_v12, %v4381_v18 }
 0x2dc   : > { %v4345_v26 = vpop.f32.mrf.mxu0  ;;  %v4449_v44 = vmax.f32 %v4417_v0, 0.0 }
 0x2dd   : > { %v3919_v25 = vpop.f32.mrf.mxu3  ;;  %v2927_v10 = vpop.f32.mrf.mxu1 }
 0x2de   : > { %v3956_v29 = vadd.f32 %v3919_v25, %v3274_v22  ;;  %v2961_v7 = vadd.f32 %v2927_v10, %v6875_v19 }
 0x2e0   : > { %v4382_v52 = vadd.f32 %v4345_v26, %v3956_v29  ;;  %v3240_v35 = vpop.f32.mrf.mxu2 }
 0x2e1   : > { %v3275_v53 = vadd.f32 %v3240_v35, %v2960_v16 }
 0x2e2   : > { %v4418_v39 = vadd.f32 %v7171_v12, %v4382_v52 }
 0x2e4   : > { %v4450_v33 = vmax.f32 %v4418_v39, 0.0  ;;  %v4348_v2 = vpop.f32.mrf.mxu0 }
 0x2e5   : > { %v3922_v13 = vpop.f32.mrf.mxu3 }
 0x2e6   : > { %v5576_v23 = vpack.c.bf16 %v4450_v33, %v4449_v44  ;;  %v3957_v6 = vadd.f32 %v3922_v13, %v3275_v53 }
 0x2e8   : > { %5596 = vst [vmem:[%s6930_s30 + $0x70] sm:$0xff] %v5576_v23   ;;  %v3242_v54 = vpop.f32.mrf.mxu2  ;;  %v4383_v34 = vadd.f32 %v4348_v2, %v3957_v6 }
 0x2e9   : > { %v3276_v59 = vadd.f32 %v3242_v54, %v2961_v7 }
 0x2ea   : > { %v4419_v4 = vadd.f32 %v7171_v12, %v4383_v34 }
 0x2ec   : > { %v4350_v30 = vpop.f32.mrf.mxu0  ;;  %v4451_v14 = vmax.f32 %v4419_v4, 0.0 }
 0x2ed   : > { %v3924_v5 = vpop.f32.mrf.mxu3 }
 0x2ee   : > { %v3958_v41 = vadd.f32 %v3924_v5, %v3276_v59 }
 0x2f0   : > { %v4384_v58 = vadd.f32 %v4350_v30, %v3958_v41 }
 0x2f2   : > { %v4420_v50 = vadd.f32 %v7171_v12, %v4384_v58 }
 0x2f4   : > { %v4452_v9 = vmax.f32 %v4420_v50, 0.0 }
 0x2f6   : > { %v5581_v28 = vpack.c.bf16 %v4452_v9, %v4451_v14 }
 0x2f8   : > { %5597 = vst [vmem:[%s6930_s30 + $0x78] sm:$0xff] %v5581_v28  }
 0x2f9 PF: > { %s13_s14 = sadd.s32 1, %s5711_s14   ;;  %s7217_s12 = smov %s5707_s13 }
 0x2fa   : > { %p10_p5 = scmp.ge.s32.totalorder %s13_s14, 4   ;;  %s7218_s13 = smov %s7220_s15 }
 0x2fc   :  { %12 = sbr.rel (!%p10_p5) target bundleno = 2 (0x2), region = 78 }

// kernel: _lambda_.7
= control target key start
LH: loop header
LB: loop body
LE: loop exit
PB: predicated region body
PF: predicated region fallthrough
CT: control target
= control target key end

     0   :  { %vm18_vm0 = vcmask 261120   ;;  %v459_v6 = vmov 0.0   ;;  %vm332_vm1 = vcmask 257024   ;;  %s645_s1 = inlined_call_operand.vmem [shape: bf16[128,32], index: 1, kind: input, shape index: {}]   ;;  %s646_s2 = inlined_call_operand.vmem [shape: f32[1,32], index: 2, kind: input, shape index: {}]   ;;  %s647_s0 = inlined_call_operand.vmem [shape: bf16[128,128], index: 0, kind: input, shape index: {}]   ;;  %s648_s3 = inlined_call_operand.vmem [shape: bf16[128,32], index: 3, kind: output, shape index: {}]  }
   0x1   :  { %v432_v0 = vld [vmem:[%s645_s1 + $0x38] sm:$0xff]  ;;  %v431_v1 = vld [vmem:[%s645_s1 + $0x30] sm:$0xff]  ;;  %v430_v2 = vld [vmem:[%s645_s1 + $0x28] sm:$0xff]  ;;  %19 = vst.msk [vmem:[#allocation2] sm:$0xff] %vm18_vm0, %v459_v6 }
   0x2   :  { %179 = vmatpush.bf16.msra.mxu0 %v432_v0  ;;  %433 = vmatpush.bf16.msra.mxu1 %v432_v0  ;;  %v429_v3 = vld [vmem:[%s645_s1 + $0x20] sm:$0xff]  ;;  %v428_v4 = vld [vmem:[%s645_s1 + $0x18] sm:$0xff]  ;;  %v427_v5 = vld [vmem:[%s645_s1 + $0x10] sm:$0xff]  ;;  %20 = vst.msk [vmem:[#allocation2 + $0x8] sm:$0xff] %vm18_vm0, %v459_v6 }
   0x3   :  { %434 = vmatpush.bf16.msra.mxu2 %v432_v0  ;;  %435 = vmatpush.bf16.msra.mxu3 %v432_v0  ;;  %21 = vst.msk [vmem:[#allocation2 + $0x10] sm:$0xff] %vm18_vm0, %v459_v6  ;;  %v426_v7 = vld [vmem:[%s645_s1 + $0x8] sm:$0xff]  ;;  %v425_v8 = vld [vmem:[%s645_s1] sm:$0xff]  ;;  %v419_v10 = vld [vmem:[%s647_s0 + $0x10] sm:$0xff] }
   0x4   :  { %22 = vst.msk [vmem:[#allocation2 + $0x18] sm:$0xff] %vm18_vm0, %v459_v6  ;;  %v417_v9 = vld [vmem:[%s647_s0] sm:$0xff]  ;;  %v423_v12 = vld [vmem:[%s647_s0 + $0x30] sm:$0xff]  ;;  %v418_v13 = vld [vmem:[%s647_s0 + $0x8] sm:$0xff] }
   0x5   :  { %23 = vst.msk [vmem:[#allocation2 + $0x20] sm:$0xff] %vm18_vm0, %v459_v6  ;;  %v421_v11 = vld [vmem:[%s647_s0 + $0x20] sm:$0xff]  ;;  %v420_v14 = vld [vmem:[%s647_s0 + $0x18] sm:$0xff]  ;;  %v422_v15 = vld [vmem:[%s647_s0 + $0x28] sm:$0xff] }
   0x6   :  { %180 = vmatpush.bf16.msra.mxu0 %v431_v1  ;;  %436 = vmatpush.bf16.msra.mxu1 %v431_v1  ;;  %24 = vst.msk [vmem:[#allocation2 + $0x28] sm:$0xff] %vm18_vm0, %v459_v6  ;;  %v424_v16 = vld [vmem:[%s647_s0 + $0x38] sm:$0xff]  ;;  %v549_v27 = vld [vmem:[%s646_s2] ss:$0 sm:$0xff] }
   0x7   :  { %437 = vmatpush.bf16.msra.mxu2 %v431_v1  ;;  %438 = vmatpush.bf16.msra.mxu3 %v431_v1  ;;  %25 = vst.msk [vmem:[#allocation2 + $0x30] sm:$0xff] %vm18_vm0, %v459_v6 }
   0x8   :  { %26 = vst.msk [vmem:[#allocation2 + $0x38] sm:$0xff] %vm18_vm0, %v459_v6  ;;  %v35_v17 = vld [vmem:[#allocation2] sm:$0xff] }
   0x9   :  { %27 = vst.msk [vmem:[#allocation2 + $0x40] sm:$0xff] %vm18_vm0, %v459_v6  ;;  %v36_v25 = vld [vmem:[#allocation2 + $0x8] sm:$0xff] }
   0xa   :  { %181 = vmatpush.bf16.msra.mxu0 %v430_v2  ;;  %439 = vmatpush.bf16.msra.mxu1 %v430_v2  ;;  %28 = vst.msk [vmem:[#allocation2 + $0x48] sm:$0xff] %vm18_vm0, %v459_v6  ;;  %v37_v44 = vld [vmem:[#allocation2 + $0x10] sm:$0xff] }
   0xb   :  { %440 = vmatpush.bf16.msra.mxu2 %v430_v2  ;;  %441 = vmatpush.bf16.msra.mxu3 %v430_v2  ;;  %29 = vst.msk [vmem:[#allocation2 + $0x50] sm:$0xff] %vm18_vm0, %v459_v6 }
   0xc   :  { %30 = vst.msk [vmem:[#allocation2 + $0x58] sm:$0xff] %vm18_vm0, %v459_v6  ;;  %v39_v18 = vld [vmem:[#allocation2 + $0x20] sm:$0xff] }
   0xd   :  { %31 = vst.msk [vmem:[#allocation2 + $0x60] sm:$0xff] %vm18_vm0, %v459_v6  ;;  %v40_v26 = vld [vmem:[#allocation2 + $0x28] sm:$0xff] }
   0xe   :  { %182 = vmatpush.bf16.msra.mxu0 %v429_v3  ;;  %442 = vmatpush.bf16.msra.mxu1 %v429_v3  ;;  %32 = vst.msk [vmem:[#allocation2 + $0x68] sm:$0xff] %vm18_vm0, %v459_v6  ;;  %v41_v48 = vld [vmem:[#allocation2 + $0x30] sm:$0xff] }
   0xf   :  { %443 = vmatpush.bf16.msra.mxu2 %v429_v3  ;;  %444 = vmatpush.bf16.msra.mxu3 %v429_v3  ;;  %33 = vst.msk [vmem:[#allocation2 + $0x70] sm:$0xff] %vm18_vm0, %v459_v6 }
  0x10   :  { %34 = vst.msk [vmem:[#allocation2 + $0x78] sm:$0xff] %vm18_vm0, %v459_v6  ;;  %v43_v23 = vld [vmem:[#allocation2 + $0x40] sm:$0xff] }
  0x11   :  { %v44_v41 = vld [vmem:[#allocation2 + $0x48] sm:$0xff] }
  0x12   :  { %183 = vmatpush.bf16.msra.mxu0 %v428_v4  ;;  %445 = vmatpush.bf16.msra.mxu1 %v428_v4  ;;  %v45_v2 = vld [vmem:[#allocation2 + $0x50] sm:$0xff] }
  0x13   :  { %446 = vmatpush.bf16.msra.mxu2 %v428_v4  ;;  %447 = vmatpush.bf16.msra.mxu3 %v428_v4 }
  0x14   :  { %v47_v24 = vld [vmem:[#allocation2 + $0x60] sm:$0xff] }
  0x15   :  { %v48_v42 = vld [vmem:[#allocation2 + $0x68] sm:$0xff] }
  0x16   :  { %184 = vmatpush.bf16.msra.mxu0 %v427_v5  ;;  %448 = vmatpush.bf16.msra.mxu1 %v427_v5 }
  0x17   :  { %449 = vmatpush.bf16.msra.mxu2 %v427_v5  ;;  %450 = vmatpush.bf16.msra.mxu3 %v427_v5  ;;  %v49_v5 = vld [vmem:[#allocation2 + $0x70] sm:$0xff] }
  0x1a   :  { %185 = vmatpush.bf16.msra.mxu0 %v426_v7  ;;  %451 = vmatpush.bf16.msra.mxu1 %v426_v7 }
  0x1b   :  { %452 = vmatpush.bf16.msra.mxu2 %v426_v7  ;;  %453 = vmatpush.bf16.msra.mxu3 %v426_v7 }
  0x1e   :  { %186 = vmatpush.bf16.msra.mxu0 %v425_v8  ;;  %454 = vmatpush.bf16.msra.mxu1 %v425_v8 }
  0x1f   :  { %455 = vmatpush.bf16.msra.mxu2 %v425_v8  ;;  %456 = vmatpush.bf16.msra.mxu3 %v425_v8 }
  0x21   :  { %187 = vmatmul.bf16.vlgmr.msra.gmra.mxu0 %v417_v9  ;;  %197 = vmatmul.bf16.vlgmr.msra.gmra.mxu1 %v419_v10  ;;  %v38_v10 = vld [vmem:[#allocation2 + $0x18] sm:$0xff] }
  0x22   :  { %207 = vmatmul.bf16.vlgmr.msra.gmra.mxu2 %v421_v11  ;;  %217 = vmatmul.bf16.vlgmr.msra.gmra.mxu3 %v423_v12 }
  0x31   :  { %192 = vmatmul.bf16.gmra.mxu0 %v418_v13  ;;  %202 = vmatmul.bf16.gmra.mxu1 %v420_v14  ;;  %v42_v14 = vld [vmem:[#allocation2 + $0x38] sm:$0xff] }
  0x32   :  { %212 = vmatmul.bf16.gmra.mxu2 %v422_v15  ;;  %222 = vmatmul.bf16.gmra.mxu3 %v424_v16 }
  0x9e   :  { %v188_v19 = vpop.f32.mrf.mxu0  ;;  %v198_v20 = vpop.f32.mrf.mxu1 }
  0x9f   :  { %v228_v21 = vadd.f32 %v188_v19, %v35_v17  ;;  %v232_v22 = vadd.f32 %v198_v20, %v39_v18 }
  0xa1   :  { %245 = vst.msk [vmem:[#allocation2] sm:$0xff] %vm18_vm0, %v228_v21 }
  0xa2   :  { %249 = vst.msk [vmem:[#allocation2 + $0x20] sm:$0xff] %vm18_vm0, %v232_v22 }
  0xa5   :  { %v208_v28 = vpop.f32.mrf.mxu2  ;;  %v218_v29 = vpop.f32.mrf.mxu3 }
  0xa6   :  { %v236_v30 = vadd.f32 %v208_v28, %v43_v23  ;;  %v240_v31 = vadd.f32 %v218_v29, %v47_v24  ;;  %v190_v32 = vpop.f32.mrf.mxu0  ;;  %v200_v33 = vpop.f32.mrf.mxu1 }
  0xa7   :  { %v229_v34 = vadd.f32 %v190_v32, %v36_v25  ;;  %v233_v35 = vadd.f32 %v200_v33, %v40_v26 }
  0xa8   :  { %v264_v36 = vld [vmem:[#allocation2] sm:$0xff]  ;;  %253 = vst.msk [vmem:[#allocation2 + $0x40] sm:$0xff] %vm18_vm0, %v236_v30 }
  0xa9   :  { %v284_v37 = vadd.f32 %v549_v27, %v264_v36  ;;  %v268_v38 = vld [vmem:[#allocation2 + $0x20] sm:$0xff]  ;;  %257 = vst.msk [vmem:[#allocation2 + $0x60] sm:$0xff] %vm18_vm0, %v240_v31  ;;  %v46_v31 = vld [vmem:[#allocation2 + $0x58] sm:$0xff] }
  0xaa   :  { %v288_v39 = vadd.f32 %v549_v27, %v268_v38  ;;  %246 = vst.msk [vmem:[#allocation2 + $0x8] sm:$0xff] %vm18_vm0, %v229_v34 }
  0xab   :  { %v300_v40 = vmax.f32 %v284_v37, 0.0  ;;  %250 = vst.msk [vmem:[#allocation2 + $0x28] sm:$0xff] %vm18_vm0, %v233_v35  ;;  %v50_v35 = vld [vmem:[#allocation2 + $0x78] sm:$0xff] }
  0xac   :  { %v304_v43 = vmax.f32 %v288_v39, 0.0 }
  0xad   :  { %v316_v45 = vpack.c.bf16 %v300_v40, %v300_v40  ;;  %v210_v46 = vpop.f32.mrf.mxu2  ;;  %v220_v47 = vpop.f32.mrf.mxu3 }
  0xae   :  { %v320_v49 = vpack.c.bf16 %v304_v43, %v304_v43  ;;  %v237_v50 = vadd.f32 %v210_v46, %v44_v41  ;;  %v241_v51 = vadd.f32 %v220_v47, %v48_v42  ;;  %v193_v52 = vpop.f32.mrf.mxu0  ;;  %v203_v53 = vpop.f32.mrf.mxu1 }
  0xaf   :  { %333 = vst.msk [vmem:[%s648_s3] sm:$0xf] %vm332_vm1, %v316_v45  ;;  %v272_v54 = vld [vmem:[#allocation2 + $0x40] sm:$0xff]  ;;  %v230_v55 = vadd.f32 %v193_v52, %v37_v44  ;;  %v234_v58 = vadd.f32 %v203_v53, %v41_v48 }
  0xb0   :  { %337 = vst.msk [vmem:[%s648_s3 + $0x10] sm:$0xf] %vm332_vm1, %v320_v49  ;;  %v292_v56 = vadd.f32 %v549_v27, %v272_v54  ;;  %v276_v57 = vld [vmem:[#allocation2 + $0x60] sm:$0xff] }
  0xb1   :  { %v296_v59 = vadd.f32 %v549_v27, %v276_v57  ;;  %v265_v60 = vld [vmem:[#allocation2 + $0x8] sm:$0xff]  ;;  %254 = vst.msk [vmem:[#allocation2 + $0x48] sm:$0xff] %vm18_vm0, %v237_v50 }
  0xb2   :  { %v308_v61 = vmax.f32 %v292_v56, 0.0  ;;  %v285_v62 = vadd.f32 %v549_v27, %v265_v60  ;;  %v269_v63 = vld [vmem:[#allocation2 + $0x28] sm:$0xff]  ;;  %258 = vst.msk [vmem:[#allocation2 + $0x68] sm:$0xff] %vm18_vm0, %v241_v51 }
  0xb3   :  { %v312_v0 = vmax.f32 %v296_v59, 0.0  ;;  %v289_v1 = vadd.f32 %v549_v27, %v269_v63  ;;  %247 = vst.msk [vmem:[#allocation2 + $0x10] sm:$0xff] %vm18_vm0, %v230_v55 }
  0xb4   :  { %v324_v3 = vpack.c.bf16 %v308_v61, %v308_v61  ;;  %v301_v4 = vmax.f32 %v285_v62, 0.0  ;;  %251 = vst.msk [vmem:[#allocation2 + $0x30] sm:$0xff] %vm18_vm0, %v234_v58 }
  0xb5   :  { %v328_v6 = vpack.c.bf16 %v312_v0, %v312_v0  ;;  %v305_v7 = vmax.f32 %v289_v1, 0.0  ;;  %v213_v8 = vpop.f32.mrf.mxu2  ;;  %v223_v9 = vpop.f32.mrf.mxu3 }
  0xb6   :  { %341 = vst.msk [vmem:[%s648_s3 + $0x20] sm:$0xf] %vm332_vm1, %v324_v3  ;;  %v317_v11 = vpack.c.bf16 %v301_v4, %v301_v4  ;;  %v238_v12 = vadd.f32 %v213_v8, %v45_v2  ;;  %v195_v13 = vpop.f32.mrf.mxu0  ;;  %v205_v15 = vpop.f32.mrf.mxu1  ;;  %v242_v17 = vadd.f32 %v223_v9, %v49_v5 }
  0xb7   :  { %345 = vst.msk [vmem:[%s648_s3 + $0x30] sm:$0xf] %vm332_vm1, %v328_v6  ;;  %v321_v16 = vpack.c.bf16 %v305_v7, %v305_v7  ;;  %v231_v19 = vadd.f32 %v195_v13, %v38_v10  ;;  %v235_v22 = vadd.f32 %v205_v15, %v42_v14 }
  0xb8   :  { %334 = vst.msk [vmem:[%s648_s3 + $0x4] sm:$0xf] %vm332_vm1, %v317_v11  ;;  %v273_v18 = vld [vmem:[#allocation2 + $0x48] sm:$0xff] }
  0xb9   :  { %338 = vst.msk [vmem:[%s648_s3 + $0x14] sm:$0xf] %vm332_vm1, %v321_v16  ;;  %v293_v20 = vadd.f32 %v549_v27, %v273_v18  ;;  %v277_v21 = vld [vmem:[#allocation2 + $0x68] sm:$0xff] }
  0xba   :  { %v297_v23 = vadd.f32 %v549_v27, %v277_v21  ;;  %v266_v24 = vld [vmem:[#allocation2 + $0x10] sm:$0xff]  ;;  %255 = vst.msk [vmem:[#allocation2 + $0x50] sm:$0xff] %vm18_vm0, %v238_v12 }
  0xbb   :  { %v309_v25 = vmax.f32 %v293_v20, 0.0  ;;  %v286_v26 = vadd.f32 %v549_v27, %v266_v24  ;;  %v270_v28 = vld [vmem:[#allocation2 + $0x30] sm:$0xff]  ;;  %259 = vst.msk [vmem:[#allocation2 + $0x70] sm:$0xff] %vm18_vm0, %v242_v17 }
  0xbc   :  { %v313_v29 = vmax.f32 %v297_v23, 0.0  ;;  %v290_v30 = vadd.f32 %v549_v27, %v270_v28  ;;  %248 = vst.msk [vmem:[#allocation2 + $0x18] sm:$0xff] %vm18_vm0, %v231_v19 }
  0xbd   :  { %v325_v32 = vpack.c.bf16 %v309_v25, %v309_v25  ;;  %v302_v33 = vmax.f32 %v286_v26, 0.0  ;;  %252 = vst.msk [vmem:[#allocation2 + $0x38] sm:$0xff] %vm18_vm0, %v235_v22  ;;  %v215_v34 = vpop.f32.mrf.mxu2  ;;  %v225_v36 = vpop.f32.mrf.mxu3 }
  0xbe   :  { %v329_v37 = vpack.c.bf16 %v313_v29, %v313_v29  ;;  %v306_v38 = vmax.f32 %v290_v30, 0.0  ;;  %v239_v40 = vadd.f32 %v215_v34, %v46_v31  ;;  %v243_v42 = vadd.f32 %v225_v36, %v50_v35 }
  0xbf   :  { %342 = vst.msk [vmem:[%s648_s3 + $0x24] sm:$0xf] %vm332_vm1, %v325_v32  ;;  %v318_v39 = vpack.c.bf16 %v302_v33, %v302_v33 }
  0xc0   :  { %346 = vst.msk [vmem:[%s648_s3 + $0x34] sm:$0xf] %vm332_vm1, %v329_v37  ;;  %v322_v41 = vpack.c.bf16 %v306_v38, %v306_v38 }
  0xc1   :  { %335 = vst.msk [vmem:[%s648_s3 + $0x8] sm:$0xf] %vm332_vm1, %v318_v39  ;;  %v274_v43 = vld [vmem:[#allocation2 + $0x50] sm:$0xff] }
  0xc2   :  { %339 = vst.msk [vmem:[%s648_s3 + $0x18] sm:$0xf] %vm332_vm1, %v322_v41  ;;  %v294_v44 = vadd.f32 %v549_v27, %v274_v43  ;;  %v278_v45 = vld [vmem:[#allocation2 + $0x70] sm:$0xff] }
  0xc3   :  { %v298_v46 = vadd.f32 %v549_v27, %v278_v45  ;;  %v267_v47 = vld [vmem:[#allocation2 + $0x18] sm:$0xff]  ;;  %256 = vst.msk [vmem:[#allocation2 + $0x58] sm:$0xff] %vm18_vm0, %v239_v40 }
  0xc4   :  { %v310_v48 = vmax.f32 %v294_v44, 0.0  ;;  %v287_v49 = vadd.f32 %v549_v27, %v267_v47  ;;  %v271_v50 = vld [vmem:[#allocation2 + $0x38] sm:$0xff]  ;;  %260 = vst.msk [vmem:[#allocation2 + $0x78] sm:$0xff] %vm18_vm0, %v243_v42 }
  0xc5   :  { %v314_v51 = vmax.f32 %v298_v46, 0.0  ;;  %v291_v52 = vadd.f32 %v549_v27, %v271_v50 }
  0xc6   :  { %v326_v53 = vpack.c.bf16 %v310_v48, %v310_v48  ;;  %v303_v54 = vmax.f32 %v287_v49, 0.0 }
  0xc7   :  { %v330_v55 = vpack.c.bf16 %v314_v51, %v314_v51  ;;  %v307_v56 = vmax.f32 %v291_v52, 0.0 }
  0xc8   :  { %343 = vst.msk [vmem:[%s648_s3 + $0x28] sm:$0xf] %vm332_vm1, %v326_v53  ;;  %v319_v57 = vpack.c.bf16 %v303_v54, %v303_v54 }
  0xc9   :  { %347 = vst.msk [vmem:[%s648_s3 + $0x38] sm:$0xf] %vm332_vm1, %v330_v55  ;;  %v323_v58 = vpack.c.bf16 %v307_v56, %v307_v56 }
  0xca   :  { %336 = vst.msk [vmem:[%s648_s3 + $0xc] sm:$0xf] %vm332_vm1, %v319_v57  ;;  %v275_v59 = vld [vmem:[#allocation2 + $0x58] sm:$0xff] }
  0xcb   :  { %340 = vst.msk [vmem:[%s648_s3 + $0x1c] sm:$0xf] %vm332_vm1, %v323_v58  ;;  %v295_v60 = vadd.f32 %v549_v27, %v275_v59  ;;  %v279_v61 = vld [vmem:[#allocation2 + $0x78] sm:$0xff] }
  0xcc   :  { %v299_v62 = vadd.f32 %v549_v27, %v279_v61 }
  0xcd   :  { %v311_v63 = vmax.f32 %v295_v60, 0.0 }
  0xce   :  { %v315_v0 = vmax.f32 %v299_v62, 0.0 }
  0xcf   :  { %v327_v1 = vpack.c.bf16 %v311_v63, %v311_v63 }
  0xd0   :  { %v331_v2 = vpack.c.bf16 %v315_v0, %v315_v0 }
  0xd1   :  { %344 = vst.msk [vmem:[%s648_s3 + $0x2c] sm:$0xf] %vm332_vm1, %v327_v1 }
  0xd2   :  { %348 = vst.msk [vmem:[%s648_s3 + $0x3c] sm:$0xf] %vm332_vm1, %v331_v2 }

// kernel: _lambda_.9
= control target key start
LH: loop header
LB: loop body
LE: loop exit
PB: predicated region body
PF: predicated region fallthrough
CT: control target
= control target key end

     0   :  { %vm126_vm0 = vcmask 261120   ;;  %s654_s1 = inlined_call_operand.vmem [shape: bf16[32,128], index: 1, kind: input, shape index: {}]   ;;  %s655_s0 = inlined_call_operand.vmem [shape: bf16[128,32], index: 0, kind: input, shape index: {}]   ;;  %s656_s2 = inlined_call_operand.vmem [shape: f32[1,128], index: 2, kind: input, shape index: {}]   ;;  %s657_s3 = inlined_call_operand.vmem [shape: bf16[128,128], index: 3, kind: input, shape index: {}]   ;;  %s658_s4 = inlined_call_operand.vmem [shape: bf16[128,128], index: 4, kind: output, shape index: {}]  }
   0x1   :  { %v428_v0 = vld [vmem:[%s654_s1 + $0x8] sm:$0xff]  ;;  %v427_v1 = vld [vmem:[%s654_s1] sm:$0xff]  ;;  %v421_v3 = vld [vmem:[%s655_s0 + $0x10] sm:$0xff] }
   0x2   :  { %157 = vmatpush.bf16.msra.mxu0 %v428_v0  ;;  %515 = vmatpush.bf16.msra.mxu1 %v428_v0  ;;  %v419_v2 = vld [vmem:[%s655_s0] sm:$0xff]  ;;  %v425_v5 = vld [vmem:[%s655_s0 + $0x30] sm:$0xff]  ;;  %v420_v6 = vld [vmem:[%s655_s0 + $0x8] sm:$0xff] }
   0x3   :  { %516 = vmatpush.bf16.msra.mxu2 %v428_v0  ;;  %517 = vmatpush.bf16.msra.mxu3 %v428_v0  ;;  %v423_v4 = vld [vmem:[%s655_s0 + $0x20] sm:$0xff]  ;;  %v422_v7 = vld [vmem:[%s655_s0 + $0x18] sm:$0xff]  ;;  %v424_v8 = vld [vmem:[%s655_s0 + $0x28] sm:$0xff] }
   0x4   :  { %v426_v9 = vld [vmem:[%s655_s0 + $0x38] sm:$0xff]  ;;  %v588_v12 = vld [vmem:[%s656_s2] ss:$0 sm:$0xff]  ;;  %v502_v14 = vld [vmem:[%s657_s3 + $0x10] sm:$0xff]  }
   0x5   :  { %v430_v13 = vld [vmem:[%s657_s3] sm:$0xff]   ;;  %v439_v18 = vunpack.c.l.bf16 %v502_v14  ;;  %v440_v22 = vunpack.c.h.bf16 %v502_v14  ;;  %v506_v28 = vld [vmem:[%s657_s3 + $0x30] sm:$0xff]   ;;  %v501_v55 = vld [vmem:[%s657_s3 + $0x8] sm:$0xff]  }
   0x6   :  { %158 = vmatpush.bf16.msra.mxu0 %v427_v1  ;;  %518 = vmatpush.bf16.msra.mxu1 %v427_v1  ;;  %v431_v16 = vunpack.c.l.bf16 %v430_v13  ;;  %v432_v21 = vunpack.c.h.bf16 %v430_v13  ;;  %v504_v27 = vld [vmem:[%s657_s3 + $0x20] sm:$0xff]   ;;  %v455_v36 = vunpack.c.l.bf16 %v506_v28  ;;  %v456_v42 = vunpack.c.h.bf16 %v506_v28  ;;  %v503_v56 = vld [vmem:[%s657_s3 + $0x18] sm:$0xff]  }
   0x7   :  { %519 = vmatpush.bf16.msra.mxu2 %v427_v1  ;;  %520 = vmatpush.bf16.msra.mxu3 %v427_v1  ;;  %v447_v34 = vunpack.c.l.bf16 %v504_v27  ;;  %v448_v41 = vunpack.c.h.bf16 %v504_v27  ;;  %v435_v62 = vunpack.c.l.bf16 %v501_v55  ;;  %v443_v0 = vunpack.c.l.bf16 %v503_v56  ;;  %v507_v13 = vld [vmem:[%s657_s3 + $0x38] sm:$0xff]  }
   0x8   :  { %v460_v27 = vunpack.c.h.bf16 %v507_v13 }
   0x9   :  { %411 = vmatmul.msk.bf16.vlgmr.msra.gmra.mxu0 %vm126_vm0, %v419_v2  ;;  %413 = vmatmul.msk.bf16.vlgmr.msra.gmra.mxu1 %vm126_vm0, %v421_v3 }
   0xa   :  { %415 = vmatmul.msk.bf16.vlgmr.msra.gmra.mxu2 %vm126_vm0, %v423_v4  ;;  %417 = vmatmul.msk.bf16.vlgmr.msra.gmra.mxu3 %vm126_vm0, %v425_v5  ;;  %v436_v5 = vunpack.c.h.bf16 %v501_v55 }
  0x19   :  { %412 = vmatmul.msk.bf16.gmra.mxu0 %vm126_vm0, %v420_v6  ;;  %414 = vmatmul.msk.bf16.gmra.mxu1 %vm126_vm0, %v422_v7  ;;  %v444_v6 = vunpack.c.h.bf16 %v503_v56 }
  0x1a   :  { %416 = vmatmul.msk.bf16.gmra.mxu2 %vm126_vm0, %v424_v8  ;;  %418 = vmatmul.msk.bf16.gmra.mxu3 %vm126_vm0, %v426_v9 }
  0x86   :  { %v160_v10 = vpop.f32.mrf.mxu0  ;;  %v170_v11 = vpop.f32.mrf.mxu1 }
  0x87   :  { %v255_v15 = vadd.f32 %v588_v12, %v160_v10  ;;  %v259_v17 = vadd.f32 %v588_v12, %v170_v11  ;;  %v505_v11 = vld [vmem:[%s657_s3 + $0x28] sm:$0xff]  }
  0x89   :  { %v303_v25 = vadd.f32 %v431_v16, %v255_v15  ;;  %v307_v26 = vadd.f32 %v439_v18, %v259_v17 }
  0x8b   :  { %v319_v37 = vmax.f32 %v303_v25, 0.0  ;;  %v323_v38 = vmax.f32 %v307_v26, 0.0  ;;  %v452_v26 = vunpack.c.h.bf16 %v505_v11 }
  0x8d   :  { %v180_v19 = vpop.f32.mrf.mxu2  ;;  %v190_v20 = vpop.f32.mrf.mxu3 }
  0x8e   :  { %v162_v23 = vpop.f32.mrf.mxu0  ;;  %v172_v24 = vpop.f32.mrf.mxu1  ;;  %v263_v33 = vadd.f32 %v588_v12, %v180_v19  ;;  %v267_v35 = vadd.f32 %v588_v12, %v190_v20  ;;  %v451_v19 = vunpack.c.l.bf16 %v505_v11 }
  0x8f   :  { %v256_v29 = vadd.f32 %v588_v12, %v162_v23  ;;  %v260_v30 = vadd.f32 %v588_v12, %v172_v24 }
  0x90   :  { %v311_v47 = vadd.f32 %v447_v34, %v263_v33  ;;  %v315_v48 = vadd.f32 %v455_v36, %v267_v35 }
  0x91   :  { %v304_v31 = vadd.f32 %v432_v21, %v256_v29  ;;  %v308_v32 = vadd.f32 %v440_v22, %v260_v30  ;;  %v459_v21 = vunpack.c.l.bf16 %v507_v13 }
  0x92   :  { %v327_v57 = vmax.f32 %v311_v47, 0.0  ;;  %v331_v58 = vmax.f32 %v315_v48, 0.0 }
  0x93   :  { %v320_v39 = vmax.f32 %v304_v31, 0.0  ;;  %v324_v40 = vmax.f32 %v308_v32, 0.0 }
  0x95   :  { %v464_v43 = vpack.c.bf16 %v320_v39, %v319_v37  ;;  %v474_v44 = vpack.c.bf16 %v324_v40, %v323_v38  ;;  %v182_v45 = vpop.f32.mrf.mxu2  ;;  %v192_v46 = vpop.f32.mrf.mxu3 }
  0x96   :  { %v264_v49 = vadd.f32 %v588_v12, %v182_v45  ;;  %v268_v50 = vadd.f32 %v588_v12, %v192_v46  ;;  %v165_v51 = vpop.f32.mrf.mxu0  ;;  %v175_v52 = vpop.f32.mrf.mxu1 }
  0x97   :  { %465 = vst [vmem:[%s658_s4] sm:$0xff] %v464_v43   ;;  %v257_v61 = vadd.f32 %v588_v12, %v165_v51  ;;  %v261_v63 = vadd.f32 %v588_v12, %v175_v52 }
  0x98   :  { %509 = vst [vmem:[%s658_s4 + $0x10] sm:$0xff] %v474_v44   ;;  %v312_v53 = vadd.f32 %v448_v41, %v264_v49  ;;  %v316_v54 = vadd.f32 %v456_v42, %v268_v50 }
  0x99   :  { %v305_v9 = vadd.f32 %v435_v62, %v257_v61  ;;  %v309_v10 = vadd.f32 %v443_v0, %v261_v63 }
  0x9a   :  { %v328_v59 = vmax.f32 %v312_v53, 0.0  ;;  %v332_v60 = vmax.f32 %v316_v54, 0.0 }
  0x9b   :  { %v321_v22 = vmax.f32 %v305_v9, 0.0  ;;  %v325_v23 = vmax.f32 %v309_v10, 0.0 }
  0x9c   :  { %v484_v1 = vpack.c.bf16 %v328_v59, %v327_v57  ;;  %v494_v2 = vpack.c.bf16 %v332_v60, %v331_v58 }
  0x9d   :  { %v185_v3 = vpop.f32.mrf.mxu2  ;;  %v195_v4 = vpop.f32.mrf.mxu3 }
  0x9e   :  { %511 = vst [vmem:[%s658_s4 + $0x20] sm:$0xff] %v484_v1   ;;  %v167_v7 = vpop.f32.mrf.mxu0  ;;  %v177_v8 = vpop.f32.mrf.mxu1  ;;  %v265_v18 = vadd.f32 %v588_v12, %v185_v3  ;;  %v269_v20 = vadd.f32 %v588_v12, %v195_v4 }
  0x9f   :  { %513 = vst [vmem:[%s658_s4 + $0x30] sm:$0xff] %v494_v2   ;;  %v258_v14 = vadd.f32 %v588_v12, %v167_v7  ;;  %v262_v15 = vadd.f32 %v588_v12, %v177_v8 }
  0xa0   :  { %v313_v32 = vadd.f32 %v451_v19, %v265_v18  ;;  %v317_v33 = vadd.f32 %v459_v21, %v269_v20 }
  0xa1   :  { %v306_v16 = vadd.f32 %v436_v5, %v258_v14  ;;  %v310_v17 = vadd.f32 %v444_v6, %v262_v15 }
  0xa2   :  { %v329_v38 = vmax.f32 %v313_v32, 0.0  ;;  %v333_v39 = vmax.f32 %v317_v33, 0.0 }
  0xa3   :  { %v322_v24 = vmax.f32 %v306_v16, 0.0  ;;  %v326_v25 = vmax.f32 %v310_v17, 0.0 }
  0xa5   :  { %v469_v28 = vpack.c.bf16 %v322_v24, %v321_v22  ;;  %v479_v29 = vpack.c.bf16 %v326_v25, %v325_v23  ;;  %v187_v30 = vpop.f32.mrf.mxu2  ;;  %v197_v31 = vpop.f32.mrf.mxu3 }
  0xa6   :  { %v266_v34 = vadd.f32 %v588_v12, %v187_v30  ;;  %v270_v35 = vadd.f32 %v588_v12, %v197_v31 }
  0xa7   :  { %508 = vst [vmem:[%s658_s4 + $0x8] sm:$0xff] %v469_v28  }
  0xa8   :  { %510 = vst [vmem:[%s658_s4 + $0x18] sm:$0xff] %v479_v29   ;;  %v314_v36 = vadd.f32 %v452_v26, %v266_v34  ;;  %v318_v37 = vadd.f32 %v460_v27, %v270_v35 }
  0xaa   :  { %v330_v40 = vmax.f32 %v314_v36, 0.0  ;;  %v334_v41 = vmax.f32 %v318_v37, 0.0 }
  0xac   :  { %v489_v42 = vpack.c.bf16 %v330_v40, %v329_v38  ;;  %v499_v43 = vpack.c.bf16 %v334_v41, %v333_v39 }
  0xae   :  { %512 = vst [vmem:[%s658_s4 + $0x28] sm:$0xff] %v489_v42  }
  0xaf   :  { %514 = vst [vmem:[%s658_s4 + $0x38] sm:$0xff] %v499_v43  }

// kernel: _lambda_.8
= control target key start
LH: loop header
LB: loop body
LE: loop exit
PB: predicated region body
PF: predicated region fallthrough
CT: control target
= control target key end

     0   :  { %s2046_s12 = smov 0   ;;  %s2048_s13 = smov 0   ;;  %s2535_s0 = inlined_call_operand.vmem [shape: bf16[2,10,10,32], index: 0, kind: input, shape index: {}]   ;;  %s2536_s1 = inlined_call_operand.vmem [shape: bf16[3,3,32,32], index: 1, kind: input, shape index: {}]   ;;  %s2537_s2 = inlined_call_operand.vmem [shape: f32[1,32], index: 2, kind: input, shape index: {}]   ;;  %s2538_s3 = inlined_call_operand.vmem [shape: bf16[2,8,8,32], index: 3, kind: output, shape index: {}]  }
   0x1   :  { %s2050_s14 = smov 0  }
   0x2 LB: > { %s25_s15 = sadd.s32 1, %s2020_s13  ;;  %p1657_p0 = scmp.ge.s32.totalorder %s2024_s14, 1  ;;  %s2024_s14 = sphi %s2050_s14, %s13_s14   ;;  %s2020_s13 = sphi %s2048_s13, %s2544_s13   ;;  %s2016_s12 = sphi %s2046_s12, %s2543_s12  }
   0x3   : > { %p27_p1 = scmp.ge.s32.totalorder %s25_s15, 2  ;;  %p168_p2 = scmp.lt.s32.totalorder %s2024_s14, 3 }
   0x5   : > { %s2546_s15 = smov (%p27_p1, %s25_s15), 0  ;;  %p169_p3 = pnand %p1657_p0, %p168_p2 }
   0x6   : > { %p202_p4 = scmp.lt.s32.totalorder (!%p169_p3), %s2016_s12, 1 }
   0x7   : > { %172 = sbr.rel (%p169_p3) target bundleno = 320 (0x140), region = 32 }
   0xc   : > { %v1947_v0 = vld [vmem:[%s2536_s1 + $0x18] sm:$0xff]  ;;  %v1946_v1 = vld [vmem:[%s2536_s1 + $0x10] sm:$0xff]  ;;  %s2548_s12 = smov (!%p202_p4, %s2016_s12), 1  ;;  %v1949_v2 = vld [vmem:[%s2536_s1 + $0x28] sm:$0xff]  ;;  %vm243_vm0 = vsmask.f32 3328 }
   0xd   : > { %1970 = vmatpush.bf16.msra.mxu1 %v1947_v0  ;;  %1971 = vmatpush.bf16.msra.mxu2 %v1947_v0  ;;  %s1976_s20 = smul.u32 80, %s2548_s12  ;;  %v1955_v3 = vld [vmem:[%s2536_s1 + $0x38] sm:$0xff]  ;;  %v1945_v4 = vld [vmem:[%s2536_s1 + $0x8] sm:$0xff]  ;;  %vm244_vm1 = vsmask.f32 7440  ;;  %v1948_v6 = vld [vmem:[%s2536_s1 + $0x20] sm:$0xff] }
   0xe   : > { %1972 = vmatpush.bf16.msra.mxu3 %v1947_v0  ;;  %406 = vmatpush.bf16.msra.mxu0 %v1947_v0  ;;  %v1957_v5 = vld [vmem:[%s2536_s1 + $0x48] sm:$0xff]  ;;  %v1954_v7 = vld [vmem:[%s2536_s1 + $0x30] sm:$0xff]  ;;  %v1944_v11 = vld [vmem:[%s2536_s1] sm:$0xff]  ;;  %vm387_vm2 = vcmask 261120   ;;  %vm526_vm4 = vcmask 1042432   ;;  %vm527_vm5 = vcmask 1046532  }
   0xf   : > { %s2088_s4 = scalar_lea.vmem %s2535_s0, %s1976_s20  ;;  %v1956_v12 = vld [vmem:[%s2536_s1 + $0x40] sm:$0xff]  ;;  %vm2124_vm3 = vmor %vm243_vm0, %vm244_vm1  ;;  %s1939_s8 = sshll.u32 %s2548_s12, 5  ;;  %vm1537_vm7 = vcmask 257024  }
  0x10   : > { %v225_v8 = vld [vmem:[%s2088_s4 + $0x10] sm:$0xf]  ;;  %v226_v9 = vld [vmem:[%s2088_s4 + $0x18] sm:$0xf]  ;;  %v2099_v10 = vld [vmem:[%s2088_s4 + $0x14] sm:$0x1]  ;;  %s2480_s11 = scalar_lea.vmem %s2538_s3, %s1939_s8 }
  0x11   : > { %1973 = vmatpush.bf16.msra.mxu1 %v1946_v1  ;;  %1974 = vmatpush.bf16.msra.mxu2 %v1946_v1  ;;  %v2108_v13 = vld [vmem:[%s2088_s4 + $0x1c] sm:$0x1]  ;;  %v275_v14 = vshrl.u32 %v225_v8, 16  ;;  %v278_v15 = vshll.u32 %v225_v8, 16  ;;  %v284_v16 = vshll.u32 %v2099_v10, 16  ;;  %v289_v17 = vshrl.u32 %v226_v9, 16  ;;  %vm2164_vm6 = vmor %vm526_vm4, %vm527_vm5 }
  0x12   : > { %1975 = vmatpush.bf16.msra.mxu3 %v1946_v1  ;;  %407 = vmatpush.bf16.msra.mxu0 %v1946_v1  ;;  %v292_v18 = vshll.u32 %v226_v9, 16  ;;  %v298_v19 = vshll.u32 %v2108_v13, 16  ;;  %v227_v20 = vld [vmem:[%s2088_s4 + $0x20] sm:$0xf]  ;;  %v228_v21 = vld [vmem:[%s2088_s4 + $0x28] sm:$0xf] }
  0x13   : > { %v277_v22 = vrot.slane %v275_v14, 4  ;;  %v280_v23 = vrot.slane %v278_v15, 5  ;;  %v286_v24 = vrot.slane %v284_v16, 5  ;;  %v291_v25 = vrot.slane %v289_v17, 4  ;;  %v2115_v26 = vld [vmem:[%s2088_s4 + $0x24] sm:$0x1] }
  0x14   : > { %v294_v27 = vrot.slane %v292_v18, 5  ;;  %v300_v28 = vrot.slane %v298_v19, 5  ;;  %v2118_v29 = vld [vmem:[%s2088_s4 + $0x2c] sm:$0x1]  ;;  %v303_v30 = vshrl.u32 %v227_v20, 16  ;;  %v306_v31 = vshll.u32 %v227_v20, 16 }
  0x15   : > { %608 = vmatpush.bf16.msrb.mxu2 %v1949_v2  ;;  %479 = vmatpush.bf16.msrb.mxu1 %v1945_v4  ;;  %v281_v32 = vor.u32 %v280_v23, %v277_v22  ;;  %v312_v33 = vshll.u32 %v2115_v26, 16  ;;  %v317_v34 = vshrl.u32 %v228_v21, 16  ;;  %v320_v35 = vshll.u32 %v228_v21, 16  ;;  %v229_v36 = vld [vmem:[%s2088_s4 + $0x30] sm:$0xf]  ;;  %v1965_v22 = vld [vmem:[%s2536_s1 + $0x68] sm:$0xff] }
  0x16   : > { %703 = vmatpush.bf16.msrb.mxu3 %v1955_v3  ;;  %909 = vmatpush.bf16.msrb.mxu0 %v1957_v5  ;;  %v295_v38 = vor.u32 %v294_v27, %v291_v25  ;;  %v305_v39 = vrot.slane %v303_v30, 4  ;;  %v308_v40 = vrot.slane %v306_v31, 5  ;;  %v326_v41 = vshll.u32 %v2118_v29, 16  ;;  %v2130_v46 = vld [vmem:[%s2088_s4 + $0x34] sm:$0x1] }
  0x17   : > { %v282_v42 = vrot.slane %v281_v32, 4  ;;  %v314_v43 = vrot.slane %v312_v33, 5  ;;  %v319_v44 = vrot.slane %v317_v34, 4  ;;  %v322_v45 = vrot.slane %v320_v35, 5  ;;  %v230_v53 = vld [vmem:[%s2088_s4 + $0x38] sm:$0xf] }
  0x18   : > { %v296_v47 = vrot.slane %v295_v38, 4  ;;  %v309_v48 = vor.u32 %v308_v40, %v305_v39  ;;  %v328_v49 = vrot.slane %v326_v41, 5  ;;  %v331_v50 = vshrl.u32 %v229_v36, 16  ;;  %v2136_v54 = vld [vmem:[%s2088_s4 + $0x3c] sm:$0x1] }
  0x19   : > { %609 = vmatpush.bf16.msrb.mxu2 %v1948_v6  ;;  %480 = vmatpush.bf16.msrb.mxu1 %v1944_v11  ;;  %v287_v51 = vsel %vm2124_vm3, %v282_v42, %v286_v24  ;;  %v323_v52 = vor.u32 %v322_v45, %v319_v44  ;;  %v334_v55 = vshll.u32 %v229_v36, 16  ;;  %v340_v56 = vshll.u32 %v2130_v46, 16  ;;  %v223_v1 = vld [vmem:[%s2088_s4] sm:$0xf]  ;;  %v235_v6 = vld [vmem:[%s2088_s4 + $0x4] sm:$0x1] }
  0x1a   : > { %704 = vmatpush.bf16.msrb.mxu3 %v1954_v7  ;;  %910 = vmatpush.bf16.msrb.mxu0 %v1956_v12  ;;  %v301_v57 = vsel %vm2124_vm3, %v296_v47, %v300_v28  ;;  %v365_v58 = vunpack.c.l.b16 %v287_v51  ;;  %v310_v59 = vrot.slane %v309_v48, 4  ;;  %v333_v60 = vrot.slane %v331_v50, 4  ;;  %v224_v12 = vld [vmem:[%s2088_s4 + $0x8] sm:$0xf]  ;;  %v236_v25 = vld [vmem:[%s2088_s4 + $0xc] sm:$0x1] }
  0x1b   : > { %v366_v61 = vunpack.c.l.b16 %v301_v57  ;;  %v324_v62 = vrot.slane %v323_v52, 4  ;;  %v336_v63 = vrot.slane %v334_v55, 5  ;;  %v342_v0 = vrot.slane %v340_v56, 5  ;;  %v502_v34 = vld [vmem:[%s2088_s4] sm:$0xe]  ;;  %v1959_v35 = vld [vmem:[%s2536_s1 + $0x58] sm:$0xff] }
  0x1c   : > { %v315_v2 = vsel %vm2124_vm3, %v310_v59, %v314_v43  ;;  %v345_v3 = vshrl.u32 %v230_v53, 16  ;;  %v348_v4 = vshll.u32 %v230_v53, 16  ;;  %v354_v5 = vshll.u32 %v2136_v54, 16  ;;  %v503_v41 = vld [vmem:[%s2088_s4 + $0x8] sm:$0xe] }
  0x1d   : > { %v372_v7 = vpack.c.b16 %v366_v61, %v365_v58  ;;  %v329_v8 = vsel %vm2124_vm3, %v324_v62, %v328_v49  ;;  %v367_v9 = vunpack.c.l.b16 %v315_v2  ;;  %v337_v11 = vor.u32 %v336_v63, %v333_v60  ;;  %v1769_v48 = vld [vmem:[%s2088_s4 + $0x8] sm:$0xf]  ;;  %v1771_v59 = vld [vmem:[%s2088_s4 + $0x10] sm:$0xf]  ;;  %v1967_v61 = vld [vmem:[%s2536_s1 + $0x78] sm:$0xff] }
  0x1e   : > { %v368_v14 = vunpack.c.l.b16 %v329_v8  ;;  %v347_v15 = vrot.slane %v345_v3, 4  ;;  %v350_v16 = vrot.slane %v348_v4, 5  ;;  %v356_v17 = vrot.slane %v354_v5, 5  ;;  %v2185_v2 = vld [vmem:[%s2088_s4 + $0x14] sm:$0x1] }
  0x1f   : > { %1674 = vmatmul.msk.bf16.vlgmr.msra.gmra.mxu1 %vm387_vm2, %v372_v7  ;;  %v338_v18 = vrot.slane %v337_v11, 4  ;;  %v247_v19 = vshrl.u32 %v223_v1, 16  ;;  %v250_v20 = vshll.u32 %v223_v1, 16  ;;  %v256_v21 = vshll.u32 %v235_v6, 16  ;;  %v2182_v1 = vld [vmem:[%s2088_s4 + $0xc] sm:$0x1] }
  0x20   : > { %v373_v23 = vpack.c.b16 %v368_v14, %v367_v9  ;;  %v351_v24 = vor.u32 %v350_v16, %v347_v15  ;;  %v261_v27 = vshrl.u32 %v224_v12, 16  ;;  %v264_v28 = vshll.u32 %v224_v12, 16  ;;  %1043 = vmatpush.bf16.msra.mxu1 %v1959_v35  ;;  %v1679_v5 = vld [vmem:[%s2088_s4] sm:$0xf] }
  0x21   : > { %v343_v30 = vsel %vm2124_vm3, %v338_v18, %v342_v0  ;;  %v249_v31 = vrot.slane %v247_v19, 4  ;;  %v252_v32 = vrot.slane %v250_v20, 5  ;;  %v258_v33 = vrot.slane %v256_v21, 5  ;;  %v1969_v18 = vld [vmem:[%s2536_s1 + $0x88] sm:$0xff] }
  0x22   : > { %1675 = vmatmul.msk.bf16.vlgmr.msra.gmra.mxu2 %vm387_vm2, %v373_v23  ;;  %v352_v36 = vrot.slane %v351_v24, 4  ;;  %v369_v38 = vunpack.c.l.b16 %v343_v30  ;;  %v263_v39 = vrot.slane %v261_v27, 4  ;;  %v266_v40 = vrot.slane %v264_v28, 5 }
  0x23   : > { %v253_v42 = vor.u32 %v252_v32, %v249_v31  ;;  %v270_v43 = vshll.u32 %v236_v25, 16  ;;  %v531_v44 = vrot.slane %v235_v6, 5  ;;  %v535_v45 = vrot.slane %v236_v25, 5  ;;  %1138 = vmatpush.bf16.msra.mxu2 %v1965_v22  ;;  %v1940_v6 = vld [vmem:[%s2088_s4 + $0x4] sm:$0xf0] }
  0x24   : > { %v357_v49 = vsel %vm2124_vm3, %v352_v36, %v356_v17  ;;  %v267_v50 = vor.u32 %v266_v40, %v263_v39  ;;  %v1705_v51 = vrot.slane %v502_v34, 9  ;;  %v1706_v56 = vrot.slane %v503_v41, 9  ;;  %v504_v31 = vld [vmem:[%s2088_s4 + $0x10] sm:$0xe]  ;;  %v1773_v32 = vld [vmem:[%s2088_s4 + $0x18] sm:$0xf] }
  0x25   : > { %v370_v52 = vunpack.c.l.b16 %v357_v49  ;;  %v254_v53 = vrot.slane %v253_v42, 4  ;;  %v272_v55 = vrot.slane %v270_v43, 5  ;;  %v751_v60 = vshrl.u32 %v1769_v48, 16  ;;  %v1775_v34 = vld [vmem:[%s2088_s4 + $0x20] sm:$0xf] }
  0x26   : > { %v268_v57 = vrot.slane %v267_v50, 4  ;;  %v532_v58 = vsel %vm2164_vm6, %v1705_v51, %v531_v44  ;;  %v536_v0 = vsel %vm2164_vm6, %v1706_v56, %v535_v45  ;;  %v754_v11 = vshll.u32 %v1769_v48, 16  ;;  %v505_v36 = vld [vmem:[%s2088_s4 + $0x18] sm:$0xe]  ;;  %v1743_v42 = vld [vmem:[%s2088_s4 + $0x8] sm:$0xf] }
  0x27   : > { %v374_v62 = vpack.c.b16 %v370_v52, %v369_v38  ;;  %v259_v63 = vsel %vm2124_vm3, %v254_v53, %v258_v33  ;;  %v566_v7 = vunpack.c.l.b16 %v532_v58  ;;  %v753_v9 = vrot.slane %v751_v60, 4  ;;  %v1950_v43 = vld [vmem:[%s2088_s4 + $0xc] sm:$0xf0]  ;;  %v2215_v56 = vld [vmem:[%s2088_s4 + $0x1c] sm:$0x1] }
  0x28   : > { %v273_v3 = vsel %vm2124_vm3, %v268_v57, %v272_v55  ;;  %v363_v4 = vunpack.c.l.b16 %v259_v63  ;;  %v765_v12 = vshrl.u32 %v1771_v59, 16  ;;  %v567_v14 = vunpack.c.l.b16 %v536_v0  ;;  %v1683_v63 = vld [vmem:[%s2088_s4 + $0x10] sm:$0xf] }
  0x29   : > { %1676 = vmatmul.msk.bf16.vlgmr.msra.gmra.mxu3 %vm387_vm2, %v374_v62  ;;  %v364_v8 = vunpack.c.l.b16 %v273_v3  ;;  %v760_v15 = vshll.u32 %v2182_v1, 16  ;;  %v768_v16 = vshll.u32 %v1771_v59, 16  ;;  %v774_v17 = vshll.u32 %v2185_v2, 16  ;;  %v2220_v62 = vld [vmem:[%s2088_s4 + $0x24] sm:$0x1] }
  0x2a   : > { %1344 = vmatpush.bf16.msra.mxu3 %v1967_v61  ;;  %v1680_v20 = vor.u32 %v1940_v6, %v1679_v5  ;;  %v756_v21 = vrot.slane %v754_v11, 5  ;;  %v767_v22 = vrot.slane %v765_v12, 4  ;;  %v574_v25 = vpack.c.b16 %v567_v14, %v566_v7  ;;  %v1964_v5 = vld [vmem:[%s2536_s1 + $0x60] sm:$0xff]  ;;  %v1777_v12 = vld [vmem:[%s2088_s4 + $0x28] sm:$0xf] }
  0x2b   : > { %v371_v19 = vpack.c.b16 %v364_v8, %v363_v4  ;;  %v770_v23 = vrot.slane %v768_v16, 5  ;;  %v762_v27 = vrot.slane %v760_v15, 5  ;;  %v776_v30 = vrot.slane %v774_v17, 5  ;;  %1139 = vmatpush.bf16.msra.mxu2 %v1964_v5  ;;  %v1966_v15 = vld [vmem:[%s2536_s1 + $0x70] sm:$0xff]  ;;  %v1968_v17 = vld [vmem:[%s2536_s1 + $0x80] sm:$0xff] }
  0x2c   : > { %v757_v24 = vor.u32 %v756_v21, %v753_v9  ;;  %v1707_v38 = vrot.slane %v504_v31, 9  ;;  %v539_v39 = vrot.slane %v2099_v10, 5  ;;  %v779_v40 = vshrl.u32 %v1773_v32, 16  ;;  %v1958_v16 = vld [vmem:[%s2536_s1 + $0x50] sm:$0xff] }
  0x2d   : > { %1673 = vmatmul.msk.bf16.vlgmr.msra.gmra.mxu0 %vm387_vm2, %v371_v19  ;;  %v771_v28 = vor.u32 %v770_v23, %v767_v22  ;;  %v782_v41 = vshll.u32 %v1773_v32, 16  ;;  %v793_v48 = vshrl.u32 %v1775_v34, 16  ;;  %v796_v49 = vshll.u32 %v1775_v34, 16  ;;  %v1779_v22 = vld [vmem:[%s2088_s4 + $0x30] sm:$0xf]  ;;  %1044 = vmatpush.bf16.msra.mxu1 %v1958_v16 }
  0x2e   : > { %1478 = vmatpush.bf16.msra.mxu0 %v1969_v18  ;;  %v758_v33 = vrot.slane %v757_v24, 4  ;;  %v1708_v50 = vrot.slane %v505_v36, 9  ;;  %v543_v10 = vrot.slane %v2108_v13, 5  ;;  %v1744_v51 = vor.u32 %v1950_v43, %v1743_v42  ;;  %v1941_v13 = vld [vmem:[%s2088_s4 + $0x14] sm:$0xf0]  ;;  %1345 = vmatpush.bf16.msra.mxu3 %v1966_v15 }
  0x2f   : > { %1701 = vmatmul.msk.bf16.vlgmr.msrb.gmra.mxu1 %vm387_vm2, %v1680_v20  ;;  %v772_v35 = vrot.slane %v771_v28, 4  ;;  %v540_v55 = vsel %vm2164_vm6, %v1707_v38, %v539_v39  ;;  %v781_v57 = vrot.slane %v779_v40, 4  ;;  %v784_v58 = vrot.slane %v782_v41, 5  ;;  %v506_v23 = vld [vmem:[%s2088_s4 + $0x20] sm:$0xe] }
  0x30   : > { %v763_v44 = vsel %vm2124_vm3, %v758_v33, %v762_v27  ;;  %v795_v59 = vrot.slane %v793_v48, 4  ;;  %v798_v60 = vrot.slane %v796_v49, 5  ;;  %v544_v61 = vsel %vm2164_vm6, %v1708_v50, %v543_v10  ;;  %v507_v24 = vld [vmem:[%s2088_s4 + $0x28] sm:$0xe]  ;;  %v1747_v28 = vld [vmem:[%s2088_s4 + $0x18] sm:$0xf] }
  0x31   : > { %v777_v45 = vsel %vm2124_vm3, %v772_v35, %v776_v30  ;;  %v867_v52 = vunpack.c.l.b16 %v763_v44  ;;  %v568_v3 = vunpack.c.l.b16 %v540_v55  ;;  %v788_v4 = vshll.u32 %v2215_v56, 16  ;;  %v1951_v30 = vld [vmem:[%s2088_s4 + $0x1c] sm:$0xf0] }
  0x32   : > { %1725 = vmatmul.msk.bf16.vlgmr.msrb.gmra.mxu2 %vm387_vm2, %v574_v25  ;;  %v868_v53 = vunpack.c.l.b16 %v777_v45  ;;  %v569_v6 = vunpack.c.l.b16 %v544_v61  ;;  %v785_v7 = vor.u32 %v784_v58, %v781_v57  ;;  %v799_v8 = vor.u32 %v798_v60, %v795_v59  ;;  %1479 = vmatpush.bf16.msra.mxu0 %v1968_v17  ;;  %v2255_v45 = vld [vmem:[%s2088_s4 + $0x2c] sm:$0x1] }
  0x33   : > { %v802_v9 = vshll.u32 %v2220_v62, 16  ;;  %v1684_v11 = vor.u32 %v1941_v13, %v1683_v63  ;;  %v790_v14 = vrot.slane %v788_v4, 5  ;;  %v807_v25 = vshrl.u32 %v1777_v12, 16 }
  0x34   : > { %v875_v0 = vpack.c.b16 %v868_v53, %v867_v52  ;;  %v575_v18 = vpack.c.b16 %v569_v6, %v568_v3  ;;  %v786_v19 = vrot.slane %v785_v7, 4  ;;  %v800_v20 = vrot.slane %v799_v8, 4  ;;  %v509_v6 = vld [vmem:[%s2088_s4 + $0x38] sm:$0xe]  ;;  %v1783_v8 = vld [vmem:[%s2088_s4 + $0x40] sm:$0xf] }
  0x35   : > { %v804_v21 = vrot.slane %v802_v9, 5  ;;  %v810_v27 = vshll.u32 %v1777_v12, 16  ;;  %v821_v33 = vshrl.u32 %v1779_v22, 16  ;;  %v824_v34 = vshll.u32 %v1779_v22, 16  ;;  %v1781_v7 = vld [vmem:[%s2088_s4 + $0x38] sm:$0xf] }
  0x36   : > { %v791_v31 = vsel %vm2124_vm3, %v786_v19, %v790_v14  ;;  %v1709_v35 = vrot.slane %v506_v23, 9  ;;  %v547_v36 = vrot.slane %v2115_v26, 5  ;;  %v1710_v38 = vrot.slane %v507_v24, 9  ;;  %v2262_v26 = vld [vmem:[%s2088_s4 + $0x34] sm:$0x1] }
  0x37   : > { %v805_v32 = vsel %vm2124_vm3, %v800_v20, %v804_v21  ;;  %v551_v39 = vrot.slane %v2118_v29, 5  ;;  %v809_v40 = vrot.slane %v807_v25, 4  ;;  %v812_v41 = vrot.slane %v810_v27, 5  ;;  %v1942_v29 = vld [vmem:[%s2088_s4 + $0x24] sm:$0xf0] }
  0x38   : > { %v1748_v42 = vor.u32 %v1951_v30, %v1747_v28  ;;  %v869_v43 = vunpack.c.l.b16 %v791_v31  ;;  %v870_v44 = vunpack.c.l.b16 %v805_v32  ;;  %v823_v48 = vrot.slane %v821_v33, 4  ;;  %v1751_v9 = vld [vmem:[%s2088_s4 + $0x28] sm:$0xf]  ;;  %v1952_v14 = vld [vmem:[%s2088_s4 + $0x2c] sm:$0xf0] }
  0x39   : > { %1765 = vmatmul.msk.bf16.vlgmr.msrb.gmra.mxu3 %vm387_vm2, %v1744_v51  ;;  %v826_v49 = vrot.slane %v824_v34, 5  ;;  %v548_v50 = vsel %vm2164_vm6, %v1709_v35, %v547_v36  ;;  %v552_v10 = vsel %vm2164_vm6, %v1710_v38, %v551_v39  ;;  %v1687_v51 = vld [vmem:[%s2088_s4 + $0x20] sm:$0xf]  ;;  %v813_v52 = vor.u32 %v812_v41, %v809_v40  ;;  %v2289_v27 = vld [vmem:[%s2088_s4 + $0x3c] sm:$0x1] }
  0x3a   : > { %v816_v53 = vshll.u32 %v2255_v45, 16  ;;  %v876_v55 = vpack.c.b16 %v870_v44, %v869_v43  ;;  %v570_v57 = vunpack.c.l.b16 %v548_v50  ;;  %v571_v58 = vunpack.c.l.b16 %v552_v10  ;;  %v2292_v28 = vld [vmem:[%s2088_s4 + $0x44] sm:$0x1]  ;;  %v1691_v34 = vld [vmem:[%s2088_s4 + $0x30] sm:$0xf] }
  0x3b   : > { %v827_v59 = vor.u32 %v826_v49, %v823_v48  ;;  %v830_v60 = vshll.u32 %v2262_v26, 16  ;;  %v1688_v61 = vor.u32 %v1942_v29, %v1687_v51  ;;  %v814_v63 = vrot.slane %v813_v52, 4  ;;  %v1943_v35 = vld [vmem:[%s2088_s4 + $0x34] sm:$0xf0] }
  0x3c   : > { %v818_v13 = vrot.slane %v816_v53, 5  ;;  %v576_v3 = vpack.c.b16 %v571_v58, %v570_v57  ;;  %v555_v12 = vrot.slane %v2130_v46, 5  ;;  %v1712_v16 = vrot.slane %v509_v6, 9  ;;  %v1875_v49 = vld [vmem:[%s2088_s4 + $0x18] sm:$0xf] }
  0x3d   : > { %1797 = vmatmul.msk.bf16.vlgmr.msrb.gmra.mxu0 %vm387_vm2, %v875_v0  ;;  %v508_v0 = vld [vmem:[%s2088_s4 + $0x30] sm:$0xe]  ;;  %v828_v4 = vrot.slane %v827_v59, 4  ;;  %v832_v5 = vrot.slane %v830_v60, 5  ;;  %v559_v17 = vrot.slane %v2136_v54, 5  ;;  %v838_v20 = vshll.u32 %v1781_v7, 16 }
  0x3e   : > { %v1711_v15 = vrot.slane %v508_v0, 9  ;;  %v849_v21 = vshrl.u32 %v1783_v8, 16  ;;  %v852_v22 = vshll.u32 %v1783_v8, 16  ;;  %v1752_v23 = vor.u32 %v1952_v14, %v1751_v9  ;;  %v1801_v53 = vld [vmem:[%s2088_s4 + $0x8] sm:$0xe] }
  0x3f   : > { %1702 = vmatmul.msk.bf16.gmra.mxu1 %vm387_vm2, %v1684_v11  ;;  %v819_v11 = vsel %vm2124_vm3, %v814_v63, %v818_v13  ;;  %v833_v19 = vsel %vm2124_vm3, %v828_v4, %v832_v5  ;;  %v560_v54 = vsel %vm2164_vm6, %v1712_v16, %v559_v17  ;;  %v840_v31 = vrot.slane %v838_v20, 5  ;;  %v1874_v5 = vld [vmem:[%s2088_s4 + $0x14] sm:$0x1]  ;;  %v1755_v6 = vld [vmem:[%s2088_s4 + $0x38] sm:$0xf] }
  0x40   : > { %v871_v46 = vunpack.c.l.b16 %v819_v11  ;;  %v872_v24 = vunpack.c.l.b16 %v833_v19  ;;  %v556_v25 = vsel %vm2164_vm6, %v1711_v15, %v555_v12  ;;  %v851_v32 = vrot.slane %v849_v21, 4 }
  0x41   : > { %v854_v33 = vrot.slane %v852_v22, 5  ;;  %v572_v36 = vunpack.c.l.b16 %v556_v25  ;;  %v573_v39 = vunpack.c.l.b16 %v560_v54  ;;  %v844_v40 = vshll.u32 %v2289_v27, 16  ;;  %v1847_v54 = vld [vmem:[%s2088_s4 + $0x10] sm:$0xf] }
  0x42   : > { %1726 = vmatmul.msk.bf16.gmra.mxu2 %vm387_vm2, %v575_v18  ;;  %v835_v18 = vshrl.u32 %v1781_v7, 16  ;;  %v877_v38 = vpack.c.b16 %v872_v24, %v871_v46  ;;  %v858_v41 = vshll.u32 %v2292_v28, 16  ;;  %v1692_v48 = vor.u32 %v1943_v35, %v1691_v34  ;;  %v1953_v7 = vld [vmem:[%s2088_s4 + $0x3c] sm:$0xf0] }
  0x43   : > { %v855_v44 = vor.u32 %v854_v33, %v851_v32  ;;  %v577_v51 = vpack.c.b16 %v573_v39, %v572_v36  ;;  %v846_v29 = vrot.slane %v844_v40, 5  ;;  %v1200_v59 = vshrl.u32 %v1875_v49, 16  ;;  %v1960_v32 = vld [vmem:[%s2088_s4 + $0x14] sm:$0xf0]  ;;  %v1877_v35 = vld [vmem:[%s2088_s4 + $0x20] sm:$0xf] }
  0x44   : > { %v837_v30 = vrot.slane %v835_v18, 4  ;;  %v860_v52 = vrot.slane %v858_v41, 5  ;;  %v1203_v60 = vshll.u32 %v1875_v49, 16  ;;  %v970_v63 = vrot.slane %v2185_v2, 5  ;;  %v1876_v2 = vld [vmem:[%s2088_s4 + $0x1c] sm:$0x1] }
  0x45   : > { %v856_v58 = vrot.slane %v855_v44, 4  ;;  %v1809_v13 = vrot.slane %v1801_v53, 9  ;;  %v1195_v16 = vshll.u32 %v1874_v5, 16  ;;  %v1756_v17 = vor.u32 %v1953_v7, %v1755_v6  ;;  %v1803_v44 = vld [vmem:[%s2088_s4 + $0x18] sm:$0xe] }
  0x46   : > { %v841_v43 = vor.u32 %v840_v31, %v837_v30  ;;  %v1205_v11 = vrot.slane %v1203_v60, 5  ;;  %v1209_v21 = vshll.u32 %v1876_v2, 16  ;;  %v1905_v30 = vld [vmem:[%s2088_s4 + $0x10] sm:$0xe]  ;;  %v1906_v31 = vld [vmem:[%s2088_s4 + $0x18] sm:$0xe] }
  0x47   : > { %v861_v9 = vsel %vm2124_vm3, %v856_v58, %v860_v52  ;;  %v1197_v24 = vrot.slane %v1195_v16, 5  ;;  %v1913_v40 = vrot.slane %v1905_v30, 9  ;;  %v1401_v41 = vrot.slane %v1874_v5, 5  ;;  %v1880_v6 = vld [vmem:[%s2088_s4 + $0x2c] sm:$0x1] }
  0x48   : > { %v842_v57 = vrot.slane %v841_v43, 4  ;;  %v874_v19 = vunpack.c.l.b16 %v861_v9  ;;  %v1211_v34 = vrot.slane %v1209_v21, 5  ;;  %v1848_v43 = vor.u32 %v1960_v32, %v1847_v54  ;;  %v1851_v16 = vld [vmem:[%s2088_s4 + $0x20] sm:$0xf]  ;;  %v1881_v21 = vld [vmem:[%s2088_s4 + $0x30] sm:$0xf] }
  0x49   : > { %1766 = vmatmul.msk.bf16.gmra.mxu3 %vm387_vm2, %v1748_v42  ;;  %v1873_v42 = vld [vmem:[%s2088_s4 + $0x10] sm:$0xf]  ;;  %v1214_v49 = vshrl.u32 %v1877_v35, 16  ;;  %v1883_v54 = vld [vmem:[%s2088_s4 + $0x38] sm:$0xf]  ;;  %v1245_v32 = vshll.u32 %v1881_v21, 16 }
  0x4a   : > { %v1186_v50 = vshrl.u32 %v1873_v42, 16  ;;  %v1189_v10 = vshll.u32 %v1873_v42, 16  ;;  %v847_v8 = vsel %vm2124_vm3, %v842_v57, %v846_v29  ;;  %v1914_v42 = vrot.slane %v1906_v31, 9 }
  0x4b   : > { %v873_v18 = vunpack.c.l.b16 %v847_v8  ;;  %v974_v57 = vrot.slane %v2215_v56, 5  ;;  %v1242_v31 = vshrl.u32 %v1881_v21, 16 }
  0x4c   : > { %v1191_v4 = vrot.slane %v1189_v10, 5 }
  0x4d   : > { %1798 = vmatmul.msk.bf16.gmra.mxu0 %vm387_vm2, %v876_v55  ;;  %v1802_v55 = vld [vmem:[%s2088_s4 + $0x10] sm:$0xe]  ;;  %v878_v25 = vpack.c.b16 %v874_v19, %v873_v18 }
  0x4e   : > { %v1810_v0 = vrot.slane %v1802_v55, 9  ;;  %v1811_v55 = vrot.slane %v1803_v44, 9  ;;  %v982_v44 = vrot.slane %v2255_v45, 5  ;;  %v1884_v45 = vld [vmem:[%s2088_s4 + $0x3c] sm:$0x1] }
  0x4f   : > { %1703 = vmatmul.msk.bf16.gmra.mxu1 %vm387_vm2, %v1688_v61  ;;  %v966_v61 = vrot.slane %v2182_v1, 5  ;;  %v1202_v1 = vrot.slane %v1200_v59, 4  ;;  %v978_v59 = vrot.slane %v2220_v62, 5 }
  0x50   : > { %v971_v14 = vsel %vm2164_vm6, %v1810_v0, %v970_v63  ;;  %v1216_v63 = vrot.slane %v1214_v49, 4  ;;  %v975_v62 = vsel %vm2164_vm6, %v1811_v55, %v974_v57 }
  0x51   : > { %v967_v12 = vsel %vm2164_vm6, %v1809_v13, %v966_v61  ;;  %v1206_v20 = vor.u32 %v1205_v11, %v1202_v1  ;;  %v1402_v61 = vsel %vm2164_vm6, %v1913_v40, %v1401_v41  ;;  %v1413_v41 = vrot.slane %v1880_v6, 5 }
  0x52   : > { %1727 = vmatmul.msk.bf16.gmra.mxu2 %vm387_vm2, %v576_v3  ;;  %v1188_v3 = vrot.slane %v1186_v50, 4  ;;  %v1001_v22 = vunpack.c.l.b16 %v967_v12  ;;  %v1217_v50 = vshll.u32 %v1877_v35, 16  ;;  %v1436_v56 = vunpack.c.l.b16 %v1402_v61 }
  0x53   : > { %v1207_v33 = vrot.slane %v1206_v20, 4  ;;  %v1237_v12 = vshll.u32 %v1880_v6, 16  ;;  %v1907_v20 = vld [vmem:[%s2088_s4 + $0x20] sm:$0xe] }
  0x54   : > { %v1192_v15 = vor.u32 %v1191_v4, %v1188_v3  ;;  %v1219_v13 = vrot.slane %v1217_v50, 5  ;;  %v1878_v3 = vld [vmem:[%s2088_s4 + $0x24] sm:$0x1]  ;;  %v1915_v30 = vrot.slane %v1907_v20, 9 }
  0x55   : > { %v1212_v10 = vsel %vm2124_vm3, %v1207_v33, %v1211_v34  ;;  %v1223_v11 = vshll.u32 %v1878_v3, 16  ;;  %v1409_v35 = vrot.slane %v1878_v3, 5 }
  0x56   : > { %v1193_v46 = vrot.slane %v1192_v15, 4  ;;  %v1303_v60 = vunpack.c.l.b16 %v1212_v10  ;;  %v1220_v1 = vor.u32 %v1219_v13, %v1216_v63  ;;  %v1244_v10 = vrot.slane %v1242_v31, 4 }
  0x57   : > { %v1225_v19 = vrot.slane %v1223_v11, 5  ;;  %v1410_v55 = vsel %vm2164_vm6, %v1915_v30, %v1409_v35  ;;  %v1910_v11 = vld [vmem:[%s2088_s4 + $0x38] sm:$0xe]  ;;  %v1421_v30 = vrot.slane %v1884_v45, 5  ;;  %v990_v35 = vrot.slane %v2289_v27, 5 }
  0x58   : > { %v1198_v39 = vsel %vm2124_vm3, %v1193_v46, %v1197_v24  ;;  %v1221_v18 = vrot.slane %v1220_v1, 4  ;;  %v1239_v46 = vrot.slane %v1237_v12, 5  ;;  %v1908_v24 = vld [vmem:[%s2088_s4 + $0x28] sm:$0xe]  ;;  %v1909_v1 = vld [vmem:[%s2088_s4 + $0x30] sm:$0xe] }
  0x59   : > { %1767 = vmatmul.msk.bf16.gmra.mxu3 %vm387_vm2, %v1752_v23  ;;  %v1002_v23 = vunpack.c.l.b16 %v971_v14  ;;  %v1302_v53 = vunpack.c.l.b16 %v1198_v39  ;;  %v1003_v14 = vunpack.c.l.b16 %v975_v62  ;;  %v1806_v39 = vld [vmem:[%s2088_s4 + $0x30] sm:$0xe]  ;;  %v1918_v21 = vrot.slane %v1910_v11, 9 }
  0x5a   : > { %v1226_v34 = vsel %vm2124_vm3, %v1221_v18, %v1225_v19  ;;  %v1814_v50 = vrot.slane %v1806_v39, 9  ;;  %v1917_v19 = vrot.slane %v1909_v1, 9 }
  0x5b   : > { %v1009_v36 = vpack.c.b16 %v1002_v23, %v1001_v22  ;;  %v1310_v8 = vpack.c.b16 %v1303_v60, %v1302_v53  ;;  %v1961_v22 = vld [vmem:[%s2088_s4 + $0x24] sm:$0xf0]  ;;  %v1882_v53 = vld [vmem:[%s2088_s4 + $0x34] sm:$0x1] }
  0x5c   : > { %v1852_v33 = vor.u32 %v1961_v22, %v1851_v16  ;;  %v1251_v63 = vshll.u32 %v1882_v53, 16  ;;  %v1417_v20 = vrot.slane %v1882_v53, 5 }
  0x5d   : > { %1799 = vmatmul.msk.bf16.gmra.mxu0 %vm387_vm2, %v877_v38  ;;  %v1879_v38 = vld [vmem:[%s2088_s4 + $0x28] sm:$0xf] }
  0x5e   : > { %v1228_v29 = vshrl.u32 %v1879_v38, 16  ;;  %v1231_v52 = vshll.u32 %v1879_v38, 16  ;;  %v1805_v38 = vld [vmem:[%s2088_s4 + $0x28] sm:$0xe] }
  0x5f   : > { %1704 = vmatmul.msk.bf16.gmra.mxu1 %vm387_vm2, %v1692_v48  ;;  %v1804_v48 = vld [vmem:[%s2088_s4 + $0x20] sm:$0xe]  ;;  %v1813_v49 = vrot.slane %v1805_v38, 9  ;;  %v994_v38 = vrot.slane %v2292_v28, 5 }
  0x60   : > { %v1812_v58 = vrot.slane %v1804_v48, 9  ;;  %v1230_v4 = vrot.slane %v1228_v29, 4  ;;  %v1233_v5 = vrot.slane %v1231_v52, 5  ;;  %v986_v48 = vrot.slane %v2262_v26, 5 }
  0x61   : > { %v1304_v29 = vunpack.c.l.b16 %v1226_v34  ;;  %v983_v26 = vsel %vm2164_vm6, %v1813_v49, %v982_v44  ;;  %v1886_v44 = vld [vmem:[%s2088_s4 + $0x44] sm:$0x1] }
  0x62   : > { %1728 = vmatmul.msk.bf16.gmra.mxu2 %vm387_vm2, %v577_v51  ;;  %v1405_v51 = vrot.slane %v1876_v2, 5  ;;  %v979_v7 = vsel %vm2164_vm6, %v1812_v58, %v978_v59  ;;  %v1234_v2 = vor.u32 %v1233_v5, %v1230_v4  ;;  %v987_v60 = vsel %vm2164_vm6, %v1814_v50, %v986_v48  ;;  %v1888_v50 = vld [vmem:[%s2088_s4 + $0x4c] sm:$0x1] }
  0x63   : > { %v1004_v15 = vunpack.c.l.b16 %v979_v7  ;;  %v1265_v5 = vshll.u32 %v1884_v45, 16  ;;  %v1005_v6 = vunpack.c.l.b16 %v983_v26  ;;  %v1253_v7 = vrot.slane %v1251_v63, 5 }
  0x64   : > { %v1406_v0 = vsel %vm2164_vm6, %v1914_v42, %v1405_v51  ;;  %v1235_v23 = vrot.slane %v1234_v2, 4  ;;  %v1256_v42 = vshrl.u32 %v1883_v54, 16  ;;  %v1247_v51 = vrot.slane %v1245_v32, 5  ;;  %v1962_v2 = vld [vmem:[%s2088_s4 + $0x34] sm:$0xf0] }
  0x65   : > { %v1437_v9 = vunpack.c.l.b16 %v1406_v0  ;;  %v1438_v0 = vunpack.c.l.b16 %v1410_v55  ;;  %v1279_v53 = vshll.u32 %v1886_v44, 16  ;;  %v1429_v11 = vrot.slane %v1888_v50, 5 }
  0x66   : > { %v1240_v40 = vsel %vm2124_vm3, %v1235_v23, %v1239_v46  ;;  %v1258_v58 = vrot.slane %v1256_v42, 4  ;;  %v1248_v61 = vor.u32 %v1247_v51, %v1244_v10  ;;  %v1807_v23 = vld [vmem:[%s2088_s4 + $0x38] sm:$0xe]  ;;  %v1808_v46 = vld [vmem:[%s2088_s4 + $0x40] sm:$0xe] }
  0x67   : > { %v1305_v52 = vunpack.c.l.b16 %v1240_v40  ;;  %v1815_v34 = vrot.slane %v1807_v23, 9  ;;  %v1418_v40 = vsel %vm2164_vm6, %v1917_v19, %v1417_v20 }
  0x68   : > { %v1249_v62 = vrot.slane %v1248_v61, 4  ;;  %v1440_v10 = vunpack.c.l.b16 %v1418_v40 }
  0x69   : > { %1768 = vmatmul.msk.bf16.gmra.mxu3 %vm387_vm2, %v1756_v17  ;;  %v1444_v17 = vpack.c.b16 %v1437_v9, %v1436_v56  ;;  %v1311_v13 = vpack.c.b16 %v1305_v52, %v1304_v29  ;;  %v1006_v56 = vunpack.c.l.b16 %v987_v60  ;;  %v1855_v9 = vld [vmem:[%s2088_s4 + $0x30] sm:$0xf]  ;;  %v991_v27 = vsel %vm2164_vm6, %v1815_v34, %v990_v35 }
  0x6a   : > { %v1254_v18 = vsel %vm2124_vm3, %v1249_v62, %v1253_v7  ;;  %v1856_v22 = vor.u32 %v1962_v2, %v1855_v9  ;;  %v1281_v60 = vrot.slane %v1279_v53, 5  ;;  %v1425_v7 = vrot.slane %v1886_v44, 5 }
  0x6b   : > { %v1011_v16 = vpack.c.b16 %v1006_v56, %v1005_v6 }
  0x6d   : > { %1800 = vmatmul.msk.bf16.gmra.mxu0 %vm387_vm2, %v878_v25  ;;  %v1010_v25 = vpack.c.b16 %v1004_v15, %v1003_v14  ;;  %v1267_v14 = vrot.slane %v1265_v5, 5  ;;  %v1885_v15 = vld [vmem:[%s2088_s4 + $0x40] sm:$0xf]  ;;  %v1912_v5 = vld [vmem:[%s2088_s4 + $0x48] sm:$0xe] }
  0x6e   : > { %v1920_v1 = vrot.slane %v1912_v5, 9 }
  0x6f   : > { %1829 = vmatmul.msk.bf16.vlgmr.msra.gmra.mxu1 %vm387_vm2, %v1009_v36  ;;  %v1916_v36 = vrot.slane %v1908_v24, 9  ;;  %v1270_v24 = vshrl.u32 %v1885_v15, 16 }
  0x71   : > { %v1414_v57 = vsel %vm2164_vm6, %v1916_v36, %v1413_v41  ;;  %v1816_v36 = vrot.slane %v1808_v46, 9  ;;  %v1272_v41 = vrot.slane %v1270_v24, 4 }
  0x72   : > { %1869 = vmatmul.msk.bf16.vlgmr.msra.gmra.mxu2 %vm387_vm2, %v1848_v43  ;;  %v1259_v43 = vshll.u32 %v1883_v54, 16  ;;  %v1439_v3 = vunpack.c.l.b16 %v1414_v57  ;;  %v1293_v57 = vshll.u32 %v1888_v50, 16 }
  0x73   : > { %v995_v28 = vsel %vm2164_vm6, %v1816_v36, %v994_v38 }
  0x74   : > { %v1261_v59 = vrot.slane %v1259_v43, 5  ;;  %v1422_v43 = vsel %vm2164_vm6, %v1918_v21, %v1421_v30  ;;  %v1295_v63 = vrot.slane %v1293_v57, 5 }
  0x75   : > { %v1441_v29 = vunpack.c.l.b16 %v1422_v43 }
  0x76   : > { %v1262_v4 = vor.u32 %v1261_v59, %v1258_v58  ;;  %v1007_v58 = vunpack.c.l.b16 %v991_v27  ;;  %v1008_v59 = vunpack.c.l.b16 %v995_v28 }
  0x77   : > { %v1446_v45 = vpack.c.b16 %v1441_v29, %v1440_v10 }
  0x78   : > { %v1263_v12 = vrot.slane %v1262_v4, 4  ;;  %v1963_v4 = vld [vmem:[%s2088_s4 + $0x44] sm:$0xf0] }
  0x79   : > { %1901 = vmatmul.msk.bf16.vlgmr.msra.gmra.mxu3 %vm387_vm2, %v1310_v8  ;;  %v1445_v8 = vpack.c.b16 %v1439_v3, %v1438_v0  ;;  %v1012_v0 = vpack.c.b16 %v1008_v59, %v1007_v58  ;;  %v1859_v3 = vld [vmem:[%s2088_s4 + $0x40] sm:$0xf] }
  0x7a   : > { %v1268_v54 = vsel %vm2124_vm3, %v1263_v12, %v1267_v14 }
  0x7b   : > { %v1307_v39 = vunpack.c.l.b16 %v1268_v54 }
  0x7d   : > { %1933 = vmatmul.msk.bf16.vlgmr.msra.gmra.mxu0 %vm387_vm2, %v1444_v17  ;;  %v1887_v17 = vld [vmem:[%s2088_s4 + $0x48] sm:$0xf] }
  0x7e   : > { %v1284_v31 = vshrl.u32 %v1887_v17, 16  ;;  %v1287_v32 = vshll.u32 %v1887_v17, 16 }
  0x7f   : > { %1830 = vmatmul.msk.bf16.gmra.mxu1 %vm387_vm2, %v1010_v25  ;;  %v1273_v25 = vshll.u32 %v1885_v15, 16  ;;  %v1430_v15 = vsel %vm2164_vm6, %v1920_v1, %v1429_v11 }
  0x80   : > { %v1286_v48 = vrot.slane %v1284_v31, 4  ;;  %v1289_v49 = vrot.slane %v1287_v32, 5  ;;  %v1443_v37 = vunpack.c.l.b16 %v1430_v15 }
  0x81   : > { %v1275_v42 = vrot.slane %v1273_v25, 5 }
  0x82   : > { %1870 = vmatmul.msk.bf16.gmra.mxu2 %vm387_vm2, %v1852_v33  ;;  %v1306_v33 = vunpack.c.l.b16 %v1254_v18  ;;  %v1290_v55 = vor.u32 %v1289_v49, %v1286_v48 }
  0x83   : > { %v1276_v52 = vor.u32 %v1275_v42, %v1272_v41 }
  0x84   : > { %v1312_v51 = vpack.c.b16 %v1307_v39, %v1306_v33  ;;  %v1291_v61 = vrot.slane %v1290_v55, 4 }
  0x85   : > { %v1277_v26 = vrot.slane %v1276_v52, 4 }
  0x86   : > { %v1296_v9 = vsel %vm2124_vm3, %v1291_v61, %v1295_v63 }
  0x87   : > { %v1282_v56 = vsel %vm2124_vm3, %v1277_v26, %v1281_v60  ;;  %v1309_v12 = vunpack.c.l.b16 %v1296_v9 }
  0x88   : > { %v1308_v2 = vunpack.c.l.b16 %v1282_v56 }
  0x89   : > { %1902 = vmatmul.msk.bf16.gmra.mxu3 %vm387_vm2, %v1311_v13  ;;  %v1911_v13 = vld [vmem:[%s2088_s4 + $0x40] sm:$0xe] }
  0x8a   : > { %v1919_v62 = vrot.slane %v1911_v13, 9  ;;  %v1313_v17 = vpack.c.b16 %v1309_v12, %v1308_v2 }
  0x8c   : > { %v1426_v14 = vsel %vm2164_vm6, %v1919_v62, %v1425_v7 }
  0x8d   : > { %1934 = vmatmul.msk.bf16.gmra.mxu0 %vm387_vm2, %v1445_v8  ;;  %v1860_v8 = vor.u32 %v1963_v4, %v1859_v3  ;;  %v1442_v18 = vunpack.c.l.b16 %v1426_v14  ;;  %v2472_v14 = vld [vmem:[%s2537_s2] ss:$0 sm:$0xff] }
  0x8f   : > { %1831 = vmatmul.msk.bf16.gmra.mxu1 %vm387_vm2, %v1011_v16  ;;  %v1447_v20 = vpack.c.b16 %v1443_v37, %v1442_v18 }
  0x92   : > { %1871 = vmatmul.msk.bf16.gmra.mxu2 %vm387_vm2, %v1856_v22 }
  0x99   : > { %1903 = vmatmul.msk.bf16.gmra.mxu3 %vm387_vm2, %v1312_v51 }
  0x9c   : > { %v2409_v6 = vpop.f32.mrf.mxu1 }
  0x9d   : > { %1935 = vmatmul.msk.bf16.gmra.mxu0 %vm387_vm2, %v1446_v45 }
  0x9f   : > { %1832 = vmatmul.msk.bf16.gmra.mxu1 %vm387_vm2, %v1012_v0 }
  0xa2   : > { %1872 = vmatmul.msk.bf16.gmra.mxu2 %vm387_vm2, %v1860_v8 }
  0xa4   : > { %v2422_v16 = vpop.f32.mrf.mxu1 }
  0xa5   : > { %v2424_v19 = vpop.f32.mrf.mxu2 }
  0xa9   : > { %1904 = vmatmul.msk.bf16.gmra.mxu3 %vm387_vm2, %v1313_v17 }
  0xaa   : > { %v409_v21 = vpop.f32.mrf.mxu0 }
  0xac   : > { %v2427_v22 = vpop.f32.mrf.mxu3  ;;  %v482_v23 = vpop.f32.mrf.mxu1 }
  0xad   : > { %1936 = vmatmul.msk.bf16.gmra.mxu0 %vm387_vm2, %v1447_v20  ;;  %v2430_v46 = vpop.f32.mrf.mxu2  ;;  %v483_v57 = vadd.f32 %v482_v23, %v409_v21 }
  0xb2   : > { %v411_v47 = vpop.f32.mrf.mxu0 }
  0xb4   : > { %v2432_v24 = vpop.f32.mrf.mxu3  ;;  %v484_v25 = vpop.f32.mrf.mxu1 }
  0xb5   : > { %v611_v54 = vpop.f32.mrf.mxu2  ;;  %v485_v63 = vadd.f32 %v484_v25, %v411_v47 }
  0xb6   : > { %v631_v45 = vadd.f32 %v611_v54, %v483_v57 }
  0xba   : > { %v912_v30 = vpop.f32.mrf.mxu0 }
  0xbc   : > { %v706_v31 = vpop.f32.mrf.mxu3  ;;  %v487_v32 = vpop.f32.mrf.mxu1 }
  0xbd   : > { %v613_v33 = vpop.f32.mrf.mxu2  ;;  %v726_v60 = vadd.f32 %v706_v31, %v631_v45  ;;  %v488_v9 = vadd.f32 %v487_v32, %v2409_v6 }
  0xbe   : > { %v632_v3 = vadd.f32 %v613_v33, %v485_v63 }
  0xbf   : > { %v932_v4 = vadd.f32 %v912_v30, %v726_v60 }
  0xc2   : > { %v914_v34 = vpop.f32.mrf.mxu0 }
  0xc4   : > { %v708_v35 = vpop.f32.mrf.mxu3  ;;  %v489_v36 = vpop.f32.mrf.mxu1 }
  0xc5   : > { %v616_v38 = vpop.f32.mrf.mxu2  ;;  %v727_v62 = vadd.f32 %v708_v35, %v632_v3  ;;  %v490_v6 = vadd.f32 %v489_v36, %v2422_v16 }
  0xc6   : > { %v633_v2 = vadd.f32 %v616_v38, %v488_v9 }
  0xc7   : > { %v933_v15 = vadd.f32 %v914_v34, %v727_v62 }
  0xca   : > { %v917_v39 = vpop.f32.mrf.mxu0 }
  0xcc   : > { %v711_v40 = vpop.f32.mrf.mxu3  ;;  %v2434_v41 = vpop.f32.mrf.mxu1 }
  0xcd   : > { %v618_v42 = vpop.f32.mrf.mxu2  ;;  %v728_v20 = vadd.f32 %v711_v40, %v633_v2  ;;  %v493_v45 = vadd.f32 %v2434_v41, %v2424_v19 }
  0xce   : > { %v634_v31 = vadd.f32 %v618_v42, %v490_v6 }
  0xcf   : > { %v934_v34 = vadd.f32 %v917_v39, %v728_v20 }
  0xd2   : > { %v2436_v43 = vpop.f32.mrf.mxu0 }
  0xd4   : > { %v713_v44 = vpop.f32.mrf.mxu3  ;;  %v2438_v48 = vpop.f32.mrf.mxu1 }
  0xd5   : > { %v2440_v49 = vpop.f32.mrf.mxu2  ;;  %v729_v36 = vadd.f32 %v713_v44, %v634_v31 }
  0xd6   : > { %v635_v42 = vadd.f32 %v2440_v49, %v493_v45  ;;  %v495_v49 = vadd.f32 %v2438_v48, %v2430_v46 }
  0xd7   : > { %v935_v3 = vadd.f32 %v2436_v43, %v729_v36 }
  0xda   : > { %v2442_v50 = vpop.f32.mrf.mxu0 }
  0xdc   : > { %v2444_v10 = vpop.f32.mrf.mxu3  ;;  %v2446_v27 = vpop.f32.mrf.mxu1 }
  0xdd   : > { %v2448_v28 = vpop.f32.mrf.mxu2  ;;  %v730_v62 = vadd.f32 %v2444_v10, %v635_v42 }
  0xde   : > { %v636_v43 = vadd.f32 %v2448_v28, %v495_v49  ;;  %v498_v28 = vadd.f32 %v2446_v27, %v2427_v22 }
  0xdf   : > { %v936_v2 = vadd.f32 %v2442_v50, %v730_v62 }
  0xe2   : > { %v2450_v51 = vpop.f32.mrf.mxu0 }
  0xe4   : > { %v2452_v29 = vpop.f32.mrf.mxu3  ;;  %v2454_v52 = vpop.f32.mrf.mxu1 }
  0xe5   : > { %v2456_v53 = vpop.f32.mrf.mxu2 }
  0xe6   : > { %v637_v50 = vadd.f32 %v2456_v53, %v498_v28  ;;  %v500_v53 = vadd.f32 %v2454_v52, %v2432_v24 }
  0xea   : > { %v2458_v55 = vpop.f32.mrf.mxu0 }
  0xec   : > { %v2460_v58 = vpop.f32.mrf.mxu3  ;;  %v1046_v59 = vpop.f32.mrf.mxu1 }
  0xed   : > { %v2462_v26 = vpop.f32.mrf.mxu2  ;;  %v1066_v56 = vadd.f32 %v1046_v59, %v932_v4 }
  0xf2   : > { %v2464_v61 = vpop.f32.mrf.mxu0 }
  0xf4   : > { %v2466_v13 = vpop.f32.mrf.mxu3  ;;  %v1048_v0 = vpop.f32.mrf.mxu1 }
  0xf5   : > { %v1141_v5 = vpop.f32.mrf.mxu2  ;;  %v1067_v37 = vadd.f32 %v1048_v0, %v933_v15 }
  0xf6   : > { %v1161_v7 = vadd.f32 %v1141_v5, %v1066_v56 }
  0xfa   : > { %v1481_v8 = vpop.f32.mrf.mxu0 }
  0xfc   : > { %v1347_v1 = vpop.f32.mrf.mxu3  ;;  %v1051_v11 = vpop.f32.mrf.mxu1 }
  0xfd   : > { %v1367_v12 = vadd.f32 %v1347_v1, %v1161_v7  ;;  %v1143_v17 = vpop.f32.mrf.mxu2  ;;  %v1068_v16 = vadd.f32 %v1051_v11, %v934_v34 }
  0xfe   : > { %v1162_v23 = vadd.f32 %v1143_v17, %v1067_v37 }
  0xff   : > { %v1501_v18 = vadd.f32 %v1481_v8, %v1367_v12 }
 0x101   : > { %v1513_v21 = vadd.f32 %v2472_v14, %v1501_v18  ;;  %v731_v18 = vadd.f32 %v2452_v29, %v636_v43 }
 0x102   : > { %v1483_v47 = vpop.f32.mrf.mxu0 }
 0x103   : > { %v1521_v25 = vmax.f32 %v1513_v21, 0.0  ;;  %v937_v6 = vadd.f32 %v2450_v51, %v731_v18  ;;  %v638_v51 = vadd.f32 %v2462_v26, %v500_v53 }
 0x104   : > { %v1349_v54 = vpop.f32.mrf.mxu3  ;;  %v1053_v30 = vpop.f32.mrf.mxu1 }
 0x105   : > { %v1529_v32 = vpack.c.bf16 %v1521_v25, %v1521_v25  ;;  %v1368_v33 = vadd.f32 %v1349_v54, %v1162_v23  ;;  %v1146_v35 = vpop.f32.mrf.mxu2  ;;  %v1069_v56 = vadd.f32 %v1053_v30, %v935_v3  ;;  %v732_v30 = vadd.f32 %v2460_v58, %v637_v50 }
 0x106   : > { %v1163_v57 = vadd.f32 %v1146_v35, %v1068_v16 }
 0x107   : > { %1538 = vst.msk [vmem:[%s2480_s11] sm:$0xf] %vm1537_vm7, %v1529_v32  ;;  %v1502_v38 = vadd.f32 %v1483_v47, %v1368_v33  ;;  %v938_v16 = vadd.f32 %v2458_v55, %v732_v30 }
 0x109   : > { %v1514_v40 = vadd.f32 %v2472_v14, %v1502_v38 }
 0x10a   : > { %v1486_v59 = vpop.f32.mrf.mxu0 }
 0x10b   : > { %v1522_v60 = vmax.f32 %v1514_v40, 0.0 }
 0x10c   : > { %v1352_v63 = vpop.f32.mrf.mxu3  ;;  %v1056_v5 = vpop.f32.mrf.mxu1 }
 0x10d   : > { %v1530_v0 = vpack.c.bf16 %v1522_v60, %v1522_v60  ;;  %v1369_v39 = vadd.f32 %v1352_v63, %v1163_v57  ;;  %v1148_v4 = vpop.f32.mrf.mxu2  ;;  %v1070_v15 = vadd.f32 %v1056_v5, %v936_v2  ;;  %v733_v57 = vadd.f32 %v2466_v13, %v638_v51 }
 0x10e   : > { %v1164_v19 = vadd.f32 %v1148_v4, %v1069_v56 }
 0x10f   : > { %1539 = vst.msk [vmem:[%s2480_s11 + $0x4] sm:$0xf] %vm1537_vm7, %v1530_v0  ;;  %v1503_v44 = vadd.f32 %v1486_v59, %v1369_v39  ;;  %v939_v55 = vadd.f32 %v2464_v61, %v733_v57 }
 0x111   : > { %v1515_v7 = vadd.f32 %v2472_v14, %v1503_v44 }
 0x112   : > { %v1488_v41 = vpop.f32.mrf.mxu0 }
 0x113   : > { %v1523_v8 = vmax.f32 %v1515_v7, 0.0 }
 0x114   : > { %v1354_v9 = vpop.f32.mrf.mxu3  ;;  %v1058_v17 = vpop.f32.mrf.mxu1 }
 0x115   : > { %v1531_v1 = vpack.c.bf16 %v1523_v8, %v1523_v8  ;;  %v1370_v11 = vadd.f32 %v1354_v9, %v1164_v19  ;;  %v1151_v12 = vpop.f32.mrf.mxu2  ;;  %v1071_v54 = vadd.f32 %v1058_v17, %v937_v6 }
 0x116   : > { %v1165_v46 = vadd.f32 %v1151_v12, %v1070_v15 }
 0x117   : > { %1540 = vst.msk [vmem:[%s2480_s11 + $0x8] sm:$0xf] %vm1537_vm7, %v1531_v1  ;;  %v1504_v10 = vadd.f32 %v1488_v41, %v1370_v11 }
 0x119   : > { %v1516_v37 = vadd.f32 %v2472_v14, %v1504_v10 }
 0x11a   : > { %v1491_v48 = vpop.f32.mrf.mxu0 }
 0x11b   : > { %v1524_v20 = vmax.f32 %v1516_v37, 0.0 }
 0x11c   : > { %v1357_v21 = vpop.f32.mrf.mxu3  ;;  %v1061_v22 = vpop.f32.mrf.mxu1 }
 0x11d   : > { %v1532_v23 = vpack.c.bf16 %v1524_v20, %v1524_v20  ;;  %v1371_v47 = vadd.f32 %v1357_v21, %v1165_v46  ;;  %v1153_v25 = vpop.f32.mrf.mxu2  ;;  %v1072_v40 = vadd.f32 %v1061_v22, %v938_v16 }
 0x11e   : > { %v1166_v32 = vadd.f32 %v1153_v25, %v1071_v54 }
 0x11f   : > { %1541 = vst.msk [vmem:[%s2480_s11 + $0xc] sm:$0xf] %vm1537_vm7, %v1532_v23  ;;  %v1505_v29 = vadd.f32 %v1491_v48, %v1371_v47 }
 0x121   : > { %v1517_v31 = vadd.f32 %v2472_v14, %v1505_v29 }
 0x122   : > { %v1493_v27 = vpop.f32.mrf.mxu0 }
 0x123   : > { %v1525_v33 = vmax.f32 %v1517_v31, 0.0 }
 0x124   : > { %v1359_v34 = vpop.f32.mrf.mxu3  ;;  %v1063_v52 = vpop.f32.mrf.mxu1 }
 0x125   : > { %v1533_v35 = vpack.c.bf16 %v1525_v33, %v1525_v33  ;;  %v1372_v38 = vadd.f32 %v1359_v34, %v1166_v32  ;;  %v1156_v36 = vpop.f32.mrf.mxu2  ;;  %v1073_v3 = vadd.f32 %v1063_v52, %v939_v55 }
 0x126   : > { %v1167_v45 = vadd.f32 %v1156_v36, %v1072_v40 }
 0x127   : > { %1542 = vst.msk [vmem:[%s2480_s11 + $0x10] sm:$0xf] %vm1537_vm7, %v1533_v35  ;;  %v1506_v58 = vadd.f32 %v1493_v27, %v1372_v38 }
 0x129   : > { %v1518_v59 = vadd.f32 %v2472_v14, %v1506_v58 }
 0x12a   : > { %v1496_v60 = vpop.f32.mrf.mxu0 }
 0x12b   : > { %v1526_v24 = vmax.f32 %v1518_v59, 0.0 }
 0x12c   : > { %v1362_v26 = vpop.f32.mrf.mxu3 }
 0x12d   : > { %v1534_v63 = vpack.c.bf16 %v1526_v24, %v1526_v24  ;;  %v1373_v42 = vadd.f32 %v1362_v26, %v1167_v45  ;;  %v1158_v0 = vpop.f32.mrf.mxu2 }
 0x12e   : > { %v1168_v4 = vadd.f32 %v1158_v0, %v1073_v3 }
 0x12f   : > { %1543 = vst.msk [vmem:[%s2480_s11 + $0x14] sm:$0xf] %vm1537_vm7, %v1534_v63  ;;  %v1507_v39 = vadd.f32 %v1496_v60, %v1373_v42 }
 0x131   : > { %v1519_v13 = vadd.f32 %v2472_v14, %v1507_v39 }
 0x132   : > { %v1498_v7 = vpop.f32.mrf.mxu0 }
 0x133   : > { %v1527_v5 = vmax.f32 %v1519_v13, 0.0 }
 0x134   : > { %v1364_v44 = vpop.f32.mrf.mxu3 }
 0x135   : > { %v1535_v56 = vpack.c.bf16 %v1527_v5, %v1527_v5  ;;  %v1374_v62 = vadd.f32 %v1364_v44, %v1168_v4 }
 0x137   : > { %1544 = vst.msk [vmem:[%s2480_s11 + $0x18] sm:$0xf] %vm1537_vm7, %v1535_v56  ;;  %v1508_v19 = vadd.f32 %v1498_v7, %v1374_v62 }
 0x139   : > { %v1520_v41 = vadd.f32 %v2472_v14, %v1508_v19 }
 0x13b   : > { %v1528_v61 = vmax.f32 %v1520_v41, 0.0 }
 0x13d   : > { %v1536_v49 = vpack.c.bf16 %v1528_v61, %v1528_v61 }
 0x13f   : > { %1545 = vst.msk [vmem:[%s2480_s11 + $0x1c] sm:$0xf] %vm1537_vm7, %v1536_v49 }
 0x140 PF: > { %s13_s14 = sadd.s32 1, %s2024_s14   ;;  %s2543_s12 = smov %s2020_s13 }
 0x141   : > { %p10_p5 = scmp.ge.s32.totalorder %s13_s14, 4   ;;  %s2544_s13 = smov %s2546_s15 }
 0x143   :  { %12 = sbr.rel (!%p10_p5) target bundleno = 2 (0x2), region = 78 }

</bundles_post_ra>
